<compile_context>
chip_gen: v5e
topology: v5e:2x2
jax: 0.10.0
libtpu: 0.0.40
codegen_flags: <defaults>
</compile_context>

<pallas_src>
import functools

import jax
import jax.numpy as jnp
from jax.experimental import pallas as pl
from jax.experimental.pallas import tpu as pltpu


# ----------------------------------------------------------------------------
# In-kernel helpers
# ----------------------------------------------------------------------------
_LN_EPS = 1e-5  # torch.nn.LayerNorm default


def _layernorm(x, g, b):
    mean = jnp.mean(x, axis=-1, keepdims=True)
    xc = x - mean
    var = jnp.mean(xc * xc, axis=-1, keepdims=True)
    return xc * jax.lax.rsqrt(var + _LN_EPS) * g + b


def _layernorm_noaffine(x):
    # The affine (g, b) of this LayerNorm has been folded into the Linear that
    # immediately follows it (W' = diag(g) W, b' = b_ln @ W + b).
    mean = jnp.mean(x, axis=-1, keepdims=True)
    xc = x - mean
    var = jnp.mean(xc * xc, axis=-1, keepdims=True)
    return xc * jax.lax.rsqrt(var + _LN_EPS)


def _erf(x):
    # Abramowitz & Stegun 7.1.26 (max abs err ~1.5e-7): exact-GELU to fp32
    # noise, using only ops that lower cleanly in Mosaic (abs / exp / where).
    a1, a2, a3, a4, a5 = (0.254829592, -0.284496736, 1.421413741,
                          -1.453152027, 1.061405429)
    p = 0.3275911
    ax = jnp.abs(x)
    t = 1.0 / (1.0 + p * ax)
    poly = ((((a5 * t + a4) * t + a3) * t + a2) * t + a1) * t
    y = 1.0 - poly * jnp.exp(-ax * ax)
    return jnp.where(x >= 0, y, -y)


def _gelu(x):
    # nn.GELU() default (exact, erf-based)
    return 0.5 * x * (1.0 + _erf(x * 0.7071067811865476))


def _mxu(a, w):
    """bf16 x bf16 MXU matmul with f32 accumulation (weights stored in bf16)."""
    return jnp.dot(a.astype(jnp.bfloat16), w, preferred_element_type=jnp.float32)


# ----------------------------------------------------------------------------
# Fused kernel: one grid step == one batch element through the whole network.
# ----------------------------------------------------------------------------
def _vit_kernel(x_ref, pe_w_ref, pe_b_ref, pe_g2_ref, pe_b2_ref, pos_ref,
                wqkv_ref, qkvb_ref, wo_ref, bo_ref,
                w1_ref, b1_ref, w2_ref, b2_ref,
                fg_ref, fb_ref, o_ref, *, heads, dim_head, patch_dim):
    n_tok, f_pad = x_ref.shape[1], x_ref.shape[2]
    inner = heads * dim_head
    depth = wqkv_ref.shape[0]

    # ---- patch embedding: LN(patch_dim) [g1/b1 folded into pe_w/pe_b]
    #      -> Linear(patch_dim, dim) -> LN(dim) -> + pos_embedding[:, :n] -----
    xp = x_ref[0]                                      # (N, f_pad) f32; lanes >= patch_dim are zero
    lane = jax.lax.broadcasted_iota(jnp.int32, (n_tok, f_pad), 1)
    inv_pd = 1.0 / patch_dim
    mean = jnp.sum(xp, axis=-1, keepdims=True) * inv_pd     # zero padding: sum unaffected
    xc = jnp.where(lane < patch_dim, xp - mean, 0.0)
    var = jnp.sum(xc * xc, axis=-1, keepdims=True) * inv_pd
    xn = xc * jax.lax.rsqrt(var + _LN_EPS)                  # padded lanes stay zero
    h = _mxu(xn, pe_w_ref[...]) + pe_b_ref[...]             # Linear(patch_dim, dim)
    h = _layernorm(h, pe_g2_ref[...], pe_b2_ref[...])       # LayerNorm(dim)
    x = h + pos_ref[...]                                    # + pos_embedding[:, :n]
    # dropout(emb_dropout=0.0) -> identity

    for l in range(depth):                                  # static unroll over layers
        # ---- attention (pre-LN affine + softmax scale folded into wqkv) -----
        qkv = (_mxu(_layernorm_noaffine(x), wqkv_ref[l])
               + qkvb_ref[l]).astype(jnp.bfloat16)          # (N, 3*inner); single bf16 cast
        wo = wo_ref[l]                                      # (inner, dim) bf16
        proj = None
        for hh in range(heads):                             # static unroll over heads
            q = qkv[:, hh * dim_head:(hh + 1) * dim_head]
            k = qkv[:, inner + hh * dim_head:inner + (hh + 1) * dim_head]
            v = qkv[:, 2 * inner + hh * dim_head:2 * inner + (hh + 1) * dim_head]
            # q @ k^T without explicit transpose (scale pre-folded into W_q)
            s = jax.lax.dot_general(q, k, (((1,), (1,)), ((), ())),
                                    preferred_element_type=jnp.float32)
            s = s - jnp.max(s, axis=-1, keepdims=True)      # stable softmax
            p = jnp.exp(s)
            p = p * pl.reciprocal(jnp.sum(p, axis=-1, keepdims=True), approx=True)
            oh = jnp.dot(p.astype(jnp.bfloat16), v,
                         preferred_element_type=jnp.float32)            # (N, dim_head)
            # 'b h n d -> b n (h d)' + to_out Linear fused: accumulate each
            # head through the matching sublane slice of W_o (no concatenate).
            contrib = jnp.dot(oh.astype(jnp.bfloat16),
                              wo[hh * dim_head:(hh + 1) * dim_head, :],
                              preferred_element_type=jnp.float32)
            proj = contrib if proj is None else proj + contrib
        x = proj + bo_ref[l] + x                            # to_out bias + residual

        # ---- feed-forward (pre-LN affine folded into w1/b1) ------------------
        hmid = _mxu(_layernorm_noaffine(x), w1_ref[l]) + b1_ref[l]
        hmid = _gelu(hmid)
        x = _mxu(hmid, w2_ref[l]) + b2_ref[l] + x           # residual

    # ---- final LayerNorm (Transformer.norm) ---------------------------------
    o_ref[0] = _layernorm(x, fg_ref[...], fb_ref[...]).astype(o_ref.dtype)


# ----------------------------------------------------------------------------
# Wrapper
# ----------------------------------------------------------------------------
def _to_patches(img, patch_size, pad_to):
    """einops 'b c (h p1) (w p2) -> b (h w) (p1 p2 c)' + zero-pad the feature
    dim to a lane-dense width.  Pure layout glue, left to XLA."""
    ph, pw = patch_size
    B, C, H, W = img.shape
    h, w = H // ph, W // pw
    x = img.reshape(B, C, h, ph, w, pw)
    x = jnp.transpose(x, (0, 2, 4, 3, 5, 1))   # b h w p1 p2 c
    x = x.reshape(B, h * w, ph * pw * C)
    patch_dim = x.shape[-1]
    if pad_to > patch_dim:
        x = jnp.pad(x, ((0, 0), (0, 0), (0, pad_to - patch_dim)))
    return x, patch_dim


def decoder_vit_forward(img, params, *, patch_size, heads, dim_head):
    x, patch_dim = _to_patches(img, patch_size, params["pe_w"].shape[0])
    B, N, f_pad = x.shape
    dim = params["pe_w"].shape[1]

    def _resident(a):
        nd = a.ndim
        return pl.BlockSpec(a.shape, lambda b, _nd=nd: (0,) * _nd)

    pe_args = [params["pe_w"], params["pe_b"], params["pe_g2"], params["pe_b2"]]
    layer_args = [params["wqkv"], params["qkv_b"], params["wo"], params["bo"],
                  params["w1"], params["b1"], params["w2"], params["b2"]]
    final_args = [params["final_g"], params["final_b"]]

    in_specs = (
        [pl.BlockSpec((1, N, f_pad), lambda b: (b, 0, 0))]
        + [_resident(a) for a in pe_args]
        # pos_embedding is (num_patches+1, dim); the (N, dim) block at block
        # index (0, 0) is exactly the [:, :n] slice — no wrapper-side copy.
        + [pl.BlockSpec((N, dim), lambda b: (0, 0))]
        + [_resident(a) for a in layer_args]
        + [_resident(a) for a in final_args])

    kernel = functools.partial(_vit_kernel, heads=heads, dim_head=dim_head,
                               patch_dim=patch_dim)
    return pl.pallas_call(
        kernel,
        out_shape=jax.ShapeDtypeStruct((B, N, dim), jnp.float32),
        grid=(B,),
        in_specs=in_specs,
        out_specs=pl.BlockSpec((1, N, dim), lambda b: (b, 0, 0)),
        compiler_params=pltpu.CompilerParams(
            dimension_semantics=("parallel",)),  # 2-TC split on v7x, no-op v5e/v6e
    )(x, *pe_args, params["pos"], *layer_args, *final_args)


# ----------------------------------------------------------------------------
# Deterministic parameter init (PyTorch-default-style: Linear U(-1/sqrt(in),
# 1/sqrt(in)), LayerNorm ones/zeros, pos_embedding ~ N(0,1)).  Weight matrices
# are stored already transposed (in, out), in bf16, with every LN->Linear
# affine and the attention softmax scale folded in at init time.
# ----------------------------------------------------------------------------
def _uniform_w(key, fan_in, fan_out):
    lim = 1.0 / (fan_in ** 0.5)
    return jax.random.uniform(key, (fan_in, fan_out), jnp.float32, -lim, lim)


def _uniform_b(key, fan_in, fan_out):
    lim = 1.0 / (fan_in ** 0.5)
    return jax.random.uniform(key, (1, fan_out), jnp.float32, -lim, lim)


def init_params(key, *, image_size, patch_size, channels, dim, depth, heads,
                dim_head, mlp_dim, patch_pad=128):
    ih, iw = image_size
    ph, pw = patch_size
    num_patches = (ih // ph) * (iw // pw)
    patch_dim = channels * ph * pw
    inner = heads * dim_head
    scale = dim_head ** -0.5

    ks = iter(jax.random.split(key, 4 + 7 * depth))

    # patch embedding: LN(patch_dim) affine folded into the Linear, then the
    # input axis zero-padded to `patch_pad` lanes (lane-dense K=128 matmul).
    g1 = jnp.ones((patch_dim,), jnp.float32)
    b1 = jnp.zeros((patch_dim,), jnp.float32)
    pe_w = _uniform_w(next(ks), patch_dim, dim)
    pe_b = _uniform_b(next(ks), patch_dim, dim)
    pe_w_f = g1[:, None] * pe_w
    pe_b_f = b1[None, :] @ pe_w + pe_b
    pe_w_pad = jnp.zeros((patch_pad, dim), jnp.float32).at[:patch_dim].set(pe_w_f)

    p = {
        "pe_w": pe_w_pad.astype(jnp.bfloat16),
        "pe_b": pe_b_f,
        "pe_g2": jnp.ones((1, dim), jnp.float32),
        "pe_b2": jnp.zeros((1, dim), jnp.float32),
        "pos": jax.random.normal(next(ks), (num_patches + 1, dim), jnp.float32),
        "final_g": jnp.ones((1, dim), jnp.float32),
        "final_b": jnp.zeros((1, dim), jnp.float32),
    }
    _cls_token_unused = jax.random.normal(next(ks), (1, 1, dim), jnp.float32)

    wqkv_l, qkvb_l, wo_l, bo_l = [], [], [], []
    w1_l, b1_l, w2_l, b2_l = [], [], [], []
    for _ in range(depth):
        # attention: pre-LN affine + softmax scale folded into wqkv / qkv bias
        g = jnp.ones((dim,), jnp.float32)
        b = jnp.zeros((dim,), jnp.float32)
        wqkv = _uniform_w(next(ks), dim, 3 * inner)          # to_qkv has bias=False
        wqkv = wqkv.at[:, :inner].multiply(scale)            # fold dim_head**-0.5 into Q
        wqkv_l.append((g[:, None] * wqkv).astype(jnp.bfloat16))
        qkvb_l.append(b[None, :] @ wqkv)                     # (1, 3*inner) f32 (zero at init)
        wo_l.append(_uniform_w(next(ks), inner, dim).astype(jnp.bfloat16))
        bo_l.append(_uniform_b(next(ks), inner, dim))
        # feed-forward: pre-LN affine folded into w1 / b1
        gf = jnp.ones((dim,), jnp.float32)
        bf = jnp.zeros((dim,), jnp.float32)
        w1 = _uniform_w(next(ks), dim, mlp_dim)
        b1_ = _uniform_b(next(ks), dim, mlp_dim)
        w1_l.append((gf[:, None] * w1).astype(jnp.bfloat16))
        b1_l.append(bf[None, :] @ w1 + b1_)
        w2_l.append(_uniform_w(next(ks), mlp_dim, dim).astype(jnp.bfloat16))
        b2_l.append(_uniform_b(next(ks), mlp_dim, dim))

    p["wqkv"] = jnp.stack(wqkv_l)      # (depth, dim, 3*inner) bf16
    p["qkv_b"] = jnp.stack(qkvb_l)     # (depth, 1, 3*inner) f32
    p["wo"] = jnp.stack(wo_l)          # (depth, inner, dim) bf16
    p["bo"] = jnp.stack(bo_l)          # (depth, 1, dim) f32
    p["w1"] = jnp.stack(w1_l)          # (depth, dim, mlp) bf16
    p["b1"] = jnp.stack(b1_l)          # (depth, 1, mlp) f32
    p["w2"] = jnp.stack(w2_l)          # (depth, mlp, dim) bf16
    p["b2"] = jnp.stack(b2_l)          # (depth, 1, dim) f32
    return p


if __name__ == "__main__":
    # Small, lane-dense ViT config: N=64 tokens, dim=128, inner=128, mlp=256.
    image_size = (32, 32)
    patch_size = (4, 4)
    channels = 3
    dim = 128
    depth = 2
    heads = 4
    dim_head = 32
    mlp_dim = 256
    B = 2

    key = jax.random.PRNGKey(0)
    k_param, k_img = jax.random.split(key)
    params = init_params(k_param, image_size=image_size, patch_size=patch_size,
                         channels=channels, dim=dim, depth=depth, heads=heads,
                         dim_head=dim_head, mlp_dim=mlp_dim)
    img = jax.random.normal(k_img, (B, channels) + image_size, jnp.float32)

    fwd = jax.jit(functools.partial(decoder_vit_forward, patch_size=patch_size,
                                    heads=heads, dim_head=dim_head))
    out = fwd(img, params)
    jax.block_until_ready(out)

    num_patches = (image_size[0] // patch_size[0]) * (image_size[1] // patch_size[1])
    assert out.shape == (B, num_patches, dim)
    assert bool(jnp.all(jnp.isfinite(out)))
    print("KERNEL_OK")
</pallas_src>

<mosaic_0001>
module attributes {stable_mosaic.version = 11 : i64} {
  func.func @_vit_kernel(%arg0: i32, %arg1: memref<1x64x128xf32, #tpu.memory_space<vmem>>, %arg2: memref<128x128xbf16, #tpu.memory_space<vmem>>, %arg3: memref<1x128xf32, #tpu.memory_space<vmem>>, %arg4: memref<1x128xf32, #tpu.memory_space<vmem>>, %arg5: memref<1x128xf32, #tpu.memory_space<vmem>>, %arg6: memref<64x128xf32, #tpu.memory_space<vmem>>, %arg7: memref<2x128x384xbf16, #tpu.memory_space<vmem>>, %arg8: memref<2x1x384xf32, #tpu.memory_space<vmem>>, %arg9: memref<2x128x128xbf16, #tpu.memory_space<vmem>>, %arg10: memref<2x1x128xf32, #tpu.memory_space<vmem>>, %arg11: memref<2x128x256xbf16, #tpu.memory_space<vmem>>, %arg12: memref<2x1x256xf32, #tpu.memory_space<vmem>>, %arg13: memref<2x256x128xbf16, #tpu.memory_space<vmem>>, %arg14: memref<2x1x128xf32, #tpu.memory_space<vmem>>, %arg15: memref<1x128xf32, #tpu.memory_space<vmem>>, %arg16: memref<1x128xf32, #tpu.memory_space<vmem>>, %arg17: memref<1x64x128xf32, #tpu.memory_space<vmem>>) attributes {dimension_semantics = [#tpu.dimension_semantics<parallel>], iteration_bounds = array<i64: 2>, scalar_prefetch = 0 : i64, scratch_operands = 0 : i64, tpu.core_type = #tpu.core_type<tc>, window_params = [{transform_indices = @transform_0, window_bounds = array<i64: 1, 64, 128>}, {pipeline_mode = #tpu.pipeline_mode<synchronous>, transform_indices = @transform_1, window_bounds = array<i64: 128, 128>}, {pipeline_mode = #tpu.pipeline_mode<synchronous>, transform_indices = @transform_2, window_bounds = array<i64: 1, 128>}, {pipeline_mode = #tpu.pipeline_mode<synchronous>, transform_indices = @transform_3, window_bounds = array<i64: 1, 128>}, {pipeline_mode = #tpu.pipeline_mode<synchronous>, transform_indices = @transform_4, window_bounds = array<i64: 1, 128>}, {transform_indices = @transform_5, window_bounds = array<i64: 64, 128>}, {pipeline_mode = #tpu.pipeline_mode<synchronous>, transform_indices = @transform_6, window_bounds = array<i64: 2, 128, 384>}, {pipeline_mode = #tpu.pipeline_mode<synchronous>, transform_indices = @transform_7, window_bounds = array<i64: 2, 1, 384>}, {pipeline_mode = #tpu.pipeline_mode<synchronous>, transform_indices = @transform_8, window_bounds = array<i64: 2, 128, 128>}, {pipeline_mode = #tpu.pipeline_mode<synchronous>, transform_indices = @transform_9, window_bounds = array<i64: 2, 1, 128>}, {pipeline_mode = #tpu.pipeline_mode<synchronous>, transform_indices = @transform_10, window_bounds = array<i64: 2, 128, 256>}, {pipeline_mode = #tpu.pipeline_mode<synchronous>, transform_indices = @transform_11, window_bounds = array<i64: 2, 1, 256>}, {pipeline_mode = #tpu.pipeline_mode<synchronous>, transform_indices = @transform_12, window_bounds = array<i64: 2, 256, 128>}, {pipeline_mode = #tpu.pipeline_mode<synchronous>, transform_indices = @transform_13, window_bounds = array<i64: 2, 1, 128>}, {pipeline_mode = #tpu.pipeline_mode<synchronous>, transform_indices = @transform_14, window_bounds = array<i64: 1, 128>}, {pipeline_mode = #tpu.pipeline_mode<synchronous>, transform_indices = @transform_15, window_bounds = array<i64: 1, 128>}, {transform_indices = @transform_16, window_bounds = array<i64: 1, 64, 128>}]} {
    %c0 = arith.constant 0 : index
    %c0_0 = arith.constant 0 : index
    %c0_1 = arith.constant 0 : index
    %0 = vector.load %arg1[%c0, %c0_0, %c0_1] : memref<1x64x128xf32, #tpu.memory_space<vmem>>, vector<1x64x128xf32>
    %1 = vector.shape_cast %0 : vector<1x64x128xf32> to vector<64x128xf32>
    %2 = tpu.iota {dimensions = array<i32: 1>} : vector<64x128xi32>
    %cst = arith.constant dense<0.000000e+00> : vector<64xf32>
    %3 = vector.multi_reduction <add>, %1, %cst [1] : vector<64x128xf32> to vector<64xf32>
    %4 = vector.shape_cast %3 : vector<64xf32> to vector<64x1xf32>
    %cst_2 = arith.constant 0.020833334 : f32
    %5 = vector.broadcast %cst_2 : f32 to vector<64x1xf32>
    %6 = arith.mulf %4, %5 : vector<64x1xf32>
    %c48_i32 = arith.constant 48 : i32
    %7 = vector.broadcast %c48_i32 : i32 to vector<64x128xi32>
    %8 = arith.cmpi slt, %2, %7 : vector<64x128xi32>
    %9 = vector.broadcast %6 : vector<64x1xf32> to vector<64x128xf32>
    %10 = arith.subf %1, %9 : vector<64x128xf32>
    %cst_3 = arith.constant 0.000000e+00 : f32
    %11 = vector.broadcast %cst_3 : f32 to vector<64x128xf32>
    %12 = arith.select %8, %10, %11 : vector<64x128xi1>, vector<64x128xf32>
    %13 = arith.mulf %12, %12 : vector<64x128xf32>
    %cst_4 = arith.constant dense<0.000000e+00> : vector<64xf32>
    %14 = vector.multi_reduction <add>, %13, %cst_4 [1] : vector<64x128xf32> to vector<64xf32>
    %15 = vector.shape_cast %14 : vector<64xf32> to vector<64x1xf32>
    %cst_5 = arith.constant 0.020833334 : f32
    %16 = vector.broadcast %cst_5 : f32 to vector<64x1xf32>
    %17 = arith.mulf %15, %16 : vector<64x1xf32>
    %cst_6 = arith.constant 9.99999974E-6 : f32
    %18 = vector.broadcast %cst_6 : f32 to vector<64x1xf32>
    %19 = arith.addf %17, %18 : vector<64x1xf32>
    %20 = math.rsqrt %19 : vector<64x1xf32>
    %21 = vector.broadcast %20 : vector<64x1xf32> to vector<64x128xf32>
    %22 = arith.mulf %12, %21 : vector<64x128xf32>
    %c0_7 = arith.constant 0 : index
    %c0_8 = arith.constant 0 : index
    %23 = vector.load %arg2[%c0_7, %c0_8] : memref<128x128xbf16, #tpu.memory_space<vmem>>, vector<128x128xbf16>
    %24 = arith.truncf %22 : vector<64x128xf32> to vector<64x128xbf16>
    %cst_9 = arith.constant dense<0.000000e+00> : vector<64x128xf32>
    %25 = tpu.matmul %24, %23, %cst_9 {dimension_numbers = #tpu.dot_dimension_numbers<[1], [0], [0], [1], [0, 0, 1, 1], [], []>} : vector<64x128xbf16>, vector<128x128xbf16>, vector<64x128xf32> -> vector<64x128xf32>
    %c0_10 = arith.constant 0 : index
    %c0_11 = arith.constant 0 : index
    %26 = vector.load %arg3[%c0_10, %c0_11] : memref<1x128xf32, #tpu.memory_space<vmem>>, vector<1x128xf32>
    %27 = vector.broadcast %26 : vector<1x128xf32> to vector<64x128xf32>
    %28 = arith.addf %25, %27 : vector<64x128xf32>
    %c0_12 = arith.constant 0 : index
    %c0_13 = arith.constant 0 : index
    %29 = vector.load %arg4[%c0_12, %c0_13] : memref<1x128xf32, #tpu.memory_space<vmem>>, vector<1x128xf32>
    %c0_14 = arith.constant 0 : index
    %c0_15 = arith.constant 0 : index
    %30 = vector.load %arg5[%c0_14, %c0_15] : memref<1x128xf32, #tpu.memory_space<vmem>>, vector<1x128xf32>
    %cst_16 = arith.constant dense<0.000000e+00> : vector<64xf32>
    %31 = vector.multi_reduction <add>, %28, %cst_16 [1] : vector<64x128xf32> to vector<64xf32>
    %32 = vector.shape_cast %31 : vector<64xf32> to vector<64x1xf32>
    %cst_17 = arith.constant 1.280000e+02 : f32
    %33 = vector.broadcast %cst_17 : f32 to vector<64x1xf32>
    %34 = arith.divf %32, %33 : vector<64x1xf32>
    %35 = vector.broadcast %34 : vector<64x1xf32> to vector<64x128xf32>
    %36 = arith.subf %28, %35 : vector<64x128xf32>
    %37 = arith.mulf %36, %36 : vector<64x128xf32>
    %cst_18 = arith.constant dense<0.000000e+00> : vector<64xf32>
    %38 = vector.multi_reduction <add>, %37, %cst_18 [1] : vector<64x128xf32> to vector<64xf32>
    %39 = vector.shape_cast %38 : vector<64xf32> to vector<64x1xf32>
    %cst_19 = arith.constant 1.280000e+02 : f32
    %40 = vector.broadcast %cst_19 : f32 to vector<64x1xf32>
    %41 = arith.divf %39, %40 : vector<64x1xf32>
    %cst_20 = arith.constant 9.99999974E-6 : f32
    %42 = vector.broadcast %cst_20 : f32 to vector<64x1xf32>
    %43 = arith.addf %41, %42 : vector<64x1xf32>
    %44 = math.rsqrt %43 : vector<64x1xf32>
    %45 = vector.broadcast %44 : vector<64x1xf32> to vector<64x128xf32>
    %46 = arith.mulf %36, %45 : vector<64x128xf32>
    %47 = vector.broadcast %29 : vector<1x128xf32> to vector<64x128xf32>
    %48 = arith.mulf %46, %47 : vector<64x128xf32>
    %49 = vector.broadcast %30 : vector<1x128xf32> to vector<64x128xf32>
    %50 = arith.addf %48, %49 : vector<64x128xf32>
    %c0_21 = arith.constant 0 : index
    %c0_22 = arith.constant 0 : index
    %51 = vector.load %arg6[%c0_21, %c0_22] : memref<64x128xf32, #tpu.memory_space<vmem>>, vector<64x128xf32>
    %52 = arith.addf %50, %51 : vector<64x128xf32>
    %cst_23 = arith.constant dense<0.000000e+00> : vector<64xf32>
    %53 = vector.multi_reduction <add>, %52, %cst_23 [1] : vector<64x128xf32> to vector<64xf32>
    %54 = vector.shape_cast %53 : vector<64xf32> to vector<64x1xf32>
    %cst_24 = arith.constant 1.280000e+02 : f32
    %55 = vector.broadcast %cst_24 : f32 to vector<64x1xf32>
    %56 = arith.divf %54, %55 : vector<64x1xf32>
    %57 = vector.broadcast %56 : vector<64x1xf32> to vector<64x128xf32>
    %58 = arith.subf %52, %57 : vector<64x128xf32>
    %59 = arith.mulf %58, %58 : vector<64x128xf32>
    %cst_25 = arith.constant dense<0.000000e+00> : vector<64xf32>
    %60 = vector.multi_reduction <add>, %59, %cst_25 [1] : vector<64x128xf32> to vector<64xf32>
    %61 = vector.shape_cast %60 : vector<64xf32> to vector<64x1xf32>
    %cst_26 = arith.constant 1.280000e+02 : f32
    %62 = vector.broadcast %cst_26 : f32 to vector<64x1xf32>
    %63 = arith.divf %61, %62 : vector<64x1xf32>
    %cst_27 = arith.constant 9.99999974E-6 : f32
    %64 = vector.broadcast %cst_27 : f32 to vector<64x1xf32>
    %65 = arith.addf %63, %64 : vector<64x1xf32>
    %66 = math.rsqrt %65 : vector<64x1xf32>
    %67 = vector.broadcast %66 : vector<64x1xf32> to vector<64x128xf32>
    %68 = arith.mulf %58, %67 : vector<64x128xf32>
    %c0_28 = arith.constant 0 : index
    %c0_29 = arith.constant 0 : index
    %c0_30 = arith.constant 0 : index
    %69 = vector.load %arg7[%c0_28, %c0_29, %c0_30] : memref<2x128x384xbf16, #tpu.memory_space<vmem>>, vector<1x128x384xbf16>
    %70 = vector.shape_cast %69 : vector<1x128x384xbf16> to vector<128x384xbf16>
    %71 = arith.truncf %68 : vector<64x128xf32> to vector<64x128xbf16>
    %cst_31 = arith.constant dense<0.000000e+00> : vector<64x384xf32>
    %72 = tpu.matmul %71, %70, %cst_31 {dimension_numbers = #tpu.dot_dimension_numbers<[1], [0], [0], [1], [0, 0, 1, 1], [], []>} : vector<64x128xbf16>, vector<128x384xbf16>, vector<64x384xf32> -> vector<64x384xf32>
    %c0_32 = arith.constant 0 : index
    %c0_33 = arith.constant 0 : index
    %c0_34 = arith.constant 0 : index
    %73 = vector.load %arg8[%c0_32, %c0_33, %c0_34] : memref<2x1x384xf32, #tpu.memory_space<vmem>>, vector<1x1x384xf32>
    %74 = vector.shape_cast %73 : vector<1x1x384xf32> to vector<1x384xf32>
    %75 = vector.broadcast %74 : vector<1x384xf32> to vector<64x384xf32>
    %76 = arith.addf %72, %75 : vector<64x384xf32>
    %77 = arith.truncf %76 : vector<64x384xf32> to vector<64x384xbf16>
    %c0_35 = arith.constant 0 : index
    %c0_36 = arith.constant 0 : index
    %c0_37 = arith.constant 0 : index
    %78 = vector.load %arg9[%c0_35, %c0_36, %c0_37] : memref<2x128x128xbf16, #tpu.memory_space<vmem>>, vector<1x128x128xbf16>
    %79 = vector.shape_cast %78 : vector<1x128x128xbf16> to vector<128x128xbf16>
    %80 = vector.extract_strided_slice %77 {offsets = [0, 0], sizes = [64, 32], strides = [1, 1]} : vector<64x384xbf16> to vector<64x32xbf16>
    %81 = vector.extract_strided_slice %77 {offsets = [0, 128], sizes = [64, 32], strides = [1, 1]} : vector<64x384xbf16> to vector<64x32xbf16>
    %82 = vector.extract_strided_slice %77 {offsets = [0, 256], sizes = [64, 32], strides = [1, 1]} : vector<64x384xbf16> to vector<64x32xbf16>
    %cst_38 = arith.constant dense<0.000000e+00> : vector<64x64xf32>
    %83 = tpu.matmul %80, %81, %cst_38 {dimension_numbers = #tpu.dot_dimension_numbers<[1], [1], [0], [0], [0, 0, 1, 0], [], []>} : vector<64x32xbf16>, vector<64x32xbf16>, vector<64x64xf32> -> vector<64x64xf32>
    %cst_39 = arith.constant dense<0xFF800000> : vector<64xf32>
    %84 = vector.multi_reduction <maximumf>, %83, %cst_39 [1] : vector<64x64xf32> to vector<64xf32>
    %85 = vector.shape_cast %84 : vector<64xf32> to vector<64x1xf32>
    %86 = vector.broadcast %85 : vector<64x1xf32> to vector<64x64xf32>
    %87 = arith.subf %83, %86 : vector<64x64xf32>
    %88 = math.exp %87 : vector<64x64xf32>
    %cst_40 = arith.constant dense<0.000000e+00> : vector<64xf32>
    %89 = vector.multi_reduction <add>, %88, %cst_40 [1] : vector<64x64xf32> to vector<64xf32>
    %90 = vector.shape_cast %89 : vector<64xf32> to vector<64x1xf32>
    %91 = tpu.reciprocal %90 {approx = true} : vector<64x1xf32> -> vector<64x1xf32>
    %92 = vector.broadcast %91 : vector<64x1xf32> to vector<64x64xf32>
    %93 = arith.mulf %88, %92 : vector<64x64xf32>
    %94 = arith.truncf %93 : vector<64x64xf32> to vector<64x64xbf16>
    %cst_41 = arith.constant dense<0.000000e+00> : vector<64x32xf32>
    %95 = tpu.matmul %94, %82, %cst_41 {dimension_numbers = #tpu.dot_dimension_numbers<[1], [0], [0], [1], [0, 0, 1, 1], [], []>} : vector<64x64xbf16>, vector<64x32xbf16>, vector<64x32xf32> -> vector<64x32xf32>
    %96 = arith.truncf %95 : vector<64x32xf32> to vector<64x32xbf16>
    %97 = vector.extract_strided_slice %79 {offsets = [0, 0], sizes = [32, 128], strides = [1, 1]} : vector<128x128xbf16> to vector<32x128xbf16>
    %cst_42 = arith.constant dense<0.000000e+00> : vector<64x128xf32>
    %98 = tpu.matmul %96, %97, %cst_42 {dimension_numbers = #tpu.dot_dimension_numbers<[1], [0], [0], [1], [0, 0, 1, 1], [], []>} : vector<64x32xbf16>, vector<32x128xbf16>, vector<64x128xf32> -> vector<64x128xf32>
    %99 = vector.extract_strided_slice %77 {offsets = [0, 32], sizes = [64, 32], strides = [1, 1]} : vector<64x384xbf16> to vector<64x32xbf16>
    %100 = vector.extract_strided_slice %77 {offsets = [0, 160], sizes = [64, 32], strides = [1, 1]} : vector<64x384xbf16> to vector<64x32xbf16>
    %101 = vector.extract_strided_slice %77 {offsets = [0, 288], sizes = [64, 32], strides = [1, 1]} : vector<64x384xbf16> to vector<64x32xbf16>
    %cst_43 = arith.constant dense<0.000000e+00> : vector<64x64xf32>
    %102 = tpu.matmul %99, %100, %cst_43 {dimension_numbers = #tpu.dot_dimension_numbers<[1], [1], [0], [0], [0, 0, 1, 0], [], []>} : vector<64x32xbf16>, vector<64x32xbf16>, vector<64x64xf32> -> vector<64x64xf32>
    %cst_44 = arith.constant dense<0xFF800000> : vector<64xf32>
    %103 = vector.multi_reduction <maximumf>, %102, %cst_44 [1] : vector<64x64xf32> to vector<64xf32>
    %104 = vector.shape_cast %103 : vector<64xf32> to vector<64x1xf32>
    %105 = vector.broadcast %104 : vector<64x1xf32> to vector<64x64xf32>
    %106 = arith.subf %102, %105 : vector<64x64xf32>
    %107 = math.exp %106 : vector<64x64xf32>
    %cst_45 = arith.constant dense<0.000000e+00> : vector<64xf32>
    %108 = vector.multi_reduction <add>, %107, %cst_45 [1] : vector<64x64xf32> to vector<64xf32>
    %109 = vector.shape_cast %108 : vector<64xf32> to vector<64x1xf32>
    %110 = tpu.reciprocal %109 {approx = true} : vector<64x1xf32> -> vector<64x1xf32>
    %111 = vector.broadcast %110 : vector<64x1xf32> to vector<64x64xf32>
    %112 = arith.mulf %107, %111 : vector<64x64xf32>
    %113 = arith.truncf %112 : vector<64x64xf32> to vector<64x64xbf16>
    %cst_46 = arith.constant dense<0.000000e+00> : vector<64x32xf32>
    %114 = tpu.matmul %113, %101, %cst_46 {dimension_numbers = #tpu.dot_dimension_numbers<[1], [0], [0], [1], [0, 0, 1, 1], [], []>} : vector<64x64xbf16>, vector<64x32xbf16>, vector<64x32xf32> -> vector<64x32xf32>
    %115 = arith.truncf %114 : vector<64x32xf32> to vector<64x32xbf16>
    %116 = vector.extract_strided_slice %79 {offsets = [32, 0], sizes = [32, 128], strides = [1, 1]} : vector<128x128xbf16> to vector<32x128xbf16>
    %cst_47 = arith.constant dense<0.000000e+00> : vector<64x128xf32>
    %117 = tpu.matmul %115, %116, %cst_47 {dimension_numbers = #tpu.dot_dimension_numbers<[1], [0], [0], [1], [0, 0, 1, 1], [], []>} : vector<64x32xbf16>, vector<32x128xbf16>, vector<64x128xf32> -> vector<64x128xf32>
    %118 = arith.addf %98, %117 : vector<64x128xf32>
    %119 = vector.extract_strided_slice %77 {offsets = [0, 64], sizes = [64, 32], strides = [1, 1]} : vector<64x384xbf16> to vector<64x32xbf16>
    %120 = vector.extract_strided_slice %77 {offsets = [0, 192], sizes = [64, 32], strides = [1, 1]} : vector<64x384xbf16> to vector<64x32xbf16>
    %121 = vector.extract_strided_slice %77 {offsets = [0, 320], sizes = [64, 32], strides = [1, 1]} : vector<64x384xbf16> to vector<64x32xbf16>
    %cst_48 = arith.constant dense<0.000000e+00> : vector<64x64xf32>
    %122 = tpu.matmul %119, %120, %cst_48 {dimension_numbers = #tpu.dot_dimension_numbers<[1], [1], [0], [0], [0, 0, 1, 0], [], []>} : vector<64x32xbf16>, vector<64x32xbf16>, vector<64x64xf32> -> vector<64x64xf32>
    %cst_49 = arith.constant dense<0xFF800000> : vector<64xf32>
    %123 = vector.multi_reduction <maximumf>, %122, %cst_49 [1] : vector<64x64xf32> to vector<64xf32>
    %124 = vector.shape_cast %123 : vector<64xf32> to vector<64x1xf32>
    %125 = vector.broadcast %124 : vector<64x1xf32> to vector<64x64xf32>
    %126 = arith.subf %122, %125 : vector<64x64xf32>
    %127 = math.exp %126 : vector<64x64xf32>
    %cst_50 = arith.constant dense<0.000000e+00> : vector<64xf32>
    %128 = vector.multi_reduction <add>, %127, %cst_50 [1] : vector<64x64xf32> to vector<64xf32>
    %129 = vector.shape_cast %128 : vector<64xf32> to vector<64x1xf32>
    %130 = tpu.reciprocal %129 {approx = true} : vector<64x1xf32> -> vector<64x1xf32>
    %131 = vector.broadcast %130 : vector<64x1xf32> to vector<64x64xf32>
    %132 = arith.mulf %127, %131 : vector<64x64xf32>
    %133 = arith.truncf %132 : vector<64x64xf32> to vector<64x64xbf16>
    %cst_51 = arith.constant dense<0.000000e+00> : vector<64x32xf32>
    %134 = tpu.matmul %133, %121, %cst_51 {dimension_numbers = #tpu.dot_dimension_numbers<[1], [0], [0], [1], [0, 0, 1, 1], [], []>} : vector<64x64xbf16>, vector<64x32xbf16>, vector<64x32xf32> -> vector<64x32xf32>
    %135 = arith.truncf %134 : vector<64x32xf32> to vector<64x32xbf16>
    %136 = vector.extract_strided_slice %79 {offsets = [64, 0], sizes = [32, 128], strides = [1, 1]} : vector<128x128xbf16> to vector<32x128xbf16>
    %cst_52 = arith.constant dense<0.000000e+00> : vector<64x128xf32>
    %137 = tpu.matmul %135, %136, %cst_52 {dimension_numbers = #tpu.dot_dimension_numbers<[1], [0], [0], [1], [0, 0, 1, 1], [], []>} : vector<64x32xbf16>, vector<32x128xbf16>, vector<64x128xf32> -> vector<64x128xf32>
    %138 = arith.addf %118, %137 : vector<64x128xf32>
    %139 = vector.extract_strided_slice %77 {offsets = [0, 96], sizes = [64, 32], strides = [1, 1]} : vector<64x384xbf16> to vector<64x32xbf16>
    %140 = vector.extract_strided_slice %77 {offsets = [0, 224], sizes = [64, 32], strides = [1, 1]} : vector<64x384xbf16> to vector<64x32xbf16>
    %141 = vector.extract_strided_slice %77 {offsets = [0, 352], sizes = [64, 32], strides = [1, 1]} : vector<64x384xbf16> to vector<64x32xbf16>
    %cst_53 = arith.constant dense<0.000000e+00> : vector<64x64xf32>
    %142 = tpu.matmul %139, %140, %cst_53 {dimension_numbers = #tpu.dot_dimension_numbers<[1], [1], [0], [0], [0, 0, 1, 0], [], []>} : vector<64x32xbf16>, vector<64x32xbf16>, vector<64x64xf32> -> vector<64x64xf32>
    %cst_54 = arith.constant dense<0xFF800000> : vector<64xf32>
    %143 = vector.multi_reduction <maximumf>, %142, %cst_54 [1] : vector<64x64xf32> to vector<64xf32>
    %144 = vector.shape_cast %143 : vector<64xf32> to vector<64x1xf32>
    %145 = vector.broadcast %144 : vector<64x1xf32> to vector<64x64xf32>
    %146 = arith.subf %142, %145 : vector<64x64xf32>
    %147 = math.exp %146 : vector<64x64xf32>
    %cst_55 = arith.constant dense<0.000000e+00> : vector<64xf32>
    %148 = vector.multi_reduction <add>, %147, %cst_55 [1] : vector<64x64xf32> to vector<64xf32>
    %149 = vector.shape_cast %148 : vector<64xf32> to vector<64x1xf32>
    %150 = tpu.reciprocal %149 {approx = true} : vector<64x1xf32> -> vector<64x1xf32>
    %151 = vector.broadcast %150 : vector<64x1xf32> to vector<64x64xf32>
    %152 = arith.mulf %147, %151 : vector<64x64xf32>
    %153 = arith.truncf %152 : vector<64x64xf32> to vector<64x64xbf16>
    %cst_56 = arith.constant dense<0.000000e+00> : vector<64x32xf32>
    %154 = tpu.matmul %153, %141, %cst_56 {dimension_numbers = #tpu.dot_dimension_numbers<[1], [0], [0], [1], [0, 0, 1, 1], [], []>} : vector<64x64xbf16>, vector<64x32xbf16>, vector<64x32xf32> -> vector<64x32xf32>
    %155 = arith.truncf %154 : vector<64x32xf32> to vector<64x32xbf16>
    %156 = vector.extract_strided_slice %79 {offsets = [96, 0], sizes = [32, 128], strides = [1, 1]} : vector<128x128xbf16> to vector<32x128xbf16>
    %cst_57 = arith.constant dense<0.000000e+00> : vector<64x128xf32>
    %157 = tpu.matmul %155, %156, %cst_57 {dimension_numbers = #tpu.dot_dimension_numbers<[1], [0], [0], [1], [0, 0, 1, 1], [], []>} : vector<64x32xbf16>, vector<32x128xbf16>, vector<64x128xf32> -> vector<64x128xf32>
    %158 = arith.addf %138, %157 : vector<64x128xf32>
    %c0_58 = arith.constant 0 : index
    %c0_59 = arith.constant 0 : index
    %c0_60 = arith.constant 0 : index
    %159 = vector.load %arg10[%c0_58, %c0_59, %c0_60] : memref<2x1x128xf32, #tpu.memory_space<vmem>>, vector<1x1x128xf32>
    %160 = vector.shape_cast %159 : vector<1x1x128xf32> to vector<1x128xf32>
    %161 = vector.broadcast %160 : vector<1x128xf32> to vector<64x128xf32>
    %162 = arith.addf %158, %161 : vector<64x128xf32>
    %163 = arith.addf %162, %52 : vector<64x128xf32>
    %cst_61 = arith.constant dense<0.000000e+00> : vector<64xf32>
    %164 = vector.multi_reduction <add>, %163, %cst_61 [1] : vector<64x128xf32> to vector<64xf32>
    %165 = vector.shape_cast %164 : vector<64xf32> to vector<64x1xf32>
    %cst_62 = arith.constant 1.280000e+02 : f32
    %166 = vector.broadcast %cst_62 : f32 to vector<64x1xf32>
    %167 = arith.divf %165, %166 : vector<64x1xf32>
    %168 = vector.broadcast %167 : vector<64x1xf32> to vector<64x128xf32>
    %169 = arith.subf %163, %168 : vector<64x128xf32>
    %170 = arith.mulf %169, %169 : vector<64x128xf32>
    %cst_63 = arith.constant dense<0.000000e+00> : vector<64xf32>
    %171 = vector.multi_reduction <add>, %170, %cst_63 [1] : vector<64x128xf32> to vector<64xf32>
    %172 = vector.shape_cast %171 : vector<64xf32> to vector<64x1xf32>
    %cst_64 = arith.constant 1.280000e+02 : f32
    %173 = vector.broadcast %cst_64 : f32 to vector<64x1xf32>
    %174 = arith.divf %172, %173 : vector<64x1xf32>
    %cst_65 = arith.constant 9.99999974E-6 : f32
    %175 = vector.broadcast %cst_65 : f32 to vector<64x1xf32>
    %176 = arith.addf %174, %175 : vector<64x1xf32>
    %177 = math.rsqrt %176 : vector<64x1xf32>
    %178 = vector.broadcast %177 : vector<64x1xf32> to vector<64x128xf32>
    %179 = arith.mulf %169, %178 : vector<64x128xf32>
    %c0_66 = arith.constant 0 : index
    %c0_67 = arith.constant 0 : index
    %c0_68 = arith.constant 0 : index
    %180 = vector.load %arg11[%c0_66, %c0_67, %c0_68] : memref<2x128x256xbf16, #tpu.memory_space<vmem>>, vector<1x128x256xbf16>
    %181 = vector.shape_cast %180 : vector<1x128x256xbf16> to vector<128x256xbf16>
    %182 = arith.truncf %179 : vector<64x128xf32> to vector<64x128xbf16>
    %cst_69 = arith.constant dense<0.000000e+00> : vector<64x256xf32>
    %183 = tpu.matmul %182, %181, %cst_69 {dimension_numbers = #tpu.dot_dimension_numbers<[1], [0], [0], [1], [0, 0, 1, 1], [], []>} : vector<64x128xbf16>, vector<128x256xbf16>, vector<64x256xf32> -> vector<64x256xf32>
    %c0_70 = arith.constant 0 : index
    %c0_71 = arith.constant 0 : index
    %c0_72 = arith.constant 0 : index
    %184 = vector.load %arg12[%c0_70, %c0_71, %c0_72] : memref<2x1x256xf32, #tpu.memory_space<vmem>>, vector<1x1x256xf32>
    %185 = vector.shape_cast %184 : vector<1x1x256xf32> to vector<1x256xf32>
    %186 = vector.broadcast %185 : vector<1x256xf32> to vector<64x256xf32>
    %187 = arith.addf %183, %186 : vector<64x256xf32>
    %cst_73 = arith.constant 5.000000e-01 : f32
    %188 = vector.broadcast %cst_73 : f32 to vector<64x256xf32>
    %189 = arith.mulf %188, %187 : vector<64x256xf32>
    %cst_74 = arith.constant 0.707106769 : f32
    %190 = vector.broadcast %cst_74 : f32 to vector<64x256xf32>
    %191 = arith.mulf %187, %190 : vector<64x256xf32>
    %192 = math.absf %191 : vector<64x256xf32>
    %cst_75 = arith.constant 0.327591091 : f32
    %193 = vector.broadcast %cst_75 : f32 to vector<64x256xf32>
    %194 = arith.mulf %193, %192 : vector<64x256xf32>
    %cst_76 = arith.constant 1.000000e+00 : f32
    %195 = vector.broadcast %cst_76 : f32 to vector<64x256xf32>
    %196 = arith.addf %195, %194 : vector<64x256xf32>
    %cst_77 = arith.constant 1.000000e+00 : f32
    %197 = vector.broadcast %cst_77 : f32 to vector<64x256xf32>
    %198 = arith.divf %197, %196 : vector<64x256xf32>
    %cst_78 = arith.constant 1.06140542 : f32
    %199 = vector.broadcast %cst_78 : f32 to vector<64x256xf32>
    %200 = arith.mulf %199, %198 : vector<64x256xf32>
    %cst_79 = arith.constant -1.45315206 : f32
    %201 = vector.broadcast %cst_79 : f32 to vector<64x256xf32>
    %202 = arith.addf %200, %201 : vector<64x256xf32>
    %203 = arith.mulf %202, %198 : vector<64x256xf32>
    %cst_80 = arith.constant 1.42141378 : f32
    %204 = vector.broadcast %cst_80 : f32 to vector<64x256xf32>
    %205 = arith.addf %203, %204 : vector<64x256xf32>
    %206 = arith.mulf %205, %198 : vector<64x256xf32>
    %cst_81 = arith.constant -0.284496725 : f32
    %207 = vector.broadcast %cst_81 : f32 to vector<64x256xf32>
    %208 = arith.addf %206, %207 : vector<64x256xf32>
    %209 = arith.mulf %208, %198 : vector<64x256xf32>
    %cst_82 = arith.constant 0.254829586 : f32
    %210 = vector.broadcast %cst_82 : f32 to vector<64x256xf32>
    %211 = arith.addf %209, %210 : vector<64x256xf32>
    %212 = arith.mulf %211, %198 : vector<64x256xf32>
    %cst_83 = arith.constant 0.000000e+00 : f32
    %213 = vector.broadcast %cst_83 : f32 to vector<64x256xf32>
    %214 = arith.subf %213, %192 : vector<64x256xf32>
    %215 = arith.mulf %214, %192 : vector<64x256xf32>
    %216 = math.exp %215 : vector<64x256xf32>
    %217 = arith.mulf %212, %216 : vector<64x256xf32>
    %cst_84 = arith.constant 1.000000e+00 : f32
    %218 = vector.broadcast %cst_84 : f32 to vector<64x256xf32>
    %219 = arith.subf %218, %217 : vector<64x256xf32>
    %cst_85 = arith.constant 0.000000e+00 : f32
    %220 = vector.broadcast %cst_85 : f32 to vector<64x256xf32>
    %221 = arith.cmpf oge, %191, %220 : vector<64x256xf32>
    %cst_86 = arith.constant 0.000000e+00 : f32
    %222 = vector.broadcast %cst_86 : f32 to vector<64x256xf32>
    %223 = arith.subf %222, %219 : vector<64x256xf32>
    %224 = arith.select %221, %219, %223 : vector<64x256xi1>, vector<64x256xf32>
    %cst_87 = arith.constant 1.000000e+00 : f32
    %225 = vector.broadcast %cst_87 : f32 to vector<64x256xf32>
    %226 = arith.addf %225, %224 : vector<64x256xf32>
    %227 = arith.mulf %189, %226 : vector<64x256xf32>
    %c0_88 = arith.constant 0 : index
    %c0_89 = arith.constant 0 : index
    %c0_90 = arith.constant 0 : index
    %228 = vector.load %arg13[%c0_88, %c0_89, %c0_90] : memref<2x256x128xbf16, #tpu.memory_space<vmem>>, vector<1x256x128xbf16>
    %229 = vector.shape_cast %228 : vector<1x256x128xbf16> to vector<256x128xbf16>
    %230 = arith.truncf %227 : vector<64x256xf32> to vector<64x256xbf16>
    %cst_91 = arith.constant dense<0.000000e+00> : vector<64x128xf32>
    %231 = tpu.matmul %230, %229, %cst_91 {dimension_numbers = #tpu.dot_dimension_numbers<[1], [0], [0], [1], [0, 0, 1, 1], [], []>} : vector<64x256xbf16>, vector<256x128xbf16>, vector<64x128xf32> -> vector<64x128xf32>
    %c0_92 = arith.constant 0 : index
    %c0_93 = arith.constant 0 : index
    %c0_94 = arith.constant 0 : index
    %232 = vector.load %arg14[%c0_92, %c0_93, %c0_94] : memref<2x1x128xf32, #tpu.memory_space<vmem>>, vector<1x1x128xf32>
    %233 = vector.shape_cast %232 : vector<1x1x128xf32> to vector<1x128xf32>
    %234 = vector.broadcast %233 : vector<1x128xf32> to vector<64x128xf32>
    %235 = arith.addf %231, %234 : vector<64x128xf32>
    %236 = arith.addf %235, %163 : vector<64x128xf32>
    %cst_95 = arith.constant dense<0.000000e+00> : vector<64xf32>
    %237 = vector.multi_reduction <add>, %236, %cst_95 [1] : vector<64x128xf32> to vector<64xf32>
    %238 = vector.shape_cast %237 : vector<64xf32> to vector<64x1xf32>
    %cst_96 = arith.constant 1.280000e+02 : f32
    %239 = vector.broadcast %cst_96 : f32 to vector<64x1xf32>
    %240 = arith.divf %238, %239 : vector<64x1xf32>
    %241 = vector.broadcast %240 : vector<64x1xf32> to vector<64x128xf32>
    %242 = arith.subf %236, %241 : vector<64x128xf32>
    %243 = arith.mulf %242, %242 : vector<64x128xf32>
    %cst_97 = arith.constant dense<0.000000e+00> : vector<64xf32>
    %244 = vector.multi_reduction <add>, %243, %cst_97 [1] : vector<64x128xf32> to vector<64xf32>
    %245 = vector.shape_cast %244 : vector<64xf32> to vector<64x1xf32>
    %cst_98 = arith.constant 1.280000e+02 : f32
    %246 = vector.broadcast %cst_98 : f32 to vector<64x1xf32>
    %247 = arith.divf %245, %246 : vector<64x1xf32>
    %cst_99 = arith.constant 9.99999974E-6 : f32
    %248 = vector.broadcast %cst_99 : f32 to vector<64x1xf32>
    %249 = arith.addf %247, %248 : vector<64x1xf32>
    %250 = math.rsqrt %249 : vector<64x1xf32>
    %251 = vector.broadcast %250 : vector<64x1xf32> to vector<64x128xf32>
    %252 = arith.mulf %242, %251 : vector<64x128xf32>
    %c1 = arith.constant 1 : index
    %c0_100 = arith.constant 0 : index
    %c0_101 = arith.constant 0 : index
    %253 = vector.load %arg7[%c1, %c0_100, %c0_101] : memref<2x128x384xbf16, #tpu.memory_space<vmem>>, vector<1x128x384xbf16>
    %254 = vector.shape_cast %253 : vector<1x128x384xbf16> to vector<128x384xbf16>
    %255 = arith.truncf %252 : vector<64x128xf32> to vector<64x128xbf16>
    %cst_102 = arith.constant dense<0.000000e+00> : vector<64x384xf32>
    %256 = tpu.matmul %255, %254, %cst_102 {dimension_numbers = #tpu.dot_dimension_numbers<[1], [0], [0], [1], [0, 0, 1, 1], [], []>} : vector<64x128xbf16>, vector<128x384xbf16>, vector<64x384xf32> -> vector<64x384xf32>
    %c1_103 = arith.constant 1 : index
    %c0_104 = arith.constant 0 : index
    %c0_105 = arith.constant 0 : index
    %257 = vector.load %arg8[%c1_103, %c0_104, %c0_105] : memref<2x1x384xf32, #tpu.memory_space<vmem>>, vector<1x1x384xf32>
    %258 = vector.shape_cast %257 : vector<1x1x384xf32> to vector<1x384xf32>
    %259 = vector.broadcast %258 : vector<1x384xf32> to vector<64x384xf32>
    %260 = arith.addf %256, %259 : vector<64x384xf32>
    %261 = arith.truncf %260 : vector<64x384xf32> to vector<64x384xbf16>
    %c1_106 = arith.constant 1 : index
    %c0_107 = arith.constant 0 : index
    %c0_108 = arith.constant 0 : index
    %262 = vector.load %arg9[%c1_106, %c0_107, %c0_108] : memref<2x128x128xbf16, #tpu.memory_space<vmem>>, vector<1x128x128xbf16>
    %263 = vector.shape_cast %262 : vector<1x128x128xbf16> to vector<128x128xbf16>
    %264 = vector.extract_strided_slice %261 {offsets = [0, 0], sizes = [64, 32], strides = [1, 1]} : vector<64x384xbf16> to vector<64x32xbf16>
    %265 = vector.extract_strided_slice %261 {offsets = [0, 128], sizes = [64, 32], strides = [1, 1]} : vector<64x384xbf16> to vector<64x32xbf16>
    %266 = vector.extract_strided_slice %261 {offsets = [0, 256], sizes = [64, 32], strides = [1, 1]} : vector<64x384xbf16> to vector<64x32xbf16>
    %cst_109 = arith.constant dense<0.000000e+00> : vector<64x64xf32>
    %267 = tpu.matmul %264, %265, %cst_109 {dimension_numbers = #tpu.dot_dimension_numbers<[1], [1], [0], [0], [0, 0, 1, 0], [], []>} : vector<64x32xbf16>, vector<64x32xbf16>, vector<64x64xf32> -> vector<64x64xf32>
    %cst_110 = arith.constant dense<0xFF800000> : vector<64xf32>
    %268 = vector.multi_reduction <maximumf>, %267, %cst_110 [1] : vector<64x64xf32> to vector<64xf32>
    %269 = vector.shape_cast %268 : vector<64xf32> to vector<64x1xf32>
    %270 = vector.broadcast %269 : vector<64x1xf32> to vector<64x64xf32>
    %271 = arith.subf %267, %270 : vector<64x64xf32>
    %272 = math.exp %271 : vector<64x64xf32>
    %cst_111 = arith.constant dense<0.000000e+00> : vector<64xf32>
    %273 = vector.multi_reduction <add>, %272, %cst_111 [1] : vector<64x64xf32> to vector<64xf32>
    %274 = vector.shape_cast %273 : vector<64xf32> to vector<64x1xf32>
    %275 = tpu.reciprocal %274 {approx = true} : vector<64x1xf32> -> vector<64x1xf32>
    %276 = vector.broadcast %275 : vector<64x1xf32> to vector<64x64xf32>
    %277 = arith.mulf %272, %276 : vector<64x64xf32>
    %278 = arith.truncf %277 : vector<64x64xf32> to vector<64x64xbf16>
    %cst_112 = arith.constant dense<0.000000e+00> : vector<64x32xf32>
    %279 = tpu.matmul %278, %266, %cst_112 {dimension_numbers = #tpu.dot_dimension_numbers<[1], [0], [0], [1], [0, 0, 1, 1], [], []>} : vector<64x64xbf16>, vector<64x32xbf16>, vector<64x32xf32> -> vector<64x32xf32>
    %280 = arith.truncf %279 : vector<64x32xf32> to vector<64x32xbf16>
    %281 = vector.extract_strided_slice %263 {offsets = [0, 0], sizes = [32, 128], strides = [1, 1]} : vector<128x128xbf16> to vector<32x128xbf16>
    %cst_113 = arith.constant dense<0.000000e+00> : vector<64x128xf32>
    %282 = tpu.matmul %280, %281, %cst_113 {dimension_numbers = #tpu.dot_dimension_numbers<[1], [0], [0], [1], [0, 0, 1, 1], [], []>} : vector<64x32xbf16>, vector<32x128xbf16>, vector<64x128xf32> -> vector<64x128xf32>
    %283 = vector.extract_strided_slice %261 {offsets = [0, 32], sizes = [64, 32], strides = [1, 1]} : vector<64x384xbf16> to vector<64x32xbf16>
    %284 = vector.extract_strided_slice %261 {offsets = [0, 160], sizes = [64, 32], strides = [1, 1]} : vector<64x384xbf16> to vector<64x32xbf16>
    %285 = vector.extract_strided_slice %261 {offsets = [0, 288], sizes = [64, 32], strides = [1, 1]} : vector<64x384xbf16> to vector<64x32xbf16>
    %cst_114 = arith.constant dense<0.000000e+00> : vector<64x64xf32>
    %286 = tpu.matmul %283, %284, %cst_114 {dimension_numbers = #tpu.dot_dimension_numbers<[1], [1], [0], [0], [0, 0, 1, 0], [], []>} : vector<64x32xbf16>, vector<64x32xbf16>, vector<64x64xf32> -> vector<64x64xf32>
    %cst_115 = arith.constant dense<0xFF800000> : vector<64xf32>
    %287 = vector.multi_reduction <maximumf>, %286, %cst_115 [1] : vector<64x64xf32> to vector<64xf32>
    %288 = vector.shape_cast %287 : vector<64xf32> to vector<64x1xf32>
    %289 = vector.broadcast %288 : vector<64x1xf32> to vector<64x64xf32>
    %290 = arith.subf %286, %289 : vector<64x64xf32>
    %291 = math.exp %290 : vector<64x64xf32>
    %cst_116 = arith.constant dense<0.000000e+00> : vector<64xf32>
    %292 = vector.multi_reduction <add>, %291, %cst_116 [1] : vector<64x64xf32> to vector<64xf32>
    %293 = vector.shape_cast %292 : vector<64xf32> to vector<64x1xf32>
    %294 = tpu.reciprocal %293 {approx = true} : vector<64x1xf32> -> vector<64x1xf32>
    %295 = vector.broadcast %294 : vector<64x1xf32> to vector<64x64xf32>
    %296 = arith.mulf %291, %295 : vector<64x64xf32>
    %297 = arith.truncf %296 : vector<64x64xf32> to vector<64x64xbf16>
    %cst_117 = arith.constant dense<0.000000e+00> : vector<64x32xf32>
    %298 = tpu.matmul %297, %285, %cst_117 {dimension_numbers = #tpu.dot_dimension_numbers<[1], [0], [0], [1], [0, 0, 1, 1], [], []>} : vector<64x64xbf16>, vector<64x32xbf16>, vector<64x32xf32> -> vector<64x32xf32>
    %299 = arith.truncf %298 : vector<64x32xf32> to vector<64x32xbf16>
    %300 = vector.extract_strided_slice %263 {offsets = [32, 0], sizes = [32, 128], strides = [1, 1]} : vector<128x128xbf16> to vector<32x128xbf16>
    %cst_118 = arith.constant dense<0.000000e+00> : vector<64x128xf32>
    %301 = tpu.matmul %299, %300, %cst_118 {dimension_numbers = #tpu.dot_dimension_numbers<[1], [0], [0], [1], [0, 0, 1, 1], [], []>} : vector<64x32xbf16>, vector<32x128xbf16>, vector<64x128xf32> -> vector<64x128xf32>
    %302 = arith.addf %282, %301 : vector<64x128xf32>
    %303 = vector.extract_strided_slice %261 {offsets = [0, 64], sizes = [64, 32], strides = [1, 1]} : vector<64x384xbf16> to vector<64x32xbf16>
    %304 = vector.extract_strided_slice %261 {offsets = [0, 192], sizes = [64, 32], strides = [1, 1]} : vector<64x384xbf16> to vector<64x32xbf16>
    %305 = vector.extract_strided_slice %261 {offsets = [0, 320], sizes = [64, 32], strides = [1, 1]} : vector<64x384xbf16> to vector<64x32xbf16>
    %cst_119 = arith.constant dense<0.000000e+00> : vector<64x64xf32>
    %306 = tpu.matmul %303, %304, %cst_119 {dimension_numbers = #tpu.dot_dimension_numbers<[1], [1], [0], [0], [0, 0, 1, 0], [], []>} : vector<64x32xbf16>, vector<64x32xbf16>, vector<64x64xf32> -> vector<64x64xf32>
    %cst_120 = arith.constant dense<0xFF800000> : vector<64xf32>
    %307 = vector.multi_reduction <maximumf>, %306, %cst_120 [1] : vector<64x64xf32> to vector<64xf32>
    %308 = vector.shape_cast %307 : vector<64xf32> to vector<64x1xf32>
    %309 = vector.broadcast %308 : vector<64x1xf32> to vector<64x64xf32>
    %310 = arith.subf %306, %309 : vector<64x64xf32>
    %311 = math.exp %310 : vector<64x64xf32>
    %cst_121 = arith.constant dense<0.000000e+00> : vector<64xf32>
    %312 = vector.multi_reduction <add>, %311, %cst_121 [1] : vector<64x64xf32> to vector<64xf32>
    %313 = vector.shape_cast %312 : vector<64xf32> to vector<64x1xf32>
    %314 = tpu.reciprocal %313 {approx = true} : vector<64x1xf32> -> vector<64x1xf32>
    %315 = vector.broadcast %314 : vector<64x1xf32> to vector<64x64xf32>
    %316 = arith.mulf %311, %315 : vector<64x64xf32>
    %317 = arith.truncf %316 : vector<64x64xf32> to vector<64x64xbf16>
    %cst_122 = arith.constant dense<0.000000e+00> : vector<64x32xf32>
    %318 = tpu.matmul %317, %305, %cst_122 {dimension_numbers = #tpu.dot_dimension_numbers<[1], [0], [0], [1], [0, 0, 1, 1], [], []>} : vector<64x64xbf16>, vector<64x32xbf16>, vector<64x32xf32> -> vector<64x32xf32>
    %319 = arith.truncf %318 : vector<64x32xf32> to vector<64x32xbf16>
    %320 = vector.extract_strided_slice %263 {offsets = [64, 0], sizes = [32, 128], strides = [1, 1]} : vector<128x128xbf16> to vector<32x128xbf16>
    %cst_123 = arith.constant dense<0.000000e+00> : vector<64x128xf32>
    %321 = tpu.matmul %319, %320, %cst_123 {dimension_numbers = #tpu.dot_dimension_numbers<[1], [0], [0], [1], [0, 0, 1, 1], [], []>} : vector<64x32xbf16>, vector<32x128xbf16>, vector<64x128xf32> -> vector<64x128xf32>
    %322 = arith.addf %302, %321 : vector<64x128xf32>
    %323 = vector.extract_strided_slice %261 {offsets = [0, 96], sizes = [64, 32], strides = [1, 1]} : vector<64x384xbf16> to vector<64x32xbf16>
    %324 = vector.extract_strided_slice %261 {offsets = [0, 224], sizes = [64, 32], strides = [1, 1]} : vector<64x384xbf16> to vector<64x32xbf16>
    %325 = vector.extract_strided_slice %261 {offsets = [0, 352], sizes = [64, 32], strides = [1, 1]} : vector<64x384xbf16> to vector<64x32xbf16>
    %cst_124 = arith.constant dense<0.000000e+00> : vector<64x64xf32>
    %326 = tpu.matmul %323, %324, %cst_124 {dimension_numbers = #tpu.dot_dimension_numbers<[1], [1], [0], [0], [0, 0, 1, 0], [], []>} : vector<64x32xbf16>, vector<64x32xbf16>, vector<64x64xf32> -> vector<64x64xf32>
    %cst_125 = arith.constant dense<0xFF800000> : vector<64xf32>
    %327 = vector.multi_reduction <maximumf>, %326, %cst_125 [1] : vector<64x64xf32> to vector<64xf32>
    %328 = vector.shape_cast %327 : vector<64xf32> to vector<64x1xf32>
    %329 = vector.broadcast %328 : vector<64x1xf32> to vector<64x64xf32>
    %330 = arith.subf %326, %329 : vector<64x64xf32>
    %331 = math.exp %330 : vector<64x64xf32>
    %cst_126 = arith.constant dense<0.000000e+00> : vector<64xf32>
    %332 = vector.multi_reduction <add>, %331, %cst_126 [1] : vector<64x64xf32> to vector<64xf32>
    %333 = vector.shape_cast %332 : vector<64xf32> to vector<64x1xf32>
    %334 = tpu.reciprocal %333 {approx = true} : vector<64x1xf32> -> vector<64x1xf32>
    %335 = vector.broadcast %334 : vector<64x1xf32> to vector<64x64xf32>
    %336 = arith.mulf %331, %335 : vector<64x64xf32>
    %337 = arith.truncf %336 : vector<64x64xf32> to vector<64x64xbf16>
    %cst_127 = arith.constant dense<0.000000e+00> : vector<64x32xf32>
    %338 = tpu.matmul %337, %325, %cst_127 {dimension_numbers = #tpu.dot_dimension_numbers<[1], [0], [0], [1], [0, 0, 1, 1], [], []>} : vector<64x64xbf16>, vector<64x32xbf16>, vector<64x32xf32> -> vector<64x32xf32>
    %339 = arith.truncf %338 : vector<64x32xf32> to vector<64x32xbf16>
    %340 = vector.extract_strided_slice %263 {offsets = [96, 0], sizes = [32, 128], strides = [1, 1]} : vector<128x128xbf16> to vector<32x128xbf16>
    %cst_128 = arith.constant dense<0.000000e+00> : vector<64x128xf32>
    %341 = tpu.matmul %339, %340, %cst_128 {dimension_numbers = #tpu.dot_dimension_numbers<[1], [0], [0], [1], [0, 0, 1, 1], [], []>} : vector<64x32xbf16>, vector<32x128xbf16>, vector<64x128xf32> -> vector<64x128xf32>
    %342 = arith.addf %322, %341 : vector<64x128xf32>
    %c1_129 = arith.constant 1 : index
    %c0_130 = arith.constant 0 : index
    %c0_131 = arith.constant 0 : index
    %343 = vector.load %arg10[%c1_129, %c0_130, %c0_131] : memref<2x1x128xf32, #tpu.memory_space<vmem>>, vector<1x1x128xf32>
    %344 = vector.shape_cast %343 : vector<1x1x128xf32> to vector<1x128xf32>
    %345 = vector.broadcast %344 : vector<1x128xf32> to vector<64x128xf32>
    %346 = arith.addf %342, %345 : vector<64x128xf32>
    %347 = arith.addf %346, %236 : vector<64x128xf32>
    %cst_132 = arith.constant dense<0.000000e+00> : vector<64xf32>
    %348 = vector.multi_reduction <add>, %347, %cst_132 [1] : vector<64x128xf32> to vector<64xf32>
    %349 = vector.shape_cast %348 : vector<64xf32> to vector<64x1xf32>
    %cst_133 = arith.constant 1.280000e+02 : f32
    %350 = vector.broadcast %cst_133 : f32 to vector<64x1xf32>
    %351 = arith.divf %349, %350 : vector<64x1xf32>
    %352 = vector.broadcast %351 : vector<64x1xf32> to vector<64x128xf32>
    %353 = arith.subf %347, %352 : vector<64x128xf32>
    %354 = arith.mulf %353, %353 : vector<64x128xf32>
    %cst_134 = arith.constant dense<0.000000e+00> : vector<64xf32>
    %355 = vector.multi_reduction <add>, %354, %cst_134 [1] : vector<64x128xf32> to vector<64xf32>
    %356 = vector.shape_cast %355 : vector<64xf32> to vector<64x1xf32>
    %cst_135 = arith.constant 1.280000e+02 : f32
    %357 = vector.broadcast %cst_135 : f32 to vector<64x1xf32>
    %358 = arith.divf %356, %357 : vector<64x1xf32>
    %cst_136 = arith.constant 9.99999974E-6 : f32
    %359 = vector.broadcast %cst_136 : f32 to vector<64x1xf32>
    %360 = arith.addf %358, %359 : vector<64x1xf32>
    %361 = math.rsqrt %360 : vector<64x1xf32>
    %362 = vector.broadcast %361 : vector<64x1xf32> to vector<64x128xf32>
    %363 = arith.mulf %353, %362 : vector<64x128xf32>
    %c1_137 = arith.constant 1 : index
    %c0_138 = arith.constant 0 : index
    %c0_139 = arith.constant 0 : index
    %364 = vector.load %arg11[%c1_137, %c0_138, %c0_139] : memref<2x128x256xbf16, #tpu.memory_space<vmem>>, vector<1x128x256xbf16>
    %365 = vector.shape_cast %364 : vector<1x128x256xbf16> to vector<128x256xbf16>
    %366 = arith.truncf %363 : vector<64x128xf32> to vector<64x128xbf16>
    %cst_140 = arith.constant dense<0.000000e+00> : vector<64x256xf32>
    %367 = tpu.matmul %366, %365, %cst_140 {dimension_numbers = #tpu.dot_dimension_numbers<[1], [0], [0], [1], [0, 0, 1, 1], [], []>} : vector<64x128xbf16>, vector<128x256xbf16>, vector<64x256xf32> -> vector<64x256xf32>
    %c1_141 = arith.constant 1 : index
    %c0_142 = arith.constant 0 : index
    %c0_143 = arith.constant 0 : index
    %368 = vector.load %arg12[%c1_141, %c0_142, %c0_143] : memref<2x1x256xf32, #tpu.memory_space<vmem>>, vector<1x1x256xf32>
    %369 = vector.shape_cast %368 : vector<1x1x256xf32> to vector<1x256xf32>
    %370 = vector.broadcast %369 : vector<1x256xf32> to vector<64x256xf32>
    %371 = arith.addf %367, %370 : vector<64x256xf32>
    %cst_144 = arith.constant 5.000000e-01 : f32
    %372 = vector.broadcast %cst_144 : f32 to vector<64x256xf32>
    %373 = arith.mulf %372, %371 : vector<64x256xf32>
    %cst_145 = arith.constant 0.707106769 : f32
    %374 = vector.broadcast %cst_145 : f32 to vector<64x256xf32>
    %375 = arith.mulf %371, %374 : vector<64x256xf32>
    %376 = math.absf %375 : vector<64x256xf32>
    %cst_146 = arith.constant 0.327591091 : f32
    %377 = vector.broadcast %cst_146 : f32 to vector<64x256xf32>
    %378 = arith.mulf %377, %376 : vector<64x256xf32>
    %cst_147 = arith.constant 1.000000e+00 : f32
    %379 = vector.broadcast %cst_147 : f32 to vector<64x256xf32>
    %380 = arith.addf %379, %378 : vector<64x256xf32>
    %cst_148 = arith.constant 1.000000e+00 : f32
    %381 = vector.broadcast %cst_148 : f32 to vector<64x256xf32>
    %382 = arith.divf %381, %380 : vector<64x256xf32>
    %cst_149 = arith.constant 1.06140542 : f32
    %383 = vector.broadcast %cst_149 : f32 to vector<64x256xf32>
    %384 = arith.mulf %383, %382 : vector<64x256xf32>
    %cst_150 = arith.constant -1.45315206 : f32
    %385 = vector.broadcast %cst_150 : f32 to vector<64x256xf32>
    %386 = arith.addf %384, %385 : vector<64x256xf32>
    %387 = arith.mulf %386, %382 : vector<64x256xf32>
    %cst_151 = arith.constant 1.42141378 : f32
    %388 = vector.broadcast %cst_151 : f32 to vector<64x256xf32>
    %389 = arith.addf %387, %388 : vector<64x256xf32>
    %390 = arith.mulf %389, %382 : vector<64x256xf32>
    %cst_152 = arith.constant -0.284496725 : f32
    %391 = vector.broadcast %cst_152 : f32 to vector<64x256xf32>
    %392 = arith.addf %390, %391 : vector<64x256xf32>
    %393 = arith.mulf %392, %382 : vector<64x256xf32>
    %cst_153 = arith.constant 0.254829586 : f32
    %394 = vector.broadcast %cst_153 : f32 to vector<64x256xf32>
    %395 = arith.addf %393, %394 : vector<64x256xf32>
    %396 = arith.mulf %395, %382 : vector<64x256xf32>
    %cst_154 = arith.constant 0.000000e+00 : f32
    %397 = vector.broadcast %cst_154 : f32 to vector<64x256xf32>
    %398 = arith.subf %397, %376 : vector<64x256xf32>
    %399 = arith.mulf %398, %376 : vector<64x256xf32>
    %400 = math.exp %399 : vector<64x256xf32>
    %401 = arith.mulf %396, %400 : vector<64x256xf32>
    %cst_155 = arith.constant 1.000000e+00 : f32
    %402 = vector.broadcast %cst_155 : f32 to vector<64x256xf32>
    %403 = arith.subf %402, %401 : vector<64x256xf32>
    %cst_156 = arith.constant 0.000000e+00 : f32
    %404 = vector.broadcast %cst_156 : f32 to vector<64x256xf32>
    %405 = arith.cmpf oge, %375, %404 : vector<64x256xf32>
    %cst_157 = arith.constant 0.000000e+00 : f32
    %406 = vector.broadcast %cst_157 : f32 to vector<64x256xf32>
    %407 = arith.subf %406, %403 : vector<64x256xf32>
    %408 = arith.select %405, %403, %407 : vector<64x256xi1>, vector<64x256xf32>
    %cst_158 = arith.constant 1.000000e+00 : f32
    %409 = vector.broadcast %cst_158 : f32 to vector<64x256xf32>
    %410 = arith.addf %409, %408 : vector<64x256xf32>
    %411 = arith.mulf %373, %410 : vector<64x256xf32>
    %c1_159 = arith.constant 1 : index
    %c0_160 = arith.constant 0 : index
    %c0_161 = arith.constant 0 : index
    %412 = vector.load %arg13[%c1_159, %c0_160, %c0_161] : memref<2x256x128xbf16, #tpu.memory_space<vmem>>, vector<1x256x128xbf16>
    %413 = vector.shape_cast %412 : vector<1x256x128xbf16> to vector<256x128xbf16>
    %414 = arith.truncf %411 : vector<64x256xf32> to vector<64x256xbf16>
    %cst_162 = arith.constant dense<0.000000e+00> : vector<64x128xf32>
    %415 = tpu.matmul %414, %413, %cst_162 {dimension_numbers = #tpu.dot_dimension_numbers<[1], [0], [0], [1], [0, 0, 1, 1], [], []>} : vector<64x256xbf16>, vector<256x128xbf16>, vector<64x128xf32> -> vector<64x128xf32>
    %c1_163 = arith.constant 1 : index
    %c0_164 = arith.constant 0 : index
    %c0_165 = arith.constant 0 : index
    %416 = vector.load %arg14[%c1_163, %c0_164, %c0_165] : memref<2x1x128xf32, #tpu.memory_space<vmem>>, vector<1x1x128xf32>
    %417 = vector.shape_cast %416 : vector<1x1x128xf32> to vector<1x128xf32>
    %418 = vector.broadcast %417 : vector<1x128xf32> to vector<64x128xf32>
    %419 = arith.addf %415, %418 : vector<64x128xf32>
    %420 = arith.addf %419, %347 : vector<64x128xf32>
    %c0_166 = arith.constant 0 : index
    %c0_167 = arith.constant 0 : index
    %421 = vector.load %arg15[%c0_166, %c0_167] : memref<1x128xf32, #tpu.memory_space<vmem>>, vector<1x128xf32>
    %c0_168 = arith.constant 0 : index
    %c0_169 = arith.constant 0 : index
    %422 = vector.load %arg16[%c0_168, %c0_169] : memref<1x128xf32, #tpu.memory_space<vmem>>, vector<1x128xf32>
    %cst_170 = arith.constant dense<0.000000e+00> : vector<64xf32>
    %423 = vector.multi_reduction <add>, %420, %cst_170 [1] : vector<64x128xf32> to vector<64xf32>
    %424 = vector.shape_cast %423 : vector<64xf32> to vector<64x1xf32>
    %cst_171 = arith.constant 1.280000e+02 : f32
    %425 = vector.broadcast %cst_171 : f32 to vector<64x1xf32>
    %426 = arith.divf %424, %425 : vector<64x1xf32>
    %427 = vector.broadcast %426 : vector<64x1xf32> to vector<64x128xf32>
    %428 = arith.subf %420, %427 : vector<64x128xf32>
    %429 = arith.mulf %428, %428 : vector<64x128xf32>
    %cst_172 = arith.constant dense<0.000000e+00> : vector<64xf32>
    %430 = vector.multi_reduction <add>, %429, %cst_172 [1] : vector<64x128xf32> to vector<64xf32>
    %431 = vector.shape_cast %430 : vector<64xf32> to vector<64x1xf32>
    %cst_173 = arith.constant 1.280000e+02 : f32
    %432 = vector.broadcast %cst_173 : f32 to vector<64x1xf32>
    %433 = arith.divf %431, %432 : vector<64x1xf32>
    %cst_174 = arith.constant 9.99999974E-6 : f32
    %434 = vector.broadcast %cst_174 : f32 to vector<64x1xf32>
    %435 = arith.addf %433, %434 : vector<64x1xf32>
    %436 = math.rsqrt %435 : vector<64x1xf32>
    %437 = vector.broadcast %436 : vector<64x1xf32> to vector<64x128xf32>
    %438 = arith.mulf %428, %437 : vector<64x128xf32>
    %439 = vector.broadcast %421 : vector<1x128xf32> to vector<64x128xf32>
    %440 = arith.mulf %438, %439 : vector<64x128xf32>
    %441 = vector.broadcast %422 : vector<1x128xf32> to vector<64x128xf32>
    %442 = arith.addf %440, %441 : vector<64x128xf32>
    %c0_175 = arith.constant 0 : index
    %c0_176 = arith.constant 0 : index
    %c0_177 = arith.constant 0 : index
    %443 = vector.load %arg17[%c0_175, %c0_176, %c0_177] : memref<1x64x128xf32, #tpu.memory_space<vmem>>, vector<1x64x128xf32>
    %444 = vector.shape_cast %443 : vector<1x64x128xf32> to vector<64x128xf32>
    %445 = vector.shape_cast %442 : vector<64x128xf32> to vector<1x64x128xf32>
    tpu.vector_store %arg17[%c0_175, %c0_176, %c0_177], %445 {strides = array<i32>} : memref<1x64x128xf32, #tpu.memory_space<vmem>>, vector<1x64x128xf32>,
    return
  }
  func.func @transform_0(%arg0: i32) -> (i32, i32, i32) {
    %c0_i32 = arith.constant 0 : i32
    %c0_i32_0 = arith.constant 0 : i32
    %c0_i32_1 = arith.constant 0 : i32
    return %arg0, %c0_i32, %c0_i32_0 : i32, i32, i32
  }
  func.func @transform_1(%arg0: i32) -> (i32, i32) {
    %c0_i32 = arith.constant 0 : i32
    %c0_i32_0 = arith.constant 0 : i32
    %c0_i32_1 = arith.constant 0 : i32
    return %c0_i32, %c0_i32_0 : i32, i32
  }
  func.func @transform_2(%arg0: i32) -> (i32, i32) {
    %c0_i32 = arith.constant 0 : i32
    %c0_i32_0 = arith.constant 0 : i32
    %c0_i32_1 = arith.constant 0 : i32
    return %c0_i32, %c0_i32_0 : i32, i32
  }
  func.func @transform_3(%arg0: i32) -> (i32, i32) {
    %c0_i32 = arith.constant 0 : i32
    %c0_i32_0 = arith.constant 0 : i32
    %c0_i32_1 = arith.constant 0 : i32
    return %c0_i32, %c0_i32_0 : i32, i32
  }
  func.func @transform_4(%arg0: i32) -> (i32, i32) {
    %c0_i32 = arith.constant 0 : i32
    %c0_i32_0 = arith.constant 0 : i32
    %c0_i32_1 = arith.constant 0 : i32
    return %c0_i32, %c0_i32_0 : i32, i32
  }
  func.func @transform_5(%arg0: i32) -> (i32, i32) {
    %c0_i32 = arith.constant 0 : i32
    %c0_i32_0 = arith.constant 0 : i32
    %c0_i32_1 = arith.constant 0 : i32
    return %c0_i32, %c0_i32_0 : i32, i32
  }
  func.func @transform_6(%arg0: i32) -> (i32, i32, i32) {
    %c0_i32 = arith.constant 0 : i32
    %c0_i32_0 = arith.constant 0 : i32
    %c0_i32_1 = arith.constant 0 : i32
    %c0_i32_2 = arith.constant 0 : i32
    return %c0_i32, %c0_i32_0, %c0_i32_1 : i32, i32, i32
  }
  func.func @transform_7(%arg0: i32) -> (i32, i32, i32) {
    %c0_i32 = arith.constant 0 : i32
    %c0_i32_0 = arith.constant 0 : i32
    %c0_i32_1 = arith.constant 0 : i32
    %c0_i32_2 = arith.constant 0 : i32
    return %c0_i32, %c0_i32_0, %c0_i32_1 : i32, i32, i32
  }
  func.func @transform_8(%arg0: i32) -> (i32, i32, i32) {
    %c0_i32 = arith.constant 0 : i32
    %c0_i32_0 = arith.constant 0 : i32
    %c0_i32_1 = arith.constant 0 : i32
    %c0_i32_2 = arith.constant 0 : i32
    return %c0_i32, %c0_i32_0, %c0_i32_1 : i32, i32, i32
  }
  func.func @transform_9(%arg0: i32) -> (i32, i32, i32) {
    %c0_i32 = arith.constant 0 : i32
    %c0_i32_0 = arith.constant 0 : i32
    %c0_i32_1 = arith.constant 0 : i32
    %c0_i32_2 = arith.constant 0 : i32
    return %c0_i32, %c0_i32_0, %c0_i32_1 : i32, i32, i32
  }
  func.func @transform_10(%arg0: i32) -> (i32, i32, i32) {
    %c0_i32 = arith.constant 0 : i32
    %c0_i32_0 = arith.constant 0 : i32
    %c0_i32_1 = arith.constant 0 : i32
    %c0_i32_2 = arith.constant 0 : i32
    return %c0_i32, %c0_i32_0, %c0_i32_1 : i32, i32, i32
  }
  func.func @transform_11(%arg0: i32) -> (i32, i32, i32) {
    %c0_i32 = arith.constant 0 : i32
    %c0_i32_0 = arith.constant 0 : i32
    %c0_i32_1 = arith.constant 0 : i32
    %c0_i32_2 = arith.constant 0 : i32
    return %c0_i32, %c0_i32_0, %c0_i32_1 : i32, i32, i32
  }
  func.func @transform_12(%arg0: i32) -> (i32, i32, i32) {
    %c0_i32 = arith.constant 0 : i32
    %c0_i32_0 = arith.constant 0 : i32
    %c0_i32_1 = arith.constant 0 : i32
    %c0_i32_2 = arith.constant 0 : i32
    return %c0_i32, %c0_i32_0, %c0_i32_1 : i32, i32, i32
  }
  func.func @transform_13(%arg0: i32) -> (i32, i32, i32) {
    %c0_i32 = arith.constant 0 : i32
    %c0_i32_0 = arith.constant 0 : i32
    %c0_i32_1 = arith.constant 0 : i32
    %c0_i32_2 = arith.constant 0 : i32
    return %c0_i32, %c0_i32_0, %c0_i32_1 : i32, i32, i32
  }
  func.func @transform_14(%arg0: i32) -> (i32, i32) {
    %c0_i32 = arith.constant 0 : i32
    %c0_i32_0 = arith.constant 0 : i32
    %c0_i32_1 = arith.constant 0 : i32
    return %c0_i32, %c0_i32_0 : i32, i32
  }
  func.func @transform_15(%arg0: i32) -> (i32, i32) {
    %c0_i32 = arith.constant 0 : i32
    %c0_i32_0 = arith.constant 0 : i32
    %c0_i32_1 = arith.constant 0 : i32
    return %c0_i32, %c0_i32_0 : i32, i32
  }
  func.func @transform_16(%arg0: i32) -> (i32, i32, i32) {
    %c0_i32 = arith.constant 0 : i32
    %c0_i32_0 = arith.constant 0 : i32
    %c0_i32_1 = arith.constant 0 : i32
    return %arg0, %c0_i32, %c0_i32_0 : i32, i32, i32
  }
}

</mosaic_0001>

<bundles_post_ra>
// kernel: decoder_vit_forward.1
= control target key start
LH: loop header
LB: loop body
LE: loop exit
PB: predicated region body
PF: predicated region fallthrough
CT: control target
= control target key end

     0   :  { %s11956_s0 = inlined_call_operand.vmem [shape: f32[2,64,128], index: 0, kind: input, shape index: {}]   ;;  %s11957_s1 = inlined_call_operand.vmem [shape: bf16[128,128], index: 1, kind: input, shape index: {}]   ;;  %s11958_s2 = inlined_call_operand.vmem [shape: f32[1,128], index: 2, kind: input, shape index: {}]   ;;  %s11959_s3 = inlined_call_operand.vmem [shape: f32[1,128], index: 3, kind: input, shape index: {}]   ;;  %s11960_s4 = inlined_call_operand.vmem [shape: f32[1,128], index: 4, kind: input, shape index: {}]   ;;  %s11961_s5 = inlined_call_operand.vmem [shape: f32[65,128], index: 5, kind: input, shape index: {}]   ;;  %s11962_s6 = inlined_call_operand.vmem [shape: bf16[2,128,384], index: 6, kind: input, shape index: {}]   ;;  %s11963_s7 = inlined_call_operand.vmem [shape: f32[2,1,384], index: 7, kind: input, shape index: {}]   ;;  %s11964_s8 = inlined_call_operand.vmem [shape: bf16[2,128,128], index: 8, kind: input, shape index: {}]   ;;  %s11965_s9 = inlined_call_operand.vmem [shape: f32[2,1,128], index: 9, kind: input, shape index: {}]   ;;  %s11966_s10 = inlined_call_operand.vmem [shape: bf16[2,128,256], index: 10, kind: input, shape index: {}]   ;;  %s11967_s11 = inlined_call_operand.vmem [shape: f32[2,1,256], index: 11, kind: input, shape index: {}]   ;;  %s11968_s12 = inlined_call_operand.vmem [shape: bf16[2,256,128], index: 12, kind: input, shape index: {}]   ;;  %s11969_s13 = inlined_call_operand.vmem [shape: f32[2,1,128], index: 13, kind: input, shape index: {}]   ;;  %s11970_s14 = inlined_call_operand.vmem [shape: f32[1,128], index: 14, kind: input, shape index: {}]   ;;  %s11971_s15 = inlined_call_operand.vmem [shape: f32[1,128], index: 15, kind: input, shape index: {}]   ;;  %s11972_s16 = inlined_call_operand.hbm [shape: f32[2,64,128], index: 16, kind: output, shape index: {}]  }
   0x1   :  { %11980 = sst [smem:[#allocation7_spill]] %s11956_s0 }
   0x2   :  { %11981 = sst [smem:[#allocation8_spill]] %s11957_s1 }
   0x3   :  { %11982 = sst [smem:[#allocation9_spill]] %s11958_s2 }
   0x4   :  { %11983 = sst [smem:[#allocation10_spill]] %s11959_s3 }
   0x5   :  { %21 = vsyncpa [#allocation3], 0 }
   0x6   :  { %23 = vsyncpa [#allocation3 + $0x1], 0  ;;  %s8439_s21 = smov 0   ;;  %s8441_s22 = smov 0  }
   0x7   :  { %s8443_s23 = smov 0   ;;  %s8445_s24 = smov 0  }
   0x8 LB: > { %11984 = sst [smem:[#allocation5_spill]] %s8342_s23  ;;  %s8460_s25 = sadd.s32 4294967295, %s8346_s24   ;;  %s8346_s24 = sphi %s8445_s24, %s12007_s24   ;;  %s8342_s23 = sphi %s8443_s23, %s12004_s23   ;;  %s8338_s22 = sphi %s8441_s22, %s12006_s22   ;;  %s8334_s21 = sphi %s8439_s21, %s12005_s21  }
   0x9   : > { %s6826_s26 = sadd.s32 4294967294, %s8346_s24   ;;  %s8464_s27 = sadd.s32 1, %s8346_s24  }
   0xa   : > { %s377_s28 = sadd.s32 1, %s8342_s23  ;;  %s374_s29 = ssub.s32 %s8346_s24, %s8464_s27 }
   0xb   : > { %p387_p0 = scmp.ne.s32.totalorder %s8342_s23, %s8338_s22  ;;  %p375_p1 = scmp.eq.s32.totalorder %s374_s29, 0 }
   0xc   : > { %p388_p2 = scmp.eq.s32.totalorder %s8460_s25, 1  ;;  %p393_p3 = scmp.ne.s32.totalorder %s8338_s22, %s8334_s21 }
   0xd   : > { %p394_p4 = scmp.eq.s32.totalorder %s6826_s26, 1  ;;  %p6829_p7 = scmp.ge.s32.totalorder %s8346_s24, 1 }
   0xe   : > { %s8475_s30 = scalar_select %p375_p1, %s8342_s23, %s377_s28  }
   0xf   : > { %p8477_p5 = por %p388_p2, %p387_p0  ;;  %p8481_p6 = por %p394_p4, %p393_p3 }
  0x10   : > { %11985 = sst [smem:[#allocation6_spill]] %s8475_s30  ;;  %p465_p8 = scmp.lt.s32.totalorder %s8346_s24, 3 }
  0x12   : > { %p466_p9 = pnand %p6829_p7, %p465_p8 }
  0x13   : > { %p515_p10 = scmp.lt.s32.totalorder (!%p466_p9), %s8460_s25, 1  ;;  %s11988_s28 = sld [smem:[#allocation7_spill]] (!%p466_p9) }
  0x14   : > { %469 = sbr.rel (%p466_p9) target bundleno = 6255 (0x186f), region = 84  ;;  %s11989_s1 = sld [smem:[#allocation8_spill]] (!%p466_p9) }
  0x15   : > { %s11994_s2 = sld [smem:[#allocation9_spill]] (!%p466_p9)  ;;  %s11976_s23 = smov (!%p466_p9), 64  }
  0x16   : > { %s11995_s3 = sld [smem:[#allocation10_spill]] (!%p466_p9)  ;;  %s11974_s30 = smov (!%p466_p9), 32  }
  0x19   : > { %s516_s18 = scalar_select %p515_p10, %s8460_s25, 1  ;;  %v529_v8 = vlaneseq }
  0x1a   : > { %v7586_v50 = vld [vmem:[%s11989_s1 + $0x38] sm:$0xff]  ;;  %v7585_v51 = vld [vmem:[%s11989_s1 + $0x30] sm:$0xff]  ;;  %v7584_v52 = vld [vmem:[%s11989_s1 + $0x28] sm:$0xff] }
  0x1b   : > { %s7578_s19 = sshll.u32 %s516_s18, 6  ;;  %v530_v9 = vand.u32 127, %v529_v8  ;;  %772 = vmatpush.bf16.msra.mxu0 %v7586_v50  ;;  %7716 = vmatpush.bf16.msra.mxu3 %v7586_v50  ;;  %v7583_v53 = vld [vmem:[%s11989_s1 + $0x20] sm:$0xff]  ;;  %v7582_v54 = vld [vmem:[%s11989_s1 + $0x18] sm:$0xff]  ;;  %v7581_v55 = vld [vmem:[%s11989_s1 + $0x10] sm:$0xff] }
  0x1c   : > { %s519_s29 = scalar_lea.vmem %s11988_s28, %s7578_s19  ;;  %v7580_v56 = vld [vmem:[%s11989_s1 + $0x8] sm:$0xff]  ;;  %v7579_v58 = vld [vmem:[%s11989_s1] sm:$0xff]  ;;  %s12000_s28 = smov 32  }
  0x1d   : > { %v525_v0 = vld [vmem:[%s519_s29 + $0x20] sm:$0xff]  ;;  %v523_v1 = vld [vmem:[%s519_s29 + $0x10] sm:$0xff]  ;;  %v526_v3 = vld [vmem:[%s519_s29 + $0x28] sm:$0xff]  ;;  %vm555_vm0 = vcmp.lt.s32.totalorder %v530_v9, 48 }
  0x1e   : > { %v521_v2 = vld [vmem:[%s519_s29] sm:$0xff]  ;;  %539 = vadd.xlane.f32.xlu2 %v525_v0  ;;  %535 = vadd.xlane.f32.xlu1 %v523_v1  ;;  %v524_v4 = vld [vmem:[%s519_s29 + $0x18] sm:$0xff]  ;;  %v522_v5 = vld [vmem:[%s519_s29 + $0x8] sm:$0xff] }
  0x1f   : > { %531 = vadd.xlane.f32.xlu0 %v521_v2  ;;  %v528_v6 = vld [vmem:[%s519_s29 + $0x38] sm:$0xff]  ;;  %v527_v7 = vld [vmem:[%s519_s29 + $0x30] sm:$0xff]  ;;  %773 = vmatpush.bf16.msra.mxu0 %v7585_v51  ;;  %s11978_s29 = smov 96  }
  0x20   : > { %7717 = vmatpush.bf16.msra.mxu3 %v7585_v51 }
  0x23   : > { %774 = vmatpush.bf16.msra.mxu0 %v7584_v52 }
  0x24   : > { %7718 = vmatpush.bf16.msra.mxu3 %v7584_v52 }
  0x26   : > { %541 = vadd.xlane.f32.xlu2 %v526_v3  ;;  %537 = vadd.xlane.f32.xlu1 %v524_v4 }
  0x27   : > { %533 = vadd.xlane.f32.xlu0 %v522_v5  ;;  %775 = vmatpush.bf16.msra.mxu0 %v7583_v53 }
  0x28   : > { %7719 = vmatpush.bf16.msra.mxu3 %v7583_v53 }
  0x2b   : > { %776 = vmatpush.bf16.msra.mxu0 %v7582_v54 }
  0x2c   : > { %7720 = vmatpush.bf16.msra.mxu3 %v7582_v54 }
  0x2e   : > { %545 = vadd.xlane.f32.xlu1 %v528_v6 }
  0x2f   : > { %543 = vadd.xlane.f32.xlu0 %v527_v7  ;;  %777 = vmatpush.bf16.msra.mxu0 %v7581_v55 }
  0x30   : > { %7721 = vmatpush.bf16.msra.mxu3 %v7581_v55 }
  0x33   : > { %778 = vmatpush.bf16.msra.mxu0 %v7580_v56 }
  0x34   : > { %7722 = vmatpush.bf16.msra.mxu3 %v7580_v56 }
  0x37   : > { %779 = vmatpush.bf16.msra.mxu0 %v7579_v58 }
  0x38   : > { %7723 = vmatpush.bf16.msra.mxu3 %v7579_v58 }
  0x91   : > { %v540_v10 = vpop.xlane.xlu2 %539  ;;  %v536_v11 = vpop.xlane.xlu1 %535 }
  0x92   : > { %v549_v12 = vmul.f32 0.020833334, %v536_v11  ;;  %v532_v13 = vpop.xlane.xlu0 %531  ;;  %v551_v26 = vmul.f32 0.020833334, %v540_v10 }
  0x93   : > { %v547_v14 = vmul.f32 0.020833334, %v532_v13 }
  0x94   : > { %v558_v15 = vsub.f32 %v523_v1, %v549_v12  ;;  %v560_v33 = vsub.f32 %v525_v0, %v551_v26 }
  0x95   : > { %v556_v16 = vsub.f32 %v521_v2, %v547_v14 }
  0x96   : > { %v8493_v17 = vsel %vm555_vm0, %v558_v15, 0.0  ;;  %v8518_v42 = vsel %vm555_vm0, %v560_v33, 0.0 }
  0x97   : > { %v574_v18 = vmul.f32 %v8493_v17, %v8493_v17  ;;  %v8498_v19 = vsel %vm555_vm0, %v556_v16, 0.0  ;;  %v576_v44 = vmul.f32 %v8518_v42, %v8518_v42 }
  0x98   : > { %v572_v20 = vmul.f32 %v8498_v19, %v8498_v19 }
  0x99   : > { %v542_v21 = vpop.xlane.xlu2 %541  ;;  %584 = vadd.xlane.f32.xlu1 %v574_v18  ;;  %v538_v22 = vpop.xlane.xlu1 %537 }
  0x9a   : > { %v552_v23 = vmul.f32 0.020833334, %v542_v21  ;;  %v550_v24 = vmul.f32 0.020833334, %v538_v22  ;;  %580 = vadd.xlane.f32.xlu2 %v572_v20  ;;  %v534_v25 = vpop.xlane.xlu0 %533 }
  0x9b   : > { %v548_v27 = vmul.f32 0.020833334, %v534_v25 }
  0x9c   : > { %v561_v28 = vsub.f32 %v526_v3, %v552_v23  ;;  %v559_v29 = vsub.f32 %v524_v4, %v550_v24 }
  0x9d   : > { %v557_v30 = vsub.f32 %v522_v5, %v548_v27 }
  0x9e   : > { %v8503_v31 = vsel %vm555_vm0, %v561_v28, 0.0  ;;  %v8506_v32 = vsel %vm555_vm0, %v559_v29, 0.0 }
  0x9f   : > { %v577_v34 = vmul.f32 %v8503_v31, %v8503_v31  ;;  %v575_v35 = vmul.f32 %v8506_v32, %v8506_v32  ;;  %v8513_v36 = vsel %vm555_vm0, %v557_v30, 0.0 }
  0xa0   : > { %v573_v37 = vmul.f32 %v8513_v36, %v8513_v36 }
  0xa1   : > { %590 = vadd.xlane.f32.xlu1 %v577_v34  ;;  %v546_v38 = vpop.xlane.xlu1 %545 }
  0xa2   : > { %586 = vadd.xlane.f32.xlu2 %v575_v35  ;;  %582 = vadd.xlane.f32.xlu0 %v573_v37  ;;  %v544_v39 = vpop.xlane.xlu0 %543  ;;  %v554_v41 = vmul.f32 0.020833334, %v546_v38 }
  0xa3   : > { %v553_v40 = vmul.f32 0.020833334, %v544_v39 }
  0xa4   : > { %v563_v45 = vsub.f32 %v528_v6, %v554_v41 }
  0xa5   : > { %v562_v43 = vsub.f32 %v527_v7, %v553_v40 }
  0xa6   : > { %v8528_v48 = vsel %vm555_vm0, %v563_v45, 0.0 }
  0xa7   : > { %v8523_v46 = vsel %vm555_vm0, %v562_v43, 0.0  ;;  %v579_v49 = vmul.f32 %v8528_v48, %v8528_v48 }
  0xa8   : > { %v578_v47 = vmul.f32 %v8523_v46, %v8523_v46 }
  0xaa   : > { %588 = vadd.xlane.f32.xlu0 %v576_v44  ;;  %592 = vadd.xlane.f32.xlu2 %v578_v47 }
  0xb2   : > { %594 = vadd.xlane.f32.xlu0 %v579_v49 }
 0x10c   : > { %v585_v57 = vpop.xlane.xlu1 %584 }
 0x10d   : > { %v581_v59 = vpop.xlane.xlu2 %580  ;;  %v598_v62 = vmul.f32 0.020833334, %v585_v57 }
 0x10e   : > { %v596_v60 = vmul.f32 0.020833334, %v581_v59 }
 0x10f   : > { %v8558_v7 = vadd.f32 1e-05, %v598_v62 }
 0x110   : > { %v604_v61 = vadd.f32 1e-05, %v596_v60 }
 0x111   : > { %vm638_vm15 = vweird.f32 %v8558_v7 }
 0x112   : > { %7786 = vrsqrt.f32 %v604_v61  ;;  %vm618_vm2 = vweird.f32 %v604_v61 }
 0x114   : > { %v591_v63 = vpop.xlane.xlu1 %590 }
 0x115   : > { %v601_v0 = vmul.f32 0.020833334, %v591_v63  ;;  %v587_v1 = vpop.xlane.xlu2 %586  ;;  %v583_v2 = vpop.xlane.xlu0 %582 }
 0x116   : > { %v599_v3 = vmul.f32 0.020833334, %v587_v1  ;;  %v597_v4 = vmul.f32 0.020833334, %v583_v2 }
 0x117   : > { %v8556_v5 = vadd.f32 1e-05, %v601_v0 }
 0x118   : > { %v7787_v6 = vpop.eup %7786  ;;  %v8560_v8 = vadd.f32 1e-05, %v599_v3  ;;  %v605_v9 = vadd.f32 1e-05, %v597_v4 }
 0x119   : > { %v613_v10 = vmul.f32 %v7787_v6, %v604_v61  ;;  %7788 = vrsqrt.f32 %v8556_v5  ;;  %vm619_vm1 = vweird.f32 %v7787_v6  ;;  %vm668_vm6 = vweird.f32 %v8556_v5 }
 0x11a   : > { %7790 = vrsqrt.f32 %v8560_v8  ;;  %vm8584_vm3 = vmor %vm618_vm2, %vm619_vm1  ;;  %vm628_vm5 = vweird.f32 %v605_v9  ;;  %vm648_vm12 = vweird.f32 %v8560_v8 }
 0x11b   : > { %v614_v11 = vmul.f32 %v7787_v6, %v613_v10  ;;  %7792 = vrsqrt.f32 %v605_v9 }
 0x11c   : > { %7794 = vrsqrt.f32 %v8558_v7 }
 0x11d   : > { %v615_v12 = vmul.f32 0.5, %v614_v11  ;;  %v593_v13 = vpop.xlane.xlu2 %592  ;;  %v589_v14 = vpop.xlane.xlu0 %588 }
 0x11e   : > { %v602_v15 = vmul.f32 0.020833334, %v593_v13  ;;  %v600_v16 = vmul.f32 0.020833334, %v589_v14 }
 0x11f   : > { %v8565_v18 = vpop.eup %7788  ;;  %v616_v24 = vsub.f32 1.5, %v615_v12 }
 0x120   : > { %v8567_v20 = vpop.eup %7790  ;;  %v663_v21 = vmul.f32 %v8565_v18, %v8556_v5  ;;  %v608_v22 = vadd.f32 1e-05, %v600_v16  ;;  %v8571_v25 = vadd.f32 1e-05, %v602_v15  ;;  %vm669_vm8 = vweird.f32 %v8565_v18 }
 0x121   : > { %v7793_v23 = vpop.eup %7792  ;;  %v643_v29 = vmul.f32 %v8567_v20, %v8560_v8  ;;  %v617_v35 = vmul.f32 %v7787_v6, %v616_v24  ;;  %vm8603_vm11 = vmor %vm668_vm6, %vm669_vm8  ;;  %vm649_vm14 = vweird.f32 %v8567_v20 }
 0x122   : > { %v8573_v26 = vpop.eup %7794  ;;  %v664_v27 = vmul.f32 %v8565_v18, %v663_v21  ;;  %v623_v28 = vmul.f32 %v7793_v23, %v605_v9  ;;  %7796 = vrsqrt.f32 %v608_v22  ;;  %vm629_vm4 = vweird.f32 %v7793_v23  ;;  %vm650_vm1 = vmor %vm648_vm12, %vm649_vm14 }
 0x123   : > { %v633_v33 = vmul.f32 %v8573_v26, %v8558_v7  ;;  %7798 = vrsqrt.f32 %v8571_v25  ;;  %v644_v40 = vmul.f32 %v8567_v20, %v643_v29  ;;  %v621_v49 = vsel %vm8584_vm3, %v7787_v6, %v617_v35  ;;  %vm630_vm7 = vmor %vm628_vm5, %vm629_vm4 }
 0x124   : > { %v624_v30 = vmul.f32 %v7793_v23, %v623_v28  ;;  %v665_v37 = vmul.f32 0.5, %v664_v27  ;;  %vm658_vm9 = vweird.f32 %v608_v22  ;;  %v692_v58 = vmul.f32 %v621_v49, %v8498_v19 }
 0x125   : > { %v595_v34 = vpop.xlane.xlu0 %594  ;;  %v634_v47 = vmul.f32 %v8573_v26, %v633_v33  ;;  %v645_v54 = vmul.f32 0.5, %v644_v40  ;;  %vm639_vm0 = vweird.f32 %v8573_v26  ;;  %vm678_vm5 = vweird.f32 %v8571_v25 }
 0x126   : > { %v625_v38 = vmul.f32 0.5, %v624_v30  ;;  %v603_v39 = vmul.f32 0.020833334, %v595_v34  ;;  %v666_v50 = vsub.f32 1.5, %v665_v37  ;;  %vm640_vm2 = vmor %vm638_vm15, %vm639_vm0 }
 0x127   : > { %v635_v57 = vmul.f32 0.5, %v634_v47  ;;  %v646_v2 = vsub.f32 1.5, %v645_v54 }
 0x128   : > { %v626_v41 = vsub.f32 1.5, %v625_v38  ;;  %v8582_v43 = vadd.f32 1e-05, %v603_v39  ;;  %v7797_v45 = vpop.eup %7796  ;;  %v667_v62 = vmul.f32 %v8565_v18, %v666_v50 }
 0x129   : > { %v653_v51 = vmul.f32 %v7797_v45, %v608_v22  ;;  %v8592_v53 = vpop.eup %7798  ;;  %vm659_vm10 = vweird.f32 %v7797_v45  ;;  %v636_v19 = vsub.f32 1.5, %v635_v57  ;;  %v647_v11 = vmul.f32 %v8567_v20, %v646_v2 }
 0x12a   : > { %7800 = vrsqrt.f32 %v8582_v43  ;;  %v627_v52 = vmul.f32 %v7793_v23, %v626_v41  ;;  %v673_v60 = vmul.f32 %v8592_v53, %v8571_v25  ;;  %vm660_vm13 = vmor %vm658_vm9, %vm659_vm10  ;;  %v671_v5 = vsel %vm8603_vm11, %v8565_v18, %v667_v62  ;;  %v7777_v25 = vld [vmem:[%s11994_s2] ss:$0 sm:$0xff]  ;;  %s11998_s2 = smov 96  }
 0x12b   : > { %v654_v55 = vmul.f32 %v7797_v45, %v653_v51  ;;  %v697_v14 = vmul.f32 %v671_v5, %v8503_v31  ;;  %v637_v16 = vmul.f32 %v8573_v26, %v636_v19  ;;  %v651_v7 = vsel %vm650_vm1, %v8567_v20, %v647_v11 }
 0x12c   : > { %v631_v56 = vsel %vm630_vm7, %v7793_v23, %v627_v52  ;;  %v674_v4 = vmul.f32 %v8592_v53, %v673_v60  ;;  %vm688_vm3 = vweird.f32 %v8582_v43  ;;  %v695_v31 = vmul.f32 %v651_v7, %v8506_v32 }
 0x12d   : > { %v693_v59 = vmul.f32 %v631_v56, %v8513_v36  ;;  %v655_v61 = vmul.f32 0.5, %v654_v55  ;;  %v641_v23 = vsel %vm640_vm2, %v8573_v26, %v637_v16  ;;  %vm679_vm6 = vweird.f32 %v8592_v53 }
 0x12e   : > { %v675_v15 = vmul.f32 0.5, %v674_v4  ;;  %v694_v8 = vmul.f32 %v641_v23, %v8493_v17  ;;  %vm680_vm8 = vmor %vm678_vm5, %vm679_vm6 }
 0x12f   : > { %v716_v63 = vpack.c.bf16 %v693_v59, %v692_v58  ;;  %v656_v3 = vsub.f32 1.5, %v655_v61 }
 0x130   : > { %v7801_v1 = vpop.eup %7800  ;;  %v676_v22 = vsub.f32 1.5, %v675_v15  ;;  %v717_v20 = vpack.c.bf16 %v695_v31, %v694_v8 }
 0x131   : > { %v683_v36 = vmul.f32 %v7801_v1, %v8582_v43  ;;  %780 = vmatmul.bf16.vlgmr.msra.gmra.mxu0 %v716_v63  ;;  %v657_v6 = vmul.f32 %v7797_v45, %v656_v3  ;;  %vm689_vm4 = vweird.f32 %v7801_v1 }
 0x132   : > { %vm690_vm7 = vmor %vm688_vm3, %vm689_vm4  ;;  %v677_v24 = vmul.f32 %v8592_v53, %v676_v22 }
 0x133   : > { %v684_v9 = vmul.f32 %v7801_v1, %v683_v36  ;;  %v661_v10 = vsel %vm660_vm13, %v7797_v45, %v657_v6  ;;  %v8348_v45 = vmov 128.0  }
 0x134   : > { %v696_v13 = vmul.f32 %v661_v10, %v8518_v42  ;;  %v681_v28 = vsel %vm680_vm8, %v8592_v53, %v677_v24  ;;  %7802 = vrcp.f32 %v8348_v45 }
 0x135   : > { %v685_v12 = vmul.f32 0.5, %v684_v9  ;;  %v698_v32 = vmul.f32 %v681_v28, %v8523_v46 }
 0x136   : > { %v718_v18 = vpack.c.bf16 %v697_v14, %v696_v13 }
 0x137   : > { %v686_v21 = vsub.f32 1.5, %v685_v12 }
 0x138   : > { %790 = vmatmul.bf16.vlgmr.msra.gmra.mxu3 %v718_v18 }
 0x139   : > { %v687_v42 = vmul.f32 %v7801_v1, %v686_v21 }
 0x13a   : > { %v7803_v47 = vpop.eup %7802 }
 0x13b   : > { %v691_v27 = vsel %vm690_vm7, %v7801_v1, %v687_v42  ;;  %v820_v49 = vmul.f32 128.0, %v7803_v47  ;;  %vm824_vm9 = vweird.f32 %v7803_v47 }
 0x13c   : > { %v699_v26 = vmul.f32 %v691_v27, %v8528_v48 }
 0x13d   : > { %v821_v50 = vsub.f32 1.0, %v820_v49 }
 0x13e   : > { %v719_v29 = vpack.c.bf16 %v699_v26, %v698_v32 }
 0x13f   : > { %v822_v51 = vmul.f32 %v7803_v47, %v821_v50 }
 0x141   : > { %785 = vmatmul.bf16.gmra.mxu0 %v717_v20  ;;  %v823_v52 = vadd.f32 %v7803_v47, %v822_v51 }
 0x143   : > { %v8637_v53 = vsel %vm824_vm9, %v7803_v47, %v823_v52  ;;  %v8695_v47 = vld [vmem:[%s11960_s4] ss:$0 sm:$0xff] }
 0x148   : > { %795 = vmatmul.bf16.gmra.mxu3 %v719_v29 }
 0x1ae   : > { %v781_v17 = vpop.f32.mrf.mxu0 }
 0x1af   : > { %v782_v30 = vadd.f32 %v7777_v25, %v781_v17 }
 0x1b1   : > { %803 = vadd.xlane.f32.xlu1 %v782_v30 }
 0x1b6   : > { %v783_v33 = vpop.f32.mrf.mxu0 }
 0x1b7   : > { %v784_v34 = vadd.f32 %v7777_v25, %v783_v33 }
 0x1b9   : > { %805 = vadd.xlane.f32.xlu2 %v784_v34 }
 0x1bb   : > { %v791_v35 = vpop.f32.mrf.mxu3 }
 0x1bc   : > { %v792_v38 = vadd.f32 %v7777_v25, %v791_v35 }
 0x1be   : > { %v786_v37 = vpop.f32.mrf.mxu0 }
 0x1bf   : > { %v787_v39 = vadd.f32 %v7777_v25, %v786_v37 }
 0x1c1   : > { %807 = vadd.xlane.f32.xlu0 %v787_v39  ;;  %811 = vadd.xlane.f32.xlu2 %v792_v38 }
 0x1c3   : > { %v793_v48 = vpop.f32.mrf.mxu3 }
 0x1c4   : > { %v794_v41 = vadd.f32 %v7777_v25, %v793_v48 }
 0x1c6   : > { %v788_v46 = vpop.f32.mrf.mxu0 }
 0x1c7   : > { %v789_v40 = vadd.f32 %v7777_v25, %v788_v46 }
 0x1c9   : > { %809 = vadd.xlane.f32.xlu1 %v789_v40  ;;  %813 = vadd.xlane.f32.xlu0 %v794_v41 }
 0x1cb   : > { %v796_v43 = vpop.f32.mrf.mxu3 }
 0x1cc   : > { %v797_v44 = vadd.f32 %v7777_v25, %v796_v43 }
 0x1d1   : > { %815 = vadd.xlane.f32.xlu0 %v797_v44 }
 0x1d3   : > { %v798_v60 = vpop.f32.mrf.mxu3 }
 0x1d4   : > { %v799_v63 = vadd.f32 %v7777_v25, %v798_v60 }
 0x224   : > { %v804_v54 = vpop.xlane.xlu1 %803 }
 0x225   : > { %v826_v55 = vmul.f32 %v8637_v53, %v804_v54 }
 0x227   : > { %v8640_v56 = vsub.f32 %v782_v30, %v826_v55 }
 0x229   : > { %v842_v57 = vmul.f32 %v8640_v56, %v8640_v56 }
 0x22b   : > { %850 = vadd.xlane.f32.xlu1 %v842_v57 }
 0x22c   : > { %v806_v58 = vpop.xlane.xlu2 %805 }
 0x22d   : > { %v827_v59 = vmul.f32 %v8637_v53, %v806_v58 }
 0x22f   : > { %v8645_v61 = vsub.f32 %v784_v34, %v827_v59 }
 0x231   : > { %v843_v62 = vmul.f32 %v8645_v61, %v8645_v61 }
 0x233   : > { %852 = vadd.xlane.f32.xlu2 %v843_v62  ;;  %817 = vadd.xlane.f32.xlu1 %v799_v63 }
 0x234   : > { %v812_v0 = vpop.xlane.xlu2 %811  ;;  %v808_v1 = vpop.xlane.xlu0 %807 }
 0x235   : > { %v830_v2 = vmul.f32 %v8637_v53, %v812_v0  ;;  %v828_v3 = vmul.f32 %v8637_v53, %v808_v1  ;;  %v992_v1 = vld [vmem:[%s11961_s5] sm:$0xff] }
 0x237   : > { %v8651_v19 = vsub.f32 %v792_v38, %v830_v2  ;;  %v8653_v36 = vsub.f32 %v787_v39, %v828_v3 }
 0x239   : > { %v846_v4 = vmul.f32 %v8651_v19, %v8651_v19  ;;  %v844_v6 = vmul.f32 %v8653_v36, %v8653_v36 }
 0x23b   : > { %858 = vadd.xlane.f32.xlu1 %v846_v4  ;;  %854 = vadd.xlane.f32.xlu2 %v844_v6 }
 0x23c   : > { %v810_v5 = vpop.xlane.xlu1 %809  ;;  %v814_v9 = vpop.xlane.xlu0 %813 }
 0x23d   : > { %v829_v10 = vmul.f32 %v8637_v53, %v810_v5  ;;  %v831_v11 = vmul.f32 %v8637_v53, %v814_v9 }
 0x23f   : > { %v8661_v12 = vsub.f32 %v789_v40, %v829_v10  ;;  %v8663_v13 = vsub.f32 %v794_v41, %v831_v11  ;;  %v8688_v41 = vld [vmem:[%s11995_s3] ss:$0 sm:$0xff]  ;;  %s11999_s3 = smov 64  }
 0x241   : > { %v845_v14 = vmul.f32 %v8661_v12, %v8661_v12  ;;  %v847_v15 = vmul.f32 %v8663_v13, %v8663_v13 }
 0x243   : > { %856 = vadd.xlane.f32.xlu0 %v845_v14  ;;  %860 = vadd.xlane.f32.xlu2 %v847_v15 }
 0x244   : > { %v816_v16 = vpop.xlane.xlu0 %815 }
 0x245   : > { %v832_v18 = vmul.f32 %v8637_v53, %v816_v16 }
 0x247   : > { %v8670_v21 = vsub.f32 %v797_v44, %v832_v18 }
 0x249   : > { %v848_v7 = vmul.f32 %v8670_v21, %v8670_v21 }
 0x24b   : > { %862 = vadd.xlane.f32.xlu0 %v848_v7 }
 0x29e   : > { %v851_v22 = vpop.xlane.xlu1 %850 }
 0x29f   : > { %v866_v23 = vmul.f32 %v851_v22, %v8637_v53 }
 0x2a1   : > { %v874_v31 = vadd.f32 1e-05, %v866_v23 }
 0x2a3   : > { %7804 = vrsqrt.f32 %v874_v31  ;;  %vm888_vm11 = vweird.f32 %v874_v31 }
 0x2a6   : > { %v853_v42 = vpop.xlane.xlu2 %852  ;;  %v818_v8 = vpop.xlane.xlu1 %817 }
 0x2a7   : > { %v867_v24 = vmul.f32 %v853_v42, %v8637_v53  ;;  %v833_v20 = vmul.f32 %v8637_v53, %v818_v8 }
 0x2a9   : > { %v7805_v27 = vpop.eup %7804  ;;  %v875_v28 = vadd.f32 1e-05, %v867_v24  ;;  %v8677_v26 = vsub.f32 %v799_v63, %v833_v20 }
 0x2aa   : > { %v883_v32 = vmul.f32 %v7805_v27, %v874_v31  ;;  %vm889_vm10 = vweird.f32 %v7805_v27 }
 0x2ab   : > { %7806 = vrsqrt.f32 %v875_v28  ;;  %v849_v29 = vmul.f32 %v8677_v26, %v8677_v26  ;;  %vm890_vm12 = vmor %vm888_vm11, %vm889_vm10  ;;  %vm898_vm14 = vweird.f32 %v875_v28 }
 0x2ac   : > { %v884_v25 = vmul.f32 %v7805_v27, %v883_v32 }
 0x2ad   : > { %864 = vadd.xlane.f32.xlu1 %v849_v29 }
 0x2ae   : > { %v885_v17 = vmul.f32 0.5, %v884_v25  ;;  %v859_v30 = vpop.xlane.xlu1 %858  ;;  %v855_v33 = vpop.xlane.xlu2 %854 }
 0x2af   : > { %v870_v34 = vmul.f32 %v859_v30, %v8637_v53  ;;  %v868_v35 = vmul.f32 %v855_v33, %v8637_v53 }
 0x2b0   : > { %v886_v37 = vsub.f32 1.5, %v885_v17 }
 0x2b1   : > { %v7807_v38 = vpop.eup %7806  ;;  %v878_v39 = vadd.f32 1e-05, %v870_v34  ;;  %v8683_v48 = vadd.f32 1e-05, %v868_v35 }
 0x2b2   : > { %v887_v46 = vmul.f32 %v7805_v27, %v886_v37  ;;  %v893_v40 = vmul.f32 %v7807_v38, %v875_v28  ;;  %vm899_vm13 = vweird.f32 %v7807_v38 }
 0x2b3   : > { %7808 = vrsqrt.f32 %v878_v39  ;;  %vm900_vm15 = vmor %vm898_vm14, %vm899_vm13  ;;  %vm928_vm2 = vweird.f32 %v878_v39  ;;  %vm908_vm4 = vweird.f32 %v8683_v48 }
 0x2b4   : > { %v891_v43 = vsel %vm890_vm12, %v7805_v27, %v887_v46  ;;  %v894_v44 = vmul.f32 %v7807_v38, %v893_v40  ;;  %7810 = vrsqrt.f32 %v8683_v48 }
 0x2b5   : > { %v962_v45 = vmul.f32 %v891_v43, %v8640_v56 }
 0x2b6   : > { %v895_v49 = vmul.f32 0.5, %v894_v44  ;;  %v861_v50 = vpop.xlane.xlu2 %860  ;;  %v857_v51 = vpop.xlane.xlu0 %856 }
 0x2b7   : > { %v871_v52 = vmul.f32 %v861_v50, %v8637_v53  ;;  %v869_v54 = vmul.f32 %v857_v51, %v8637_v53  ;;  %v973_v55 = vmul.f32 %v8688_v41, %v962_v45 }
 0x2b8   : > { %v896_v57 = vsub.f32 1.5, %v895_v49 }
 0x2b9   : > { %v7809_v58 = vpop.eup %7808  ;;  %v8700_v59 = vadd.f32 1e-05, %v871_v52  ;;  %v8702_v56 = vadd.f32 1e-05, %v869_v54  ;;  %v984_v60 = vadd.f32 %v8695_v47, %v973_v55 }
 0x2ba   : > { %v7811_v62 = vpop.eup %7810  ;;  %v897_v63 = vmul.f32 %v7807_v38, %v896_v57  ;;  %v923_v0 = vmul.f32 %v7809_v58, %v878_v39  ;;  %vm929_vm0 = vweird.f32 %v7809_v58 }
 0x2bb   : > { %v903_v2 = vmul.f32 %v7811_v62, %v8683_v48  ;;  %7812 = vrsqrt.f32 %v8700_v59  ;;  %v8711_v5 = vadd.f32 %v992_v1, %v984_v60  ;;  %vm909_vm1 = vweird.f32 %v7811_v62  ;;  %vm930_vm3 = vmor %vm928_vm2, %vm929_vm0  ;;  %v996_v48 = vld [vmem:[%s11961_s5 + $0x20] sm:$0xff] }
 0x2bc   : > { %v901_v3 = vsel %vm900_vm15, %v7807_v38, %v897_v63  ;;  %v924_v4 = vmul.f32 %v7809_v58, %v923_v0  ;;  %7814 = vrsqrt.f32 %v8702_v56  ;;  %vm910_vm5 = vmor %vm908_vm4, %vm909_vm1  ;;  %vm938_vm8 = vweird.f32 %v8700_v59 }
 0x2bd   : > { %v904_v6 = vmul.f32 %v7811_v62, %v903_v2  ;;  %v963_v9 = vmul.f32 %v901_v3, %v8645_v61  ;;  %1008 = vadd.xlane.f32.xlu2 %v8711_v5  ;;  %v993_v61 = vld [vmem:[%s11961_s5 + $0x8] sm:$0xff]  ;;  %vm918_vm10 = vweird.f32 %v8702_v56 }
 0x2be   : > { %v925_v10 = vmul.f32 0.5, %v924_v4  ;;  %v863_v11 = vpop.xlane.xlu0 %862 }
 0x2bf   : > { %v905_v14 = vmul.f32 0.5, %v904_v6  ;;  %v872_v15 = vmul.f32 %v863_v11, %v8637_v53  ;;  %v974_v16 = vmul.f32 %v8688_v41, %v963_v9 }
 0x2c0   : > { %v926_v18 = vsub.f32 1.5, %v925_v10  ;;  %v998_v10 = vld [vmem:[%s11961_s5 + $0x30] sm:$0xff] }
 0x2c1   : > { %v7813_v7 = vpop.eup %7812  ;;  %v906_v22 = vsub.f32 1.5, %v905_v14  ;;  %v880_v23 = vadd.f32 1e-05, %v872_v15  ;;  %v985_v31 = vadd.f32 %v8695_v47, %v974_v16 }
 0x2c2   : > { %v7815_v42 = vpop.eup %7814  ;;  %v927_v8 = vmul.f32 %v7809_v58, %v926_v18  ;;  %v933_v24 = vmul.f32 %v7813_v7, %v8700_v59  ;;  %vm939_vm6 = vweird.f32 %v7813_v7 }
 0x2c3   : > { %v907_v20 = vmul.f32 %v7811_v62, %v906_v22  ;;  %v913_v27 = vmul.f32 %v7815_v42, %v8702_v56  ;;  %7816 = vrsqrt.f32 %v880_v23  ;;  %v8724_v29 = vadd.f32 %v993_v61, %v985_v31  ;;  %vm940_vm9 = vmor %vm938_vm8, %vm939_vm6 }
 0x2c4   : > { %v931_v28 = vsel %vm930_vm3, %v7809_v58, %v927_v8  ;;  %v934_v32 = vmul.f32 %v7813_v7, %v933_v24  ;;  %vm919_vm7 = vweird.f32 %v7815_v42  ;;  %vm948_vm13 = vweird.f32 %v880_v23 }
 0x2c5   : > { %v911_v25 = vsel %vm910_vm5, %v7811_v62, %v907_v20  ;;  %v914_v17 = vmul.f32 %v7815_v42, %v913_v27  ;;  %v966_v30 = vmul.f32 %v931_v28, %v8651_v19  ;;  %1010 = vadd.xlane.f32.xlu0 %v8724_v29  ;;  %v994_v19 = vld [vmem:[%s11961_s5 + $0x10] sm:$0xff]  ;;  %vm920_vm11 = vmor %vm918_vm10, %vm919_vm7  ;;  %v997_v62 = vld [vmem:[%s11961_s5 + $0x28] sm:$0xff] }
 0x2c6   : > { %v935_v33 = vmul.f32 0.5, %v934_v32  ;;  %v964_v34 = vmul.f32 %v911_v25, %v8653_v36 }
 0x2c7   : > { %v915_v35 = vmul.f32 0.5, %v914_v17  ;;  %v977_v37 = vmul.f32 %v8688_v41, %v966_v30  ;;  %v999_v30 = vld [vmem:[%s11961_s5 + $0x38] sm:$0xff] }
 0x2c8   : > { %v936_v38 = vsub.f32 1.5, %v935_v33  ;;  %v975_v39 = vmul.f32 %v8688_v41, %v964_v34 }
 0x2c9   : > { %v7817_v46 = vpop.eup %7816  ;;  %v916_v40 = vsub.f32 1.5, %v915_v35  ;;  %v988_v36 = vadd.f32 %v8695_v47, %v977_v37 }
 0x2ca   : > { %v937_v43 = vmul.f32 %v7813_v7, %v936_v38  ;;  %v943_v44 = vmul.f32 %v7817_v46, %v880_v23  ;;  %v986_v45 = vadd.f32 %v8695_v47, %v975_v39  ;;  %vm949_vm12 = vweird.f32 %v7817_v46 }
 0x2cb   : > { %v917_v49 = vmul.f32 %v7815_v42, %v916_v40  ;;  %v8741_v50 = vadd.f32 %v996_v48, %v988_v36  ;;  %vm950_vm14 = vmor %vm948_vm13, %vm949_vm12 }
 0x2cc   : > { %v941_v51 = vsel %vm940_vm9, %v7813_v7, %v937_v43  ;;  %v944_v52 = vmul.f32 %v7817_v46, %v943_v44  ;;  %v8743_v54 = vadd.f32 %v994_v19, %v986_v45 }
 0x2cd   : > { %v921_v55 = vsel %vm920_vm11, %v7815_v42, %v917_v49  ;;  %v967_v57 = vmul.f32 %v941_v51, %v8663_v13  ;;  %1016 = vadd.xlane.f32.xlu0 %v8741_v50  ;;  %v995_v13 = vld [vmem:[%s11961_s5 + $0x18] sm:$0xff] }
 0x2ce   : > { %v945_v58 = vmul.f32 0.5, %v944_v52  ;;  %1012 = vadd.xlane.f32.xlu1 %v8743_v54  ;;  %v965_v59 = vmul.f32 %v921_v55, %v8661_v12 }
 0x2cf   : > { %v978_v60 = vmul.f32 %v8688_v41, %v967_v57 }
 0x2d0   : > { %v946_v56 = vsub.f32 1.5, %v945_v58  ;;  %v976_v63 = vmul.f32 %v8688_v41, %v965_v59 }
 0x2d1   : > { %v989_v0 = vadd.f32 %v8695_v47, %v978_v60  ;;  %v6951_v60 = vld [vmem:[%s11962_s6 + $0xa8] sm:$0xf] }
 0x2d2   : > { %v947_v1 = vmul.f32 %v7817_v46, %v946_v56  ;;  %v987_v12 = vadd.f32 %v8695_v47, %v976_v63  ;;  %v7609_v56 = vld [vmem:[%s11962_s6 + $0xb0] sm:$0xf0] }
 0x2d3   : > { %v8759_v2 = vadd.f32 %v997_v62, %v989_v0  ;;  %v7608_v62 = vld [vmem:[%s11962_s6 + $0xac] sm:$0xf]  ;;  %v6952_v63 = vor.u32 %v7609_v56, %v6951_v60  ;;  %v6953_v0 = vld [vmem:[%s11962_s6 + $0xb4] sm:$0xf0]  ;;  %v6893_v56 = vld [vmem:[%s11962_s6 + $0x3c] sm:$0xf0] }
 0x2d4   : > { %v951_v3 = vsel %vm950_vm14, %v7817_v46, %v947_v1  ;;  %v8761_v4 = vadd.f32 %v995_v13, %v987_v12  ;;  %v6959_v13 = vld [vmem:[%s11962_s6 + $0xb0] sm:$0xf]  ;;  %v7610_v1 = vld [vmem:[%s11962_s6 + $0xb8] sm:$0xf0]  ;;  %v6956_v12 = vor.u32 %v7608_v62, %v6953_v0  ;;  %v6899_v62 = vld [vmem:[%s11962_s6 + $0x38] sm:$0xf] }
 0x2d5   : > { %v968_v6 = vmul.f32 %v951_v3, %v8670_v21  ;;  %v6960_v3 = vor.u32 %v7610_v1, %v6959_v13  ;;  %1340 = vmatpush.bf16.msra.mxu1 %v6952_v63  ;;  %v7595_v63 = vld [vmem:[%s11962_s6 + $0x40] sm:$0xf0]  ;;  %v6879_v1 = vld [vmem:[%s11962_s6 + $0x18] sm:$0xf] }
 0x2d6   : > { %1018 = vadd.xlane.f32.xlu1 %v8759_v2  ;;  %1014 = vadd.xlane.f32.xlu2 %v8761_v4  ;;  %v6900_v13 = vor.u32 %v7595_v63, %v6899_v62 }
 0x2d7   : > { %v979_v9 = vmul.f32 %v8688_v41, %v968_v6  ;;  %1369 = vmatpush.bf16.msra.mxu2 %v6956_v12  ;;  %1398 = vmatpush.bf16.msrb.mxu3 %v6960_v3  ;;  %v6939_v6 = vld [vmem:[%s11962_s6 + $0x90] sm:$0xf]  ;;  %v7591_v12 = vld [vmem:[%s11962_s6 + $0x20] sm:$0xf0]  ;;  %v7590_v3 = vld [vmem:[%s11962_s6 + $0x1c] sm:$0xf] }
 0x2d9   : > { %v990_v11 = vadd.f32 %v8695_v47, %v979_v9  ;;  %v7606_v9 = vld [vmem:[%s11962_s6 + $0x98] sm:$0xf0] }
 0x2db   : > { %v8771_v14 = vadd.f32 %v998_v10, %v990_v11  ;;  %v7605_v10 = vld [vmem:[%s11962_s6 + $0x94] sm:$0xf]  ;;  %v6940_v11 = vor.u32 %v7606_v9, %v6939_v6  ;;  %v6880_v6 = vor.u32 %v7591_v12, %v6879_v1  ;;  %v6881_v9 = vld [vmem:[%s11962_s6 + $0x24] sm:$0xf0] }
 0x2dd   : > { %1341 = vmatpush.bf16.msra.mxu1 %v6940_v11  ;;  %v7592_v11 = vld [vmem:[%s11962_s6 + $0x28] sm:$0xf0] }
 0x2de   : > { %1020 = vadd.xlane.f32.xlu1 %v8771_v14 }
 0x320   : > { %v865_v15 = vpop.xlane.xlu1 %864 }
 0x321   : > { %v873_v16 = vmul.f32 %v865_v15, %v8637_v53  ;;  %v6941_v15 = vld [vmem:[%s11962_s6 + $0x9c] sm:$0xf0] }
 0x323   : > { %v881_v21 = vadd.f32 1e-05, %v873_v16  ;;  %v6947_v16 = vld [vmem:[%s11962_s6 + $0x98] sm:$0xf] }
 0x325   : > { %7818 = vrsqrt.f32 %v881_v21  ;;  %vm958_vm0 = vweird.f32 %v881_v21 }
 0x32b   : > { %v7819_v18 = vpop.eup %7818 }
 0x32c   : > { %v953_v7 = vmul.f32 %v7819_v18, %v881_v21  ;;  %vm959_vm15 = vweird.f32 %v7819_v18  ;;  %v7607_v21 = vld [vmem:[%s11962_s6 + $0xa0] sm:$0xf0] }
 0x32d   : > { %vm960_vm1 = vmor %vm958_vm0, %vm959_vm15 }
 0x32e   : > { %v954_v22 = vmul.f32 %v7819_v18, %v953_v7  ;;  %v6948_v7 = vor.u32 %v7607_v21, %v6947_v16  ;;  %v6867_v21 = vld [vmem:[%s11962_s6] sm:$0xf] }
 0x330   : > { %v955_v23 = vmul.f32 0.5, %v954_v22  ;;  %v1009_v61 = vpop.xlane.xlu2 %1008  ;;  %1399 = vmatpush.bf16.msrb.mxu3 %v6948_v7  ;;  %v6927_v22 = vld [vmem:[%s11962_s6 + $0x78] sm:$0xf]  ;;  %v7587_v7 = vld [vmem:[%s11962_s6 + $0x4] sm:$0xf] }
 0x331   : > { %v1024_v42 = vmul.f32 %v1009_v61, %v8637_v53 }
 0x332   : > { %v956_v31 = vsub.f32 1.5, %v955_v23  ;;  %v7603_v23 = vld [vmem:[%s11962_s6 + $0x80] sm:$0xf0] }
 0x333   : > { %v8777_v24 = vsub.f32 %v8711_v5, %v1024_v42  ;;  %v6928_v61 = vor.u32 %v7603_v23, %v6927_v22  ;;  %v6929_v42 = vld [vmem:[%s11962_s6 + $0x84] sm:$0xf0]  ;;  %v6869_v23 = vld [vmem:[%s11962_s6 + $0xc] sm:$0xf0] }
 0x334   : > { %v957_v8 = vmul.f32 %v7819_v18, %v956_v31  ;;  %v7602_v31 = vld [vmem:[%s11962_s6 + $0x7c] sm:$0xf] }
 0x335   : > { %v1040_v27 = vmul.f32 %v8777_v24, %v8777_v24  ;;  %1342 = vmatpush.bf16.msra.mxu1 %v6928_v61  ;;  %v7589_v61 = vld [vmem:[%s11962_s6 + $0x10] sm:$0xf0] }
 0x336   : > { %v961_v20 = vsel %vm960_vm1, %v7819_v18, %v957_v8  ;;  %v6944_v18 = vor.u32 %v7605_v10, %v6941_v15  ;;  %v6935_v8 = vld [vmem:[%s11962_s6 + $0x80] sm:$0xf]  ;;  %v6884_v15 = vor.u32 %v7590_v3, %v6881_v9 }
 0x337   : > { %v969_v28 = vmul.f32 %v961_v20, %v8677_v26  ;;  %1048 = vadd.xlane.f32.xlu2 %v1040_v27  ;;  %v7604_v20 = vld [vmem:[%s11962_s6 + $0x88] sm:$0xf0]  ;;  %v6932_v27 = vor.u32 %v7602_v31, %v6929_v42  ;;  %v6887_v10 = vld [vmem:[%s11962_s6 + $0x20] sm:$0xf]  ;;  %v6875_v31 = vld [vmem:[%s11962_s6 + $0x8] sm:$0xf]  ;;  %v6872_v42 = vor.u32 %v7587_v7, %v6869_v23 }
 0x338   : > { %v1011_v32 = vpop.xlane.xlu0 %1010  ;;  %1370 = vmatpush.bf16.msra.mxu2 %v6944_v18  ;;  %v6888_v16 = vor.u32 %v7592_v11, %v6887_v10  ;;  %v7588_v18 = vld [vmem:[%s11962_s6 + $0x8] sm:$0xf0] }
 0x339   : > { %v980_v25 = vmul.f32 %v8688_v41, %v969_v28  ;;  %v1025_v17 = vmul.f32 %v1011_v32, %v8637_v53  ;;  %v6936_v28 = vor.u32 %v7604_v20, %v6935_v8  ;;  %v6915_v32 = vld [vmem:[%s11962_s6 + $0x60] sm:$0xf]  ;;  %v6868_v22 = vor.u32 %v7588_v18, %v6867_v21 }
 0x33a   : > { %v6876_v8 = vor.u32 %v7589_v61, %v6875_v31 }
 0x33b   : > { %v991_v33 = vadd.f32 %v8695_v47, %v980_v25  ;;  %v8789_v34 = vsub.f32 %v8724_v29, %v1025_v17  ;;  %1400 = vmatpush.bf16.msrb.mxu3 %v6936_v28  ;;  %v7600_v25 = vld [vmem:[%s11962_s6 + $0x68] sm:$0xf0]  ;;  %v7599_v17 = vld [vmem:[%s11962_s6 + $0x64] sm:$0xf] }
 0x33c   : > { %1371 = vmatpush.bf16.msra.mxu2 %v6932_v27 }
 0x33d   : > { %v8791_v35 = vadd.f32 %v999_v30, %v991_v33  ;;  %v1041_v26 = vmul.f32 %v8789_v34, %v8789_v34  ;;  %v6916_v30 = vor.u32 %v7600_v25, %v6915_v32  ;;  %v6917_v33 = vld [vmem:[%s11962_s6 + $0x6c] sm:$0xf0] }
 0x33f   : > { %1050 = vadd.xlane.f32.xlu0 %v1041_v26  ;;  %1022 = vadd.xlane.f32.xlu2 %v8791_v35  ;;  %v6923_v26 = vld [vmem:[%s11962_s6 + $0x68] sm:$0xf] }
 0x340   : > { %v1017_v37 = vpop.xlane.xlu0 %1016  ;;  %1343 = vmatpush.bf16.msra.mxu1 %v6916_v30 }
 0x341   : > { %v1013_v41 = vpop.xlane.xlu1 %1012  ;;  %v1028_v39 = vmul.f32 %v1017_v37, %v8637_v53  ;;  %v6920_v37 = vor.u32 %v7599_v17, %v6917_v33 }
 0x342   : > { %v1026_v38 = vmul.f32 %v1013_v41, %v8637_v53  ;;  %v7601_v41 = vld [vmem:[%s11962_s6 + $0x70] sm:$0xf0] }
 0x343   : > { %v8802_v47 = vsub.f32 %v8741_v50, %v1028_v39  ;;  %1372 = vmatpush.bf16.msra.mxu2 %v6920_v37  ;;  %v6903_v39 = vld [vmem:[%s11962_s6 + $0x48] sm:$0xf] }
 0x344   : > { %v8799_v48 = vsub.f32 %v8743_v54, %v1026_v38  ;;  %v6924_v38 = vor.u32 %v7601_v41, %v6923_v26 }
 0x345   : > { %v1044_v40 = vmul.f32 %v8802_v47, %v8802_v47 }
 0x346   : > { %v1042_v46 = vmul.f32 %v8799_v48, %v8799_v48  ;;  %1401 = vmatpush.bf16.msrb.mxu3 %v6924_v38 }
 0x347   : > { %1056 = vadd.xlane.f32.xlu2 %v1044_v40  ;;  %v7596_v40 = vld [vmem:[%s11962_s6 + $0x4c] sm:$0xf] }
 0x348   : > { %1052 = vadd.xlane.f32.xlu0 %v1042_v46  ;;  %v7597_v46 = vld [vmem:[%s11962_s6 + $0x50] sm:$0xf0] }
 0x349   : > { %v1019_v19 = vpop.xlane.xlu1 %1018  ;;  %v1015_v36 = vpop.xlane.xlu2 %1014 }
 0x34a   : > { %v1029_v43 = vmul.f32 %v1019_v19, %v8637_v53  ;;  %v1027_v44 = vmul.f32 %v1015_v36, %v8637_v53  ;;  %v6904_v19 = vor.u32 %v7597_v46, %v6903_v39  ;;  %v6905_v36 = vld [vmem:[%s11962_s6 + $0x54] sm:$0xf0] }
 0x34c   : > { %v8811_v45 = vsub.f32 %v8761_v4, %v1027_v44  ;;  %v8814_v49 = vsub.f32 %v8759_v2, %v1029_v43  ;;  %v6911_v43 = vld [vmem:[%s11962_s6 + $0x50] sm:$0xf]  ;;  %v7598_v44 = vld [vmem:[%s11962_s6 + $0x58] sm:$0xf0]  ;;  %1344 = vmatpush.bf16.msra.mxu1 %v6904_v19 }
 0x34e   : > { %v1043_v51 = vmul.f32 %v8811_v45, %v8811_v45  ;;  %v1045_v52 = vmul.f32 %v8814_v49, %v8814_v49 }
 0x350   : > { %1054 = vadd.xlane.f32.xlu1 %v1043_v51  ;;  %1058 = vadd.xlane.f32.xlu0 %v1045_v52  ;;  %v6908_v51 = vor.u32 %v7596_v40, %v6905_v36  ;;  %v6912_v52 = vor.u32 %v7598_v44, %v6911_v43 }
 0x351   : > { %v1021_v55 = vpop.xlane.xlu1 %1020 }
 0x352   : > { %v1030_v57 = vmul.f32 %v1021_v55, %v8637_v53  ;;  %1373 = vmatpush.bf16.msra.mxu2 %v6908_v51  ;;  %1402 = vmatpush.bf16.msrb.mxu3 %v6912_v52  ;;  %v6891_v55 = vld [vmem:[%s11962_s6 + $0x30] sm:$0xf] }
 0x354   : > { %v8822_v58 = vsub.f32 %v8771_v14, %v1030_v57  ;;  %v7594_v57 = vld [vmem:[%s11962_s6 + $0x38] sm:$0xf0] }
 0x355   : > { %v6892_v60 = vor.u32 %v7594_v57, %v6891_v55 }
 0x356   : > { %v1046_v59 = vmul.f32 %v8822_v58, %v8822_v58  ;;  %1403 = vmatpush.bf16.msrb.mxu3 %v6900_v13 }
 0x357   : > { %1345 = vmatpush.bf16.msra.mxu1 %v6892_v60 }
 0x358   : > { %1060 = vadd.xlane.f32.xlu1 %v1046_v59  ;;  %v7593_v59 = vld [vmem:[%s11962_s6 + $0x34] sm:$0xf] }
 0x359   : > { %v6896_v0 = vor.u32 %v7593_v59, %v6893_v56 }
 0x35a   : > { %1404 = vmatpush.bf16.msrb.mxu3 %v6888_v16 }
 0x35b   : > { %1374 = vmatpush.bf16.msra.mxu2 %v6896_v0  ;;  %1346 = vmatpush.bf16.msra.mxu1 %v6880_v6 }
 0x35e   : > { %1405 = vmatpush.bf16.msrb.mxu3 %v6876_v8 }
 0x35f   : > { %1375 = vmatpush.bf16.msra.mxu2 %v6884_v15  ;;  %1347 = vmatpush.bf16.msra.mxu1 %v6868_v22 }
 0x363   : > { %1376 = vmatpush.bf16.msra.mxu2 %v6872_v42 }
 0x3aa   : > { %v1049_v20 = vpop.xlane.xlu2 %1048 }
 0x3ab   : > { %v1064_v27 = vmul.f32 %v1049_v20, %v8637_v53 }
 0x3ad   : > { %v1072_v28 = vadd.f32 1e-05, %v1064_v27 }
 0x3af   : > { %7820 = vrsqrt.f32 %v1072_v28  ;;  %vm1086_vm3 = vweird.f32 %v1072_v28 }
 0x3b2   : > { %v1051_v32 = vpop.xlane.xlu0 %1050  ;;  %v1023_v25 = vpop.xlane.xlu2 %1022 }
 0x3b3   : > { %v1065_v17 = vmul.f32 %v1051_v32, %v8637_v53  ;;  %v1031_v30 = vmul.f32 %v1023_v25, %v8637_v53 }
 0x3b5   : > { %v1073_v33 = vadd.f32 1e-05, %v1065_v17  ;;  %v7821_v26 = vpop.eup %7820  ;;  %v8974_v41 = vsub.f32 %v8791_v35, %v1031_v30 }
 0x3b6   : > { %v1081_v37 = vmul.f32 %v7821_v26, %v1072_v28  ;;  %vm1087_vm2 = vweird.f32 %v7821_v26 }
 0x3b7   : > { %7822 = vrsqrt.f32 %v1073_v33  ;;  %v1047_v38 = vmul.f32 %v8974_v41, %v8974_v41  ;;  %vm1088_vm5 = vmor %vm1086_vm3, %vm1087_vm2  ;;  %vm1096_vm6 = vweird.f32 %v1073_v33 }
 0x3b8   : > { %v1082_v39 = vmul.f32 %v7821_v26, %v1081_v37 }
 0x3b9   : > { %1062 = vadd.xlane.f32.xlu2 %v1047_v38 }
 0x3ba   : > { %v1083_v40 = vmul.f32 0.5, %v1082_v39  ;;  %v1057_v52 = vpop.xlane.xlu2 %1056 }
 0x3bb   : > { %v1053_v46 = vpop.xlane.xlu0 %1052  ;;  %v1068_v57 = vmul.f32 %v1057_v52, %v8637_v53 }
 0x3bc   : > { %v1066_v19 = vmul.f32 %v1053_v46, %v8637_v53  ;;  %v1084_v44 = vsub.f32 1.5, %v1083_v40 }
 0x3bd   : > { %v7823_v36 = vpop.eup %7822  ;;  %v1076_v12 = vadd.f32 1e-05, %v1068_v57 }
 0x3be   : > { %v1074_v43 = vadd.f32 1e-05, %v1066_v19  ;;  %v1091_v51 = vmul.f32 %v7823_v36, %v1073_v33  ;;  %v1085_v62 = vmul.f32 %v7821_v26, %v1084_v44  ;;  %vm1097_vm4 = vweird.f32 %v7823_v36 }
 0x3bf   : > { %vm1098_vm7 = vmor %vm1096_vm6, %vm1097_vm4  ;;  %vm1126_vm2 = vweird.f32 %v1076_v12 }
 0x3c0   : > { %7824 = vrsqrt.f32 %v1074_v43  ;;  %v1092_v55 = vmul.f32 %v7823_v36, %v1091_v51  ;;  %v1089_v10 = vsel %vm1088_vm5, %v7821_v26, %v1085_v62  ;;  %vm1106_vm9 = vweird.f32 %v1074_v43 }
 0x3c1   : > { %v1160_v21 = vmul.f32 %v1089_v10, %v8777_v24 }
 0x3c2   : > { %v1093_v59 = vmul.f32 0.5, %v1092_v55 }
 0x3c3   : > { %v1055_v60 = vpop.xlane.xlu1 %1054  ;;  %v1059_v56 = vpop.xlane.xlu0 %1058 }
 0x3c4   : > { %v1067_v63 = vmul.f32 %v1055_v60, %v8637_v53  ;;  %v1069_v0 = vmul.f32 %v1059_v56, %v8637_v53  ;;  %v1094_v13 = vsub.f32 1.5, %v1093_v59 }
 0x3c6   : > { %v7825_v1 = vpop.eup %7824  ;;  %v1075_v3 = vadd.f32 1e-05, %v1067_v63  ;;  %v1077_v6 = vadd.f32 1e-05, %v1069_v0  ;;  %v1095_v11 = vmul.f32 %v7823_v36, %v1094_v13 }
 0x3c7   : > { %v1101_v9 = vmul.f32 %v7825_v1, %v1074_v43  ;;  %vm1107_vm8 = vweird.f32 %v7825_v1 }
 0x3c8   : > { %7826 = vrsqrt.f32 %v1075_v3  ;;  %v1099_v16 = vsel %vm1098_vm7, %v7823_v36, %v1095_v11  ;;  %vm1108_vm11 = vmor %vm1106_vm9, %vm1107_vm8  ;;  %vm1116_vm12 = vweird.f32 %v1075_v3  ;;  %vm1136_vm0 = vweird.f32 %v1077_v6 }
 0x3c9   : > { %v1102_v15 = vmul.f32 %v7825_v1, %v1101_v9  ;;  %7828 = vrsqrt.f32 %v1077_v6  ;;  %v1161_v18 = vmul.f32 %v1099_v16, %v8789_v34 }
 0x3ca   : > { %7830 = vrsqrt.f32 %v1076_v12 }
 0x3cb   : > { %v1103_v7 = vmul.f32 0.5, %v1102_v15  ;;  %v1200_v22 = vpack.c.bf16 %v1161_v18, %v1160_v21  ;;  %v1061_v57 = vpop.xlane.xlu1 %1060 }
 0x3cc   : > { %v1070_v59 = vmul.f32 %v1061_v57, %v8637_v53 }
 0x3cd   : > { %1348 = vmatmul.bf16.vlgmr.msra.gmra.mxu1 %v1200_v22  ;;  %1377 = vmatmul.bf16.vlgmr.msra.gmra.mxu2 %v1200_v22  ;;  %v1104_v61 = vsub.f32 1.5, %v1103_v7 }
 0x3ce   : > { %v7827_v23 = vpop.eup %7826  ;;  %1406 = vmatmul.bf16.vlgmr.msrb.gmra.mxu3 %v1200_v22  ;;  %v1078_v60 = vadd.f32 1e-05, %v1070_v59 }
 0x3cf   : > { %v7829_v31 = vpop.eup %7828  ;;  %v1111_v42 = vmul.f32 %v7827_v23, %v1075_v3  ;;  %v1105_v25 = vmul.f32 %v7825_v1, %v1104_v61  ;;  %vm1117_vm10 = vweird.f32 %v7827_v23 }
 0x3d0   : > { %v7831_v8 = vpop.eup %7830  ;;  %v1131_v27 = vmul.f32 %v7829_v31, %v1077_v6  ;;  %vm1118_vm13 = vmor %vm1116_vm12, %vm1117_vm10  ;;  %vm1137_vm14 = vweird.f32 %v7829_v31  ;;  %7832 = vrsqrt.f32 %v1078_v60  ;;  %vm1146_vm5 = vweird.f32 %v1078_v60 }
 0x3d1   : > { %v1112_v20 = vmul.f32 %v7827_v23, %v1111_v42  ;;  %v1121_v28 = vmul.f32 %v7831_v8, %v1076_v12  ;;  %v1109_v30 = vsel %vm1108_vm11, %v7825_v1, %v1105_v25  ;;  %vm1127_vm15 = vweird.f32 %v7831_v8  ;;  %vm1138_vm1 = vmor %vm1136_vm0, %vm1137_vm14 }
 0x3d2   : > { %v1132_v34 = vmul.f32 %v7829_v31, %v1131_v27  ;;  %v1162_v38 = vmul.f32 %v1109_v30, %v8799_v48  ;;  %vm1128_vm3 = vmor %vm1126_vm2, %vm1127_vm15  ;;  %vm1491_vm10 = vcmask 261120   ;;  %vm1545_vm11 = vcmask 523264  }
 0x3d3   : > { %v1113_v32 = vmul.f32 0.5, %v1112_v20  ;;  %v1122_v17 = vmul.f32 %v7831_v8, %v1121_v28 }
 0x3d4   : > { %v1133_v26 = vmul.f32 0.5, %v1132_v34 }
 0x3d5   : > { %v1114_v24 = vsub.f32 1.5, %v1113_v32  ;;  %v1123_v46 = vmul.f32 0.5, %v1122_v17 }
 0x3d6   : > { %v1134_v19 = vsub.f32 1.5, %v1133_v26  ;;  %v7833_v56 = vpop.eup %7832 }
 0x3d7   : > { %v1115_v33 = vmul.f32 %v7827_v23, %v1114_v24  ;;  %v1124_v36 = vsub.f32 1.5, %v1123_v46  ;;  %v1141_v62 = vmul.f32 %v7833_v56, %v1078_v60  ;;  %vm1147_vm4 = vweird.f32 %v7833_v56 }
 0x3d8   : > { %v1135_v43 = vmul.f32 %v7829_v31, %v1134_v19  ;;  %vm1148_vm7 = vmor %vm1146_vm5, %vm1147_vm4 }
 0x3d9   : > { %v1119_v37 = vsel %vm1118_vm13, %v7827_v23, %v1115_v33  ;;  %v1125_v44 = vmul.f32 %v7831_v8, %v1124_v36  ;;  %v1142_v1 = vmul.f32 %v7833_v56, %v1141_v62  ;;  %v1204_v23 = vld [vmem:[%s11963_s7] sm:$0x7] }
 0x3da   : > { %v1163_v39 = vmul.f32 %v1119_v37, %v8811_v45  ;;  %v1139_v51 = vsel %vm1138_vm1, %v7829_v31, %v1135_v43  ;;  %v8995_v31 = vperm.slane %v1204_v23, 0  ;;  %v8997_v61 = vperm.slane %v1204_v23, 1 }
 0x3db   : > { %v1129_v52 = vsel %vm1128_vm3, %v7831_v8, %v1125_v44  ;;  %v1165_v48 = vmul.f32 %v1139_v51, %v8814_v49  ;;  %v1143_v49 = vmul.f32 0.5, %v1142_v1  ;;  %v1208_v51 = vperm.slane %v1204_v23, 2 }
 0x3dc   : > { %v1201_v40 = vpack.c.bf16 %v1163_v39, %v1162_v38  ;;  %v1164_v45 = vmul.f32 %v1129_v52, %v8802_v47 }
 0x3dd   : > { %v1144_v47 = vsub.f32 1.5, %v1143_v49 }
 0x3de   : > { %1353 = vmatmul.bf16.gmra.mxu1 %v1201_v40  ;;  %1382 = vmatmul.bf16.gmra.mxu2 %v1201_v40  ;;  %v1202_v55 = vpack.c.bf16 %v1165_v48, %v1164_v45 }
 0x3df   : > { %1411 = vmatmul.bf16.gmra.mxu3 %v1201_v40  ;;  %v1145_v10 = vmul.f32 %v7833_v56, %v1144_v47 }
 0x3e1   : > { %v1149_v15 = vsel %vm1148_vm7, %v7833_v56, %v1145_v10 }
 0x3e2   : > { %v1166_v18 = vmul.f32 %v1149_v15, %v8822_v58 }
 0x3ee   : > { %1358 = vmatmul.bf16.gmra.mxu1 %v1202_v55  ;;  %1387 = vmatmul.bf16.gmra.mxu2 %v1202_v55 }
 0x3ef   : > { %1416 = vmatmul.bf16.gmra.mxu3 %v1202_v55 }
 0x42c   : > { %v1063_v63 = vpop.xlane.xlu2 %1062 }
 0x42d   : > { %v1071_v0 = vmul.f32 %v1063_v63, %v8637_v53 }
 0x42f   : > { %v1079_v13 = vadd.f32 1e-05, %v1071_v0 }
 0x431   : > { %7834 = vrsqrt.f32 %v1079_v13  ;;  %vm1156_vm8 = vweird.f32 %v1079_v13 }
 0x437   : > { %v7835_v12 = vpop.eup %7834 }
 0x438   : > { %v1151_v3 = vmul.f32 %v7835_v12, %v1079_v13  ;;  %vm1157_vm6 = vweird.f32 %v7835_v12 }
 0x439   : > { %vm1158_vm9 = vmor %vm1156_vm8, %vm1157_vm6 }
 0x43a   : > { %v1152_v6 = vmul.f32 %v7835_v12, %v1151_v3 }
 0x43c   : > { %v1153_v9 = vmul.f32 0.5, %v1152_v6 }
 0x43e   : > { %v1154_v11 = vsub.f32 1.5, %v1153_v9 }
 0x440   : > { %v1155_v16 = vmul.f32 %v7835_v12, %v1154_v11 }
 0x442   : > { %v1159_v21 = vsel %vm1158_vm9, %v7835_v12, %v1155_v16 }
 0x443   : > { %v1167_v7 = vmul.f32 %v1159_v21, %v8974_v41 }
 0x445   : > { %v1203_v22 = vpack.c.bf16 %v1167_v7, %v1166_v18 }
 0x447   : > { %1363 = vmatmul.bf16.gmra.mxu1 %v1203_v22  ;;  %1392 = vmatmul.bf16.gmra.mxu2 %v1203_v22 }
 0x448   : > { %1421 = vmatmul.bf16.gmra.mxu3 %v1203_v22 }
 0x44a   : > { %v1349_v42 = vpop.f32.mrf.mxu1 }
 0x44b   : > { %v1350_v20 = vadd.f32 %v1349_v42, %v8995_v31 }
 0x450   : > { %v1378_v8 = vpop.f32.mrf.mxu2 }
 0x451   : > { %v1379_v58 = vadd.f32 %v1378_v8, %v8997_v61  ;;  %v1407_v41 = vpop.f32.mrf.mxu3 }
 0x452   : > { %v9003_v28 = vpop.f32.mrf.mxu1 }
 0x453   : > { %v9001_v27 = vpack.c.bf16 %v1379_v58, %v1350_v20 }
 0x458   : > { %v9005_v32 = vpop.f32.mrf.mxu2 }
 0x459   : > { %v1409_v25 = vpop.f32.mrf.mxu3 }
 0x45b   : > { %v9007_v24 = vpop.f32.mrf.mxu1 }
 0x461   : > { %v1383_v34 = vpop.f32.mrf.mxu2 }
 0x462   : > { %v1412_v17 = vpop.f32.mrf.mxu3 }
 0x463   : > { %v1356_v30 = vpop.f32.mrf.mxu1  ;;  %v1413_v22 = vadd.f32 %v1412_v17, %v1208_v51 }
 0x469   : > { %v1385_v33 = vpop.f32.mrf.mxu2 }
 0x46a   : > { %v1414_v26 = vpop.f32.mrf.mxu3 }
 0x46b   : > { %v1359_v37 = vpop.f32.mrf.mxu1  ;;  %v1415_v47 = vadd.f32 %v1414_v26, %v1208_v51 }
 0x46c   : > { %v1360_v9 = vadd.f32 %v1359_v37, %v8995_v31  ;;  %v1410_v37 = vadd.f32 %v1409_v25, %v1208_v51  ;;  %v1357_v25 = vadd.f32 %v1356_v30, %v8995_v31  ;;  %v1381_v30 = vadd.f32 %v9005_v32, %v8997_v61 }
 0x471   : > { %v1388_v38 = vpop.f32.mrf.mxu2 }
 0x472   : > { %v1417_v39 = vpop.f32.mrf.mxu3  ;;  %v1389_v3 = vadd.f32 %v1388_v38, %v8997_v61  ;;  %v1434_v38 = vpack.c.bf16 %v1415_v47, %v1415_v47 }
 0x473   : > { %v1361_v46 = vpop.f32.mrf.mxu1  ;;  %v1418_v13 = vadd.f32 %v1417_v39, %v1208_v51 }
 0x474   : > { %v1362_v1 = vadd.f32 %v1361_v46, %v8995_v31  ;;  %v9019_v20 = vpack.c.bf16 %v1389_v3, %v1360_v9  ;;  %v1479_v3 = vunpack.c.h.b16 %v9001_v27  ;;  %v1467_v9 = vunpack.c.l.b16 %v9001_v27 }
 0x475   : > { %v1436_v23 = vpack.c.bf16 %v1418_v13, %v1418_v13 }
 0x479   : > { %v1390_v40 = vpop.f32.mrf.mxu2 }
 0x47a   : > { %v1419_v19 = vpop.f32.mrf.mxu3  ;;  %v1391_v57 = vadd.f32 %v1390_v40, %v8997_v61  ;;  %v1386_v40 = vadd.f32 %v1385_v33, %v8997_v61 }
 0x47b   : > { %v1420_v59 = vadd.f32 %v1419_v19, %v1208_v51 }
 0x47c   : > { %v9017_v10 = vpack.c.bf16 %v1391_v57, %v1362_v1  ;;  %v1355_v57 = vadd.f32 %v9007_v24, %v8995_v31  ;;  %v1352_v24 = vadd.f32 %v9003_v28, %v8995_v31 }
 0x47d   : > { %v1438_v11 = vpack.c.bf16 %v1420_v59, %v1420_v59  ;;  %v1433_v59 = vpack.c.bf16 %v1386_v40, %v1357_v25 }
 0x47e   : > { %v1484_v19 = vunpack.c.h.b16 %v9017_v10  ;;  %v1472_v27 = vunpack.c.l.b16 %v9017_v10 }
 0x47f   : > { %v1651_v39 = vunpack.c.l.b16 %v1438_v11 }
 0x4c4   : > { %v1364_v36 = vpop.f32.mrf.mxu1 }
 0x4c5   : > { %v1365_v55 = vadd.f32 %v1364_v36, %v8995_v31  ;;  %v1408_v36 = vadd.f32 %v1407_v41, %v1208_v51 }
 0x4ca   : > { %v1393_v43 = vpop.f32.mrf.mxu2 }
 0x4cb   : > { %v1422_v44 = vpop.f32.mrf.mxu3  ;;  %v1394_v52 = vadd.f32 %v1393_v43, %v8997_v61  ;;  %v1432_v43 = vpack.c.bf16 %v1413_v22, %v1413_v22 }
 0x4cc   : > { %v1423_v48 = vadd.f32 %v1422_v44, %v1208_v51  ;;  %v1366_v45 = vpop.f32.mrf.mxu1  ;;  %v1650_v44 = vunpack.c.l.b16 %v1436_v23 }
 0x4cd   : > { %v1439_v56 = vpack.c.bf16 %v1394_v52, %v1365_v55  ;;  %v1367_v62 = vadd.f32 %v1366_v45, %v8995_v31  ;;  %v1384_v52 = vadd.f32 %v1383_v34, %v8997_v61  ;;  %v1430_v45 = vpack.c.bf16 %v1410_v37, %v1410_v37 }
 0x4ce   : > { %v1440_v49 = vpack.c.bf16 %v1423_v48, %v1423_v48  ;;  %v1483_v48 = vunpack.c.h.b16 %v9019_v20  ;;  %v1649_v55 = vunpack.c.l.b16 %v1434_v38  ;;  %v9035_v33 = vpack.c.b16 %v1651_v39, %v1650_v44 }
 0x4cf   : > { %v1473_v16 = vunpack.c.l.b16 %v1439_v56  ;;  %v1485_v21 = vunpack.c.h.b16 %v1439_v56  ;;  %v1431_v56 = vpack.c.bf16 %v1384_v52, %v1355_v57  ;;  %v1647_v34 = vunpack.c.l.b16 %v1430_v45 }
 0x4d0   : > { %v1652_v42 = vunpack.c.l.b16 %v1440_v49  ;;  %v9039_v41 = vpack.c.b16 %v1484_v19, %v1483_v48 }
 0x4d1   : > { %v1481_v1 = vunpack.c.h.b16 %v1431_v56 }
 0x4d2   : > { %v1395_v60 = vpop.f32.mrf.mxu2 }
 0x4d3   : > { %v1396_v63 = vadd.f32 %v1395_v60, %v8997_v61  ;;  %v1424_v0 = vpop.f32.mrf.mxu3  ;;  %v1648_v60 = vunpack.c.l.b16 %v1432_v43 }
 0x4d4   : > { %v1425_v12 = vadd.f32 %v1424_v0, %v1208_v51  ;;  %v1428_v51 = vpack.c.bf16 %v1408_v36, %v1408_v36  ;;  %v1511_v0 = vsel %vm1491_vm10, %v9039_v41, 0 }
 0x4d5   : > { %v1441_v6 = vpack.c.bf16 %v1396_v63, %v1367_v62  ;;  %v9042_v62 = vpack.c.b16 %v1649_v55, %v1648_v60  ;;  %v1482_v63 = vunpack.c.h.b16 %v1433_v59 }
 0x4d6   : > { %v1442_v15 = vpack.c.bf16 %v1425_v12, %v1425_v12  ;;  %v1646_v13 = vunpack.c.l.b16 %v1428_v51  ;;  %v1429_v12 = vpack.c.bf16 %v1381_v30, %v1352_v24 }
 0x4d7   : > { %v1474_v18 = vunpack.c.l.b16 %v1441_v6  ;;  %v1486_v7 = vunpack.c.h.b16 %v1441_v6  ;;  %v9053_v47 = vpack.c.b16 %v1482_v63, %v1481_v1 }
 0x4d8   : > { %v1653_v8 = vunpack.c.l.b16 %v1442_v15  ;;  %v9051_v49 = vpack.c.b16 %v1647_v34, %v1646_v13  ;;  %v1480_v61 = vunpack.c.h.b16 %v1429_v12  ;;  %v1468_v28 = vunpack.c.l.b16 %v1429_v12 }
 0x4d9   : > { %v9021_v58 = vpack.c.b16 %v1486_v7, %v1485_v21  ;;  %v9023_v26 = vpack.c.b16 %v1474_v18, %v1473_v16  ;;  %v1508_v32 = vsel %vm1491_vm10, %v9053_v47, 0  ;;  %v1470_v15 = vunpack.c.l.b16 %v1433_v59 }
 0x4da   : > { %v9025_v46 = vpack.c.b16 %v1653_v8, %v1652_v42  ;;  %v9059_v6 = vpack.c.b16 %v1480_v61, %v1479_v3  ;;  %v9066_v11 = vpack.c.b16 %v1468_v28, %v1467_v9  ;;  %v1469_v16 = vunpack.c.l.b16 %v1431_v56 }
 0x4db   : > { %v1514_v17 = vsel %vm1491_vm10, %v9021_v58, 0  ;;  %v1471_v18 = vunpack.c.l.b16 %v9019_v20 }
 0x4dc   : > { %7724 = vmatpush.bf16.msrb.mxu1 %v9025_v46  ;;  %1520 = vmatpush.bf16.xpose.msrb.mxu0 %v1514_v17  ;;  %v1505_v31 = vsel %vm1491_vm10, %v9059_v6, 0  ;;  %v9072_v21 = vpack.c.b16 %v1470_v15, %v1469_v16 }
 0x4dd   : > { %v9078_v7 = vpack.c.b16 %v1472_v27, %v1471_v18 }
 0x4e0   : > { %7725 = vmatpush.bf16.msrb.mxu1 %v9035_v33 }
 0x4e4   : > { %7726 = vmatpush.bf16.msrb.mxu1 %v9042_v62  ;;  %1521 = vmatpush.bf16.xpose.msrb.mxu0 %v1511_v0 }
 0x4e8   : > { %7727 = vmatpush.bf16.msrb.mxu1 %v9051_v49 }
 0x4ec   : > { %1522 = vmatpush.bf16.xpose.msrb.mxu0 %v1508_v32 }
 0x4f4   : > { %1523 = vmatpush.bf16.xpose.msrb.mxu0 %v1505_v31 }
 0x4fb   : > { %6961 = vmatmul.msk.bf16.vlgmr.msrb.gmra.mxu0 %vm1491_vm10, %v9066_v11 }
 0x4fc   : > { %1678 = vmatpush.bf16.msra.mxu0 %v9025_v46 }
 0x500   : > { %1679 = vmatpush.bf16.msra.mxu0 %v9035_v33 }
 0x504   : > { %1680 = vmatpush.bf16.msra.mxu0 %v9042_v62 }
 0x508   : > { %1681 = vmatpush.bf16.msra.mxu0 %v9051_v49 }
 0x50b   : > { %6962 = vmatmul.msk.bf16.gmra.mxu0 %vm1491_vm10, %v9072_v21 }
 0x51b   : > { %6963 = vmatmul.msk.bf16.gmra.mxu0 %vm1491_vm10, %v9078_v7 }
 0x52b   : > { %6964 = vmatmul.msk.bf16.gmra.mxu0 %vm1491_vm10, %v9023_v26 }
 0x578   : > { %v1525_v22 = vpop.f32.mrf.mxu0 }
 0x579   : > { %v1546_v23 = vsel %vm1545_vm11, %v1525_v22, -inf }
 0x57a   : > { %1547 = vmax.xlane.f32.xlu0 %v1546_v23 }
 0x580   : > { %v1527_v42 = vpop.f32.mrf.mxu0 }
 0x581   : > { %v1549_v8 = vsel %vm1545_vm11, %v1527_v42, -inf }
 0x582   : > { %1550 = vmax.xlane.f32.xlu1 %v1549_v8 }
 0x588   : > { %v1530_v10 = vpop.f32.mrf.mxu0 }
 0x589   : > { %v1552_v20 = vsel %vm1545_vm11, %v1530_v10, -inf }
 0x58a   : > { %1553 = vmax.xlane.f32.xlu2 %v1552_v20 }
 0x590   : > { %v1532_v37 = vpop.f32.mrf.mxu0 }
 0x591   : > { %v1555_v38 = vsel %vm1545_vm11, %v1532_v37, -inf }
 0x592   : > { %1556 = vmax.xlane.f32.xlu0 %v1555_v38 }
 0x598   : > { %v1535_v39 = vpop.f32.mrf.mxu0 }
 0x599   : > { %v1558_v40 = vsel %vm1545_vm11, %v1535_v39, -inf }
 0x59a   : > { %1559 = vmax.xlane.f32.xlu1 %v1558_v40 }
 0x5a0   : > { %v1537_v19 = vpop.f32.mrf.mxu0 }
 0x5a1   : > { %v1561_v17 = vsel %vm1545_vm11, %v1537_v19, -inf }
 0x5a2   : > { %1562 = vmax.xlane.f32.xlu2 %v1561_v17 }
 0x5a8   : > { %v1540_v36 = vpop.f32.mrf.mxu0 }
 0x5a9   : > { %v1564_v43 = vsel %vm1545_vm11, %v1540_v36, -inf }
 0x5aa   : > { %1565 = vmax.xlane.f32.xlu0 %v1564_v43 }
 0x5b0   : > { %v1542_v44 = vpop.f32.mrf.mxu0 }
 0x5b1   : > { %v1567_v52 = vsel %vm1545_vm11, %v1542_v44, -inf }
 0x5b2   : > { %1568 = vmax.xlane.f32.xlu1 %v1567_v52 }
 0x5ed   : > { %v1548_v25 = vpop.xlane.xlu0 %1547 }
 0x5ee   : > { %v1570_v48 = vsub.f32 %v1525_v22, %v1548_v25 }
 0x5f0   : > { %v1578_v45 = vmul.f32 1.442695, %v1570_v48 }
 0x5f2   : > { %7836 = vpow2.f32 %v1578_v45 }
 0x5f5   : > { %v1551_v55 = vpop.xlane.xlu1 %1550 }
 0x5f6   : > { %v1571_v57 = vsub.f32 %v1527_v42, %v1551_v55 }
 0x5f8   : > { %v9092_v59 = vpop.eup %7836  ;;  %v1580_v51 = vmul.f32 1.442695, %v1571_v57 }
 0x5f9   : > { %v1594_v60 = vsel %vm1545_vm11, %v9092_v59, 0.0 }
 0x5fa   : > { %7838 = vpow2.f32 %v1580_v51  ;;  %1595 = vadd.xlane.f32.xlu2 %v1594_v60 }
 0x5fd   : > { %v1554_v56 = vpop.xlane.xlu2 %1553 }
 0x5fe   : > { %v1572_v34 = vsub.f32 %v1530_v10, %v1554_v56 }
 0x600   : > { %v9096_v30 = vpop.eup %7838  ;;  %v1582_v63 = vmul.f32 1.442695, %v1572_v34 }
 0x601   : > { %v1597_v0 = vsel %vm1545_vm11, %v9096_v30, 0.0 }
 0x602   : > { %7840 = vpow2.f32 %v1582_v63  ;;  %1598 = vadd.xlane.f32.xlu0 %v1597_v0 }
 0x605   : > { %v1557_v13 = vpop.xlane.xlu0 %1556 }
 0x606   : > { %v1573_v24 = vsub.f32 %v1532_v37, %v1557_v13  ;;  %v7611_v13 = vld [vmem:[%s11964_s8] sm:$0xff] }
 0x608   : > { %v9100_v1 = vpop.eup %7840  ;;  %v1584_v12 = vmul.f32 1.442695, %v1573_v24 }
 0x609   : > { %v1600_v61 = vsel %vm1545_vm11, %v9100_v1, 0.0 }
 0x60a   : > { %7842 = vpow2.f32 %v1584_v12  ;;  %1601 = vadd.xlane.f32.xlu1 %v1600_v61 }
 0x60d   : > { %v1560_v32 = vpop.xlane.xlu1 %1559 }
 0x60e   : > { %v1574_v3 = vsub.f32 %v1535_v39, %v1560_v32 }
 0x610   : > { %v9104_v31 = vpop.eup %7842  ;;  %v1586_v28 = vmul.f32 1.442695, %v1574_v3 }
 0x611   : > { %v1603_v9 = vsel %vm1545_vm11, %v9104_v31, 0.0 }
 0x612   : > { %7844 = vpow2.f32 %v1586_v28  ;;  %1604 = vadd.xlane.f32.xlu2 %v1603_v9 }
 0x615   : > { %v1563_v15 = vpop.xlane.xlu2 %1562 }
 0x616   : > { %v1575_v16 = vsub.f32 %v1537_v19, %v1563_v15 }
 0x618   : > { %v9108_v27 = vpop.eup %7844  ;;  %v1588_v18 = vmul.f32 1.442695, %v1575_v16 }
 0x619   : > { %v1606_v22 = vsel %vm1545_vm11, %v9108_v27, 0.0 }
 0x61a   : > { %7846 = vpow2.f32 %v1588_v18  ;;  %1607 = vadd.xlane.f32.xlu0 %v1606_v22 }
 0x61d   : > { %v1566_v23 = vpop.xlane.xlu0 %1565 }
 0x61e   : > { %v1576_v42 = vsub.f32 %v1540_v36, %v1566_v23 }
 0x620   : > { %v9112_v8 = vpop.eup %7846  ;;  %v1590_v10 = vmul.f32 1.442695, %v1576_v42 }
 0x621   : > { %v1609_v20 = vsel %vm1545_vm11, %v9112_v8, 0.0 }
 0x622   : > { %7848 = vpow2.f32 %v1590_v10  ;;  %1610 = vadd.xlane.f32.xlu1 %v1609_v20 }
 0x625   : > { %v1569_v37 = vpop.xlane.xlu1 %1568 }
 0x626   : > { %v1577_v38 = vsub.f32 %v1542_v44, %v1569_v37 }
 0x628   : > { %v9116_v39 = vpop.eup %7848  ;;  %v1592_v40 = vmul.f32 1.442695, %v1577_v38 }
 0x629   : > { %v1612_v19 = vsel %vm1545_vm11, %v9116_v39, 0.0 }
 0x62a   : > { %7850 = vpow2.f32 %v1592_v40  ;;  %1613 = vadd.xlane.f32.xlu2 %v1612_v19 }
 0x630   : > { %v9120_v17 = vpop.eup %7850 }
 0x631   : > { %v1615_v36 = vsel %vm1545_vm11, %v9120_v17, 0.0 }
 0x632   : > { %1616 = vadd.xlane.f32.xlu0 %v1615_v36 }
 0x63b   : > { %1721 = vrot.lane.b32.xlu1 %v9021_v58, %s11978_s29 }
 0x642   : > { %1719 = vrot.lane.b32.xlu2 %v9039_v41, %s11978_s29 }
 0x643   : > { %1707 = vrot.lane.b32.xlu1 %v9066_v11, %s11978_s29 }
 0x646   : > { %1717 = vrot.lane.b32.xlu0 %v9053_v47, %s11978_s29 }
 0x64a   : > { %1715 = vrot.lane.b32.xlu2 %v9059_v6, %s11978_s29 }
 0x64b   : > { %2045 = vrot.lane.b32.xlu1 %v9021_v58, %s11976_s23 }
 0x64e   : > { %1709 = vrot.lane.b32.xlu0 %v9072_v21, %s11978_s29 }
 0x652   : > { %1711 = vrot.lane.b32.xlu2 %v9078_v7, %s11978_s29 }
 0x653   : > { %2322 = vrot.lane.b32.xlu1 %v9039_v41, %s11974_s30 }
 0x656   : > { %2324 = vrot.lane.b32.xlu0 %v9021_v58, %s11974_s30 }
 0x65a   : > { %2043 = vrot.lane.b32.xlu2 %v9039_v41, %s11976_s23 }
 0x65b   : > { %2320 = vrot.lane.b32.xlu1 %v9053_v47, %s11974_s30 }
 0x65e   : > { %1713 = vrot.lane.b32.xlu0 %v9023_v26, %s11978_s29 }
 0x662   : > { %2041 = vrot.lane.b32.xlu2 %v9053_v47, %s11976_s23 }
 0x663   : > { %2031 = vrot.lane.b32.xlu1 %v9066_v11, %s11976_s23 }
 0x666   : > { %2039 = vrot.lane.b32.xlu0 %v9059_v6, %s11976_s23 }
 0x66a   : > { %2318 = vrot.lane.b32.xlu2 %v9059_v6, %s11974_s30 }
 0x66b   : > { %2312 = vrot.lane.b32.xlu1 %v9072_v21, %s11974_s30 }
 0x66d   : > { %v1596_v58 = vpop.xlane.xlu2 %1595 }
 0x66e   : > { %2310 = vrot.lane.b32.xlu0 %v9066_v11, %s11974_s30  ;;  %7852 = vrcp.f32 %v1596_v58 }
 0x672   : > { %2033 = vrot.lane.b32.xlu2 %v9072_v21, %s11976_s23 }
 0x673   : > { %2037 = vrot.lane.b32.xlu1 %v9023_v26, %s11976_s23 }
 0x674   : > { %v7853_v47 = vpop.eup %7852 }
 0x675   : > { %v1599_v41 = vpop.xlane.xlu0 %1598  ;;  %v1626_v11 = vmul.f32 %v7853_v47, %v9092_v59 }
 0x676   : > { %7854 = vrcp.f32 %v1599_v41  ;;  %2035 = vrot.lane.b32.xlu0 %v9078_v7, %s11976_s23 }
 0x67a   : > { %2314 = vrot.lane.b32.xlu2 %v9078_v7, %s11974_s30 }
 0x67c   : > { %v7855_v6 = vpop.eup %7854 }
 0x67d   : > { %v1627_v43 = vmul.f32 %v7855_v6, %v9096_v30  ;;  %v1602_v44 = vpop.xlane.xlu1 %1601  ;;  %v7612_v30 = vld [vmem:[%s11964_s8 + $0x8] sm:$0xff] }
 0x67e   : > { %2316 = vrot.lane.b32.xlu0 %v9023_v26, %s11974_s30  ;;  %7856 = vrcp.f32 %v1602_v44  ;;  %2008 = vmatpush.bf16.msra.mxu1 %v7612_v30 }
 0x67f   : > { %v1634_v21 = vpack.c.bf16 %v1627_v43, %v1626_v11 }
 0x681   : > { %6965 = vmatmul.msk.bf16.vlgmr.msra.gmra.mxu0 %vm1545_vm11, %v1634_v21 }
 0x682   : > { %2009 = vmatpush.bf16.msra.mxu1 %v7611_v13 }
 0x684   : > { %v7857_v25 = vpop.eup %7856 }
 0x685   : > { %v1605_v52 = vpop.xlane.xlu2 %1604  ;;  %v1628_v45 = vmul.f32 %v7857_v25, %v9100_v1 }
 0x686   : > { %7858 = vrcp.f32 %v1605_v52 }
 0x68c   : > { %v7859_v48 = vpop.eup %7858 }
 0x68d   : > { %v1629_v7 = vmul.f32 %v7859_v48, %v9104_v31  ;;  %v1608_v57 = vpop.xlane.xlu0 %1607 }
 0x68e   : > { %7860 = vrcp.f32 %v1608_v57 }
 0x68f   : > { %v1635_v55 = vpack.c.bf16 %v1629_v7, %v1628_v45 }
 0x691   : > { %6966 = vmatmul.msk.bf16.vlgmr.msrb.gmra.mxu1 %vm1545_vm11, %v1635_v55 }
 0x694   : > { %v7861_v26 = vpop.eup %7860 }
 0x695   : > { %v1611_v59 = vpop.xlane.xlu1 %1610  ;;  %v1630_v60 = vmul.f32 %v7861_v26, %v9108_v27 }
 0x696   : > { %7862 = vrcp.f32 %v1611_v59 }
 0x69c   : > { %v7863_v51 = vpop.eup %7862 }
 0x69d   : > { %v1631_v56 = vmul.f32 %v7863_v51, %v9112_v8  ;;  %v1614_v63 = vpop.xlane.xlu2 %1613 }
 0x69e   : > { %7864 = vrcp.f32 %v1614_v63 }
 0x69f   : > { %v1636_v34 = vpack.c.bf16 %v1631_v56, %v1630_v60 }
 0x6a1   : > { %6967 = vmatmul.msk.bf16.gmra.mxu1 %vm1545_vm11, %v1636_v34 }
 0x6a4   : > { %v7865_v24 = vpop.eup %7864 }
 0x6a5   : > { %v1617_v0 = vpop.xlane.xlu0 %1616  ;;  %v1720_v12 = vpop.permute.xlu2 %1719  ;;  %v1632_v32 = vmul.f32 %v7865_v24, %v9116_v39 }
 0x6a6   : > { %7866 = vrcp.f32 %v1617_v0  ;;  %v1742_v15 = vsel %vm1491_vm10, %v1720_v12, 0 }
 0x6ac   : > { %v7867_v1 = vpop.eup %7866 }
 0x6ad   : > { %v1722_v61 = vpop.permute.xlu1 %1721  ;;  %v1633_v3 = vmul.f32 %v7867_v1, %v9120_v17  ;;  %v1716_v9 = vpop.permute.xlu2 %1715 }
 0x6ae   : > { %v1745_v31 = vsel %vm1491_vm10, %v1722_v61, 0  ;;  %v1736_v8 = vsel %vm1491_vm10, %v1716_v9, 0 }
 0x6af   : > { %1751 = vmatpush.bf16.xpose.msrb.mxu2 %v1745_v31  ;;  %7728 = vmatpush.bf16.xpose.msra.mxu3 %v1745_v31  ;;  %v1637_v28 = vpack.c.bf16 %v1633_v3, %v1632_v32 }
 0x6b1   : > { %6968 = vmatmul.msk.bf16.gmra.mxu1 %vm1545_vm11, %v1637_v28 }
 0x6b5   : > { %v1708_v16 = vpop.permute.xlu1 %1707  ;;  %v1712_v22 = vpop.permute.xlu2 %1711 }
 0x6b7   : > { %1752 = vmatpush.bf16.xpose.msrb.mxu2 %v1742_v15  ;;  %7729 = vmatpush.bf16.xpose.msra.mxu3 %v1742_v15 }
 0x6b8   : > { %v1718_v27 = vpop.permute.xlu0 %1717 }
 0x6b9   : > { %v1739_v18 = vsel %vm1491_vm10, %v1718_v27, 0 }
 0x6bd   : > { %v2046_v42 = vpop.permute.xlu1 %2045  ;;  %v2044_v38 = vpop.permute.xlu2 %2043 }
 0x6be   : > { %v2069_v10 = vsel %vm1491_vm10, %v2046_v42, 0  ;;  %v2066_v40 = vsel %vm1491_vm10, %v2044_v38, 0 }
 0x6bf   : > { %1753 = vmatpush.bf16.xpose.msrb.mxu2 %v1739_v18  ;;  %7730 = vmatpush.bf16.xpose.msra.mxu3 %v1739_v18 }
 0x6c0   : > { %v1710_v23 = vpop.permute.xlu0 %1709 }
 0x6c5   : > { %v2323_v39 = vpop.permute.xlu1 %2322  ;;  %v2042_v36 = vpop.permute.xlu2 %2041 }
 0x6c6   : > { %v2345_v17 = vsel %vm1491_vm10, %v2323_v39, 0  ;;  %v2063_v41 = vsel %vm1491_vm10, %v2042_v36, 0 }
 0x6c7   : > { %1754 = vmatpush.bf16.xpose.msrb.mxu2 %v1736_v8  ;;  %7731 = vmatpush.bf16.xpose.msra.mxu3 %v1736_v8 }
 0x6c8   : > { %v2325_v20 = vpop.permute.xlu0 %2324 }
 0x6c9   : > { %v2348_v37 = vsel %vm1491_vm10, %v2325_v20, 0 }
 0x6ca   : > { %2354 = vmatpush.bf16.xpose.msrb.mxu1 %v2348_v37 }
 0x6cd   : > { %v2321_v58 = vpop.permute.xlu1 %2320  ;;  %v2319_v11 = vpop.permute.xlu2 %2318 }
 0x6ce   : > { %6969 = vmatmul.msk.bf16.vlgmr.msrb.gmra.mxu2 %vm1491_vm10, %v1708_v16  ;;  %v2342_v47 = vsel %vm1491_vm10, %v2321_v58, 0  ;;  %v2339_v21 = vsel %vm1491_vm10, %v2319_v11, 0 }
 0x6cf   : > { %2075 = vmatpush.bf16.xpose.msra.mxu2 %v2069_v10 }
 0x6d0   : > { %v1714_v19 = vpop.permute.xlu0 %1713 }
 0x6d1   : > { %6972 = vmatmul.msk.bf16.vlgmr.msra.gmra.mxu3 %vm1491_vm10, %v1714_v19 }
 0x6d2   : > { %2355 = vmatpush.bf16.xpose.msrb.mxu1 %v2345_v17 }
 0x6d5   : > { %v2032_v44 = vpop.permute.xlu1 %2031  ;;  %v2034_v45 = vpop.permute.xlu2 %2033 }
 0x6d7   : > { %2076 = vmatpush.bf16.xpose.msra.mxu2 %v2066_v40 }
 0x6d8   : > { %v2040_v6 = vpop.permute.xlu0 %2039 }
 0x6d9   : > { %v2060_v43 = vsel %vm1491_vm10, %v2040_v6, 0 }
 0x6da   : > { %2356 = vmatpush.bf16.xpose.msrb.mxu1 %v2342_v47 }
 0x6dd   : > { %v2313_v60 = vpop.permute.xlu1 %2312  ;;  %v2315_v31 = vpop.permute.xlu2 %2314 }
 0x6de   : > { %6970 = vmatmul.msk.bf16.gmra.mxu2 %vm1491_vm10, %v1710_v23 }
 0x6df   : > { %2077 = vmatpush.bf16.xpose.msra.mxu2 %v2063_v41 }
 0x6e0   : > { %v2311_v55 = vpop.permute.xlu0 %2310 }
 0x6e2   : > { %2357 = vmatpush.bf16.xpose.msrb.mxu1 %v2339_v21 }
 0x6e5   : > { %v2038_v30 = vpop.permute.xlu1 %2037 }
 0x6e7   : > { %2078 = vmatpush.bf16.xpose.msra.mxu2 %v2060_v43 }
 0x6e8   : > { %v2036_v26 = vpop.permute.xlu0 %2035 }
 0x6ee   : > { %6971 = vmatmul.msk.bf16.gmra.mxu2 %vm1491_vm10, %v1712_v22 }
 0x6f0   : > { %v2317_v23 = vpop.permute.xlu0 %2316 }
 0x6fe   : > { %v1683_v52 = vpop.f32.mrf.mxu0  ;;  %7001 = vmatmul.msk.bf16.vlgmr.msra.gmra.mxu2 %vm1491_vm10, %v2032_v44 }
 0x706   : > { %v1685_v25 = vpop.f32.mrf.mxu0 }
 0x707   : > { %v1703_v48 = vpack.c.bf16 %v1685_v25, %v1683_v52 }
 0x709   : > { %6997 = vmatmul.msk.bf16.vlgmr.msra.gmra.mxu1 %vm1491_vm10, %v1703_v48 }
 0x70e   : > { %v1688_v7 = vpop.f32.mrf.mxu1  ;;  %7002 = vmatmul.msk.bf16.gmra.mxu2 %vm1491_vm10, %v2034_v45 }
 0x716   : > { %v1690_v57 = vpop.f32.mrf.mxu1 }
 0x717   : > { %v1704_v59 = vpack.c.bf16 %v1690_v57, %v1688_v7 }
 0x719   : > { %6998 = vmatmul.msk.bf16.gmra.mxu1 %vm1491_vm10, %v1704_v59 }
 0x71e   : > { %v1693_v51 = vpop.f32.mrf.mxu1  ;;  %7003 = vmatmul.msk.bf16.gmra.mxu2 %vm1491_vm10, %v2036_v26 }
 0x726   : > { %v1695_v56 = vpop.f32.mrf.mxu1 }
 0x727   : > { %v1705_v34 = vpack.c.bf16 %v1695_v56, %v1693_v51 }
 0x729   : > { %6999 = vmatmul.msk.bf16.gmra.mxu1 %vm1491_vm10, %v1705_v34 }
 0x72e   : > { %v1698_v63 = vpop.f32.mrf.mxu1  ;;  %7004 = vmatmul.msk.bf16.gmra.mxu2 %vm1491_vm10, %v2038_v30 }
 0x736   : > { %v1700_v0 = vpop.f32.mrf.mxu1 }
 0x737   : > { %v1706_v13 = vpack.c.bf16 %v1700_v0, %v1698_v63 }
 0x739   : > { %7000 = vmatmul.msk.bf16.gmra.mxu1 %vm1491_vm10, %v1706_v13 }
 0x749   : > { %7021 = vmatmul.msk.bf16.vlgmr.msrb.gmra.mxu1 %vm1491_vm10, %v2311_v55 }
 0x751   : > { %v1756_v24 = vpop.f32.mrf.mxu2 }
 0x752   : > { %v1776_v1 = vsel %vm1545_vm11, %v1756_v24, -inf }
 0x753   : > { %1777 = vmax.xlane.f32.xlu2 %v1776_v1 }
 0x754   : > { %v1771_v15 = vpop.f32.mrf.mxu3 }
 0x755   : > { %v1794_v27 = vsel %vm1545_vm11, %v1771_v15, -inf }
 0x759   : > { %v9216_v12 = vpop.f32.mrf.mxu2  ;;  %7022 = vmatmul.msk.bf16.gmra.mxu1 %vm1491_vm10, %v2313_v60 }
 0x75a   : > { %v1779_v61 = vsel %vm1545_vm11, %v9216_v12, -inf }
 0x75b   : > { %1780 = vmax.xlane.f32.xlu1 %v1779_v61 }
 0x75c   : > { %v9232_v22 = vpop.f32.mrf.mxu3 }
 0x75d   : > { %v1797_v8 = vsel %vm1545_vm11, %v9232_v22, -inf }
 0x761   : > { %v9221_v32 = vpop.f32.mrf.mxu2 }
 0x762   : > { %v1782_v3 = vsel %vm1545_vm11, %v9221_v32, -inf }
 0x763   : > { %1783 = vmax.xlane.f32.xlu0 %v1782_v3 }
 0x769   : > { %v1763_v28 = vpop.f32.mrf.mxu2  ;;  %7023 = vmatmul.msk.bf16.gmra.mxu1 %vm1491_vm10, %v2315_v31 }
 0x76a   : > { %v1785_v9 = vsel %vm1545_vm11, %v1763_v28, -inf }
 0x76b   : > { %1786 = vmax.xlane.f32.xlu2 %v1785_v9 }
 0x771   : > { %v9227_v16 = vpop.f32.mrf.mxu2 }
 0x772   : > { %v1788_v18 = vsel %vm1545_vm11, %v9227_v16, -inf }
 0x773   : > { %1795 = vmax.xlane.f32.xlu2 %v1794_v27  ;;  %1789 = vmax.xlane.f32.xlu1 %v1788_v18 }
 0x779   : > { %v9234_v42 = vpop.f32.mrf.mxu2  ;;  %7024 = vmatmul.msk.bf16.gmra.mxu1 %vm1491_vm10, %v2317_v23 }
 0x77a   : > { %v1791_v10 = vsel %vm1545_vm11, %v9234_v42, -inf }
 0x77b   : > { %1798 = vmax.xlane.f32.xlu1 %v1797_v8  ;;  %1792 = vmax.xlane.f32.xlu0 %v1791_v10 }
 0x781   : > { %v9241_v20 = vpop.f32.mrf.mxu2 }
 0x782   : > { %v2100_v43 = vsel %vm1545_vm11, %v9241_v20, -inf }
 0x786   : > { %v9261_v17 = vpop.f32.mrf.mxu1 }
 0x789   : > { %v9243_v37 = vpop.f32.mrf.mxu2 }
 0x78a   : > { %v2103_v41 = vsel %vm1545_vm11, %v9243_v37, -inf }
 0x78b   : > { %1872 = vrot.lane.b32.xlu2 %v9035_v33, %s11978_s29 }
 0x78e   : > { %v9265_v58 = vpop.f32.mrf.mxu1 }
 0x78f   : > { %1874 = vrot.lane.b32.xlu0 %v9025_v46, %s11978_s29 }
 0x791   : > { %v9249_v38 = vpop.f32.mrf.mxu2 }
 0x794   : > { %1870 = vrot.lane.b32.xlu1 %v9042_v62, %s11978_s29 }
 0x796   : > { %v9273_v11 = vpop.f32.mrf.mxu1 }
 0x799   : > { %v9253_v39 = vpop.f32.mrf.mxu2 }
 0x79c   : > { %1868 = vrot.lane.b32.xlu1 %v9051_v49, %s11978_s29  ;;  %s7715_s29 = sshll.u32 %s8460_s25, 6 }
 0x79d   : > { %s6760_s1 = scalar_lea.hbm %s11972_s16, %s7715_s29 }
 0x79e   : > { %v9277_v25 = vpop.f32.mrf.mxu1 }
 0x7a1   : > { %v9257_v40 = vpop.f32.mrf.mxu2 }
 0x7a6   : > { %v9285_v7 = vpop.f32.mrf.mxu1 }
 0x7a9   : > { %v9259_v19 = vpop.f32.mrf.mxu2 }
 0x7ae   : > { %v9287_v57 = vpop.f32.mrf.mxu1 }
 0x7b1   : > { %v9263_v36 = vpop.f32.mrf.mxu2 }
 0x7b6   : > { %v9293_v56 = vpop.f32.mrf.mxu1 }
 0x7b9   : > { %2104 = vmax.xlane.f32.xlu0 %v2103_v41  ;;  %v9269_v47 = vpop.f32.mrf.mxu2 }
 0x7ba   : > { %v2121_v6 = vsel %vm1545_vm11, %v9269_v47, -inf }
 0x7bb   : > { %2122 = vmax.xlane.f32.xlu2 %v2121_v6 }
 0x7be   : > { %v9300_v61 = vpop.f32.mrf.mxu1 }
 0x7c6   : > { %v1778_v21 = vpop.xlane.xlu2 %1777  ;;  %2101 = vmax.xlane.f32.xlu1 %v2100_v43  ;;  %v9309_v18 = vpop.f32.mrf.mxu1 }
 0x7c7   : > { %v1800_v44 = vsub.f32 %v1756_v24, %v1778_v21 }
 0x7c9   : > { %v1808_v52 = vmul.f32 1.442695, %v1800_v44 }
 0x7cb   : > { %7868 = vpow2.f32 %v1808_v52 }
 0x7cd   : > { %2477 = vrot.lane.b32.xlu0 %v9025_v46, %s11974_s30 }
 0x7ce   : > { %v9291_v59 = vpop.xlane.xlu1 %1780 }
 0x7d1   : > { %v9281_v48 = vpop.eup %7868 }
 0x7d2   : > { %v1824_v45 = vsel %vm1545_vm11, %v9281_v48, 0.0 }
 0x7d3   : > { %1825 = vadd.xlane.f32.xlu2 %v1824_v45  ;;  %v9323_v45 = vpop.f32.mrf.mxu1 }
 0x7d6   : > { %v1784_v13 = vpop.xlane.xlu0 %1783 }
 0x7d7   : > { %v1802_v23 = vsub.f32 %v9221_v32, %v1784_v13 }
 0x7d9   : > { %v1812_v10 = vmul.f32 1.442695, %v1802_v23 }
 0x7de   : > { %v1787_v55 = vpop.xlane.xlu2 %1786 }
 0x7df   : > { %2198 = vrot.lane.b32.xlu1 %v9025_v46, %s11976_s23  ;;  %v1803_v34 = vsub.f32 %v1763_v28, %v1787_v55  ;;  %v2106_v28 = vsel %vm1545_vm11, %v9249_v38, -inf  ;;  %v2109_v55 = vsel %vm1545_vm11, %v9253_v39, -inf }
 0x7e1   : > { %v1814_v63 = vmul.f32 1.442695, %v1803_v34 }
 0x7e6   : > { %v1796_v26 = vpop.xlane.xlu2 %1795  ;;  %v1790_v60 = vpop.xlane.xlu1 %1789 }
 0x7e7   : > { %v1806_v51 = vsub.f32 %v1771_v15, %v1796_v26  ;;  %v1804_v24 = vsub.f32 %v9227_v16, %v1790_v60 }
 0x7e9   : > { %v1820_v30 = vmul.f32 1.442695, %v1806_v51  ;;  %v1816_v3 = vmul.f32 1.442695, %v1804_v24  ;;  %v2382_v51 = vsel %vm1545_vm11, %v9323_v45, -inf }
 0x7eb   : > { %7870 = vpow2.f32 %v1820_v30  ;;  %v1801_v30 = vsub.f32 %v9216_v12, %v9291_v59  ;;  %v2379_v12 = vsel %vm1545_vm11, %v9309_v18, -inf }
 0x7ec   : > { %7872 = vpow2.f32 %v1814_v63  ;;  %v2115_v63 = vsel %vm1545_vm11, %v9259_v19, -inf }
 0x7ed   : > { %7874 = vpow2.f32 %v1816_v3  ;;  %v1810_v24 = vmul.f32 1.442695, %v1801_v30 }
 0x7ee   : > { %v1799_v1 = vpop.xlane.xlu1 %1798  ;;  %v1793_v15 = vpop.xlane.xlu0 %1792 }
 0x7ef   : > { %v1807_v31 = vsub.f32 %v9232_v22, %v1799_v1  ;;  %v2112_v22 = vsel %vm1545_vm11, %v9257_v40, -inf  ;;  %v1873_v21 = vpop.permute.xlu2 %1872  ;;  %v1805_v32 = vsub.f32 %v9234_v42, %v1793_v15 }
 0x7f1   : > { %v9295_v0 = vpop.eup %7870  ;;  %v1822_v27 = vmul.f32 1.442695, %v1807_v31  ;;  %v1818_v26 = vmul.f32 1.442695, %v1805_v32  ;;  %v9349_v31 = vpop.f32.mrf.mxu1 }
 0x7f2   : > { %v1842_v46 = vsel %vm1545_vm11, %v9295_v0, 0.0  ;;  %v9305_v9 = vpop.eup %7872 }
 0x7f3   : > { %1843 = vadd.xlane.f32.xlu2 %v1842_v46  ;;  %v1833_v16 = vsel %vm1545_vm11, %v9305_v9, 0.0  ;;  %7876 = vpow2.f32 %v1822_v27  ;;  %v9314_v8 = vpop.eup %7874  ;;  %v2118_v46 = vsel %vm1545_vm11, %v9263_v36, -inf }
 0x7f4   : > { %v1836_v6 = vsel %vm1545_vm11, %v9314_v8, 0.0  ;;  %7878 = vpow2.f32 %v1812_v10 }
 0x7f5   : > { %7880 = vpow2.f32 %v1818_v26 }
 0x7f6   : > { %7882 = vpow2.f32 %v1810_v24 }
 0x7f7   : > { %2107 = vmax.xlane.f32.xlu0 %v2106_v28  ;;  %v2385_v28 = vsel %vm1545_vm11, %v9349_v31, -inf }
 0x7f9   : > { %v9318_v43 = vpop.eup %7876 }
 0x7fa   : > { %v1845_v52 = vsel %vm1545_vm11, %v9318_v43, 0.0  ;;  %v9329_v60 = vpop.eup %7878 }
 0x7fb   : > { %1834 = vadd.xlane.f32.xlu2 %v1833_v16  ;;  %v1830_v34 = vsel %vm1545_vm11, %v9329_v60, 0.0  ;;  %v9337_v13 = vpop.eup %7880 }
 0x7fc   : > { %v1839_v1 = vsel %vm1545_vm11, %v9337_v13, 0.0  ;;  %v9343_v3 = vpop.eup %7882 }
 0x7fd   : > { %v1827_v59 = vsel %vm1545_vm11, %v9343_v3, 0.0 }
 0x7ff   : > { %2113 = vmax.xlane.f32.xlu0 %v2112_v22 }
 0x801   : > { %v1875_v41 = vpop.permute.xlu0 %1874 }
 0x802   : > { %1896 = vmatpush.bf16.msrb.mxu3 %v1875_v41 }
 0x803   : > { %1837 = vadd.xlane.f32.xlu2 %v1836_v6  ;;  %v9364_v6 = vpop.f32.mrf.mxu1 }
 0x806   : > { %1897 = vmatpush.bf16.msrb.mxu3 %v1873_v21  ;;  %v1871_v44 = vpop.permute.xlu1 %1870 }
 0x807   : > { %1846 = vadd.xlane.f32.xlu0 %v1845_v52 }
 0x809   : > { %2110 = vmax.xlane.f32.xlu1 %v2109_v55 }
 0x80a   : > { %1898 = vmatpush.bf16.msrb.mxu3 %v1871_v44 }
 0x80b   : > { %2383 = vmax.xlane.f32.xlu2 %v2382_v51  ;;  %v9369_v52 = vpop.f32.mrf.mxu1 }
 0x80c   : > { %v2391_v30 = vsel %vm1545_vm11, %v9369_v52, -inf }
 0x80e   : > { %v1869_v42 = vpop.permute.xlu1 %1868 }
 0x80f   : > { %1831 = vadd.xlane.f32.xlu0 %v1830_v34  ;;  %1899 = vmatpush.bf16.msrb.mxu3 %v1869_v42 }
 0x811   : > { %2116 = vmax.xlane.f32.xlu1 %v2115_v63 }
 0x813   : > { %v9377_v51 = vpop.f32.mrf.mxu1 }
 0x817   : > { %1840 = vadd.xlane.f32.xlu0 %v1839_v1 }
 0x819   : > { %2119 = vmax.xlane.f32.xlu1 %v2118_v46 }
 0x81f   : > { %2380 = vmax.xlane.f32.xlu0 %v2379_v12 }
 0x821   : > { %1828 = vadd.xlane.f32.xlu1 %v1827_v59 }
 0x827   : > { %2386 = vmax.xlane.f32.xlu0 %v2385_v28 }
 0x82c   : > { %v2105_v15 = vpop.xlane.xlu0 %2104 }
 0x82d   : > { %v2125_v21 = vsub.f32 %v9243_v37, %v2105_v15 }
 0x82e   : > { %v9367_v44 = vpop.xlane.xlu2 %2122 }
 0x82f   : > { %v2134_v32 = vmul.f32 1.442695, %v2125_v21 }
 0x839   : > { %v2102_v27 = vpop.xlane.xlu1 %2101 }
 0x83a   : > { %v2124_v16 = vsub.f32 %v9241_v20, %v2102_v27  ;;  %2473 = vrot.lane.b32.xlu1 %v9042_v62, %s11974_s30 }
 0x83b   : > { %2475 = vrot.lane.b32.xlu0 %v9035_v33, %s11974_s30 }
 0x83c   : > { %v2132_v23 = vmul.f32 1.442695, %v2124_v16 }
 0x83e   : > { %7884 = vpow2.f32 %v2132_v23 }
 0x83f   : > { %v2478_v22 = vpop.permute.xlu0 %2477  ;;  %7886 = vpow2.f32 %v2134_v32 }
 0x840   : > { %2499 = vmatpush.bf16.msrb.mxu2 %v2478_v22 }
 0x842   : > { %2194 = vrot.lane.b32.xlu1 %v9042_v62, %s11976_s23 }
 0x844   : > { %v9360_v10 = vpop.eup %7884 }
 0x845   : > { %v2148_v41 = vsel %vm1545_vm11, %v9360_v10, 0.0  ;;  %v9373_v62 = vpop.eup %7886 }
 0x846   : > { %2149 = vadd.xlane.f32.xlu2 %v2148_v41  ;;  %v1826_v55 = vpop.xlane.xlu2 %1825  ;;  %v2151_v26 = vsel %vm1545_vm11, %v9373_v62, 0.0  ;;  %v2388_v41 = vsel %vm1545_vm11, %v9364_v6, -inf }
 0x851   : > { %v2199_v20 = vpop.permute.xlu1 %2198 }
 0x852   : > { %2220 = vmatpush.bf16.msra.mxu3 %v2199_v20 }
 0x85e   : > { %2196 = vrot.lane.b32.xlu2 %v9035_v33, %s11976_s23  ;;  %v9384_v33 = vpop.f32.mrf.mxu1 }
 0x85f   : > { %v2397_v1 = vsel %vm1545_vm11, %v9384_v33, -inf }
 0x865   : > { %2152 = vadd.xlane.f32.xlu0 %v2151_v26 }
 0x866   : > { %v9379_v37 = vpop.xlane.xlu2 %1843 }
 0x86a   : > { %v2108_v42 = vpop.xlane.xlu0 %2107 }
 0x86b   : > { %v2126_v34 = vsub.f32 %v9249_v38, %v2108_v42 }
 0x86c   : > { %2392 = vmax.xlane.f32.xlu1 %v2391_v30 }
 0x86d   : > { %v2136_v63 = vmul.f32 1.442695, %v2126_v34  ;;  %v2394_v34 = vsel %vm1545_vm11, %v9377_v51, -inf }
 0x86e   : > { %v1835_v12 = vpop.xlane.xlu2 %1834 }
 0x86f   : > { %7888 = vpow2.f32 %v2136_v63 }
 0x872   : > { %v9386_v24 = vpop.xlane.xlu0 %2113 }
 0x874   : > { %2398 = vmax.xlane.f32.xlu1 %v2397_v1  ;;  %v9410_v1 = vpop.f32.mrf.mxu1 }
 0x875   : > { %v9390_v46 = vpop.eup %7888 }
 0x876   : > { %v2154_v38 = vsel %vm1545_vm11, %v9390_v46, 0.0  ;;  %v1838_v27 = vpop.xlane.xlu2 %1837 }
 0x877   : > { %2155 = vadd.xlane.f32.xlu0 %v2154_v38 }
 0x87a   : > { %v9394_v59 = vpop.xlane.xlu0 %1846 }
 0x87c   : > { %v2111_v28 = vpop.xlane.xlu1 %2110 }
 0x87d   : > { %v2127_v15 = vsub.f32 %v9253_v39, %v2111_v28 }
 0x87e   : > { %v2384_v32 = vpop.xlane.xlu2 %2383 }
 0x87f   : > { %v2138_v16 = vmul.f32 1.442695, %v2127_v15  ;;  %v2404_v39 = vsub.f32 %v9323_v45, %v2384_v32  ;;  %v2400_v45 = vsel %vm1545_vm11, %v9410_v1, -inf }
 0x881   : > { %7890 = vpow2.f32 %v2138_v16  ;;  %v2413_v30 = vmul.f32 1.442695, %v2404_v39 }
 0x882   : > { %v1832_v23 = vpop.xlane.xlu0 %1831  ;;  %7892 = vrcp.f32 %v1826_v55 }
 0x883   : > { %7894 = vpow2.f32 %v2413_v30 }
 0x884   : > { %v9397_v22 = vpop.xlane.xlu1 %2116 }
 0x887   : > { %v9401_v20 = vpop.eup %7890  ;;  %2389 = vmax.xlane.f32.xlu2 %v2388_v41 }
 0x888   : > { %v2157_v21 = vsel %vm1545_vm11, %v9401_v20, 0.0  ;;  %v7893_v16 = vpop.eup %7892 }
 0x889   : > { %2158 = vadd.xlane.f32.xlu0 %v2157_v21  ;;  %v9415_v41 = vpop.eup %7894  ;;  %v1856_v32 = vmul.f32 %v7893_v16, %v9281_v48 }
 0x88a   : > { %v1841_v26 = vpop.xlane.xlu0 %1840  ;;  %v2430_v30 = vsel %vm1545_vm11, %v9415_v41, 0.0 }
 0x88c   : > { %v9406_v42 = vpop.xlane.xlu1 %2119 }
 0x88f   : > { %2395 = vmax.xlane.f32.xlu2 %v2394_v34 }
 0x892   : > { %v2381_v63 = vpop.xlane.xlu0 %2380 }
 0x893   : > { %v2403_v38 = vsub.f32 %v9309_v18, %v2381_v63 }
 0x894   : > { %v1829_v28 = vpop.xlane.xlu1 %1828 }
 0x895   : > { %v2411_v15 = vmul.f32 1.442695, %v2403_v38  ;;  %7896 = vrcp.f32 %v1829_v28 }
 0x897   : > { %7898 = vpow2.f32 %v2411_v15  ;;  %2401 = vmax.xlane.f32.xlu2 %v2400_v45 }
 0x898   : > { %7900 = vrcp.f32 %v1832_v23 }
 0x899   : > { %7902 = vrcp.f32 %v1835_v12 }
 0x89a   : > { %v2387_v63 = vpop.xlane.xlu0 %2386  ;;  %7904 = vrcp.f32 %v1841_v26 }
 0x89b   : > { %v7897_v21 = vpop.eup %7896  ;;  %7906 = vrcp.f32 %v1838_v27 }
 0x89c   : > { %v1857_v39 = vmul.f32 %v7897_v21, %v9343_v3  ;;  %7908 = vrcp.f32 %v9394_v59  ;;  %v2129_v59 = vsub.f32 %v9259_v19, %v9397_v22 }
 0x89d   : > { %v9419_v55 = vpop.eup %7898  ;;  %7910 = vrcp.f32 %v9379_v37 }
 0x89e   : > { %v1864_v18 = vpack.c.bf16 %v1857_v39, %v1856_v32  ;;  %v2427_v34 = vsel %vm1545_vm11, %v9419_v55, 0.0  ;;  %v7901_v38 = vpop.eup %7900 }
 0x89f   : > { %2428 = vadd.xlane.f32.xlu1 %v2427_v34  ;;  %2431 = vadd.xlane.f32.xlu2 %v2430_v30  ;;  %v7903_v48 = vpop.eup %7902  ;;  %v1858_v3 = vmul.f32 %v7901_v38, %v9329_v60  ;;  %v2142_v38 = vmul.f32 1.442695, %v2129_v59 }
 0x8a0   : > { %6973 = vmatmul.msk.bf16.vlgmr.msrb.gmra.mxu3 %vm1545_vm11, %v1864_v18  ;;  %v1859_v28 = vmul.f32 %v7903_v48, %v9305_v9  ;;  %v7905_v21 = vpop.eup %7904  ;;  %v2130_v48 = vsub.f32 %v9263_v36, %v9406_v42 }
 0x8a1   : > { %v7907_v12 = vpop.eup %7906  ;;  %v1861_v9 = vmul.f32 %v7905_v21, %v9337_v13  ;;  %v2405_v13 = vsub.f32 %v9349_v31, %v2387_v63 }
 0x8a2   : > { %v1865_v45 = vpack.c.bf16 %v1859_v28, %v1858_v3  ;;  %v1860_v23 = vmul.f32 %v7907_v12, %v9314_v8  ;;  %v7909_v39 = vpop.eup %7908  ;;  %v2144_v63 = vmul.f32 1.442695, %v2130_v48 }
 0x8a3   : > { %v1863_v18 = vmul.f32 %v7909_v39, %v9318_v43  ;;  %v2415_v30 = vmul.f32 1.442695, %v2405_v13 }
 0x8a4   : > { %v1866_v32 = vpack.c.bf16 %v1861_v9, %v1860_v23 }
 0x8a5   : > { %7912 = vpow2.f32 %v2415_v30 }
 0x8a6   : > { %7914 = vpow2.f32 %v2142_v38 }
 0x8ac   : > { %v2474_v16 = vpop.permute.xlu1 %2473 }
 0x8ad   : > { %v2476_v15 = vpop.permute.xlu0 %2475 }
 0x8ae   : > { %2500 = vmatpush.bf16.msrb.mxu2 %v2476_v15 }
 0x8b0   : > { %6974 = vmatmul.msk.bf16.gmra.mxu3 %vm1545_vm11, %v1865_v45 }
 0x8b2   : > { %2501 = vmatpush.bf16.msrb.mxu2 %v2474_v16 }
 0x8b4   : > { %v2195_v26 = vpop.permute.xlu1 %2194 }
 0x8b7   : > { %2471 = vrot.lane.b32.xlu2 %v9051_v49, %s11974_s30  ;;  %s8304_s30 = scalar_lea.hbm %s11972_s16, 128 }
 0x8b8   : > { %2192 = vrot.lane.b32.xlu1 %v9051_v49, %s11976_s23  ;;  %v7911_v49 = vpop.eup %7910 }
 0x8b9   : > { %v9433_v60 = vpop.xlane.xlu2 %2149  ;;  %v1862_v34 = vmul.f32 %v7911_v49, %v9295_v0  ;;  %v9446_v37 = vpop.eup %7912 }
 0x8ba   : > { %v2433_v0 = vsel %vm1545_vm11, %v9446_v37, 0.0  ;;  %v9453_v28 = vpop.eup %7914 }
 0x8bb   : > { %v1867_v8 = vpack.c.bf16 %v1863_v18, %v1862_v34  ;;  %v2163_v19 = vsel %vm1545_vm11, %v9453_v28, 0.0 }
 0x8c0   : > { %6975 = vmatmul.msk.bf16.gmra.mxu3 %vm1545_vm11, %v1866_v32 }
 0x8c1   : > { %v2197_v27 = vpop.permute.xlu2 %2196 }
 0x8c2   : > { %2221 = vmatpush.bf16.msra.mxu3 %v2197_v27  ;;  %v7614_v27 = vld [vmem:[%s11964_s8 + $0x18] sm:$0xff] }
 0x8c3   : > { %1955 = vmatpush.bf16.msrb.mxu0 %v7614_v27 }
 0x8c6   : > { %2222 = vmatpush.bf16.msra.mxu3 %v2195_v26  ;;  %v2131_v26 = vsub.f32 %v9269_v47, %v9367_v44  ;;  %v7613_v47 = vld [vmem:[%s11964_s8 + $0x10] sm:$0xff] }
 0x8c7   : > { %1956 = vmatpush.bf16.msrb.mxu0 %v7613_v47 }
 0x8d0   : > { %6976 = vmatmul.msk.bf16.gmra.mxu3 %vm1545_vm11, %v1867_v8 }
 0x8df   : > { %v2393_v43 = vpop.xlane.xlu1 %2392 }
 0x8e0   : > { %v2407_v31 = vsub.f32 %v9369_v52, %v2393_v43  ;;  %2434 = vadd.xlane.f32.xlu2 %v2433_v0 }
 0x8e2   : > { %v2419_v3 = vmul.f32 1.442695, %v2407_v31 }
 0x8e4   : > { %7916 = vpow2.f32 %v2419_v3 }
 0x8e5   : > { %7918 = vpow2.f32 %v2144_v63 }
 0x8e7   : > { %v2399_v15 = vpop.xlane.xlu1 %2398 }
 0x8e8   : > { %2164 = vadd.xlane.f32.xlu2 %v2163_v19  ;;  %v2409_v21 = vsub.f32 %v9384_v33, %v2399_v15  ;;  %v2153_v15 = vpop.xlane.xlu0 %2152 }
 0x8ea   : > { %v9457_v22 = vpop.eup %7916  ;;  %v2423_v9 = vmul.f32 1.442695, %v2409_v21 }
 0x8eb   : > { %v2439_v36 = vsel %vm1545_vm11, %v9457_v22, 0.0  ;;  %v9461_v42 = vpop.eup %7918 }
 0x8ec   : > { %2440 = vadd.xlane.f32.xlu0 %v2439_v36  ;;  %v2166_v52 = vsel %vm1545_vm11, %v9461_v42, 0.0 }
 0x8f0   : > { %2167 = vadd.xlane.f32.xlu2 %v2166_v52 }
 0x8fa   : > { %v2390_v45 = vpop.xlane.xlu2 %2389 }
 0x8fb   : > { %v2406_v16 = vsub.f32 %v9364_v6, %v2390_v45  ;;  %v2128_v6 = vsub.f32 %v9257_v40, %v9386_v24 }
 0x8fd   : > { %v2417_v12 = vmul.f32 1.442695, %v2406_v16  ;;  %v2140_v18 = vmul.f32 1.442695, %v2128_v6 }
 0x8ff   : > { %7920 = vpow2.f32 %v2417_v12  ;;  %v2156_v12 = vpop.xlane.xlu0 %2155 }
 0x900   : > { %7922 = vpow2.f32 %v2423_v9 }
 0x902   : > { %v2396_v23 = vpop.xlane.xlu2 %2395 }
 0x903   : > { %v2408_v32 = vsub.f32 %v9377_v51, %v2396_v23  ;;  %v2146_v51 = vmul.f32 1.442695, %v2131_v26 }
 0x905   : > { %v9473_v39 = vpop.eup %7920  ;;  %v2421_v33 = vmul.f32 1.442695, %v2408_v32 }
 0x906   : > { %v2436_v49 = vsel %vm1545_vm11, %v9473_v39, 0.0  ;;  %v9482_v44 = vpop.eup %7922 }
 0x907   : > { %7924 = vpow2.f32 %v2421_v33  ;;  %2437 = vadd.xlane.f32.xlu1 %v2436_v49  ;;  %v2445_v8 = vsel %vm1545_vm11, %v9482_v44, 0.0  ;;  %v2159_v6 = vpop.xlane.xlu0 %2158 }
 0x908   : > { %7926 = vpow2.f32 %v2146_v51 }
 0x909   : > { %7928 = vpow2.f32 %v2140_v18 }
 0x90a   : > { %v2402_v34 = vpop.xlane.xlu2 %2401 }
 0x90b   : > { %v2410_v24 = vsub.f32 %v9410_v1, %v2402_v34 }
 0x90d   : > { %v9484_v40 = vpop.eup %7924  ;;  %v2425_v30 = vmul.f32 1.442695, %v2410_v24 }
 0x90e   : > { %v2442_v13 = vsel %vm1545_vm11, %v9484_v40, 0.0  ;;  %v9491_v59 = vpop.eup %7926 }
 0x90f   : > { %2443 = vadd.xlane.f32.xlu0 %v2442_v13  ;;  %2446 = vadd.xlane.f32.xlu1 %v2445_v8  ;;  %v9493_v43 = vpop.eup %7928  ;;  %v2169_v0 = vsel %vm1545_vm11, %v9491_v59, 0.0 }
 0x910   : > { %v2160_v1 = vsel %vm1545_vm11, %v9493_v43, 0.0 }
 0x912   : > { %v2432_v38 = vpop.xlane.xlu2 %2431  ;;  %v2429_v48 = vpop.xlane.xlu1 %2428 }
 0x913   : > { %7930 = vrcp.f32 %v2432_v38 }
 0x914   : > { %7932 = vrcp.f32 %v2429_v48 }
 0x915   : > { %7934 = vpow2.f32 %v2425_v30 }
 0x916   : > { %7936 = vrcp.f32 %v2153_v15 }
 0x917   : > { %2161 = vadd.xlane.f32.xlu0 %v2160_v1  ;;  %2170 = vadd.xlane.f32.xlu1 %v2169_v0  ;;  %7938 = vrcp.f32 %v9433_v60  ;;  %v7618_v0 = vld [vmem:[%s11964_s8 + $0x38] sm:$0xff] }
 0x918   : > { %7940 = vrcp.f32 %v2159_v6 }
 0x919   : > { %v7931_v31 = vpop.eup %7930  ;;  %7942 = vrcp.f32 %v2156_v12 }
 0x91a   : > { %v7933_v63 = vpop.eup %7932  ;;  %v2460_v3 = vmul.f32 %v7931_v31, %v9415_v41  ;;  %v2472_v19 = vpop.permute.xlu2 %2471  ;;  %v7616_v31 = vld [vmem:[%s11964_s8 + $0x28] sm:$0xff] }
 0x91b   : > { %v9500_v36 = vpop.eup %7934  ;;  %v2459_v52 = vmul.f32 %v7933_v63, %v9419_v55  ;;  %2502 = vmatpush.bf16.msrb.mxu2 %v2472_v19  ;;  %2279 = vmatpush.bf16.msra.mxu0 %v7616_v31 }
 0x91c   : > { %v2448_v16 = vsel %vm1545_vm11, %v9500_v36, 0.0  ;;  %v7937_v41 = vpop.eup %7936 }
 0x91d   : > { %v2467_v45 = vpack.c.bf16 %v2460_v3, %v2459_v52  ;;  %v7939_v9 = vpop.eup %7938  ;;  %v2181_v23 = vmul.f32 %v7937_v41, %v9373_v62 }
 0x91e   : > { %v2180_v55 = vmul.f32 %v7939_v9, %v9360_v10  ;;  %v7941_v49 = vpop.eup %7940 }
 0x91f   : > { %7025 = vmatmul.msk.bf16.vlgmr.msrb.gmra.mxu2 %vm1545_vm11, %v2467_v45  ;;  %2449 = vadd.xlane.f32.xlu0 %v2448_v16  ;;  %v7943_v51 = vpop.eup %7942  ;;  %v2183_v18 = vmul.f32 %v7941_v49, %v9401_v20 }
 0x920   : > { %v2188_v26 = vpack.c.bf16 %v2181_v23, %v2180_v55  ;;  %v2182_v62 = vmul.f32 %v7943_v51, %v9390_v46 }
 0x922   : > { %v2189_v47 = vpack.c.bf16 %v2183_v18, %v2182_v62 }
 0x923   : > { %v1901_v21 = vpop.f32.mrf.mxu3 }
 0x92a   : > { %v2193_v32 = vpop.permute.xlu1 %2192 }
 0x92b   : > { %v1903_v27 = vpop.f32.mrf.mxu3  ;;  %2223 = vmatpush.bf16.msra.mxu3 %v2193_v32 }
 0x92c   : > { %v1921_v33 = vpack.c.bf16 %v1903_v27, %v1901_v21 }
 0x92e   : > { %6985 = vmatmul.msk.bf16.vlgmr.msrb.gmra.mxu0 %vm1491_vm10, %v1921_v33  ;;  %7005 = vmatmul.msk.bf16.vlgmr.msra.gmra.mxu3 %vm1545_vm11, %v2188_v26  ;;  %v7617_v26 = vld [vmem:[%s11964_s8 + $0x30] sm:$0xff] }
 0x92f   : > { %2558 = vmatpush.bf16.msrb.mxu3 %v7618_v0 }
 0x933   : > { %v1906_v60 = vpop.f32.mrf.mxu3  ;;  %2559 = vmatpush.bf16.msrb.mxu3 %v7617_v26 }
 0x93b   : > { %v1908_v10 = vpop.f32.mrf.mxu3 }
 0x93c   : > { %v1922_v34 = vpack.c.bf16 %v1908_v10, %v1906_v60 }
 0x93e   : > { %6986 = vmatmul.msk.bf16.gmra.mxu0 %vm1491_vm10, %v1922_v34  ;;  %7006 = vmatmul.msk.bf16.gmra.mxu3 %vm1545_vm11, %v2189_v47 }
 0x943   : > { %v1911_v24 = vpop.f32.mrf.mxu3 }
 0x94b   : > { %v1913_v13 = vpop.f32.mrf.mxu3 }
 0x94c   : > { %v1923_v8 = vpack.c.bf16 %v1913_v13, %v1911_v24 }
 0x94e   : > { %6987 = vmatmul.msk.bf16.gmra.mxu0 %vm1491_vm10, %v1923_v8 }
 0x953   : > { %v1916_v30 = vpop.f32.mrf.mxu3  ;;  %v2435_v20 = vpop.xlane.xlu2 %2434 }
 0x954   : > { %7944 = vrcp.f32 %v2435_v20 }
 0x95a   : > { %v7945_v63 = vpop.eup %7944 }
 0x95b   : > { %v1918_v38 = vpop.f32.mrf.mxu3  ;;  %v2461_v19 = vmul.f32 %v7945_v63, %v9446_v37  ;;  %v2165_v16 = vpop.xlane.xlu2 %2164 }
 0x95c   : > { %v1924_v48 = vpack.c.bf16 %v1918_v38, %v1916_v30 }
 0x95e   : > { %6988 = vmatmul.msk.bf16.gmra.mxu0 %vm1491_vm10, %v1924_v48 }
 0x95f   : > { %v2441_v46 = vpop.xlane.xlu0 %2440 }
 0x963   : > { %v2168_v51 = vpop.xlane.xlu2 %2167 }
 0x97a   : > { %v2438_v1 = vpop.xlane.xlu1 %2437 }
 0x97b   : > { %7946 = vrcp.f32 %v2438_v1 }
 0x981   : > { %v7947_v3 = vpop.eup %7946 }
 0x982   : > { %v2462_v52 = vmul.f32 %v7947_v3, %v9473_v39  ;;  %v2444_v15 = vpop.xlane.xlu0 %2443  ;;  %v2447_v21 = vpop.xlane.xlu1 %2446 }
 0x983   : > { %7948 = vrcp.f32 %v2444_v15 }
 0x984   : > { %v2468_v45 = vpack.c.bf16 %v2462_v52, %v2461_v19  ;;  %7950 = vrcp.f32 %v2165_v16 }
 0x985   : > { %7952 = vrcp.f32 %v2441_v46 }
 0x986   : > { %7026 = vmatmul.msk.bf16.gmra.mxu2 %vm1545_vm11, %v2468_v45 }
 0x989   : > { %v7949_v41 = vpop.eup %7948 }
 0x98a   : > { %v2162_v12 = vpop.xlane.xlu0 %2161  ;;  %v7951_v9 = vpop.eup %7950  ;;  %v2464_v55 = vmul.f32 %v7949_v41, %v9484_v40 }
 0x98b   : > { %7954 = vrcp.f32 %v2162_v12  ;;  %v7953_v23 = vpop.eup %7952  ;;  %v2185_v37 = vmul.f32 %v7951_v9, %v9453_v28  ;;  %v2171_v6 = vpop.xlane.xlu1 %2170  ;;  %v7615_v28 = vld [vmem:[%s11964_s8 + $0x20] sm:$0xff] }
 0x98c   : > { %v2463_v39 = vmul.f32 %v7953_v23, %v9457_v22  ;;  %7956 = vrcp.f32 %v2171_v6  ;;  %2280 = vmatpush.bf16.msra.mxu0 %v7615_v28  ;;  %v9558_v28 = vld [vmem:[%s11965_s9] ss:$0 sm:$0xff] }
 0x98e   : > { %v2469_v49 = vpack.c.bf16 %v2464_v55, %v2463_v39 }
 0x991   : > { %v7955_v32 = vpop.eup %7954 }
 0x992   : > { %v2184_v27 = vmul.f32 %v7955_v32, %v9493_v43  ;;  %v2450_v33 = vpop.xlane.xlu0 %2449  ;;  %v7957_v22 = vpop.eup %7956 }
 0x993   : > { %7958 = vrcp.f32 %v2450_v33  ;;  %v2187_v62 = vmul.f32 %v7957_v22, %v9491_v59 }
 0x994   : > { %v2190_v60 = vpack.c.bf16 %v2185_v37, %v2184_v27  ;;  %7960 = vrcp.f32 %v2168_v51 }
 0x995   : > { %7962 = vrcp.f32 %v2447_v21 }
 0x996   : > { %7007 = vmatmul.msk.bf16.gmra.mxu3 %vm1545_vm11, %v2190_v60  ;;  %7027 = vmatmul.msk.bf16.gmra.mxu2 %vm1545_vm11, %v2469_v49 }
 0x999   : > { %v7959_v40 = vpop.eup %7958 }
 0x99a   : > { %v7961_v43 = vpop.eup %7960  ;;  %v2466_v10 = vmul.f32 %v7959_v40, %v9500_v36 }
 0x99b   : > { %v7963_v18 = vpop.eup %7962  ;;  %v2186_v34 = vmul.f32 %v7961_v43, %v9461_v42 }
 0x99c   : > { %v2465_v47 = vmul.f32 %v7963_v18, %v9482_v44 }
 0x99d   : > { %v2191_v24 = vpack.c.bf16 %v2187_v62, %v2186_v34 }
 0x99e   : > { %v2470_v13 = vpack.c.bf16 %v2466_v10, %v2465_v47 }
 0x9a2   : > { %v2504_v8 = vpop.f32.mrf.mxu2 }
 0x9a6   : > { %7008 = vmatmul.msk.bf16.gmra.mxu3 %vm1545_vm11, %v2191_v24  ;;  %7028 = vmatmul.msk.bf16.gmra.mxu2 %vm1545_vm11, %v2470_v13 }
 0x9aa   : > { %v2506_v30 = vpop.f32.mrf.mxu2 }
 0x9ab   : > { %v2524_v48 = vpack.c.bf16 %v2506_v30, %v2504_v8  ;;  %v1958_v44 = vpop.f32.mrf.mxu0 }
 0x9ac   : > { %v2012_v33 = vadd.f32 %v9261_v17, %v1958_v44 }
 0x9b1   : > { %v2225_v38 = vpop.f32.mrf.mxu3 }
 0x9b3   : > { %v1960_v1 = vpop.f32.mrf.mxu0 }
 0x9b4   : > { %v2014_v43 = vadd.f32 %v9265_v58, %v1960_v1 }
 0x9b6   : > { %7037 = vmatmul.msk.bf16.vlgmr.msrb.gmra.mxu3 %vm1491_vm10, %v2524_v48 }
 0x9b9   : > { %v2227_v20 = vpop.f32.mrf.mxu3 }
 0x9ba   : > { %v2245_v59 = vpack.c.bf16 %v2227_v20, %v2225_v38 }
 0x9bb   : > { %v1963_v0 = vpop.f32.mrf.mxu0 }
 0x9bc   : > { %7017 = vmatmul.msk.bf16.vlgmr.msra.gmra.mxu0 %vm1491_vm10, %v2245_v59  ;;  %v2017_v8 = vadd.f32 %v9273_v11, %v1963_v0 }
 0x9c1   : > { %v2230_v36 = vpop.f32.mrf.mxu3 }
 0x9c3   : > { %v1965_v31 = vpop.f32.mrf.mxu0 }
 0x9c4   : > { %v2019_v20 = vadd.f32 %v9277_v25, %v1965_v31 }
 0x9c9   : > { %v2232_v42 = vpop.f32.mrf.mxu3 }
 0x9ca   : > { %v2246_v46 = vpack.c.bf16 %v2232_v42, %v2230_v36 }
 0x9cb   : > { %v1968_v19 = vpop.f32.mrf.mxu0 }
 0x9cc   : > { %7018 = vmatmul.msk.bf16.gmra.mxu0 %vm1491_vm10, %v2246_v46  ;;  %v2022_v11 = vadd.f32 %v9285_v7, %v1968_v19 }
 0x9d3   : > { %v1970_v16 = vpop.f32.mrf.mxu0 }
 0x9db   : > { %v1973_v23 = vpop.f32.mrf.mxu0 }
 0x9e3   : > { %v9550_v37 = vpop.f32.mrf.mxu0 }
 0xa09   : > { %v2509_v63 = vpop.f32.mrf.mxu2 }
 0xa11   : > { %v2511_v3 = vpop.f32.mrf.mxu2 }
 0xa12   : > { %v2525_v52 = vpack.c.bf16 %v2511_v3, %v2509_v63  ;;  %v2024_v3 = vadd.f32 %v9287_v57, %v1970_v16 }
 0xa14   : > { %7038 = vmatmul.msk.bf16.gmra.mxu3 %vm1491_vm10, %v2525_v52 }
 0xa19   : > { %v2235_v15 = vpop.f32.mrf.mxu3  ;;  %v2514_v45 = vpop.f32.mrf.mxu2 }
 0xa21   : > { %v2237_v21 = vpop.f32.mrf.mxu3  ;;  %v2516_v12 = vpop.f32.mrf.mxu2 }
 0xa22   : > { %v2247_v41 = vpack.c.bf16 %v2237_v21, %v2235_v15  ;;  %v2526_v9 = vpack.c.bf16 %v2516_v12, %v2514_v45  ;;  %v2027_v21 = vadd.f32 %v9293_v56, %v1973_v23 }
 0xa24   : > { %7019 = vmatmul.msk.bf16.gmra.mxu0 %vm1491_vm10, %v2247_v41  ;;  %7039 = vmatmul.msk.bf16.gmra.mxu3 %vm1491_vm10, %v2526_v9 }
 0xa29   : > { %v2240_v55 = vpop.f32.mrf.mxu3  ;;  %v2519_v32 = vpop.f32.mrf.mxu2 }
 0xa31   : > { %v2242_v39 = vpop.f32.mrf.mxu3  ;;  %v2521_v27 = vpop.f32.mrf.mxu2 }
 0xa32   : > { %v2248_v26 = vpack.c.bf16 %v2242_v39, %v2240_v55  ;;  %v2527_v6 = vpack.c.bf16 %v2521_v27, %v2519_v32 }
 0xa34   : > { %7020 = vmatmul.msk.bf16.gmra.mxu0 %vm1491_vm10, %v2248_v26  ;;  %7040 = vmatmul.msk.bf16.gmra.mxu3 %vm1491_vm10, %v2527_v6 }
 0xa39   : > { %v2282_v60 = vpop.f32.mrf.mxu0  ;;  %v2561_v49 = vpop.f32.mrf.mxu3 }
 0xa3a   : > { %v2302_v51 = vadd.f32 %v2282_v60, %v2012_v33 }
 0xa3c   : > { %v2581_v22 = vadd.f32 %v2561_v49, %v2302_v51 }
 0xa3e   : > { %v2593_v40 = vadd.f32 %v9558_v28, %v2581_v22  ;;  %v7099_v22 = vld [vmem:[%s11966_s10 + $0x70] sm:$0xf] }
 0xa40   : > { %v9563_v18 = vadd.f32 %v2593_v40, %v8711_v5  ;;  %v7634_v40 = vld [vmem:[%s11966_s10 + $0x74] sm:$0xf0] }
 0xa41   : > { %v2284_v62 = vpop.f32.mrf.mxu0  ;;  %v2563_v17 = vpop.f32.mrf.mxu3 }
 0xa42   : > { %v2303_v10 = vadd.f32 %v2284_v62, %v2014_v43  ;;  %2609 = vadd.xlane.f32.xlu0 %v9563_v18  ;;  %v7100_v62 = vor.u32 %v7634_v40, %v7099_v22  ;;  %v7053_v22 = vld [vmem:[%s11966_s10 + $0x18] sm:$0xf0] }
 0xa44   : > { %v2582_v34 = vadd.f32 %v2563_v17, %v2303_v10  ;;  %2875 = vmatpush.bf16.msrb.mxu0 %v7100_v62  ;;  %v7620_v62 = vld [vmem:[%s11966_s10 + $0x4] sm:$0xf0] }
 0xa46   : > { %v2594_v47 = vadd.f32 %v9558_v28, %v2582_v34  ;;  %v7091_v34 = vld [vmem:[%s11966_s10 + $0x60] sm:$0xf] }
 0xa48   : > { %v9568_v24 = vadd.f32 %v2594_v47, %v8724_v29  ;;  %v7632_v47 = vld [vmem:[%s11966_s10 + $0x64] sm:$0xf0] }
 0xa49   : > { %v2287_v13 = vpop.f32.mrf.mxu0 }
 0xa4a   : > { %2611 = vadd.xlane.f32.xlu2 %v9568_v24  ;;  %v2304_v58 = vadd.f32 %v2287_v13, %v2017_v8  ;;  %v7631_v13 = vld [vmem:[%s11966_s10 + $0x64] sm:$0xf] }
 0xa51   : > { %v2289_v38 = vpop.f32.mrf.mxu0 }
 0xa52   : > { %v2305_v36 = vadd.f32 %v2289_v38, %v2019_v20  ;;  %v7630_v20 = vld [vmem:[%s11966_s10 + $0x54] sm:$0xf0] }
 0xa97   : > { %v2566_v30 = vpop.f32.mrf.mxu3 }
 0xa98   : > { %v2583_v5 = vadd.f32 %v2566_v30, %v2304_v58  ;;  %v7092_v58 = vor.u32 %v7632_v47, %v7091_v34  ;;  %v7093_v30 = vld [vmem:[%s11966_s10 + $0x68] sm:$0xf0] }
 0xa99   : > { %v7045_v47 = vld [vmem:[%s11966_s10 + $0x8] sm:$0xf0] }
 0xa9a   : > { %v2595_v48 = vadd.f32 %v9558_v28, %v2583_v5  ;;  %v7096_v5 = vor.u32 %v7631_v13, %v7093_v30  ;;  %2876 = vmatpush.bf16.msrb.mxu0 %v7092_v58 }
 0xa9c   : > { %v9575_v59 = vadd.f32 %v2595_v48, %v8743_v54  ;;  %v7083_v48 = vld [vmem:[%s11966_s10 + $0x50] sm:$0xf] }
 0xa9e   : > { %2613 = vadd.xlane.f32.xlu1 %v9575_v59 }
 0xa9f   : > { %v2568_v29 = vpop.f32.mrf.mxu3 }
 0xaa0   : > { %v2584_v42 = vadd.f32 %v2568_v29, %v2305_v36  ;;  %v7629_v36 = vld [vmem:[%s11966_s10 + $0x54] sm:$0xf] }
 0xaa1   : > { %v2292_v46 = vpop.f32.mrf.mxu0 }
 0xaa2   : > { %v2596_v44 = vadd.f32 %v9558_v28, %v2584_v42  ;;  %v2306_v0 = vadd.f32 %v2292_v46, %v2022_v11  ;;  %v7084_v42 = vor.u32 %v7630_v20, %v7083_v48  ;;  %v7085_v46 = vld [vmem:[%s11966_s10 + $0x58] sm:$0xf0] }
 0xaa4   : > { %v9581_v1 = vadd.f32 %v2596_v44, %v8761_v4  ;;  %v7088_v44 = vor.u32 %v7629_v36, %v7085_v46  ;;  %2877 = vmatpush.bf16.msrb.mxu0 %v7084_v42 }
 0xaa6   : > { %2615 = vadd.xlane.f32.xlu0 %v9581_v1 }
 0xaa7   : > { %v2571_v25 = vpop.f32.mrf.mxu3 }
 0xaa8   : > { %v2585_v31 = vadd.f32 %v2571_v25, %v2306_v0  ;;  %v7075_v0 = vld [vmem:[%s11966_s10 + $0x40] sm:$0xf]  ;;  %v7628_v25 = vld [vmem:[%s11966_s10 + $0x44] sm:$0xf0] }
 0xaa9   : > { %v2294_v54 = vpop.f32.mrf.mxu0 }
 0xaaa   : > { %v2597_v63 = vadd.f32 %v9558_v28, %v2585_v31  ;;  %v2307_v15 = vadd.f32 %v2294_v54, %v2024_v3  ;;  %v7627_v31 = vld [vmem:[%s11966_s10 + $0x44] sm:$0xf]  ;;  %v7077_v3 = vld [vmem:[%s11966_s10 + $0x48] sm:$0xf0] }
 0xaac   : > { %v9587_v52 = vadd.f32 %v2597_v63, %v8741_v50  ;;  %v7076_v63 = vor.u32 %v7628_v25, %v7075_v0 }
 0xaae   : > { %2617 = vadd.xlane.f32.xlu2 %v9587_v52  ;;  %2878 = vmatpush.bf16.msrb.mxu0 %v7076_v63 }
 0xaaf   : > { %v2573_v7 = vpop.f32.mrf.mxu3 }
 0xab0   : > { %v2586_v19 = vadd.f32 %v2573_v7, %v2307_v15  ;;  %v7080_v15 = vor.u32 %v7627_v31, %v7077_v3 }
 0xab1   : > { %v2297_v4 = vpop.f32.mrf.mxu0 }
 0xab2   : > { %v2598_v45 = vadd.f32 %v9558_v28, %v2586_v19  ;;  %v2308_v9 = vadd.f32 %v2297_v4, %v2027_v21  ;;  %v7067_v19 = vld [vmem:[%s11966_s10 + $0x30] sm:$0xf]  ;;  %v7626_v4 = vld [vmem:[%s11966_s10 + $0x34] sm:$0xf0] }
 0xab4   : > { %v9593_v12 = vadd.f32 %v2598_v45, %v8759_v2  ;;  %v2029_v2 = vadd.f32 %v9300_v61, %v9550_v37  ;;  %v7625_v45 = vld [vmem:[%s11966_s10 + $0x34] sm:$0xf] }
 0xab5   : > { %v2610_v41 = vpop.xlane.xlu0 %2609 }
 0xab6   : > { %v2625_v57 = vmul.f32 %v2610_v41, %v8637_v53  ;;  %2619 = vadd.xlane.f32.xlu1 %v9593_v12  ;;  %v7068_v41 = vor.u32 %v7626_v4, %v7067_v19 }
 0xab7   : > { %v2576_v50 = vpop.f32.mrf.mxu3 }
 0xab8   : > { %v9598_v16 = vsub.f32 %v9563_v18, %v2625_v57  ;;  %v2587_v55 = vadd.f32 %v2576_v50, %v2308_v9  ;;  %v7069_v9 = vld [vmem:[%s11966_s10 + $0x38] sm:$0xf0]  ;;  %2879 = vmatpush.bf16.msrb.mxu0 %v7068_v41 }
 0xab9   : > { %v2299_v56 = vpop.f32.mrf.mxu0  ;;  %v7072_v57 = vor.u32 %v7625_v45, %v7069_v9 }
 0xaba   : > { %v2599_v32 = vadd.f32 %v9558_v28, %v2587_v55  ;;  %v2641_v39 = vmul.f32 %v9598_v16, %v9598_v16  ;;  %v2309_v26 = vadd.f32 %v2299_v56, %v2029_v2  ;;  %v7059_v55 = vld [vmem:[%s11966_s10 + $0x20] sm:$0xf] }
 0xabc   : > { %2649 = vadd.xlane.f32.xlu0 %v2641_v39  ;;  %v9606_v23 = vadd.f32 %v2599_v32, %v8771_v14  ;;  %v7624_v32 = vld [vmem:[%s11966_s10 + $0x24] sm:$0xf0]  ;;  %v7623_v39 = vld [vmem:[%s11966_s10 + $0x24] sm:$0xf] }
 0xabd   : > { %v2612_v27 = vpop.xlane.xlu2 %2611  ;;  %v7060_v2 = vor.u32 %v7624_v32, %v7059_v55 }
 0xabe   : > { %v2626_v6 = vmul.f32 %v2612_v27, %v8637_v53  ;;  %2621 = vadd.xlane.f32.xlu1 %v9606_v23  ;;  %v7061_v27 = vld [vmem:[%s11966_s10 + $0x28] sm:$0xf0] }
 0xabf   : > { %v2578_v33 = vpop.f32.mrf.mxu3  ;;  %2880 = vmatpush.bf16.msrb.mxu0 %v7060_v2 }
 0xac0   : > { %v9611_v60 = vsub.f32 %v9568_v24, %v2626_v6  ;;  %v2588_v49 = vadd.f32 %v2578_v33, %v2309_v26  ;;  %v7064_v26 = vor.u32 %v7623_v39, %v7061_v27  ;;  %v7051_v33 = vld [vmem:[%s11966_s10 + $0x10] sm:$0xf] }
 0xac2   : > { %v2600_v51 = vadd.f32 %v9558_v28, %v2588_v49  ;;  %v2642_v61 = vmul.f32 %v9611_v60, %v9611_v60  ;;  %v7633_v28 = vld [vmem:[%s11966_s10 + $0x74] sm:$0xf]  ;;  %v7622_v49 = vld [vmem:[%s11966_s10 + $0x14] sm:$0xf0] }
 0xac4   : > { %2651 = vadd.xlane.f32.xlu2 %v2642_v61  ;;  %v9617_v14 = vadd.f32 %v2600_v51, %v8791_v35  ;;  %v7101_v35 = vld [vmem:[%s11966_s10 + $0x78] sm:$0xf0]  ;;  %v7621_v51 = vld [vmem:[%s11966_s10 + $0x14] sm:$0xf] }
 0xac5   : > { %v7104_v10 = vor.u32 %v7633_v28, %v7101_v35  ;;  %v7056_v40 = vor.u32 %v7621_v51, %v7053_v22  ;;  %v7619_v35 = vld [vmem:[%s11966_s10 + $0x4] sm:$0xf] }
 0xac6   : > { %2623 = vadd.xlane.f32.xlu0 %v9617_v14 }
 0xac7   : > { %2904 = vmatpush.bf16.msra.mxu1 %v7104_v10 }
 0xacb   : > { %2905 = vmatpush.bf16.msra.mxu1 %v7096_v5 }
 0xacf   : > { %2906 = vmatpush.bf16.msra.mxu1 %v7088_v44 }
 0xad3   : > { %2907 = vmatpush.bf16.msra.mxu1 %v7080_v15 }
 0xad7   : > { %2908 = vmatpush.bf16.msra.mxu1 %v7072_v57 }
 0xadb   : > { %2909 = vmatpush.bf16.msra.mxu1 %v7064_v26 }
 0xadf   : > { %2910 = vmatpush.bf16.msra.mxu1 %v7056_v40 }
 0xb11   : > { %v2614_v37 = vpop.xlane.xlu1 %2613 }
 0xb12   : > { %v2627_v43 = vmul.f32 %v2614_v37, %v8637_v53  ;;  %v7052_v37 = vor.u32 %v7622_v49, %v7051_v33 }
 0xb14   : > { %v9634_v17 = vsub.f32 %v9575_v59, %v2627_v43  ;;  %2881 = vmatpush.bf16.msrb.mxu0 %v7052_v37  ;;  %v7043_v43 = vld [vmem:[%s11966_s10] sm:$0xf] }
 0xb15   : > { %v7044_v34 = vor.u32 %v7620_v62, %v7043_v43 }
 0xb16   : > { %v2643_v8 = vmul.f32 %v9634_v17, %v9634_v17 }
 0xb18   : > { %2653 = vadd.xlane.f32.xlu2 %v2643_v8  ;;  %v7048_v8 = vor.u32 %v7619_v35, %v7045_v47  ;;  %2882 = vmatpush.bf16.msrb.mxu0 %v7044_v34 }
 0xb19   : > { %v2616_v38 = vpop.xlane.xlu0 %2615 }
 0xb1a   : > { %v2628_v29 = vmul.f32 %v2616_v38, %v8637_v53  ;;  %2911 = vmatpush.bf16.msra.mxu1 %v7048_v8 }
 0xb1c   : > { %v9664_v11 = vsub.f32 %v9581_v1, %v2628_v29 }
 0xb1e   : > { %v2644_v54 = vmul.f32 %v9664_v11, %v9664_v11 }
 0xb20   : > { %2655 = vadd.xlane.f32.xlu1 %v2644_v54 }
 0xb21   : > { %v2618_v7 = vpop.xlane.xlu2 %2617 }
 0xb22   : > { %v2629_v21 = vmul.f32 %v2618_v7, %v8637_v53 }
 0xb24   : > { %v9694_v50 = vsub.f32 %v9587_v52, %v2629_v21 }
 0xb26   : > { %v2645_v56 = vmul.f32 %v9694_v50, %v9694_v50 }
 0xb28   : > { %2657 = vadd.xlane.f32.xlu0 %v2645_v56 }
 0xb29   : > { %v2620_v6 = vpop.xlane.xlu1 %2619 }
 0xb2a   : > { %v2630_v61 = vmul.f32 %v2620_v6, %v8637_v53 }
 0xb2c   : > { %v9724_v28 = vsub.f32 %v9593_v12, %v2630_v61 }
 0xb2e   : > { %v2646_v10 = vmul.f32 %v9724_v28, %v9724_v28 }
 0xb2f   : > { %v2650_v13 = vpop.xlane.xlu0 %2649 }
 0xb30   : > { %v2665_v58 = vmul.f32 %v2650_v13, %v8637_v53  ;;  %2659 = vadd.xlane.f32.xlu2 %v2646_v10 }
 0xb31   : > { %v2622_v30 = vpop.xlane.xlu1 %2621 }
 0xb32   : > { %v2673_v5 = vadd.f32 1e-05, %v2665_v58  ;;  %v2631_v38 = vmul.f32 %v2622_v30, %v8637_v53 }
 0xb34   : > { %7964 = vrsqrt.f32 %v2673_v5  ;;  %v9743_v48 = vsub.f32 %v9606_v23, %v2631_v38  ;;  %vm2687_vm13 = vweird.f32 %v2673_v5 }
 0xb36   : > { %v2647_v20 = vmul.f32 %v9743_v48, %v9743_v48 }
 0xb37   : > { %v2652_v36 = vpop.xlane.xlu2 %2651 }
 0xb38   : > { %v2666_v29 = vmul.f32 %v2652_v36, %v8637_v53  ;;  %2661 = vadd.xlane.f32.xlu1 %v2647_v20 }
 0xb39   : > { %v2624_v42 = vpop.xlane.xlu0 %2623 }
 0xb3a   : > { %v7965_v46 = vpop.eup %7964  ;;  %v2674_v44 = vadd.f32 1e-05, %v2666_v29  ;;  %v2632_v0 = vmul.f32 %v2624_v42, %v8637_v53 }
 0xb3b   : > { %v2682_v25 = vmul.f32 %v7965_v46, %v2673_v5  ;;  %vm2688_vm12 = vweird.f32 %v7965_v46 }
 0xb3c   : > { %7966 = vrsqrt.f32 %v2674_v44  ;;  %v9750_v31 = vsub.f32 %v9617_v14, %v2632_v0  ;;  %vm2689_vm15 = vmor %vm2687_vm13, %vm2688_vm12  ;;  %vm2697_vm0 = vweird.f32 %v2674_v44 }
 0xb3d   : > { %v2683_v54 = vmul.f32 %v7965_v46, %v2682_v25 }
 0xb3e   : > { %v2648_v63 = vmul.f32 %v9750_v31, %v9750_v31 }
 0xb3f   : > { %v2684_v3 = vmul.f32 0.5, %v2683_v54 }
 0xb40   : > { %2663 = vadd.xlane.f32.xlu0 %v2648_v63 }
 0xb41   : > { %v2685_v7 = vsub.f32 1.5, %v2684_v3 }
 0xb42   : > { %v7967_v15 = vpop.eup %7966 }
 0xb43   : > { %v2692_v19 = vmul.f32 %v7967_v15, %v2674_v44  ;;  %v2686_v45 = vmul.f32 %v7965_v46, %v2685_v7  ;;  %vm2698_vm14 = vweird.f32 %v7967_v15 }
 0xb44   : > { %vm2699_vm1 = vmor %vm2697_vm0, %vm2698_vm14 }
 0xb45   : > { %v2693_v4 = vmul.f32 %v7967_v15, %v2692_v19  ;;  %v2690_v9 = vsel %vm2689_vm15, %v7965_v46, %v2686_v45 }
 0xb46   : > { %v2761_v32 = vmul.f32 %v2690_v9, %v9598_v16 }
 0xb47   : > { %v2694_v21 = vmul.f32 0.5, %v2693_v4 }
 0xb49   : > { %v2695_v41 = vsub.f32 1.5, %v2694_v21 }
 0xb4b   : > { %v2696_v57 = vmul.f32 %v7967_v15, %v2695_v41 }
 0xb4d   : > { %v2700_v55 = vsel %vm2699_vm1, %v7967_v15, %v2696_v57 }
 0xb4e   : > { %v2762_v39 = vmul.f32 %v2700_v55, %v9611_v60 }
 0xb50   : > { %v2785_v56 = vpack.c.bf16 %v2762_v39, %v2761_v32 }
 0xb52   : > { %2883 = vmatmul.bf16.vlgmr.msrb.gmra.mxu0 %v2785_v56  ;;  %2912 = vmatmul.bf16.vlgmr.msra.gmra.mxu1 %v2785_v56 }
 0xb8b   : > { %v2654_v2 = vpop.xlane.xlu2 %2653 }
 0xb8c   : > { %v2667_v27 = vmul.f32 %v2654_v2, %v8637_v53 }
 0xb8e   : > { %v2675_v26 = vadd.f32 1e-05, %v2667_v27 }
 0xb90   : > { %7968 = vrsqrt.f32 %v2675_v26  ;;  %vm2707_vm3 = vweird.f32 %v2675_v26 }
 0xb93   : > { %v2656_v6 = vpop.xlane.xlu1 %2655 }
 0xb94   : > { %v2668_v33 = vmul.f32 %v2656_v6, %v8637_v53 }
 0xb96   : > { %v7969_v49 = vpop.eup %7968  ;;  %v2676_v51 = vadd.f32 1e-05, %v2668_v33 }
 0xb97   : > { %v2702_v61 = vmul.f32 %v7969_v49, %v2675_v26  ;;  %vm2708_vm2 = vweird.f32 %v7969_v49 }
 0xb98   : > { %7970 = vrsqrt.f32 %v2676_v51  ;;  %vm2709_vm5 = vmor %vm2707_vm3, %vm2708_vm2  ;;  %vm2717_vm6 = vweird.f32 %v2676_v51 }
 0xb99   : > { %v2703_v37 = vmul.f32 %v7969_v49, %v2702_v61 }
 0xb9b   : > { %v2704_v22 = vmul.f32 0.5, %v2703_v37  ;;  %v2658_v16 = vpop.xlane.xlu0 %2657 }
 0xb9c   : > { %v2669_v60 = vmul.f32 %v2658_v16, %v8637_v53 }
 0xb9d   : > { %v2705_v62 = vsub.f32 1.5, %v2704_v22 }
 0xb9e   : > { %v7971_v40 = vpop.eup %7970  ;;  %v2677_v43 = vadd.f32 1e-05, %v2669_v60 }
 0xb9f   : > { %v2712_v35 = vmul.f32 %v7971_v40, %v2676_v51  ;;  %v2706_v13 = vmul.f32 %v7969_v49, %v2705_v62  ;;  %vm2718_vm4 = vweird.f32 %v7971_v40 }
 0xba0   : > { %7972 = vrsqrt.f32 %v2677_v43  ;;  %vm2719_vm7 = vmor %vm2717_vm6, %vm2718_vm4  ;;  %vm2727_vm9 = vweird.f32 %v2677_v43 }
 0xba1   : > { %v2713_v10 = vmul.f32 %v7971_v40, %v2712_v35  ;;  %v2710_v20 = vsel %vm2709_vm5, %v7969_v49, %v2706_v13 }
 0xba2   : > { %v2763_v46 = vmul.f32 %v2710_v20, %v9634_v17 }
 0xba3   : > { %v2714_v34 = vmul.f32 0.5, %v2713_v10  ;;  %v2660_v47 = vpop.xlane.xlu2 %2659 }
 0xba4   : > { %v2670_v8 = vmul.f32 %v2660_v47, %v8637_v53 }
 0xba5   : > { %v2715_v58 = vsub.f32 1.5, %v2714_v34 }
 0xba6   : > { %v7973_v30 = vpop.eup %7972  ;;  %v2678_v5 = vadd.f32 1e-05, %v2670_v8 }
 0xba7   : > { %v2722_v38 = vmul.f32 %v7973_v30, %v2677_v43  ;;  %v2716_v36 = vmul.f32 %v7971_v40, %v2715_v58  ;;  %vm2728_vm8 = vweird.f32 %v7973_v30  ;;  %v2789_v43 = vld [vmem:[%s11967_s11] sm:$0x3] }
 0xba8   : > { %7974 = vrsqrt.f32 %v2678_v5  ;;  %vm2729_vm13 = vmor %vm2727_vm9, %vm2728_vm8  ;;  %vm2737_vm14 = vweird.f32 %v2678_v5  ;;  %v9771_v34 = vperm.slane %v2789_v43, 0  ;;  %v9773_v47 = vperm.slane %v2789_v43, 1  ;;  %v7638_v43 = vld [vmem:[%s11968_s12 + $0x18] sm:$0xff] }
 0xba9   : > { %v2723_v29 = vmul.f32 %v7973_v30, %v2722_v38  ;;  %v2720_v42 = vsel %vm2719_vm7, %v7971_v40, %v2716_v36 }
 0xbaa   : > { %v2764_v44 = vmul.f32 %v2720_v42, %v9664_v11 }
 0xbab   : > { %v2724_v0 = vmul.f32 0.5, %v2723_v29  ;;  %v2662_v25 = vpop.xlane.xlu1 %2661 }
 0xbac   : > { %v2671_v54 = vmul.f32 %v2662_v25, %v8637_v53  ;;  %v2786_v63 = vpack.c.bf16 %v2764_v44, %v2763_v46  ;;  %v7650_v25 = vld [vmem:[%s11968_s12 + $0x78] sm:$0xff] }
 0xbad   : > { %v2725_v7 = vsub.f32 1.5, %v2724_v0  ;;  %v7642_v0 = vld [vmem:[%s11968_s12 + $0x38] sm:$0xff]  ;;  %3742 = vmatpush.bf16.msra.mxu3 %v7650_v25  ;;  %v7637_v25 = vld [vmem:[%s11968_s12 + $0x10] sm:$0xff] }
 0xbae   : > { %v7975_v3 = vpop.eup %7974  ;;  %v2679_v15 = vadd.f32 1e-05, %v2671_v54  ;;  %2888 = vmatmul.bf16.gmra.mxu0 %v2786_v63  ;;  %2917 = vmatmul.bf16.gmra.mxu1 %v2786_v63 }
 0xbaf   : > { %v2732_v19 = vmul.f32 %v7975_v3, %v2678_v5  ;;  %v2726_v41 = vmul.f32 %v7973_v30, %v2725_v7  ;;  %vm2738_vm12 = vweird.f32 %v7975_v3  ;;  %3713 = vmatpush.bf16.msra.mxu2 %v7642_v0  ;;  %v7649_v7 = vld [vmem:[%s11968_s12 + $0x70] sm:$0xff] }
 0xbb0   : > { %7976 = vrsqrt.f32 %v2679_v15  ;;  %vm2739_vm15 = vmor %vm2737_vm14, %vm2738_vm12  ;;  %vm2747_vm1 = vweird.f32 %v2679_v15 }
 0xbb1   : > { %v2733_v4 = vmul.f32 %v7975_v3, %v2732_v19  ;;  %v2730_v32 = vsel %vm2729_vm13, %v7973_v30, %v2726_v41  ;;  %3743 = vmatpush.bf16.msra.mxu3 %v7649_v7  ;;  %v7640_v41 = vld [vmem:[%s11968_s12 + $0x28] sm:$0xff] }
 0xbb2   : > { %v2765_v27 = vmul.f32 %v2730_v32, %v9694_v50 }
 0xbb3   : > { %v2734_v45 = vmul.f32 0.5, %v2733_v4  ;;  %v2664_v21 = vpop.xlane.xlu0 %2663 }
 0xbb4   : > { %v2672_v17 = vmul.f32 %v2664_v21, %v8637_v53 }
 0xbb5   : > { %v2735_v11 = vsub.f32 1.5, %v2734_v45 }
 0xbb6   : > { %v7977_v9 = vpop.eup %7976  ;;  %v2680_v57 = vadd.f32 1e-05, %v2672_v17  ;;  %v7648_v17 = vld [vmem:[%s11968_s12 + $0x68] sm:$0xff] }
 0xbb7   : > { %v2742_v55 = vmul.f32 %v7977_v9, %v2679_v15  ;;  %v2736_v39 = vmul.f32 %v7975_v3, %v2735_v11  ;;  %vm2748_vm0 = vweird.f32 %v7977_v9  ;;  %3744 = vmatpush.bf16.msra.mxu3 %v7648_v17 }
 0xbb8   : > { %7978 = vrsqrt.f32 %v2680_v57  ;;  %vm2749_vm3 = vmor %vm2747_vm1, %vm2748_vm0  ;;  %vm2757_vm4 = vweird.f32 %v2680_v57 }
 0xbb9   : > { %v2743_v56 = vmul.f32 %v7977_v9, %v2742_v55  ;;  %v2740_v2 = vsel %vm2739_vm15, %v7975_v3, %v2736_v39  ;;  %v7641_v3 = vld [vmem:[%s11968_s12 + $0x30] sm:$0xff] }
 0xbba   : > { %v2766_v26 = vmul.f32 %v2740_v2, %v9724_v28  ;;  %3714 = vmatpush.bf16.msra.mxu2 %v7641_v3 }
 0xbbb   : > { %v2744_v6 = vmul.f32 0.5, %v2743_v56 }
 0xbbc   : > { %v2787_v33 = vpack.c.bf16 %v2766_v26, %v2765_v27 }
 0xbbd   : > { %v2745_v51 = vsub.f32 1.5, %v2744_v6 }
 0xbbe   : > { %v7979_v49 = vpop.eup %7978  ;;  %2893 = vmatmul.bf16.gmra.mxu0 %v2787_v33  ;;  %2922 = vmatmul.bf16.gmra.mxu1 %v2787_v33 }
 0xbbf   : > { %v2752_v61 = vmul.f32 %v7979_v49, %v2680_v57  ;;  %v2746_v22 = vmul.f32 %v7977_v9, %v2745_v51  ;;  %vm2758_vm2 = vweird.f32 %v7979_v49  ;;  %3715 = vmatpush.bf16.msra.mxu2 %v7640_v41  ;;  %v7639_v51 = vld [vmem:[%s11968_s12 + $0x20] sm:$0xff] }
 0xbc0   : > { %vm2759_vm5 = vmor %vm2757_vm4, %vm2758_vm2 }
 0xbc1   : > { %v2753_v37 = vmul.f32 %v7979_v49, %v2752_v61  ;;  %v2750_v40 = vsel %vm2749_vm3, %v7977_v9, %v2746_v22  ;;  %v7647_v61 = vld [vmem:[%s11968_s12 + $0x60] sm:$0xff] }
 0xbc2   : > { %v2767_v62 = vmul.f32 %v2750_v40, %v9743_v48  ;;  %3745 = vmatpush.bf16.msra.mxu3 %v7647_v61 }
 0xbc3   : > { %v2754_v16 = vmul.f32 0.5, %v2753_v37  ;;  %3716 = vmatpush.bf16.msra.mxu2 %v7639_v51 }
 0xbc5   : > { %v2755_v60 = vsub.f32 1.5, %v2754_v16 }
 0xbc7   : > { %v2756_v50 = vmul.f32 %v7979_v49, %v2755_v60  ;;  %3717 = vmatpush.bf16.msra.mxu2 %v7638_v43 }
 0xbc9   : > { %v2760_v28 = vsel %vm2759_vm5, %v7979_v49, %v2756_v50 }
 0xbca   : > { %v2768_v35 = vmul.f32 %v2760_v28, %v9750_v31 }
 0xbcb   : > { %3718 = vmatpush.bf16.msra.mxu2 %v7637_v25 }
 0xbcc   : > { %v2788_v10 = vpack.c.bf16 %v2768_v35, %v2767_v62  ;;  %v7646_v62 = vld [vmem:[%s11968_s12 + $0x58] sm:$0xff] }
 0xbcd   : > { %3746 = vmatpush.bf16.msra.mxu3 %v7646_v62 }
 0xbce   : > { %2898 = vmatmul.bf16.gmra.mxu0 %v2788_v10  ;;  %2927 = vmatmul.bf16.gmra.mxu1 %v2788_v10 }
 0xbcf   : > { %v2884_v13 = vpop.f32.mrf.mxu0  ;;  %v2913_v8 = vpop.f32.mrf.mxu1 }
 0xbd0   : > { %v9776_v58 = vadd.f32 %v2884_v13, %v9771_v34  ;;  %v9779_v30 = vadd.f32 %v2913_v8, %v9773_v47 }
 0xbd2   : > { %v9782_v5 = vmul.f32 0.70710677, %v9776_v58  ;;  %v9785_v48 = vmul.f32 0.70710677, %v9779_v30 }
 0xbd4   : > { %v9788_v31 = vand.u32 2147483647, %v9782_v5  ;;  %v9791_v38 = vand.u32 2147483647, %v9785_v48 }
 0xbd6   : > { %v2981_v20 = vmul.f32 0.3275911, %v9788_v31  ;;  %v2982_v36 = vmul.f32 0.3275911, %v9791_v38  ;;  %v3397_v2 = vsub.f32 0.0, %v9788_v31  ;;  %v3398_v33 = vsub.f32 0.0, %v9791_v38 }
 0xbd7   : > { %v2886_v29 = vpop.f32.mrf.mxu0  ;;  %v2915_v42 = vpop.f32.mrf.mxu1 }
 0xbd8   : > { %v2997_v46 = vadd.f32 1.0, %v2981_v20  ;;  %v9795_v44 = vadd.f32 1.0, %v2982_v36  ;;  %v9804_v54 = vadd.f32 %v2886_v29, %v9771_v34  ;;  %v9807_v63 = vadd.f32 %v2915_v42, %v9773_v47 }
 0xbd9   : > { %v3413_v10 = vmul.f32 %v3397_v2, %v9788_v31  ;;  %v3414_v36 = vmul.f32 %v3398_v33, %v9791_v38  ;;  %v7645_v38 = vld [vmem:[%s11968_s12 + $0x50] sm:$0xff] }
 0xbda   : > { %7980 = vrcp.f32 %v2997_v46  ;;  %v9814_v15 = vmul.f32 0.70710677, %v9804_v54  ;;  %v9820_v19 = vmul.f32 0.70710677, %v9807_v63  ;;  %v3022_v56 = vand.u32 2147483647, %v2997_v46  ;;  %3747 = vmatpush.bf16.msra.mxu3 %v7645_v38 }
 0xbdb   : > { %7982 = vrcp.f32 %v9795_v44  ;;  %v3024_v26 = vand.u32 2147483648, %v2997_v46  ;;  %v3039_v22 = vand.u32 2147483648, %v9795_v44  ;;  %v3037_v60 = vand.u32 2147483647, %v9795_v44 }
 0xbdc   : > { %v9823_v4 = vand.u32 2147483647, %v9814_v15  ;;  %v9826_v21 = vand.u32 2147483647, %v9820_v19  ;;  %vm3018_vm8 = vweird.f32 %v2997_v46  ;;  %vm3033_vm12 = vweird.f32 %v9795_v44 }
 0xbdd   : > { %v3025_v50 = vor.u32 1.1754944e-38, %v3024_v26  ;;  %vm3023_vm13 = vcmp.eq.f32.partialorder %v3022_v56, 8.507059e+37  ;;  %v3040_v13 = vor.u32 1.1754944e-38, %v3039_v22  ;;  %vm3038_vm15 = vcmp.eq.f32.partialorder %v3037_v60, 8.507059e+37  ;;  %v7636_v26 = vld [vmem:[%s11968_s12 + $0x8] sm:$0xff] }
 0xbde   : > { %v2983_v57 = vmul.f32 0.3275911, %v9823_v4  ;;  %v2984_v32 = vmul.f32 0.3275911, %v9826_v21  ;;  %v3429_v7 = vmul.f32 1.442695, %v3413_v10  ;;  %3719 = vmatpush.bf16.msra.mxu2 %v7636_v26 }
 0xbdf   : > { %v3431_v17 = vmul.f32 1.442695, %v3414_v36 }
 0xbe0   : > { %v7981_v45 = vpop.eup %7980  ;;  %v9838_v27 = vadd.f32 1.0, %v2983_v57  ;;  %v9841_v49 = vadd.f32 1.0, %v2984_v32 }
 0xbe1   : > { %v7983_v11 = vpop.eup %7982  ;;  %v3014_v9 = vmul.f32 %v7981_v45, %v2997_v46  ;;  %vm3019_vm6 = vweird.f32 %v7981_v45 }
 0xbe2   : > { %v3029_v55 = vmul.f32 %v7983_v11, %v9795_v44  ;;  %7984 = vrcp.f32 %v9838_v27  ;;  %vm3034_vm7 = vweird.f32 %v7983_v11  ;;  %vm3020_vm9 = vmor %vm3018_vm8, %vm3019_vm6  ;;  %v3052_v57 = vand.u32 2147483647, %v9838_v27 }
 0xbe3   : > { %v3015_v39 = vsub.f32 1.0, %v3014_v9  ;;  %7986 = vrcp.f32 %v9841_v49  ;;  %vm3035_vm14 = vmor %vm3033_vm12, %vm3034_vm7  ;;  %v3069_v2 = vand.u32 2147483648, %v9841_v49  ;;  %v3067_v61 = vand.u32 2147483647, %v9841_v49 }
 0xbe4   : > { %v3030_v6 = vsub.f32 1.0, %v3029_v55  ;;  %v3054_v55 = vand.u32 2147483648, %v9838_v27  ;;  %vm3048_vm2 = vweird.f32 %v9838_v27  ;;  %vm3063_vm4 = vweird.f32 %v9841_v49 }
 0xbe5   : > { %v3016_v37 = vmul.f32 %v7981_v45, %v3015_v39  ;;  %vm3053_vm5 = vcmp.eq.f32.partialorder %v3052_v57, 8.507059e+37  ;;  %v3070_v62 = vor.u32 1.1754944e-38, %v3069_v2  ;;  %vm3068_vm7 = vcmp.eq.f32.partialorder %v3067_v61, 8.507059e+37 }
 0xbe6   : > { %v3031_v16 = vmul.f32 %v7983_v11, %v3030_v6  ;;  %v7644_v6 = vld [vmem:[%s11968_s12 + $0x48] sm:$0xff]  ;;  %7988 = vpow2.f32 %v3429_v7  ;;  %vm3493_vm8 = vcmp.ge.f32.partialorder %v9782_v5, 0.0  ;;  %vm3495_vm12 = vcmp.ge.f32.partialorder %v9814_v15, 0.0 }
 0xbe7   : > { %v3017_v40 = vadd.f32 %v7981_v45, %v3016_v37  ;;  %3748 = vmatpush.bf16.msra.mxu3 %v7644_v6  ;;  %7990 = vpow2.f32 %v3431_v17  ;;  %v2935_v5 = vmul.f32 0.5, %v9804_v54 }
 0xbe8   : > { %v3032_v28 = vadd.f32 %v7983_v11, %v3031_v16  ;;  %v7985_v29 = vpop.eup %7984  ;;  %v3399_v16 = vsub.f32 0.0, %v9823_v4 }
 0xbe9   : > { %v3021_v35 = vsel %vm3020_vm9, %v7981_v45, %v3017_v40  ;;  %v7987_v44 = vpop.eup %7986  ;;  %v3044_v31 = vmul.f32 %v7985_v29, %v9838_v27  ;;  %vm3049_vm0 = vweird.f32 %v7985_v29  ;;  %v3055_v40 = vor.u32 1.1754944e-38, %v3054_v55  ;;  %v7635_v27 = vld [vmem:[%s11968_s12] sm:$0xff] }
 0xbea   : > { %v9862_v8 = vsel %vm3023_vm13, %v3025_v50, %v3021_v35  ;;  %v3036_v20 = vsel %vm3035_vm14, %v7983_v11, %v3032_v28  ;;  %v3059_v45 = vmul.f32 %v7987_v44, %v9841_v49  ;;  %vm3064_vm1 = vweird.f32 %v7987_v44  ;;  %vm3050_vm3 = vmor %vm3048_vm2, %vm3049_vm0  ;;  %v7643_v35 = vld [vmem:[%s11968_s12 + $0x40] sm:$0xff]  ;;  %3720 = vmatpush.bf16.msra.mxu2 %v7635_v27 }
 0xbeb   : > { %v3253_v42 = vmul.f32 1.0614054, %v9862_v8  ;;  %v9866_v46 = vsel %vm3038_vm15, %v3040_v13, %v3036_v20  ;;  %v3045_v11 = vsub.f32 1.0, %v3044_v31  ;;  %vm3065_vm6 = vmor %vm3063_vm4, %vm3064_vm1  ;;  %3749 = vmatpush.bf16.msra.mxu3 %v7643_v35  ;;  %vm3494_vm9 = vcmp.ge.f32.partialorder %v9785_v48, 0.0 }
 0xbec   : > { %v3254_v0 = vmul.f32 1.0614054, %v9866_v46  ;;  %v3060_v32 = vsub.f32 1.0, %v3059_v45  ;;  %v3415_v45 = vmul.f32 %v3399_v16, %v9823_v4  ;;  %vm3496_vm13 = vcmp.ge.f32.partialorder %v9820_v19, 0.0 }
 0xbed   : > { %v3269_v3 = vadd.f32 -1.4531521, %v3253_v42  ;;  %v3046_v56 = vmul.f32 %v7985_v29, %v3045_v11  ;;  %v2934_v48 = vmul.f32 0.5, %v9779_v30 }
 0xbee   : > { %v3270_v41 = vadd.f32 -1.4531521, %v3254_v0  ;;  %v3061_v51 = vmul.f32 %v7987_v44, %v3060_v32 }
 0xbef   : > { %v3285_v9 = vmul.f32 %v3269_v3, %v9862_v8  ;;  %v3047_v22 = vadd.f32 %v7985_v29, %v3046_v56  ;;  %v3433_v56 = vmul.f32 1.442695, %v3415_v45 }
 0xbf0   : > { %v3286_v39 = vmul.f32 %v3270_v41, %v9866_v46  ;;  %v3062_v50 = vadd.f32 %v7987_v44, %v3061_v51 }
 0xbf1   : > { %v3301_v33 = vadd.f32 1.4214138, %v3285_v9  ;;  %v3051_v43 = vsel %vm3050_vm3, %v7985_v29, %v3047_v22  ;;  %v3400_v29 = vsub.f32 0.0, %v9826_v21  ;;  %7992 = vpow2.f32 %v3433_v56 }
 0xbf2   : > { %v3302_v37 = vadd.f32 1.4214138, %v3286_v39  ;;  %v3056_v13 = vsel %vm3053_vm5, %v3055_v40, %v3051_v43  ;;  %v3066_v20 = vsel %vm3065_vm6, %v7987_v44, %v3062_v50  ;;  %v7989_v39 = vpop.eup %7988 }
 0xbf3   : > { %v3317_v60 = vmul.f32 %v3301_v33, %v9862_v8  ;;  %v3255_v36 = vmul.f32 1.0614054, %v3056_v13  ;;  %v3071_v42 = vsel %vm3068_vm7, %v3070_v62, %v3066_v20  ;;  %v3416_v9 = vmul.f32 %v3400_v29, %v9826_v21  ;;  %v7991_v26 = vpop.eup %7990 }
 0xbf4   : > { %v3318_v28 = vmul.f32 %v3302_v37, %v9866_v46  ;;  %v3256_v31 = vmul.f32 1.0614054, %v3071_v42 }
 0xbf5   : > { %v3333_v10 = vadd.f32 -0.28449672, %v3317_v60  ;;  %v3271_v38 = vadd.f32 -1.4531521, %v3255_v36  ;;  %v3435_v33 = vmul.f32 1.442695, %v3416_v9 }
 0xbf6   : > { %v3334_v49 = vadd.f32 -0.28449672, %v3318_v28  ;;  %v3272_v44 = vadd.f32 -1.4531521, %v3256_v31 }
 0xbf7   : > { %v3349_v0 = vmul.f32 %v3333_v10, %v9862_v8  ;;  %v3287_v11 = vmul.f32 %v3271_v38, %v3056_v13  ;;  %7994 = vpow2.f32 %v3435_v33  ;;  %v7993_v28 = vpop.eup %7992 }
 0xbf8   : > { %v3350_v25 = vmul.f32 %v3334_v49, %v9866_v46  ;;  %v3288_v55 = vmul.f32 %v3272_v44, %v3071_v42  ;;  %v2936_v44 = vmul.f32 0.5, %v9807_v63 }
 0xbf9   : > { %v3365_v3 = vadd.f32 0.2548296, %v3349_v0  ;;  %v3303_v7 = vadd.f32 1.4214138, %v3287_v11 }
 0xbfa   : > { %v3366_v41 = vadd.f32 0.2548296, %v3350_v25  ;;  %v3304_v2 = vadd.f32 1.4214138, %v3288_v55 }
 0xbfb   : > { %v3381_v57 = vmul.f32 %v3365_v3, %v9862_v8  ;;  %v3319_v6 = vmul.f32 %v3303_v7, %v3056_v13 }
 0xbfc   : > { %v3382_v32 = vmul.f32 %v3366_v41, %v9866_v46  ;;  %v3320_v4 = vmul.f32 %v3304_v2, %v3071_v42 }
 0xbfd   : > { %v3461_v17 = vmul.f32 %v7989_v39, %v3381_v57  ;;  %v3335_v61 = vadd.f32 -0.28449672, %v3319_v6  ;;  %v7995_v27 = vpop.eup %7994 }
 0xbfe   : > { %v3462_v51 = vmul.f32 %v7991_v26, %v3382_v32  ;;  %v3336_v37 = vadd.f32 -0.28449672, %v3320_v4 }
 0xbff   : > { %v3477_v22 = vsub.f32 1.0, %v3461_v17  ;;  %v3351_v21 = vmul.f32 %v3335_v61, %v3056_v13 }
 0xc00   : > { %v3478_v8 = vsub.f32 1.0, %v3462_v51  ;;  %v3352_v16 = vmul.f32 %v3336_v37, %v3071_v42 }
 0xc01   : > { %v3367_v60 = vadd.f32 0.2548296, %v3351_v21  ;;  %v3509_v40 = vsub.f32 0.0, %v3477_v22 }
 0xc02   : > { %v3368_v46 = vadd.f32 0.2548296, %v3352_v16  ;;  %v3510_v43 = vsub.f32 0.0, %v3478_v8 }
 0xc03   : > { %v3383_v50 = vmul.f32 %v3367_v60, %v3056_v13  ;;  %v3525_v20 = vsel %vm3493_vm8, %v3477_v22, %v3509_v40 }
 0xc04   : > { %v3384_v62 = vmul.f32 %v3368_v46, %v3071_v42  ;;  %v3526_v36 = vsel %vm3494_vm9, %v3478_v8, %v3510_v43  ;;  %v3541_v31 = vadd.f32 1.0, %v3525_v20  ;;  %v2933_v42 = vmul.f32 0.5, %v9776_v58 }
 0xc05   : > { %v3463_v35 = vmul.f32 %v7993_v28, %v3383_v50  ;;  %v3542_v13 = vadd.f32 1.0, %v3526_v36 }
 0xc06   : > { %v3464_v10 = vmul.f32 %v7995_v27, %v3384_v62  ;;  %v3557_v11 = vmul.f32 %v3541_v31, %v2933_v42 }
 0xc07   : > { %v3479_v49 = vsub.f32 1.0, %v3463_v35  ;;  %v3558_v57 = vmul.f32 %v3542_v13, %v2934_v48 }
 0xc08   : > { %v3480_v29 = vsub.f32 1.0, %v3464_v10 }
 0xc09   : > { %v3511_v0 = vsub.f32 0.0, %v3479_v49 }
 0xc0a   : > { %v3512_v25 = vsub.f32 0.0, %v3480_v29 }
 0xc0b   : > { %v3527_v38 = vsel %vm3495_vm12, %v3479_v49, %v3511_v0 }
 0xc0c   : > { %v3543_v3 = vadd.f32 1.0, %v3527_v38  ;;  %v3528_v45 = vsel %vm3496_vm13, %v3480_v29, %v3512_v25 }
 0xc0d   : > { %v3544_v41 = vadd.f32 1.0, %v3528_v45 }
 0xc0e   : > { %v3559_v9 = vmul.f32 %v3543_v3, %v2935_v5 }
 0xc0f   : > { %v3560_v15 = vmul.f32 %v3544_v41, %v2936_v44 }
 0xc10   : > { %v3605_v55 = vpack.c.bf16 %v3559_v9, %v3557_v11 }
 0xc11   : > { %v3606_v32 = vpack.c.bf16 %v3560_v15, %v3558_v57 }
 0xc12   : > { %3721 = vmatmul.bf16.vlgmr.msra.gmra.mxu2 %v3605_v55 }
 0xc13   : > { %3750 = vmatmul.bf16.vlgmr.msra.gmra.mxu3 %v3606_v32 }
 0xc2b   : > { %v2889_v19 = vpop.f32.mrf.mxu0  ;;  %v2918_v7 = vpop.f32.mrf.mxu1 }
 0xc2c   : > { %v9917_v58 = vadd.f32 %v2889_v19, %v9771_v34  ;;  %v9920_v54 = vadd.f32 %v2918_v7, %v9773_v47 }
 0xc2e   : > { %v9923_v30 = vmul.f32 0.70710677, %v9917_v58  ;;  %v9926_v63 = vmul.f32 0.70710677, %v9920_v54 }
 0xc30   : > { %v9929_v39 = vand.u32 2147483647, %v9923_v30  ;;  %v9932_v56 = vand.u32 2147483647, %v9926_v63 }
 0xc32   : > { %v2985_v2 = vmul.f32 0.3275911, %v9929_v39  ;;  %v2986_v26 = vmul.f32 0.3275911, %v9932_v56 }
 0xc33   : > { %v2891_v17 = vpop.f32.mrf.mxu0  ;;  %v2920_v6 = vpop.f32.mrf.mxu1 }
 0xc34   : > { %v3001_v33 = vadd.f32 1.0, %v2985_v2  ;;  %v3002_v51 = vadd.f32 1.0, %v2986_v26  ;;  %v9937_v4 = vadd.f32 %v2891_v17, %v9771_v34  ;;  %v9940_v61 = vadd.f32 %v2920_v6, %v9773_v47 }
 0xc36   : > { %7996 = vrcp.f32 %v3001_v33  ;;  %v9943_v37 = vmul.f32 0.70710677, %v9937_v4  ;;  %v9946_v22 = vmul.f32 0.70710677, %v9940_v61  ;;  %v3082_v35 = vand.u32 2147483647, %v3001_v33 }
 0xc37   : > { %7998 = vrcp.f32 %v3002_v51  ;;  %v3084_v20 = vand.u32 2147483648, %v3001_v33  ;;  %v3099_v36 = vand.u32 2147483648, %v3002_v51  ;;  %v3097_v13 = vand.u32 2147483647, %v3002_v51 }
 0xc38   : > { %v9949_v21 = vand.u32 2147483647, %v9943_v37  ;;  %v9952_v60 = vand.u32 2147483647, %v9946_v22  ;;  %vm3078_vm0 = vweird.f32 %v3001_v33  ;;  %vm3093_vm2 = vweird.f32 %v3002_v51 }
 0xc39   : > { %v3085_v42 = vor.u32 1.1754944e-38, %v3084_v20  ;;  %vm3083_vm3 = vcmp.eq.f32.partialorder %v3082_v35, 8.507059e+37  ;;  %v3100_v45 = vor.u32 1.1754944e-38, %v3099_v36  ;;  %vm3098_vm5 = vcmp.eq.f32.partialorder %v3097_v13, 8.507059e+37 }
 0xc3a   : > { %v2987_v50 = vmul.f32 0.3275911, %v9949_v21  ;;  %v2988_v62 = vmul.f32 0.3275911, %v9952_v60  ;;  %v3401_v36 = vsub.f32 0.0, %v9929_v39 }
 0xc3b   : > { %v2894_v8 = vpop.f32.mrf.mxu0  ;;  %v2923_v11 = vpop.f32.mrf.mxu1 }
 0xc3c   : > { %v7997_v16 = vpop.eup %7996  ;;  %v9956_v28 = vadd.f32 %v2894_v8, %v9771_v34  ;;  %v3003_v10 = vadd.f32 1.0, %v2987_v50  ;;  %v9959_v29 = vadd.f32 1.0, %v2988_v62  ;;  %v9979_v6 = vadd.f32 %v2923_v11, %v9773_v47 }
 0xc3d   : > { %v7999_v46 = vpop.eup %7998  ;;  %v3074_v40 = vmul.f32 %v7997_v16, %v3001_v33  ;;  %vm3079_vm14 = vweird.f32 %v7997_v16 }
 0xc3e   : > { %v3089_v43 = vmul.f32 %v7999_v46, %v3002_v51  ;;  %8000 = vrcp.f32 %v3003_v10  ;;  %v9962_v31 = vmul.f32 0.70710677, %v9956_v28  ;;  %vm3094_vm15 = vweird.f32 %v7999_v46  ;;  %vm3080_vm1 = vmor %vm3078_vm0, %vm3079_vm14 }
 0xc3f   : > { %v3075_v27 = vsub.f32 1.0, %v3074_v40  ;;  %8002 = vrcp.f32 %v9959_v29  ;;  %vm3095_vm4 = vmor %vm3093_vm2, %vm3094_vm15  ;;  %v3112_v8 = vand.u32 2147483647, %v3003_v10  ;;  %v3127_v50 = vand.u32 2147483647, %v9959_v29 }
 0xc40   : > { %v3090_v49 = vsub.f32 1.0, %v3089_v43  ;;  %v9966_v48 = vand.u32 2147483647, %v9962_v31  ;;  %vm3108_vm8 = vweird.f32 %v3003_v10  ;;  %vm3123_vm13 = vweird.f32 %v9959_v29 }
 0xc41   : > { %v3076_v0 = vmul.f32 %v7997_v16, %v3075_v27  ;;  %v3129_v27 = vand.u32 2147483648, %v9959_v29  ;;  %vm3113_vm9 = vcmp.eq.f32.partialorder %v3112_v8, 8.507059e+37  ;;  %vm3128_vm15 = vcmp.eq.f32.partialorder %v3127_v50, 8.507059e+37 }
 0xc42   : > { %v3091_v25 = vmul.f32 %v7999_v46, %v3090_v49  ;;  %v2989_v55 = vmul.f32 0.3275911, %v9966_v48  ;;  %v9987_v49 = vmul.f32 0.70710677, %v9979_v6 }
 0xc43   : > { %v3077_v38 = vadd.f32 %v7997_v16, %v3076_v0 }
 0xc44   : > { %v3092_v5 = vadd.f32 %v7999_v46, %v3091_v25  ;;  %v8001_v9 = vpop.eup %8000  ;;  %v9976_v17 = vadd.f32 1.0, %v2989_v55 }
 0xc45   : > { %v3081_v3 = vsel %vm3080_vm1, %v7997_v16, %v3077_v38  ;;  %v8003_v32 = vpop.eup %8002  ;;  %v3104_v7 = vmul.f32 %v8001_v9, %v3003_v10  ;;  %v3114_v16 = vand.u32 2147483648, %v3003_v10  ;;  %vm3109_vm6 = vweird.f32 %v8001_v9 }
 0xc46   : > { %v9968_v44 = vsel %vm3083_vm3, %v3085_v42, %v3081_v3  ;;  %v3096_v41 = vsel %vm3095_vm4, %v7999_v46, %v3092_v5  ;;  %v3119_v26 = vmul.f32 %v8003_v32, %v9959_v29  ;;  %8004 = vrcp.f32 %v9976_v17  ;;  %vm3110_vm12 = vmor %vm3108_vm8, %vm3109_vm6 }
 0xc47   : > { %v3257_v57 = vmul.f32 1.0614054, %v9968_v44  ;;  %v9971_v15 = vsel %vm3098_vm5, %v3100_v45, %v3096_v41  ;;  %v3105_v51 = vsub.f32 1.0, %v3104_v7  ;;  %vm3124_vm7 = vweird.f32 %v8003_v32 }
 0xc48   : > { %v3258_v19 = vmul.f32 1.0614054, %v9971_v15  ;;  %v3120_v40 = vsub.f32 1.0, %v3119_v26  ;;  %v3115_v25 = vor.u32 1.1754944e-38, %v3114_v16  ;;  %v9992_v38 = vand.u32 2147483647, %v9987_v49  ;;  %vm3125_vm14 = vmor %vm3123_vm13, %vm3124_vm7 }
 0xc49   : > { %v3273_v2 = vadd.f32 -1.4531521, %v3257_v57  ;;  %v3106_v62 = vmul.f32 %v8001_v9, %v3105_v51  ;;  %v3130_v3 = vor.u32 1.1754944e-38, %v3129_v27  ;;  %v3417_v7 = vmul.f32 %v3401_v36, %v9929_v39 }
 0xc4a   : > { %v3274_v33 = vadd.f32 -1.4531521, %v3258_v19  ;;  %v3121_v20 = vmul.f32 %v8003_v32, %v3120_v40  ;;  %v2990_v57 = vmul.f32 0.3275911, %v9992_v38  ;;  %v3142_v39 = vand.u32 2147483647, %v9976_v17 }
 0xc4b   : > { %v3289_v46 = vmul.f32 %v3273_v2, %v9968_v44  ;;  %v3107_v0 = vadd.f32 %v8001_v9, %v3106_v62  ;;  %v3437_v62 = vmul.f32 1.442695, %v3417_v7  ;;  %vm3138_vm1 = vweird.f32 %v9976_v17 }
 0xc4c   : > { %v3290_v43 = vmul.f32 %v3274_v33, %v9971_v15  ;;  %v3122_v13 = vadd.f32 %v8003_v32, %v3121_v20  ;;  %v8005_v45 = vpop.eup %8004  ;;  %v10005_v26 = vadd.f32 1.0, %v2990_v57  ;;  %vm3143_vm3 = vcmp.eq.f32.partialorder %v3142_v39, 8.507059e+37  ;;  %v2925_v39 = vpop.f32.mrf.mxu1 }
 0xc4d   : > { %v3305_v35 = vadd.f32 1.4214138, %v3289_v46  ;;  %v3111_v5 = vsel %vm3110_vm12, %v8001_v9, %v3107_v0  ;;  %v3134_v29 = vmul.f32 %v8005_v45, %v9976_v17  ;;  %v3402_v9 = vsub.f32 0.0, %v9932_v56 }
 0xc4e   : > { %v3306_v42 = vadd.f32 1.4214138, %v3290_v43  ;;  %v9995_v11 = vsel %vm3113_vm9, %v3115_v25, %v3111_v5  ;;  %v3126_v10 = vsel %vm3125_vm14, %v8003_v32, %v3122_v13  ;;  %v3144_v46 = vand.u32 2147483648, %v9976_v17  ;;  %v2896_v43 = vpop.f32.mrf.mxu0 }
 0xc4f   : > { %v3321_v41 = vmul.f32 %v3305_v35, %v9968_v44  ;;  %v3259_v55 = vmul.f32 1.0614054, %v9995_v11  ;;  %v9999_v19 = vsel %vm3128_vm15, %v3130_v3, %v3126_v10  ;;  %v3135_v32 = vsub.f32 1.0, %v3134_v29 }
 0xc50   : > { %v3260_v2 = vmul.f32 1.0614054, %v9999_v19  ;;  %v3322_v33 = vmul.f32 %v3306_v42, %v9971_v15  ;;  %8006 = vrcp.f32 %v10005_v26  ;;  %vm3139_vm0 = vweird.f32 %v8005_v45 }
 0xc51   : > { %v3275_v51 = vadd.f32 -1.4531521, %v3259_v55  ;;  %v3337_v8 = vadd.f32 -0.28449672, %v3321_v41  ;;  %v3136_v50 = vmul.f32 %v8005_v45, %v3135_v32  ;;  %v3418_v27 = vmul.f32 %v3402_v9, %v9932_v56  ;;  %vm3140_vm2 = vmor %vm3138_vm1, %vm3139_vm0 }
 0xc52   : > { %v3276_v16 = vadd.f32 -1.4531521, %v3260_v2  ;;  %v3403_v35 = vsub.f32 0.0, %v9949_v21  ;;  %v3338_v36 = vadd.f32 -0.28449672, %v3322_v33  ;;  %v3145_v5 = vor.u32 1.1754944e-38, %v3144_v46 }
 0xc53   : > { %v3291_v40 = vmul.f32 %v3275_v51, %v9995_v11  ;;  %v3137_v25 = vadd.f32 %v8005_v45, %v3136_v50  ;;  %v3353_v13 = vmul.f32 %v3337_v8, %v9968_v44  ;;  %v10018_v3 = vadd.f32 %v2896_v43, %v9771_v34 }
 0xc54   : > { %v3292_v20 = vmul.f32 %v3276_v16, %v9999_v19  ;;  %v3404_v56 = vsub.f32 0.0, %v9952_v60  ;;  %v3419_v55 = vmul.f32 %v3403_v35, %v9949_v21  ;;  %v3354_v7 = vmul.f32 %v3338_v36, %v9971_v15 }
 0xc55   : > { %v3307_v0 = vadd.f32 1.4214138, %v3291_v40  ;;  %v3141_v10 = vsel %vm3140_vm2, %v8005_v45, %v3137_v25  ;;  %v3439_v9 = vmul.f32 1.442695, %v3418_v27  ;;  %v3369_v51 = vadd.f32 0.2548296, %v3353_v13 }
 0xc56   : > { %v3308_v42 = vadd.f32 1.4214138, %v3292_v20  ;;  %v8007_v57 = vpop.eup %8006  ;;  %v10024_v17 = vsel %vm3143_vm3, %v3145_v5, %v3141_v10  ;;  %8008 = vpow2.f32 %v3437_v62  ;;  %v10030_v45 = vmul.f32 0.70710677, %v10018_v3 }
 0xc57   : > { %v3323_v41 = vmul.f32 %v3307_v0, %v9995_v11  ;;  %v3261_v2 = vmul.f32 1.0614054, %v10024_v17  ;;  %v3149_v33 = vmul.f32 %v8007_v57, %v10005_v26  ;;  %v3420_v21 = vmul.f32 %v3404_v56, %v9952_v60 }
 0xc58   : > { %v3324_v29 = vmul.f32 %v3308_v42, %v9999_v19  ;;  %v3441_v40 = vmul.f32 1.442695, %v3419_v55  ;;  %v10034_v50 = vand.u32 2147483647, %v10030_v45  ;;  %v3370_v43 = vadd.f32 0.2548296, %v3354_v7 }
 0xc59   : > { %v3339_v32 = vadd.f32 -0.28449672, %v3323_v41  ;;  %v3277_v16 = vadd.f32 -1.4531521, %v3261_v2  ;;  %v3150_v46 = vsub.f32 1.0, %v3149_v33  ;;  %v3159_v62 = vand.u32 2147483648, %v10005_v26 }
 0xc5a   : > { %v3340_v8 = vadd.f32 -0.28449672, %v3324_v29  ;;  %v3157_v35 = vand.u32 2147483647, %v10005_v26  ;;  %v3385_v20 = vmul.f32 %v3369_v51, %v9968_v44  ;;  %vm3154_vm4 = vweird.f32 %v8007_v57 }
 0xc5b   : > { %v3293_v27 = vmul.f32 %v3277_v16, %v10024_v17  ;;  %v3151_v36 = vmul.f32 %v8007_v57, %v3150_v46  ;;  %v2991_v60 = vmul.f32 0.3275911, %v10034_v50  ;;  %8010 = vpow2.f32 %v3439_v9 }
 0xc5c   : > { %v3355_v0 = vmul.f32 %v3339_v32, %v9995_v11  ;;  %v3356_v25 = vmul.f32 %v3340_v8, %v9999_v19  ;;  %v3443_v13 = vmul.f32 1.442695, %v3420_v21  ;;  %v8009_v42 = vpop.eup %8008  ;;  %vm3153_vm5 = vweird.f32 %v10005_v26 }
 0xc5d   : > { %v3309_v5 = vadd.f32 1.4214138, %v3293_v27  ;;  %v3152_v41 = vadd.f32 %v8007_v57, %v3151_v36  ;;  %v10044_v56 = vadd.f32 1.0, %v2991_v60  ;;  %v3386_v10 = vmul.f32 %v3370_v43, %v9971_v15  ;;  %vm3155_vm6 = vmor %vm3153_vm5, %vm3154_vm4 }
 0xc5e   : > { %8012 = vpow2.f32 %v3441_v40  ;;  %v3405_v44 = vsub.f32 0.0, %v9966_v48  ;;  %v3160_v55 = vor.u32 1.1754944e-38, %v3159_v62  ;;  %v10048_v29 = vmul.f32 %v8009_v42, %v3385_v20  ;;  %v2899_v40 = vpop.f32.mrf.mxu0 }
 0xc5f   : > { %v3156_v7 = vsel %vm3155_vm6, %v8007_v57, %v3152_v41  ;;  %vm3158_vm7 = vcmp.eq.f32.partialorder %v3157_v35, 8.507059e+37  ;;  %8014 = vrcp.f32 %v10044_v56  ;;  %v3371_v9 = vadd.f32 0.2548296, %v3355_v0  ;;  %v2928_v35 = vpop.f32.mrf.mxu1 }
 0xc60   : > { %v3372_v2 = vadd.f32 0.2548296, %v3356_v25  ;;  %v10051_v33 = vsel %vm3158_vm7, %v3160_v55, %v3156_v7  ;;  %v10054_v26 = vadd.f32 %v2925_v39, %v9773_v47  ;;  %v10057_v15 = vmul.f32 0.5, %v9917_v58 }
 0xc61   : > { %8016 = vpow2.f32 %v3443_v13  ;;  %v3325_v51 = vmul.f32 %v3309_v5, %v10024_v17  ;;  %v3262_v32 = vmul.f32 1.0614054, %v10051_v33  ;;  %v8011_v8 = vpop.eup %8010  ;;  %v10062_v57 = vmul.f32 0.5, %v9920_v54 }
 0xc62   : > { %v10065_v21 = vmul.f32 0.5, %v9937_v4  ;;  %v3421_v16 = vmul.f32 %v3405_v44, %v9966_v48  ;;  %v3406_v46 = vsub.f32 0.0, %v9992_v38  ;;  %v3481_v58 = vsub.f32 1.0, %v10048_v29 }
 0xc63   : > { %v10070_v39 = vmul.f32 %v8011_v8, %v3386_v10  ;;  %v10073_v43 = vmul.f32 0.5, %v9940_v61  ;;  %v3278_v27 = vadd.f32 -1.4531521, %v3262_v32  ;;  %v3387_v54 = vmul.f32 %v3371_v9, %v9995_v11 }
 0xc64   : > { %v8013_v62 = vpop.eup %8012  ;;  %v3388_v4 = vmul.f32 %v3372_v2, %v9999_v19  ;;  %v10078_v20 = vmul.f32 0.5, %v9956_v28  ;;  %v10081_v48 = vmul.f32 0.70710677, %v10054_v26  ;;  %v3341_v60 = vadd.f32 -0.28449672, %v3325_v51 }
 0xc65   : > { %v8015_v36 = vpop.eup %8014  ;;  %v10084_v0 = vmul.f32 0.5, %v9979_v6  ;;  %v3294_v61 = vmul.f32 %v3278_v27, %v10051_v33  ;;  %v10088_v25 = vadd.f32 %v2899_v40, %v9771_v34  ;;  %v3445_v13 = vmul.f32 1.442695, %v3421_v16 }
 0xc66   : > { %v3422_v11 = vmul.f32 %v3406_v46, %v9992_v38  ;;  %v3164_v19 = vmul.f32 %v8015_v36, %v10044_v56  ;;  %v10093_v28 = vadd.f32 %v2928_v35, %v9773_v47  ;;  %vm3497_vm8 = vcmp.ge.f32.partialorder %v9923_v30, 0.0 }
 0xc67   : > { %v8017_v42 = vpop.eup %8016  ;;  %v3513_v5 = vsub.f32 0.0, %v3481_v58  ;;  %v3482_v6 = vsub.f32 1.0, %v10070_v39  ;;  %v3310_v41 = vadd.f32 1.4214138, %v3294_v61  ;;  %v10098_v10 = vand.u32 2147483647, %v10081_v48 }
 0xc68   : > { %v3467_v44 = vmul.f32 %v8013_v62, %v3387_v54  ;;  %v3468_v55 = vmul.f32 %v8017_v42, %v3388_v4  ;;  %v3165_v29 = vsub.f32 1.0, %v3164_v19  ;;  %v3174_v38 = vand.u32 2147483648, %v10044_v56 }
 0xc69   : > { %v3357_v7 = vmul.f32 %v3341_v60, %v10024_v17  ;;  %v3326_v9 = vmul.f32 %v3310_v41, %v10051_v33  ;;  %v2992_v2 = vmul.f32 0.3275911, %v10098_v10  ;;  %v10105_v51 = vmul.f32 0.70710677, %v10088_v25 }
 0xc6a   : > { %v3166_v32 = vmul.f32 %v8015_v36, %v3165_v29  ;;  %vm3169_vm9 = vweird.f32 %v8015_v36  ;;  %v3172_v8 = vand.u32 2147483647, %v10044_v56  ;;  %v10109_v16 = vmul.f32 0.70710677, %v10093_v28 }
 0xc6b   : > { %vm3498_vm12 = vcmp.ge.f32.partialorder %v9926_v63, 0.0  ;;  %v3342_v46 = vadd.f32 -0.28449672, %v3326_v9  ;;  %vm3168_vm13 = vweird.f32 %v10044_v56  ;;  %v3407_v40 = vsub.f32 0.0, %v10034_v50 }
 0xc6c   : > { %v10114_v39 = vadd.f32 1.0, %v2992_v2  ;;  %v3483_v27 = vsub.f32 1.0, %v3467_v44  ;;  %vm3499_vm14 = vcmp.ge.f32.partialorder %v9943_v37, 0.0  ;;  %v3484_v35 = vsub.f32 1.0, %v3468_v55  ;;  %vm3170_vm0 = vmor %vm3168_vm13, %vm3169_vm9 }
 0xc6d   : > { %vm3500_vm15 = vcmp.ge.f32.partialorder %v9946_v22, 0.0  ;;  %v3167_v62 = vadd.f32 %v8015_v36, %v3166_v32  ;;  %v10119_v54 = vand.u32 2147483647, %v10105_v51  ;;  %v3373_v4 = vadd.f32 0.2548296, %v3357_v7 }
 0xc6e   : > { %v3175_v60 = vor.u32 1.1754944e-38, %v3174_v38  ;;  %8018 = vrcp.f32 %v10114_v39  ;;  %v10124_v56 = vand.u32 2147483647, %v10109_v16  ;;  %v3447_v61 = vmul.f32 1.442695, %v3422_v11 }
 0xc6f   : > { %8020 = vpow2.f32 %v3445_v13  ;;  %v3171_v19 = vsel %vm3170_vm0, %v8015_v36, %v3167_v62  ;;  %vm3173_vm1 = vcmp.eq.f32.partialorder %v3172_v8, 8.507059e+37  ;;  %v3514_v42 = vsub.f32 0.0, %v3482_v6 }
 0xc70   : > { %v3358_v41 = vmul.f32 %v3342_v46, %v10051_v33  ;;  %v10127_v44 = vsel %vm3173_vm1, %v3175_v60, %v3171_v19  ;;  %v3423_v55 = vmul.f32 %v3407_v40, %v10034_v50  ;;  %v3529_v29 = vsel %vm3497_vm8, %v3481_v58, %v3513_v5  ;;  %v2901_v60 = vpop.f32.mrf.mxu0 }
 0xc71   : > { %v3515_v38 = vsub.f32 0.0, %v3483_v27  ;;  %v3263_v7 = vmul.f32 1.0614054, %v10127_v44  ;;  %v2993_v9 = vmul.f32 0.3275911, %v10119_v54  ;;  %v3516_v2 = vsub.f32 0.0, %v3484_v35 }
 0xc72   : > { %v3389_v13 = vmul.f32 %v3373_v4, %v10024_v17  ;;  %v3408_v36 = vsub.f32 0.0, %v10098_v10  ;;  %v2994_v11 = vmul.f32 0.3275911, %v10124_v56  ;;  %8022 = vpow2.f32 %v3447_v61 }
 0xc73   : > { %v10138_v32 = vmul.f32 0.5, %v10018_v3  ;;  %v3279_v50 = vadd.f32 -1.4531521, %v3263_v7  ;;  %v10140_v8 = vadd.f32 1.0, %v2993_v9  ;;  %v10142_v58 = vadd.f32 1.0, %v3529_v29 }
 0xc74   : > { %v8019_v30 = vpop.eup %8018  ;;  %v3374_v5 = vadd.f32 0.2548296, %v3358_v41  ;;  %v3449_v46 = vmul.f32 1.442695, %v3423_v55  ;;  %v10144_v40 = vadd.f32 1.0, %v2994_v11  ;;  %v10148_v17 = vsel %vm3498_vm12, %v3482_v6, %v3514_v42 }
 0xc75   : > { %v8021_v62 = vpop.eup %8020  ;;  %v3295_v4 = vmul.f32 %v3279_v50, %v10127_v44  ;;  %v3179_v3 = vmul.f32 %v8019_v30, %v10114_v39  ;;  %8024 = vrcp.f32 %v10140_v8  ;;  %v3531_v61 = vsel %vm3499_vm14, %v3483_v27, %v3515_v38 }
 0xc76   : > { %v3532_v19 = vsel %vm3500_vm15, %v3484_v35, %v3516_v2  ;;  %v10157_v41 = vmul.f32 %v8021_v62, %v3389_v13  ;;  %v3424_v55 = vmul.f32 %v3408_v36, %v10098_v10  ;;  %v3187_v42 = vand.u32 2147483647, %v10114_v39 }
 0xc77   : > { %v3311_v63 = vadd.f32 1.4214138, %v3295_v4  ;;  %v3180_v6 = vsub.f32 1.0, %v3179_v3  ;;  %8026 = vrcp.f32 %v10144_v40  ;;  %v3390_v29 = vmul.f32 %v3374_v5, %v10051_v33 }
 0xc78   : > { %8028 = vpow2.f32 %v3449_v46  ;;  %v3189_v7 = vand.u32 2147483648, %v10114_v39  ;;  %v10165_v37 = vadd.f32 %v2901_v60, %v9771_v34  ;;  %v8023_v22 = vpop.eup %8022  ;;  %vm3184_vm2 = vweird.f32 %v8019_v30 }
 0xc79   : > { %v3327_v27 = vmul.f32 %v3311_v63, %v10127_v44  ;;  %v3181_v35 = vmul.f32 %v8019_v30, %v3180_v6  ;;  %v3202_v10 = vand.u32 2147483647, %v10140_v8  ;;  %v3547_v38 = vadd.f32 1.0, %v3531_v61  ;;  %v2930_v61 = vpop.f32.mrf.mxu1 }
 0xc7a   : > { %v10169_v9 = vadd.f32 1.0, %v3532_v19  ;;  %v3485_v2 = vsub.f32 1.0, %v10157_v41  ;;  %vm3183_vm3 = vweird.f32 %v10114_v39  ;;  %vm3188_vm4 = vcmp.eq.f32.partialorder %v3187_v42, 8.507059e+37 }
 0xc7b   : > { %v8025_v33 = vpop.eup %8024  ;;  %v3343_v13 = vadd.f32 -0.28449672, %v3327_v27  ;;  %v3182_v36 = vadd.f32 %v8019_v30, %v3181_v35  ;;  %v10173_v34 = vmul.f32 1.442695, %v3424_v55  ;;  %v10175_v11 = vmul.f32 %v8023_v22, %v3390_v29  ;;  %vm3185_vm5 = vmor %vm3183_vm3, %vm3184_vm2 }
 0xc7c   : > { %v3190_v50 = vor.u32 1.1754944e-38, %v3189_v7  ;;  %v3194_v5 = vmul.f32 %v8025_v33, %v10140_v8  ;;  %v3204_v46 = vand.u32 2147483648, %v10140_v8  ;;  %vm10180_vm6 = vcmp.eq.f32.partialorder %v3202_v10, 8.507059e+37 }
 0xc7d   : > { %v8027_v62 = vpop.eup %8026  ;;  %v3359_v4 = vmul.f32 %v3343_v13, %v10127_v44  ;;  %v3186_v3 = vsel %vm3185_vm5, %v8019_v30, %v3182_v36  ;;  %v10185_v60 = vmul.f32 0.70710677, %v10165_v37  ;;  %v3217_v42 = vand.u32 2147483647, %v10144_v40 }
 0xc7e   : > { %v8029_v19 = vpop.eup %8028  ;;  %v10187_v55 = vsel %vm3188_vm4, %v3190_v50, %v3186_v3  ;;  %v3195_v63 = vsub.f32 1.0, %v3194_v5  ;;  %v3209_v6 = vmul.f32 %v8027_v62, %v10144_v40  ;;  %vm3198_vm7 = vweird.f32 %v10140_v8 }
 0xc7f   : > { %v3375_v29 = vadd.f32 0.2548296, %v3359_v4  ;;  %v3264_v7 = vmul.f32 1.0614054, %v10187_v55  ;;  %v10194_v30 = vand.u32 2147483647, %v10185_v60  ;;  %vm3199_vm8 = vweird.f32 %v8025_v33 }
 0xc80   : > { %v3196_v22 = vmul.f32 %v8025_v33, %v3195_v63  ;;  %v3210_v27 = vsub.f32 1.0, %v3209_v6  ;;  %v10197_v35 = vadd.f32 %v2930_v61, %v9773_v47  ;;  %v3219_v36 = vand.u32 2147483648, %v10144_v40  ;;  %vm3200_vm13 = vmor %vm3198_vm7, %vm3199_vm8 }
 0xc81   : > { %v3391_v10 = vmul.f32 %v3375_v29, %v10127_v44  ;;  %v3280_v13 = vadd.f32 -1.4531521, %v3264_v7  ;;  %v2995_v50 = vmul.f32 0.3275911, %v10194_v30  ;;  %vm3214_vm9 = vweird.f32 %v8027_v62 }
 0xc82   : > { %v3197_v5 = vadd.f32 %v8025_v33, %v3196_v22  ;;  %v3211_v4 = vmul.f32 %v8027_v62, %v3210_v27  ;;  %v10203_v3 = vmul.f32 0.70710677, %v10197_v35  ;;  %vm3501_vm12 = vcmp.ge.f32.partialorder %v9962_v31, 0.0 }
 0xc83   : > { %v3471_v63 = vmul.f32 %v8029_v19, %v3391_v10  ;;  %v3296_v6 = vmul.f32 %v3280_v13, %v10187_v55  ;;  %v3205_v47 = vor.u32 1.1754944e-38, %v3204_v46  ;;  %v10209_v44 = vadd.f32 1.0, %v2995_v50 }
 0xc84   : > { %v3201_v61 = vsel %vm3200_vm13, %v8025_v33, %v3197_v5  ;;  %v3212_v29 = vadd.f32 %v8027_v62, %v3211_v4  ;;  %vm3213_vm14 = vweird.f32 %v10144_v40  ;;  %vm3218_vm15 = vcmp.eq.f32.partialorder %v3217_v42, 8.507059e+37 }
 0xc85   : > { %v3312_v7 = vadd.f32 1.4214138, %v3296_v6  ;;  %v10214_v22 = vsel %vm10180_vm6, %v3205_v47, %v3201_v61  ;;  %vm3215_vm0 = vmor %vm3213_vm14, %vm3214_vm9  ;;  %v3220_v19 = vor.u32 1.1754944e-38, %v3219_v36  ;;  %8030 = vrcp.f32 %v10209_v44 }
 0xc86   : > { %v3487_v27 = vsub.f32 1.0, %v3471_v63  ;;  %v3265_v8 = vmul.f32 1.0614054, %v10214_v22  ;;  %v3216_v46 = vsel %vm3215_vm0, %v8027_v62, %v3212_v29  ;;  %v10219_v10 = vand.u32 2147483647, %v10203_v3 }
 0xc87   : > { %v3546_v33 = vadd.f32 1.0, %v10148_v17  ;;  %v3563_v40 = vmul.f32 %v3547_v38, %v10065_v21  ;;  %v3328_v42 = vmul.f32 %v3312_v7, %v10187_v55  ;;  %v10224_v39 = vsel %vm3218_vm15, %v3220_v19, %v3216_v46 }
 0xc88   : > { %v3561_v13 = vmul.f32 %v10142_v58, %v10057_v15  ;;  %v3517_v36 = vsub.f32 0.0, %v3485_v2  ;;  %vm3502_vm1 = vcmp.ge.f32.partialorder %v9987_v49, 0.0  ;;  %v3281_v62 = vadd.f32 -1.4531521, %v3265_v8 }
 0xc89   : > { %v3266_v50 = vmul.f32 1.0614054, %v10224_v39  ;;  %v3564_v17 = vmul.f32 %v10169_v9, %v10073_v43  ;;  %v3486_v21 = vsub.f32 1.0, %v10175_v11  ;;  %v3344_v38 = vadd.f32 -0.28449672, %v3328_v42 }
 0xc8a   : > { %8032 = vpow2.f32 %v10173_v34  ;;  %v3519_v5 = vsub.f32 0.0, %v3487_v27  ;;  %v3297_v4 = vmul.f32 %v3281_v62, %v10214_v22  ;;  %v2996_v58 = vmul.f32 0.3275911, %v10219_v10 }
 0xc8b   : > { %v3282_v15 = vadd.f32 -1.4531521, %v3266_v50  ;;  %v8031_v63 = vpop.eup %8030  ;;  %vm3503_vm2 = vcmp.ge.f32.partialorder %v10030_v45, 0.0  ;;  %v3360_v6 = vmul.f32 %v3344_v38, %v10187_v55  ;;  %v3409_v47 = vsub.f32 0.0, %v10119_v54 }
 0xc8c   : > { %v3607_v61 = vpack.c.bf16 %v3563_v40, %v3561_v13  ;;  %v3562_v43 = vmul.f32 %v3546_v33, %v10062_v57  ;;  %v3533_v9 = vsel %vm3501_vm12, %v3485_v2, %v3517_v36  ;;  %v3313_v34 = vadd.f32 1.4214138, %v3297_v4 }
 0xc8d   : > { %v3224_v11 = vmul.f32 %v8031_v63, %v10209_v44  ;;  %v3518_v29 = vsub.f32 0.0, %v3486_v21  ;;  %v3376_v7 = vadd.f32 0.2548296, %v3360_v6  ;;  %v3298_v19 = vmul.f32 %v3282_v15, %v10224_v39 }
 0xc8e   : > { %v10248_v45 = vadd.f32 1.0, %v2996_v58  ;;  %3726 = vmatmul.bf16.gmra.mxu2 %v3607_v61  ;;  %v3535_v8 = vsel %vm3503_vm2, %v3487_v27, %v3519_v5  ;;  %v3329_v46 = vmul.f32 %v3313_v34, %v10214_v22  ;;  %v3608_v57 = vpack.c.bf16 %v3564_v17, %v3562_v43 }
 0xc8f   : > { %v3225_v40 = vsub.f32 1.0, %v3224_v11  ;;  %v3392_v41 = vmul.f32 %v3376_v7, %v10187_v55  ;;  %v3425_v31 = vmul.f32 %v3409_v47, %v10119_v54  ;;  %v3234_v2 = vand.u32 2147483648, %v10209_v44 }
 0xc90   : > { %v8033_v33 = vpop.eup %8032  ;;  %8034 = vrcp.f32 %v10248_v45  ;;  %v3345_v42 = vadd.f32 -0.28449672, %v3329_v46  ;;  %vm3229_vm3 = vweird.f32 %v8031_v63  ;;  %v3232_v36 = vand.u32 2147483647, %v10209_v44  ;;  %3755 = vmatmul.bf16.gmra.mxu3 %v3608_v57 }
 0xc91   : > { %v3226_v13 = vmul.f32 %v8031_v63, %v3225_v40  ;;  %v3534_v27 = vsel %vm3502_vm1, %v3486_v21, %v3518_v29  ;;  %v3551_v62 = vadd.f32 1.0, %v3535_v8  ;;  %v3472_v50 = vmul.f32 %v8033_v33, %v3392_v41 }
 0xc92   : > { %v3314_v17 = vadd.f32 1.4214138, %v3298_v19  ;;  %v3549_v38 = vadd.f32 1.0, %v3533_v9  ;;  %v3361_v55 = vmul.f32 %v3345_v42, %v10214_v22  ;;  %vm3228_vm4 = vweird.f32 %v10209_v44 }
 0xc93   : > { %v3227_v54 = vadd.f32 %v8031_v63, %v3226_v13  ;;  %v3488_v5 = vsub.f32 1.0, %v3472_v50  ;;  %v3453_v4 = vmul.f32 1.442695, %v3425_v31  ;;  %v3410_v15 = vsub.f32 0.0, %v10124_v56  ;;  %vm3230_vm5 = vmor %vm3228_vm4, %vm3229_vm3 }
 0xc94   : > { %v3235_v58 = vor.u32 1.1754944e-38, %v3234_v2  ;;  %v3550_v6 = vadd.f32 1.0, %v3534_v27  ;;  %vm3233_vm6 = vcmp.eq.f32.partialorder %v3232_v36, 8.507059e+37  ;;  %v3411_v49 = vsub.f32 0.0, %v10194_v30 }
 0xc95   : > { %v3231_v47 = vsel %vm3230_vm5, %v8031_v63, %v3227_v54  ;;  %v3567_v61 = vmul.f32 %v3551_v62, %v10138_v32  ;;  %v3520_v43 = vsub.f32 0.0, %v3488_v5  ;;  %v3330_v9 = vmul.f32 %v3314_v17, %v10224_v39 }
 0xc96   : > { %v8035_v21 = vpop.eup %8034  ;;  %v3236_v34 = vsel %vm3233_vm6, %v3235_v58, %v3231_v47  ;;  %vm3504_vm7 = vcmp.ge.f32.partialorder %v10081_v48, 0.0  ;;  %v3377_v44 = vadd.f32 0.2548296, %v3361_v55  ;;  %v3565_v7 = vmul.f32 %v3549_v38, %v10078_v20  ;;  %v3722_v58 = vpop.f32.mrf.mxu2 }
 0xc97   : > { %v3267_v11 = vmul.f32 1.0614054, %v3236_v34  ;;  %v3239_v29 = vmul.f32 %v8035_v21, %v10248_v45  ;;  %v2944_v63 = vmul.f32 0.5, %v10054_v26  ;;  %v3536_v19 = vsel %vm3504_vm7, %v3488_v5, %v3520_v43 }
 0xc98   : > { %8036 = vpow2.f32 %v3453_v4  ;;  %v3566_v8 = vmul.f32 %v3550_v6, %v10084_v0  ;;  %v3552_v46 = vadd.f32 1.0, %v3536_v19  ;;  %v3426_v32 = vmul.f32 %v3410_v15, %v10124_v56  ;;  %v10280_v15 = vld [vmem:[%s11969_s13] ss:$0 sm:$0xff] }
 0xc99   : > { %v3283_v40 = vadd.f32 -1.4531521, %v3267_v11  ;;  %v3346_v57 = vadd.f32 -0.28449672, %v3330_v9  ;;  %v3427_v33 = vmul.f32 %v3411_v49, %v10194_v30  ;;  %v3240_v48 = vsub.f32 1.0, %v3239_v29 }
 0xc9a   : > { %v3609_v41 = vpack.c.bf16 %v3567_v61, %v3565_v7  ;;  %v3568_v31 = vmul.f32 %v3552_v46, %v2944_v63  ;;  %v3393_v2 = vmul.f32 %v3377_v44, %v10214_v22  ;;  %v3249_v20 = vand.u32 2147483648, %v10248_v45 }
 0xc9b   : > { %v3299_v42 = vmul.f32 %v3283_v40, %v3236_v34  ;;  %v3241_v26 = vmul.f32 %v8035_v21, %v3240_v48  ;;  %vm3244_vm8 = vweird.f32 %v8035_v21  ;;  %v3247_v13 = vand.u32 2147483647, %v10248_v45 }
 0xc9c   : > { %v3610_v36 = vpack.c.bf16 %v3568_v31, %v3566_v8  ;;  %v3362_v56 = vmul.f32 %v3346_v57, %v10224_v39  ;;  %v3457_v62 = vmul.f32 1.442695, %v3427_v33  ;;  %vm3243_vm9 = vweird.f32 %v10248_v45  ;;  %v3751_v45 = vpop.f32.mrf.mxu3 }
 0xc9d   : > { %v3315_v0 = vadd.f32 1.4214138, %v3299_v42  ;;  %v3242_v50 = vadd.f32 %v8035_v21, %v3241_v26  ;;  %v3455_v17 = vmul.f32 1.442695, %v3426_v32  ;;  %vm3245_vm12 = vmor %vm3243_vm9, %vm3244_vm8  ;;  %v3250_v38 = vor.u32 1.1754944e-38, %v3249_v20 }
 0xc9e   : > { %v8037_v27 = vpop.eup %8036  ;;  %3731 = vmatmul.bf16.gmra.mxu2 %v3609_v41  ;;  %vm3248_vm13 = vcmp.eq.f32.partialorder %v3247_v13, 8.507059e+37  ;;  %v3412_v4 = vsub.f32 0.0, %v10219_v10  ;;  %v3378_v6 = vadd.f32 0.2548296, %v3362_v56  ;;  %8038 = vpow2.f32 %v3457_v62  ;;  %v3724_v48 = vpop.f32.mrf.mxu2 }
 0xc9f   : > { %v3473_v30 = vmul.f32 %v8037_v27, %v3393_v2  ;;  %v3331_v22 = vmul.f32 %v3315_v0, %v3236_v34  ;;  %v3246_v55 = vsel %vm3245_vm12, %v8035_v21, %v3242_v50  ;;  %8040 = vpow2.f32 %v3455_v17 }
 0xca0   : > { %v3251_v5 = vsel %vm3248_vm13, %v3250_v38, %v3246_v55  ;;  %3760 = vmatmul.bf16.gmra.mxu3 %v3610_v36  ;;  %v3723_v21 = vadd.f32 %v10280_v15, %v3722_v58  ;;  %v3428_v44 = vmul.f32 %v3412_v4, %v10219_v10  ;;  %v3394_v29 = vmul.f32 %v3378_v6, %v10224_v39 }
 0xca1   : > { %v3347_v54 = vadd.f32 -0.28449672, %v3331_v22  ;;  %v3268_v47 = vmul.f32 1.0614054, %v3251_v5  ;;  %v3489_v49 = vsub.f32 1.0, %v3473_v30  ;;  %vm3505_vm14 = vcmp.ge.f32.partialorder %v10105_v51, 0.0 }
 0xca2   : > { %v3752_v11 = vadd.f32 %v3751_v45, %v3723_v21  ;;  %v3459_v33 = vmul.f32 1.442695, %v3428_v44  ;;  %v3725_v39 = vadd.f32 %v10280_v15, %v3724_v48  ;;  %vm3507_vm15 = vcmp.ge.f32.partialorder %v10185_v60, 0.0 }
 0xca3   : > { %v3363_v61 = vmul.f32 %v3347_v54, %v3236_v34  ;;  %v3284_v43 = vadd.f32 -1.4531521, %v3268_v47  ;;  %v3521_v63 = vsub.f32 0.0, %v3489_v49  ;;  %v2945_v27 = vmul.f32 0.5, %v10088_v25 }
 0xca4   : > { %v10286_v8 = vadd.f32 %v3752_v11, %v9563_v18  ;;  %v8039_v46 = vpop.eup %8038  ;;  %8042 = vpow2.f32 %v3459_v33  ;;  %v2947_v56 = vmul.f32 0.5, %v10165_v37  ;;  %vm3506_vm0 = vcmp.ge.f32.partialorder %v10109_v16, 0.0 }
 0xca5   : > { %v3379_v9 = vadd.f32 0.2548296, %v3363_v61  ;;  %v3300_v7 = vmul.f32 %v3284_v43, %v3251_v5  ;;  %v8041_v40 = vpop.eup %8040  ;;  %v3537_v31 = vsel %vm3505_vm14, %v3489_v49, %v3521_v63  ;;  %vm3508_vm1 = vcmp.ge.f32.partialorder %v10203_v3, 0.0 }
 0xca6   : > { %3779 = vadd.xlane.f32.xlu2 %v10286_v8  ;;  %v3474_v10 = vmul.f32 %v8041_v40, %v3394_v29  ;;  %v3553_v26 = vadd.f32 1.0, %v3537_v31  ;;  %v2946_v45 = vmul.f32 0.5, %v10093_v28  ;;  %v2948_v6 = vmul.f32 0.5, %v10197_v35 }
 0xca7   : > { %v3395_v19 = vmul.f32 %v3379_v9, %v3236_v34  ;;  %v3316_v32 = vadd.f32 1.4214138, %v3300_v7  ;;  %v3753_v34 = vpop.f32.mrf.mxu3 }
 0xca8   : > { %v3754_v18 = vadd.f32 %v3753_v34, %v3725_v39  ;;  %v3490_v13 = vsub.f32 1.0, %v3474_v10  ;;  %v3569_v30 = vmul.f32 %v3553_v26, %v2945_v27 }
 0xca9   : > { %v3475_v57 = vmul.f32 %v8039_v46, %v3395_v19  ;;  %v3332_v41 = vmul.f32 %v3316_v32, %v3251_v5 }
 0xcaa   : > { %v10293_v36 = vadd.f32 %v3754_v18, %v9568_v24  ;;  %v3522_v17 = vsub.f32 0.0, %v3490_v13  ;;  %v8043_v38 = vpop.eup %8042 }
 0xcab   : > { %v3491_v2 = vsub.f32 1.0, %v3475_v57  ;;  %v3348_v42 = vadd.f32 -0.28449672, %v3332_v41 }
 0xcac   : > { %3781 = vadd.xlane.f32.xlu1 %v10293_v36  ;;  %v3538_v24 = vsel %vm3506_vm0, %v3490_v13, %v3522_v17 }
 0xcad   : > { %v3523_v20 = vsub.f32 0.0, %v3491_v2  ;;  %v3364_v0 = vmul.f32 %v3348_v42, %v3251_v5  ;;  %v3554_v25 = vadd.f32 1.0, %v3538_v24  ;;  %v7288_v24 = vld [vmem:[%s11962_s6 + $0x168] sm:$0xf] }
 0xcaf   : > { %v3539_v51 = vsel %vm3507_vm15, %v3491_v2, %v3523_v20  ;;  %v3380_v50 = vadd.f32 0.2548296, %v3364_v0  ;;  %v3570_v49 = vmul.f32 %v3554_v25, %v2946_v45  ;;  %v7296_v45 = vld [vmem:[%s11962_s6 + $0x170] sm:$0xf] }
 0xcb0   : > { %v3555_v62 = vadd.f32 1.0, %v3539_v51 }
 0xcb1   : > { %v3396_v22 = vmul.f32 %v3380_v50, %v3251_v5 }
 0xcb2   : > { %v3571_v60 = vmul.f32 %v3555_v62, %v2947_v56 }
 0xcb3   : > { %v3476_v55 = vmul.f32 %v8043_v38, %v3396_v22 }
 0xcb4   : > { %v3611_v54 = vpack.c.bf16 %v3571_v60, %v3569_v30 }
 0xcb5   : > { %v3492_v4 = vsub.f32 1.0, %v3476_v55 }
 0xcb6   : > { %3736 = vmatmul.bf16.gmra.mxu2 %v3611_v54 }
 0xcb7   : > { %v3524_v58 = vsub.f32 0.0, %v3492_v4 }
 0xcb9   : > { %v3540_v37 = vsel %vm3508_vm1, %v3492_v4, %v3524_v58  ;;  %v7673_v4 = vld [vmem:[%s11962_s6 + $0x170] sm:$0xf0]  ;;  %v7672_v58 = vld [vmem:[%s11962_s6 + $0x16c] sm:$0xf] }
 0xcba   : > { %v3556_v47 = vadd.f32 1.0, %v3540_v37  ;;  %v7289_v25 = vor.u32 %v7673_v4, %v7288_v24  ;;  %v7290_v37 = vld [vmem:[%s11962_s6 + $0x174] sm:$0xf0]  ;;  %v7660_v24 = vld [vmem:[%s11962_s6 + $0x10c] sm:$0xf] }
 0xcbc   : > { %v3572_v5 = vmul.f32 %v3556_v47, %v2948_v6  ;;  %v7674_v6 = vld [vmem:[%s11962_s6 + $0x178] sm:$0xf0]  ;;  %4113 = vmatpush.bf16.msra.mxu0 %v7289_v25  ;;  %v7242_v25 = vld [vmem:[%s11962_s6 + $0x114] sm:$0xf0] }
 0xcbe   : > { %v3612_v61 = vpack.c.bf16 %v3572_v5, %v3570_v49  ;;  %v7293_v5 = vor.u32 %v7672_v58, %v7290_v37  ;;  %v7248_v37 = vld [vmem:[%s11962_s6 + $0x110] sm:$0xf] }
 0xcc0   : > { %3765 = vmatmul.bf16.gmra.mxu3 %v3612_v61  ;;  %v7297_v61 = vor.u32 %v7674_v6, %v7296_v45  ;;  %4142 = vmatpush.bf16.msrb.mxu1 %v7293_v5  ;;  %v7245_v45 = vor.u32 %v7660_v24, %v7242_v25  ;;  %v7662_v6 = vld [vmem:[%s11962_s6 + $0x118] sm:$0xf0]  ;;  %v7228_v5 = vld [vmem:[%s11962_s6 + $0xf0] sm:$0xf] }
 0xcc2   : > { %4171 = vmatpush.bf16.msrb.mxu2 %v7297_v61  ;;  %v7658_v61 = vld [vmem:[%s11962_s6 + $0xf8] sm:$0xf0] }
 0xd11   : > { %v3727_v21 = vpop.f32.mrf.mxu2 }
 0xd12   : > { %v3728_v16 = vadd.f32 %v10280_v15, %v3727_v21  ;;  %v7276_v21 = vld [vmem:[%s11962_s6 + $0x150] sm:$0xf] }
 0xd13   : > { %v3756_v43 = vpop.f32.mrf.mxu3 }
 0xd14   : > { %v3757_v9 = vadd.f32 %v3756_v43, %v3728_v16  ;;  %v7670_v16 = vld [vmem:[%s11962_s6 + $0x158] sm:$0xf0] }
 0xd15   : > { %v7277_v43 = vor.u32 %v7670_v16, %v7276_v21  ;;  %v7249_v21 = vor.u32 %v7662_v6, %v7248_v37  ;;  %v7657_v16 = vld [vmem:[%s11962_s6 + $0xf4] sm:$0xf] }
 0xd16   : > { %v10304_v44 = vadd.f32 %v3757_v9, %v9575_v59  ;;  %v7669_v9 = vld [vmem:[%s11962_s6 + $0x154] sm:$0xf] }
 0xd17   : > { %4114 = vmatpush.bf16.msra.mxu0 %v7277_v43  ;;  %v7230_v43 = vld [vmem:[%s11962_s6 + $0xfc] sm:$0xf0] }
 0xd18   : > { %3783 = vadd.xlane.f32.xlu0 %v10304_v44 }
 0xd19   : > { %v3729_v3 = vpop.f32.mrf.mxu2  ;;  %v3780_v35 = vpop.xlane.xlu2 %3779 }
 0xd1a   : > { %v3730_v28 = vadd.f32 %v10280_v15, %v3729_v3  ;;  %v3795_v63 = vmul.f32 %v3780_v35, %v8637_v53  ;;  %v7278_v3 = vld [vmem:[%s11962_s6 + $0x15c] sm:$0xf0] }
 0xd1b   : > { %v3758_v11 = vpop.f32.mrf.mxu3  ;;  %v7281_v35 = vor.u32 %v7669_v9, %v7278_v3  ;;  %v7236_v3 = vld [vmem:[%s11962_s6 + $0xf8] sm:$0xf] }
 0xd1c   : > { %v3759_v29 = vadd.f32 %v3758_v11, %v3730_v28  ;;  %v10315_v59 = vsub.f32 %v10286_v8, %v3795_v63  ;;  %v7284_v28 = vld [vmem:[%s11962_s6 + $0x158] sm:$0xf] }
 0xd1d   : > { %4143 = vmatpush.bf16.msrb.mxu1 %v7281_v35 }
 0xd1e   : > { %v10309_v7 = vadd.f32 %v3759_v29, %v9581_v1  ;;  %v3811_v33 = vmul.f32 %v10315_v59, %v10315_v59  ;;  %v7671_v29 = vld [vmem:[%s11962_s6 + $0x160] sm:$0xf0] }
 0xd1f   : > { %v3782_v1 = vpop.xlane.xlu1 %3781  ;;  %v7285_v63 = vor.u32 %v7671_v29, %v7284_v28  ;;  %v7659_v28 = vld [vmem:[%s11962_s6 + $0x100] sm:$0xf0]  ;;  %v7229_v29 = vor.u32 %v7658_v61, %v7228_v5 }
 0xd20   : > { %3785 = vadd.xlane.f32.xlu2 %v10309_v7  ;;  %v3796_v48 = vmul.f32 %v3782_v1, %v8637_v53  ;;  %v7667_v1 = vld [vmem:[%s11962_s6 + $0x140] sm:$0xf0] }
 0xd21   : > { %v3732_v19 = vpop.f32.mrf.mxu2  ;;  %4172 = vmatpush.bf16.msrb.mxu2 %v7285_v63  ;;  %v7233_v63 = vor.u32 %v7657_v16, %v7230_v43 }
 0xd22   : > { %v3733_v46 = vadd.f32 %v10280_v15, %v3732_v19  ;;  %v10326_v39 = vsub.f32 %v10293_v36, %v3796_v48  ;;  %v7666_v48 = vld [vmem:[%s11962_s6 + $0x13c] sm:$0xf] }
 0xd23   : > { %v3761_v32 = vpop.f32.mrf.mxu3 }
 0xd24   : > { %v3762_v40 = vadd.f32 %v3761_v32, %v3733_v46  ;;  %v3812_v34 = vmul.f32 %v10326_v39, %v10326_v39 }
 0xd26   : > { %v10318_v57 = vadd.f32 %v3762_v40, %v9587_v52 }
 0xd28   : > { %3787 = vadd.xlane.f32.xlu1 %v10318_v57  ;;  %3819 = vadd.xlane.f32.xlu2 %v3811_v33  ;;  %v7264_v33 = vld [vmem:[%s11962_s6 + $0x138] sm:$0xf] }
 0xd29   : > { %v3734_v10 = vpop.f32.mrf.mxu2 }
 0xd2a   : > { %v3735_v41 = vadd.f32 %v10280_v15, %v3734_v10  ;;  %v7265_v10 = vor.u32 %v7667_v1, %v7264_v33  ;;  %v7218_v1 = vld [vmem:[%s11962_s6 + $0xe4] sm:$0xf0] }
 0xd2b   : > { %v3763_v31 = vpop.f32.mrf.mxu3 }
 0xd2c   : > { %v3764_v2 = vadd.f32 %v3763_v31, %v3735_v41  ;;  %v7266_v41 = vld [vmem:[%s11962_s6 + $0x144] sm:$0xf0]  ;;  %v7272_v31 = vld [vmem:[%s11962_s6 + $0x140] sm:$0xf]  ;;  %4115 = vmatpush.bf16.msra.mxu0 %v7265_v10  ;;  %v7656_v10 = vld [vmem:[%s11962_s6 + $0xe8] sm:$0xf0] }
 0xd2e   : > { %v10329_v52 = vadd.f32 %v3764_v2, %v9593_v12  ;;  %v7668_v2 = vld [vmem:[%s11962_s6 + $0x148] sm:$0xf0] }
 0xd30   : > { %3789 = vadd.xlane.f32.xlu0 %v10329_v52  ;;  %3821 = vadd.xlane.f32.xlu1 %v3812_v34 }
 0xd39   : > { %v3737_v42 = vpop.f32.mrf.mxu2 }
 0xd3a   : > { %v3738_v18 = vadd.f32 %v10280_v15, %v3737_v42 }
 0xd41   : > { %v3739_v13 = vpop.f32.mrf.mxu2 }
 0xd42   : > { %v3740_v12 = vadd.f32 %v10280_v15, %v3739_v13  ;;  %v7252_v13 = vld [vmem:[%s11962_s6 + $0x120] sm:$0xf] }
 0xd43   : > { %v3766_v20 = vpop.f32.mrf.mxu3 }
 0xd44   : > { %v3767_v26 = vadd.f32 %v3766_v20, %v3738_v18  ;;  %v7269_v20 = vor.u32 %v7666_v48, %v7266_v41  ;;  %v7224_v48 = vld [vmem:[%s11962_s6 + $0xe0] sm:$0xf] }
 0xd46   : > { %v10336_v0 = vadd.f32 %v3767_v26, %v9606_v23  ;;  %v7273_v26 = vor.u32 %v7668_v2, %v7272_v31  ;;  %4144 = vmatpush.bf16.msrb.mxu1 %v7269_v20  ;;  %v7204_v20 = vld [vmem:[%s11962_s6 + $0xc0] sm:$0xf] }
 0xd48   : > { %3791 = vadd.xlane.f32.xlu0 %v10336_v0  ;;  %4173 = vmatpush.bf16.msrb.mxu2 %v7273_v26 }
 0xd4b   : > { %v3768_v51 = vpop.f32.mrf.mxu3 }
 0xd4c   : > { %v3769_v27 = vadd.f32 %v3768_v51, %v3740_v12  ;;  %v7664_v12 = vld [vmem:[%s11962_s6 + $0x128] sm:$0xf0] }
 0xd4e   : > { %v10341_v56 = vadd.f32 %v3769_v27, %v9617_v14  ;;  %v7253_v27 = vor.u32 %v7664_v12, %v7252_v13  ;;  %v7225_v13 = vor.u32 %v7656_v10, %v7224_v48  ;;  %v7652_v12 = vld [vmem:[%s11962_s6 + $0xc8] sm:$0xf0] }
 0xd50   : > { %3793 = vadd.xlane.f32.xlu2 %v10341_v56  ;;  %4116 = vmatpush.bf16.msra.mxu0 %v7253_v27  ;;  %v7206_v27 = vld [vmem:[%s11962_s6 + $0xcc] sm:$0xf0] }
 0xd8b   : > { %v3784_v62 = vpop.xlane.xlu0 %3783 }
 0xd8c   : > { %v3797_v50 = vmul.f32 %v3784_v62, %v8637_v53  ;;  %v7663_v62 = vld [vmem:[%s11962_s6 + $0x124] sm:$0xf] }
 0xd8e   : > { %v10346_v30 = vsub.f32 %v10304_v44, %v3797_v50  ;;  %v7254_v50 = vld [vmem:[%s11962_s6 + $0x12c] sm:$0xf0] }
 0xd90   : > { %v3813_v23 = vmul.f32 %v10346_v30, %v10346_v30 }
 0xd92   : > { %3823 = vadd.xlane.f32.xlu1 %v3813_v23  ;;  %v7260_v23 = vld [vmem:[%s11962_s6 + $0x128] sm:$0xf] }
 0xd93   : > { %v3786_v17 = vpop.xlane.xlu2 %3785 }
 0xd94   : > { %v3798_v15 = vmul.f32 %v3786_v17, %v8637_v53 }
 0xd96   : > { %v10352_v60 = vsub.f32 %v10309_v7, %v3798_v15  ;;  %v7257_v15 = vor.u32 %v7663_v62, %v7254_v50  ;;  %v7212_v50 = vld [vmem:[%s11962_s6 + $0xc8] sm:$0xf] }
 0xd98   : > { %v3814_v14 = vmul.f32 %v10352_v60, %v10352_v60  ;;  %4145 = vmatpush.bf16.msrb.mxu1 %v7257_v15 }
 0xd9a   : > { %3825 = vadd.xlane.f32.xlu0 %v3814_v14  ;;  %v7665_v14 = vld [vmem:[%s11962_s6 + $0x130] sm:$0xf0] }
 0xd9b   : > { %v3788_v22 = vpop.xlane.xlu1 %3787  ;;  %v3820_v38 = vpop.xlane.xlu2 %3819 }
 0xd9c   : > { %v3799_v55 = vmul.f32 %v3788_v22, %v8637_v53  ;;  %v3835_v54 = vmul.f32 %v3820_v38, %v8637_v53  ;;  %v7261_v38 = vor.u32 %v7665_v14, %v7260_v23  ;;  %4146 = vmatpush.bf16.msrb.mxu1 %v7245_v45  ;;  %v7653_v23 = vld [vmem:[%s11962_s6 + $0xd0] sm:$0xf0] }
 0xd9e   : > { %v10377_v47 = vsub.f32 %v10318_v57, %v3799_v55  ;;  %v10379_v49 = vadd.f32 1e-05, %v3835_v54  ;;  %v7240_v55 = vld [vmem:[%s11962_s6 + $0x108] sm:$0xf]  ;;  %v7661_v54 = vld [vmem:[%s11962_s6 + $0x110] sm:$0xf0]  ;;  %4174 = vmatpush.bf16.msrb.mxu2 %v7261_v38 }
 0xd9f   : > { %v7241_v58 = vor.u32 %v7661_v54, %v7240_v55 }
 0xda0   : > { %v3815_v11 = vmul.f32 %v10377_v47, %v10377_v47  ;;  %8044 = vrsqrt.f32 %v10379_v49  ;;  %4147 = vmatpush.bf16.msrb.mxu1 %v7233_v63  ;;  %vm3857_vm3 = vweird.f32 %v10379_v49 }
 0xda1   : > { %4117 = vmatpush.bf16.msra.mxu0 %v7241_v58 }
 0xda2   : > { %3827 = vadd.xlane.f32.xlu2 %v3815_v11  ;;  %4175 = vmatpush.bf16.msrb.mxu2 %v7249_v21 }
 0xda3   : > { %v3790_v19 = vpop.xlane.xlu0 %3789  ;;  %v3822_v46 = vpop.xlane.xlu1 %3821 }
 0xda4   : > { %v3800_v32 = vmul.f32 %v3790_v19, %v8637_v53  ;;  %v3836_v40 = vmul.f32 %v3822_v46, %v8637_v53  ;;  %v7237_v19 = vor.u32 %v7659_v28, %v7236_v3  ;;  %v7216_v46 = vld [vmem:[%s11962_s6 + $0xd8] sm:$0xf] }
 0xda5   : > { %4118 = vmatpush.bf16.msra.mxu0 %v7229_v29 }
 0xda6   : > { %v10422_v34 = vpop.eup %8044  ;;  %v10425_v42 = vsub.f32 %v10329_v52, %v3800_v32  ;;  %v10427_v18 = vadd.f32 1e-05, %v3836_v40  ;;  %v7655_v32 = vld [vmem:[%s11962_s6 + $0xe0] sm:$0xf0]  ;;  %v7654_v40 = vld [vmem:[%s11962_s6 + $0xdc] sm:$0xf]  ;;  %4176 = vmatpush.bf16.msrb.mxu2 %v7237_v19 }
 0xda7   : > { %v3852_v51 = vmul.f32 %v10422_v34, %v10379_v49  ;;  %vm3858_vm2 = vweird.f32 %v10422_v34  ;;  %v7217_v2 = vor.u32 %v7655_v32, %v7216_v46  ;;  %v7221_v26 = vor.u32 %v7654_v40, %v7218_v1 }
 0xda8   : > { %v3816_v17 = vmul.f32 %v10425_v42, %v10425_v42  ;;  %8046 = vrsqrt.f32 %v10427_v18  ;;  %vm3859_vm5 = vmor %vm3857_vm3, %vm3858_vm2  ;;  %vm3867_vm6 = vweird.f32 %v10427_v18  ;;  %v7205_v49 = vor.u32 %v7652_v12, %v7204_v20 }
 0xda9   : > { %v3853_v22 = vmul.f32 %v10422_v34, %v3852_v51  ;;  %v7651_v51 = vld [vmem:[%s11962_s6 + $0xc4] sm:$0xf]  ;;  %4119 = vmatpush.bf16.msra.mxu0 %v7217_v2  ;;  %4148 = vmatpush.bf16.msrb.mxu1 %v7221_v26 }
 0xdaa   : > { %3829 = vadd.xlane.f32.xlu1 %v3816_v17  ;;  %4177 = vmatpush.bf16.msrb.mxu2 %v7225_v13  ;;  %v7209_v14 = vor.u32 %v7651_v51, %v7206_v27 }
 0xdab   : > { %v3854_v4 = vmul.f32 0.5, %v3853_v22  ;;  %v7213_v22 = vor.u32 %v7653_v23, %v7212_v50 }
 0xdad   : > { %v3855_v11 = vsub.f32 1.5, %v3854_v4  ;;  %4120 = vmatpush.bf16.msra.mxu0 %v7205_v49  ;;  %4149 = vmatpush.bf16.msrb.mxu1 %v7209_v14 }
 0xdae   : > { %v8047_v9 = vpop.eup %8046  ;;  %4178 = vmatpush.bf16.msrb.mxu2 %v7213_v22 }
 0xdaf   : > { %v3862_v35 = vmul.f32 %v8047_v9, %v10427_v18  ;;  %v3856_v41 = vmul.f32 %v10422_v34, %v3855_v11  ;;  %vm3868_vm4 = vweird.f32 %v8047_v9 }
 0xdb0   : > { %vm3869_vm7 = vmor %vm3867_vm6, %vm3868_vm4 }
 0xdb1   : > { %v3863_v33 = vmul.f32 %v8047_v9, %v3862_v35  ;;  %v3860_v17 = vsel %vm3859_vm5, %v10422_v34, %v3856_v41 }
 0xdb2   : > { %v3931_v55 = vmul.f32 %v3860_v17, %v10315_v59 }
 0xdb3   : > { %v3864_v31 = vmul.f32 0.5, %v3863_v33 }
 0xdb5   : > { %v3865_v62 = vsub.f32 1.5, %v3864_v31 }
 0xdb7   : > { %v3866_v15 = vmul.f32 %v8047_v9, %v3865_v62 }
 0xdb9   : > { %v3870_v38 = vsel %vm3869_vm7, %v8047_v9, %v3866_v15 }
 0xdba   : > { %v3932_v54 = vmul.f32 %v3870_v38, %v10326_v39 }
 0xdbb   : > { %v3792_v24 = vpop.xlane.xlu0 %3791 }
 0xdbc   : > { %v3801_v4 = vmul.f32 %v3792_v24, %v8637_v53  ;;  %v3972_v34 = vpack.c.bf16 %v3932_v54, %v3931_v55 }
 0xdbe   : > { %v10537_v18 = vsub.f32 %v10336_v0, %v3801_v4  ;;  %4121 = vmatmul.bf16.vlgmr.msra.gmra.mxu0 %v3972_v34  ;;  %4150 = vmatmul.bf16.vlgmr.msrb.gmra.mxu1 %v3972_v34 }
 0xdbf   : > { %4179 = vmatmul.bf16.vlgmr.msrb.gmra.mxu2 %v3972_v34 }
 0xdc0   : > { %v3817_v58 = vmul.f32 %v10537_v18, %v10537_v18 }
 0xdc2   : > { %3831 = vadd.xlane.f32.xlu0 %v3817_v58 }
 0xdc3   : > { %v3794_v59 = vpop.xlane.xlu2 %3793 }
 0xdc4   : > { %v3802_v39 = vmul.f32 %v3794_v59, %v8637_v53 }
 0xdc6   : > { %v10543_v25 = vsub.f32 %v10341_v56, %v3802_v39  ;;  %v10559_v39 = vld [vmem:[%s11963_s7 + $0x3] sm:$0x7] }
 0xdc8   : > { %v3818_v37 = vmul.f32 %v10543_v25, %v10543_v25 }
 0xdca   : > { %3833 = vadd.xlane.f32.xlu2 %v3818_v37  ;;  %v10562_v37 = vperm.slane %v10559_v39, 0 }
 0xe05   : > { %v3824_v45 = vpop.xlane.xlu1 %3823 }
 0xe06   : > { %v3837_v6 = vmul.f32 %v3824_v45, %v8637_v53 }
 0xe08   : > { %v3845_v5 = vadd.f32 1e-05, %v3837_v6 }
 0xe0a   : > { %8048 = vrsqrt.f32 %v3845_v5  ;;  %vm3877_vm9 = vweird.f32 %v3845_v5 }
 0xe0d   : > { %v3826_v61 = vpop.xlane.xlu0 %3825 }
 0xe0e   : > { %v3838_v21 = vmul.f32 %v3826_v61, %v8637_v53 }
 0xe10   : > { %v8049_v16 = vpop.eup %8048  ;;  %v3846_v43 = vadd.f32 1e-05, %v3838_v21 }
 0xe11   : > { %v3872_v9 = vmul.f32 %v8049_v16, %v3845_v5  ;;  %vm3878_vm8 = vweird.f32 %v8049_v16 }
 0xe12   : > { %8050 = vrsqrt.f32 %v3846_v43  ;;  %vm3879_vm13 = vmor %vm3877_vm9, %vm3878_vm8  ;;  %vm3887_vm14 = vweird.f32 %v3846_v43 }
 0xe13   : > { %v3873_v3 = vmul.f32 %v8049_v16, %v3872_v9 }
 0xe15   : > { %v3874_v28 = vmul.f32 0.5, %v3873_v3  ;;  %v3828_v11 = vpop.xlane.xlu2 %3827 }
 0xe16   : > { %v3839_v35 = vmul.f32 %v3828_v11, %v8637_v53 }
 0xe17   : > { %v3875_v19 = vsub.f32 1.5, %v3874_v28 }
 0xe18   : > { %v8051_v29 = vpop.eup %8050  ;;  %v3847_v63 = vadd.f32 1e-05, %v3839_v35 }
 0xe19   : > { %v3882_v46 = vmul.f32 %v8051_v29, %v3846_v43  ;;  %v3876_v40 = vmul.f32 %v8049_v16, %v3875_v19  ;;  %vm3888_vm12 = vweird.f32 %v8051_v29 }
 0xe1a   : > { %8052 = vrsqrt.f32 %v3847_v63  ;;  %vm3889_vm15 = vmor %vm3887_vm14, %vm3888_vm12  ;;  %vm3897_vm1 = vweird.f32 %v3847_v63 }
 0xe1b   : > { %v3883_v32 = vmul.f32 %v8051_v29, %v3882_v46  ;;  %v3880_v26 = vsel %vm3879_vm13, %v8049_v16, %v3876_v40 }
 0xe1c   : > { %v3933_v51 = vmul.f32 %v3880_v26, %v10346_v30 }
 0xe1d   : > { %v3884_v33 = vmul.f32 0.5, %v3883_v32  ;;  %v3830_v1 = vpop.xlane.xlu1 %3829 }
 0xe1e   : > { %v3840_v48 = vmul.f32 %v3830_v1, %v8637_v53 }
 0xe1f   : > { %v3885_v10 = vsub.f32 1.5, %v3884_v33 }
 0xe20   : > { %v8053_v41 = vpop.eup %8052  ;;  %v3848_v31 = vadd.f32 1e-05, %v3840_v48 }
 0xe21   : > { %v3886_v2 = vmul.f32 %v8051_v29, %v3885_v10  ;;  %v3892_v20 = vmul.f32 %v8053_v41, %v3847_v63  ;;  %vm3898_vm0 = vweird.f32 %v8053_v41 }
 0xe22   : > { %8054 = vrsqrt.f32 %v3848_v31  ;;  %vm3899_vm3 = vmor %vm3897_vm1, %vm3898_vm0  ;;  %vm3907_vm4 = vweird.f32 %v3848_v31 }
 0xe23   : > { %v3893_v13 = vmul.f32 %v8053_v41, %v3892_v20  ;;  %v3890_v12 = vsel %vm3889_vm15, %v8051_v29, %v3886_v2 }
 0xe24   : > { %v3934_v27 = vmul.f32 %v3890_v12, %v10352_v60 }
 0xe25   : > { %v3894_v62 = vmul.f32 0.5, %v3893_v13 }
 0xe26   : > { %v3973_v50 = vpack.c.bf16 %v3934_v27, %v3933_v51 }
 0xe27   : > { %v3895_v17 = vsub.f32 1.5, %v3894_v62 }
 0xe28   : > { %v8055_v23 = vpop.eup %8054  ;;  %4126 = vmatmul.bf16.gmra.mxu0 %v3973_v50  ;;  %4155 = vmatmul.bf16.gmra.mxu1 %v3973_v50 }
 0xe29   : > { %v3902_v15 = vmul.f32 %v8055_v23, %v3848_v31  ;;  %4184 = vmatmul.bf16.gmra.mxu2 %v3973_v50  ;;  %v3896_v14 = vmul.f32 %v8053_v41, %v3895_v17  ;;  %vm3908_vm2 = vweird.f32 %v8055_v23 }
 0xe2a   : > { %vm3909_vm5 = vmor %vm3907_vm4, %vm3908_vm2 }
 0xe2b   : > { %v3903_v49 = vmul.f32 %v8055_v23, %v3902_v15  ;;  %v3900_v30 = vsel %vm3899_vm3, %v8053_v41, %v3896_v14 }
 0xe2c   : > { %v3935_v54 = vmul.f32 %v3900_v30, %v10377_v47  ;;  %v10565_v47 = vperm.slane %v10559_v39, 1 }
 0xe2d   : > { %v3904_v22 = vmul.f32 0.5, %v3903_v49 }
 0xe2f   : > { %v3905_v38 = vsub.f32 1.5, %v3904_v22 }
 0xe31   : > { %v3906_v55 = vmul.f32 %v8055_v23, %v3905_v38 }
 0xe33   : > { %v3910_v60 = vsel %vm3909_vm5, %v8055_v23, %v3906_v55 }
 0xe34   : > { %v3936_v24 = vmul.f32 %v3910_v60, %v10425_v42 }
 0xe35   : > { %v3832_v4 = vpop.xlane.xlu0 %3831 }
 0xe36   : > { %v3841_v34 = vmul.f32 %v3832_v4, %v8637_v53  ;;  %v3974_v58 = vpack.c.bf16 %v3936_v24, %v3935_v54 }
 0xe38   : > { %v3849_v59 = vadd.f32 1e-05, %v3841_v34  ;;  %4131 = vmatmul.bf16.gmra.mxu0 %v3974_v58  ;;  %4160 = vmatmul.bf16.gmra.mxu1 %v3974_v58 }
 0xe39   : > { %4189 = vmatmul.bf16.gmra.mxu2 %v3974_v58 }
 0xe3a   : > { %8056 = vrsqrt.f32 %v3849_v59  ;;  %vm3917_vm7 = vweird.f32 %v3849_v59 }
 0xe3b   : > { %v4122_v42 = vpop.f32.mrf.mxu0  ;;  %v4151_v6 = vpop.f32.mrf.mxu1 }
 0xe3c   : > { %v4123_v45 = vadd.f32 %v4122_v42, %v10562_v37  ;;  %v4152_v61 = vadd.f32 %v4151_v6, %v10565_v47 }
 0xe3d   : > { %v3834_v5 = vpop.xlane.xlu2 %3833 }
 0xe3e   : > { %v3842_v21 = vmul.f32 %v3834_v5, %v8637_v53  ;;  %v10570_v16 = vpack.c.bf16 %v4152_v61, %v4123_v45  ;;  %v3981_v45 = vperm.slane %v10559_v39, 2 }
 0xe40   : > { %v8057_v43 = vpop.eup %8056  ;;  %v3850_v9 = vadd.f32 1e-05, %v3842_v21 }
 0xe41   : > { %v3912_v3 = vmul.f32 %v8057_v43, %v3849_v59  ;;  %vm3918_vm6 = vweird.f32 %v8057_v43 }
 0xe42   : > { %8058 = vrsqrt.f32 %v3850_v9  ;;  %vm3919_vm9 = vmor %vm3917_vm7, %vm3918_vm6  ;;  %vm3927_vm12 = vweird.f32 %v3850_v9  ;;  %v10574_v2 = vpop.f32.mrf.mxu2 }
 0xe43   : > { %v3913_v28 = vmul.f32 %v8057_v43, %v3912_v3  ;;  %v10576_v20 = vpop.f32.mrf.mxu0  ;;  %v10578_v26 = vpop.f32.mrf.mxu1 }
 0xe45   : > { %v3914_v11 = vmul.f32 0.5, %v3913_v28 }
 0xe47   : > { %v3915_v29 = vsub.f32 1.5, %v3914_v11 }
 0xe48   : > { %v8059_v35 = vpop.eup %8058 }
 0xe49   : > { %v3922_v63 = vmul.f32 %v8059_v35, %v3850_v9  ;;  %v3916_v46 = vmul.f32 %v8057_v43, %v3915_v29  ;;  %vm3928_vm8 = vweird.f32 %v8059_v35 }
 0xe4a   : > { %vm3929_vm13 = vmor %vm3927_vm12, %vm3928_vm8  ;;  %v4182_v13 = vpop.f32.mrf.mxu2 }
 0xe4b   : > { %v3923_v19 = vmul.f32 %v8059_v35, %v3922_v63  ;;  %v3920_v1 = vsel %vm3919_vm9, %v8057_v43, %v3916_v46 }
 0xe4c   : > { %v3937_v10 = vmul.f32 %v3920_v1, %v10537_v18 }
 0xe4d   : > { %v3924_v32 = vmul.f32 0.5, %v3923_v19 }
 0xe4f   : > { %v3925_v40 = vsub.f32 1.5, %v3924_v32 }
 0xe51   : > { %v3926_v33 = vmul.f32 %v8059_v35, %v3925_v40 }
 0xe53   : > { %v3930_v48 = vsel %vm3929_vm13, %v8059_v35, %v3926_v33 }
 0xe54   : > { %v3938_v41 = vmul.f32 %v3930_v48, %v10543_v25 }
 0xe56   : > { %v3975_v31 = vpack.c.bf16 %v3938_v41, %v3937_v10 }
 0xe58   : > { %4136 = vmatmul.bf16.gmra.mxu0 %v3975_v31  ;;  %4165 = vmatmul.bf16.gmra.mxu1 %v3975_v31 }
 0xe59   : > { %4194 = vmatmul.bf16.gmra.mxu2 %v3975_v31 }
 0xea5   : > { %v4127_v12 = vpop.f32.mrf.mxu0  ;;  %v4156_v51 = vpop.f32.mrf.mxu1 }
 0xeac   : > { %v4185_v27 = vpop.f32.mrf.mxu2 }
 0xead   : > { %v4129_v62 = vpop.f32.mrf.mxu0  ;;  %v4158_v50 = vpop.f32.mrf.mxu1 }
 0xeae   : > { %v4130_v33 = vadd.f32 %v4129_v62, %v10562_v37  ;;  %v4159_v1 = vadd.f32 %v4158_v50, %v10565_v47 }
 0xeb0   : > { %v4206_v50 = vpack.c.bf16 %v4159_v1, %v4130_v33 }
 0xeb4   : > { %v4187_v23 = vpop.f32.mrf.mxu2 }
 0xeb5   : > { %v4132_v18 = vpop.f32.mrf.mxu0  ;;  %v4161_v17 = vpop.f32.mrf.mxu1  ;;  %v4188_v41 = vadd.f32 %v4187_v23, %v3981_v45 }
 0xeb6   : > { %v4133_v6 = vadd.f32 %v4132_v18, %v10562_v37  ;;  %v4162_v5 = vadd.f32 %v4161_v17, %v10565_v47  ;;  %v4128_v17 = vadd.f32 %v4127_v12, %v10562_v37 }
 0xeb8   : > { %v10591_v29 = vpack.c.bf16 %v4162_v5, %v4133_v6 }
 0xebc   : > { %v4190_v25 = vpop.f32.mrf.mxu2 }
 0xebd   : > { %v4134_v15 = vpop.f32.mrf.mxu0  ;;  %v4163_v49 = vpop.f32.mrf.mxu1  ;;  %v4191_v39 = vadd.f32 %v4190_v25, %v3981_v45  ;;  %v4257_v25 = vunpack.c.h.b16 %v10591_v29 }
 0xebe   : > { %v4135_v54 = vadd.f32 %v4134_v15, %v10562_v37  ;;  %v4164_v24 = vadd.f32 %v4163_v49, %v10565_v47  ;;  %v4157_v15 = vadd.f32 %v4156_v51, %v10565_v47  ;;  %v4186_v49 = vadd.f32 %v4185_v27, %v3981_v45 }
 0xebf   : > { %v4125_v51 = vadd.f32 %v10576_v20, %v10562_v37  ;;  %v4154_v27 = vadd.f32 %v10578_v26, %v10565_v47 }
 0xec0   : > { %v10589_v21 = vpack.c.bf16 %v4164_v24, %v4135_v54  ;;  %v4204_v54 = vpack.c.bf16 %v4157_v15, %v4128_v17  ;;  %v4181_v24 = vadd.f32 %v10574_v2, %v3981_v45  ;;  %v4205_v12 = vpack.c.bf16 %v4186_v49, %v4186_v49 }
 0xec1   : > { %v4202_v5 = vpack.c.bf16 %v4154_v27, %v4125_v51 }
 0xec2   : > { %v4258_v48 = vunpack.c.h.b16 %v10589_v21  ;;  %v4255_v2 = vunpack.c.h.b16 %v4204_v54  ;;  %v4420_v6 = vunpack.c.l.b16 %v4205_v12  ;;  %v4246_v1 = vunpack.c.l.b16 %v10589_v21 }
 0xec3   : > { %v4254_v26 = vunpack.c.h.b16 %v4202_v5 }
 0xec4   : > { %v4192_v14 = vpop.f32.mrf.mxu2 }
 0xec5   : > { %v4193_v35 = vadd.f32 %v4192_v14, %v3981_v45  ;;  %v4209_v14 = vpack.c.bf16 %v4191_v39, %v4191_v39 }
 0xec7   : > { %v4211_v31 = vpack.c.bf16 %v4193_v35, %v4193_v35  ;;  %v4242_v35 = vunpack.c.l.b16 %v4202_v5 }
 0xed5   : > { %v4137_v22 = vpop.f32.mrf.mxu0  ;;  %v4166_v38 = vpop.f32.mrf.mxu1 }
 0xed6   : > { %v4138_v55 = vadd.f32 %v4137_v22, %v10562_v37  ;;  %v4167_v30 = vadd.f32 %v4166_v38, %v10565_v47  ;;  %v10605_v38 = vpack.c.b16 %v4258_v48, %v4257_v25  ;;  %v4245_v48 = vunpack.c.l.b16 %v10591_v29 }
 0xed8   : > { %v4212_v58 = vpack.c.bf16 %v4167_v30, %v4138_v55  ;;  %v4183_v55 = vadd.f32 %v4182_v13, %v3981_v45  ;;  %v4207_v30 = vpack.c.bf16 %v4188_v41, %v4188_v41  ;;  %v4284_v13 = vsel %vm1491_vm10, %v10605_v38, 0 }
 0xeda   : > { %v4247_v9 = vunpack.c.l.b16 %v4212_v58  ;;  %v4259_v3 = vunpack.c.h.b16 %v4212_v58  ;;  %v4203_v58 = vpack.c.bf16 %v4183_v55, %v4183_v55 }
 0xedc   : > { %v4195_v60 = vpop.f32.mrf.mxu2 }
 0xedd   : > { %v4139_v4 = vpop.f32.mrf.mxu0  ;;  %v4168_v34 = vpop.f32.mrf.mxu1  ;;  %v4196_v43 = vadd.f32 %v4195_v60, %v3981_v45  ;;  %v4423_v60 = vunpack.c.l.b16 %v4211_v31 }
 0xede   : > { %v4140_v59 = vadd.f32 %v4139_v4, %v10562_v37  ;;  %v4169_v42 = vadd.f32 %v4168_v34, %v10565_v47  ;;  %v4422_v4 = vunpack.c.l.b16 %v4209_v14  ;;  %v4256_v34 = vunpack.c.h.b16 %v4206_v50 }
 0xedf   : > { %v4213_v32 = vpack.c.bf16 %v4196_v43, %v4196_v43  ;;  %v4419_v37 = vunpack.c.l.b16 %v4203_v58 }
 0xee0   : > { %v4214_v61 = vpack.c.bf16 %v4169_v42, %v4140_v59  ;;  %v4421_v59 = vunpack.c.l.b16 %v4207_v30  ;;  %v10617_v42 = vpack.c.b16 %v4423_v60, %v4422_v4 }
 0xee1   : > { %v4424_v62 = vunpack.c.l.b16 %v4213_v32  ;;  %v4244_v32 = vunpack.c.l.b16 %v4206_v50 }
 0xee2   : > { %v4248_v28 = vunpack.c.l.b16 %v4214_v61  ;;  %v4260_v11 = vunpack.c.h.b16 %v4214_v61  ;;  %v10620_v61 = vpack.c.b16 %v4256_v34, %v4255_v2  ;;  %v10622_v20 = vpack.c.b16 %v4421_v59, %v4420_v6 }
 0xee4   : > { %v10593_v63 = vpack.c.b16 %v4260_v11, %v4259_v3  ;;  %v4197_v19 = vpop.f32.mrf.mxu2  ;;  %v10595_v46 = vpack.c.b16 %v4248_v28, %v4247_v9  ;;  %v4281_v43 = vsel %vm1491_vm10, %v10620_v61, 0  ;;  %v4253_v3 = vunpack.c.h.b16 %v10570_v16 }
 0xee5   : > { %v4198_v40 = vadd.f32 %v4197_v19, %v3981_v45  ;;  %v4201_v45 = vpack.c.bf16 %v4181_v24, %v4181_v24  ;;  %v4241_v19 = vunpack.c.l.b16 %v10570_v16 }
 0xee6   : > { %v4287_v10 = vsel %vm1491_vm10, %v10593_v63, 0  ;;  %v10631_v28 = vpack.c.b16 %v4254_v26, %v4253_v3 }
 0xee7   : > { %v4215_v18 = vpack.c.bf16 %v4198_v40, %v4198_v40  ;;  %4293 = vmatpush.bf16.xpose.msrb.mxu3 %v4287_v10  ;;  %v4418_v47 = vunpack.c.l.b16 %v4201_v45  ;;  %v10636_v39 = vpack.c.b16 %v4242_v35, %v4241_v19  ;;  %v4243_v40 = vunpack.c.l.b16 %v4204_v54 }
 0xee8   : > { %v4278_v11 = vsel %vm1491_vm10, %v10631_v28, 0  ;;  %v10646_v10 = vpack.c.b16 %v4246_v1, %v4245_v48 }
 0xee9   : > { %v4425_v22 = vunpack.c.l.b16 %v4215_v18  ;;  %v10627_v9 = vpack.c.b16 %v4419_v37, %v4418_v47  ;;  %v10640_v33 = vpack.c.b16 %v4244_v32, %v4243_v40 }
 0xeeb   : > { %v10607_v23 = vpack.c.b16 %v4425_v22, %v4424_v62 }
 0xeed   : > { %4450 = vmatpush.bf16.msrb.mxu0 %v10607_v23 }
 0xeef   : > { %4294 = vmatpush.bf16.xpose.msrb.mxu3 %v4284_v13 }
 0xef1   : > { %4451 = vmatpush.bf16.msrb.mxu0 %v10617_v42 }
 0xef5   : > { %4452 = vmatpush.bf16.msrb.mxu0 %v10622_v20 }
 0xef7   : > { %4295 = vmatpush.bf16.xpose.msrb.mxu3 %v4281_v43 }
 0xef9   : > { %4453 = vmatpush.bf16.msrb.mxu0 %v10627_v9 }
 0xeff   : > { %4296 = vmatpush.bf16.xpose.msrb.mxu3 %v4278_v11 }
 0xf06   : > { %7314 = vmatmul.msk.bf16.vlgmr.msrb.gmra.mxu3 %vm1491_vm10, %v10636_v39 }
 0xf16   : > { %7315 = vmatmul.msk.bf16.gmra.mxu3 %vm1491_vm10, %v10640_v33 }
 0xf26   : > { %7316 = vmatmul.msk.bf16.gmra.mxu3 %vm1491_vm10, %v10646_v10 }
 0xf36   : > { %7317 = vmatmul.msk.bf16.gmra.mxu3 %vm1491_vm10, %v10595_v46 }
 0xf89   : > { %v4298_v16 = vpop.f32.mrf.mxu3 }
 0xf8a   : > { %v4318_v41 = vsel %vm1545_vm11, %v4298_v16, -inf }
 0xf8b   : > { %4319 = vmax.xlane.f32.xlu1 %v4318_v41 }
 0xf91   : > { %v4300_v31 = vpop.f32.mrf.mxu3 }
 0xf92   : > { %v4321_v18 = vsel %vm1545_vm11, %v4300_v31, -inf }
 0xf93   : > { %4322 = vmax.xlane.f32.xlu0 %v4321_v18 }
 0xf99   : > { %v4303_v17 = vpop.f32.mrf.mxu3 }
 0xf9a   : > { %v4324_v21 = vsel %vm1545_vm11, %v4303_v17, -inf }
 0xf9b   : > { %4325 = vmax.xlane.f32.xlu2 %v4324_v21 }
 0xfa1   : > { %v4305_v29 = vpop.f32.mrf.mxu3 }
 0xfa2   : > { %v4327_v15 = vsel %vm1545_vm11, %v4305_v29, -inf }
 0xfa3   : > { %4328 = vmax.xlane.f32.xlu1 %v4327_v15 }
 0xfa9   : > { %v4308_v25 = vpop.f32.mrf.mxu3 }
 0xfaa   : > { %v4330_v49 = vsel %vm1545_vm11, %v4308_v25, -inf }
 0xfab   : > { %4331 = vmax.xlane.f32.xlu0 %v4330_v49 }
 0xfb1   : > { %v4310_v14 = vpop.f32.mrf.mxu3 }
 0xfb2   : > { %v4333_v62 = vsel %vm1545_vm11, %v4310_v14, -inf }
 0xfb3   : > { %4334 = vmax.xlane.f32.xlu2 %v4333_v62 }
 0xfb9   : > { %v4313_v22 = vpop.f32.mrf.mxu3 }
 0xfba   : > { %v4336_v50 = vsel %vm1545_vm11, %v4313_v22, -inf }
 0xfbb   : > { %4337 = vmax.xlane.f32.xlu1 %v4336_v50 }
 0xfc1   : > { %v4315_v55 = vpop.f32.mrf.mxu3 }
 0xfc2   : > { %v4339_v30 = vsel %vm1545_vm11, %v4315_v55, -inf }
 0xfc3   : > { %4340 = vmax.xlane.f32.xlu0 %v4339_v30 }
 0xffe   : > { %v4320_v60 = vpop.xlane.xlu1 %4319 }
 0xfff   : > { %v4342_v54 = vsub.f32 %v4298_v16, %v4320_v60 }
0x1001   : > { %v4350_v24 = vmul.f32 1.442695, %v4342_v54 }
0x1003   : > { %8060 = vpow2.f32 %v4350_v24 }
0x1006   : > { %v4323_v12 = vpop.xlane.xlu0 %4322 }
0x1007   : > { %v4343_v4 = vsub.f32 %v4300_v31, %v4323_v12 }
0x1009   : > { %v10660_v51 = vpop.eup %8060  ;;  %v4352_v27 = vmul.f32 1.442695, %v4343_v4 }
0x100a   : > { %v4366_v34 = vsel %vm1545_vm11, %v10660_v51, 0.0 }
0x100b   : > { %8062 = vpow2.f32 %v4352_v27  ;;  %4367 = vadd.xlane.f32.xlu2 %v4366_v34 }
0x100e   : > { %v4326_v13 = vpop.xlane.xlu2 %4325 }
0x100f   : > { %v4344_v58 = vsub.f32 %v4303_v17, %v4326_v13 }
0x1011   : > { %v10664_v59 = vpop.eup %8062  ;;  %v4354_v2 = vmul.f32 1.442695, %v4344_v58 }
0x1012   : > { %v4369_v45 = vsel %vm1545_vm11, %v10664_v59, 0.0 }
0x1013   : > { %8064 = vpow2.f32 %v4354_v2  ;;  %4370 = vadd.xlane.f32.xlu1 %v4369_v45 }
0x1016   : > { %v4329_v6 = vpop.xlane.xlu1 %4328 }
0x1017   : > { %v4345_v5 = vsub.f32 %v4305_v29, %v4329_v6 }
0x1019   : > { %v10668_v37 = vpop.eup %8064  ;;  %v4356_v47 = vmul.f32 1.442695, %v4345_v5  ;;  %v7676_v5 = vld [vmem:[%s11964_s8 + $0x48] sm:$0xff] }
0x101a   : > { %v4372_v26 = vsel %vm1545_vm11, %v10668_v37, 0.0  ;;  %4780 = vmatpush.bf16.msra.mxu0 %v7676_v5 }
0x101b   : > { %8066 = vpow2.f32 %v4356_v47  ;;  %4373 = vadd.xlane.f32.xlu0 %v4372_v26 }
0x101e   : > { %v4332_v43 = vpop.xlane.xlu0 %4331 }
0x101f   : > { %v4346_v3 = vsub.f32 %v4308_v25, %v4332_v43 }
0x1021   : > { %v10672_v11 = vpop.eup %8066  ;;  %v4358_v35 = vmul.f32 1.442695, %v4346_v3 }
0x1022   : > { %v4375_v19 = vsel %vm1545_vm11, %v10672_v11, 0.0 }
0x1023   : > { %8068 = vpow2.f32 %v4358_v35  ;;  %4376 = vadd.xlane.f32.xlu2 %v4375_v19 }
0x1026   : > { %v4335_v32 = vpop.xlane.xlu2 %4334 }
0x1027   : > { %v4347_v40 = vsub.f32 %v4310_v14, %v4335_v32 }
0x1029   : > { %v10676_v1 = vpop.eup %8068  ;;  %v4360_v48 = vmul.f32 1.442695, %v4347_v40 }
0x102a   : > { %v4378_v16 = vsel %vm1545_vm11, %v10676_v1, 0.0 }
0x102b   : > { %8070 = vpow2.f32 %v4360_v48  ;;  %4379 = vadd.xlane.f32.xlu1 %v4378_v16 }
0x102e   : > { %v4338_v41 = vpop.xlane.xlu1 %4337 }
0x102f   : > { %v4348_v31 = vsub.f32 %v4313_v22, %v4338_v41 }
0x1031   : > { %v10680_v18 = vpop.eup %8070  ;;  %v4362_v17 = vmul.f32 1.442695, %v4348_v31 }
0x1032   : > { %v4381_v21 = vsel %vm1545_vm11, %v10680_v18, 0.0 }
0x1033   : > { %8072 = vpow2.f32 %v4362_v17  ;;  %4382 = vadd.xlane.f32.xlu0 %v4381_v21 }
0x1036   : > { %v4341_v29 = vpop.xlane.xlu0 %4340 }
0x1037   : > { %v4349_v15 = vsub.f32 %v4315_v55, %v4341_v29 }
0x1039   : > { %v10684_v25 = vpop.eup %8072  ;;  %v4364_v49 = vmul.f32 1.442695, %v4349_v15 }
0x103a   : > { %v4384_v14 = vsel %vm1545_vm11, %v10684_v25, 0.0 }
0x103b   : > { %8074 = vpow2.f32 %v4364_v49  ;;  %4385 = vadd.xlane.f32.xlu2 %v4384_v14 }
0x1041   : > { %v10688_v62 = vpop.eup %8074 }
0x1042   : > { %v4387_v22 = vsel %vm1545_vm11, %v10688_v62, 0.0 }
0x1043   : > { %4388 = vadd.xlane.f32.xlu1 %v4387_v22 }
0x1047   : > { %4493 = vrot.lane.b32.xlu0 %v10593_v63, %s11998_s2 }
0x104f   : > { %4487 = vrot.lane.b32.xlu0 %v10631_v28, %s11998_s2 }
0x1053   : > { %4491 = vrot.lane.b32.xlu2 %v10605_v38, %s11998_s2 }
0x1057   : > { %4481 = vrot.lane.b32.xlu0 %v10640_v33, %s11998_s2 }
0x105b   : > { %4479 = vrot.lane.b32.xlu2 %v10636_v39, %s11998_s2 }
0x105c   : > { %4489 = vrot.lane.b32.xlu1 %v10620_v61, %s11998_s2 }
0x105f   : > { %4815 = vrot.lane.b32.xlu0 %v10605_v38, %s11999_s3 }
0x1063   : > { %4817 = vrot.lane.b32.xlu2 %v10593_v63, %s11999_s3 }
0x1064   : > { %4483 = vrot.lane.b32.xlu1 %v10646_v10, %s11998_s2 }
0x1067   : > { %4813 = vrot.lane.b32.xlu0 %v10620_v61, %s11999_s3 }
0x106b   : > { %4485 = vrot.lane.b32.xlu2 %v10595_v46, %s11998_s2 }
0x106c   : > { %5096 = vrot.lane.b32.xlu1 %v10593_v63, %s12000_s28 }
0x106f   : > { %5092 = vrot.lane.b32.xlu0 %v10620_v61, %s12000_s28 }
0x1073   : > { %4811 = vrot.lane.b32.xlu2 %v10631_v28, %s11999_s3 }
0x1074   : > { %5094 = vrot.lane.b32.xlu1 %v10605_v38, %s12000_s28 }
0x1077   : > { %5082 = vrot.lane.b32.xlu0 %v10636_v39, %s12000_s28 }
0x107b   : > { %5090 = vrot.lane.b32.xlu2 %v10631_v28, %s12000_s28 }
0x107c   : > { %4803 = vrot.lane.b32.xlu1 %v10636_v39, %s11999_s3 }
0x107e   : > { %v4368_v63 = vpop.xlane.xlu2 %4367 }
0x107f   : > { %4807 = vrot.lane.b32.xlu0 %v10646_v10, %s11999_s3  ;;  %8076 = vrcp.f32 %v4368_v63 }
0x1083   : > { %5084 = vrot.lane.b32.xlu2 %v10640_v33, %s12000_s28 }
0x1084   : > { %4805 = vrot.lane.b32.xlu1 %v10640_v33, %s11999_s3 }
0x1085   : > { %v8077_v61 = vpop.eup %8076 }
0x1086   : > { %v4371_v38 = vpop.xlane.xlu1 %4370  ;;  %v4398_v39 = vmul.f32 %v8077_v61, %v10660_v51 }
0x1087   : > { %8078 = vrcp.f32 %v4371_v38  ;;  %5088 = vrot.lane.b32.xlu0 %v10595_v46, %s12000_s28 }
0x108b   : > { %4809 = vrot.lane.b32.xlu2 %v10595_v46, %s11999_s3 }
0x108c   : > { %5086 = vrot.lane.b32.xlu1 %v10646_v10, %s12000_s28 }
0x108d   : > { %v8079_v28 = vpop.eup %8078 }
0x108e   : > { %v4399_v50 = vmul.f32 %v8079_v28, %v10664_v59  ;;  %v4374_v33 = vpop.xlane.xlu0 %4373 }
0x108f   : > { %8080 = vrcp.f32 %v4374_v33 }
0x1090   : > { %v4406_v55 = vpack.c.bf16 %v4399_v50, %v4398_v39 }
0x1092   : > { %7318 = vmatmul.msk.bf16.vlgmr.msrb.gmra.mxu0 %vm1545_vm11, %v4406_v55 }
0x1095   : > { %v8081_v60 = vpop.eup %8080 }
0x1096   : > { %v4377_v30 = vpop.xlane.xlu2 %4376  ;;  %v4400_v24 = vmul.f32 %v8081_v60, %v10668_v37 }
0x1097   : > { %8082 = vrcp.f32 %v4377_v30 }
0x109d   : > { %v8083_v54 = vpop.eup %8082 }
0x109e   : > { %v4401_v46 = vmul.f32 %v8083_v54, %v10672_v11  ;;  %v4380_v10 = vpop.xlane.xlu1 %4379  ;;  %v7675_v11 = vld [vmem:[%s11964_s8 + $0x40] sm:$0xff] }
0x109f   : > { %8084 = vrcp.f32 %v4380_v10  ;;  %4781 = vmatpush.bf16.msra.mxu0 %v7675_v11 }
0x10a0   : > { %v4407_v12 = vpack.c.bf16 %v4401_v46, %v4400_v24 }
0x10a2   : > { %7319 = vmatmul.msk.bf16.gmra.mxu0 %vm1545_vm11, %v4407_v12 }
0x10a5   : > { %v8085_v51 = vpop.eup %8084 }
0x10a6   : > { %v4383_v4 = vpop.xlane.xlu0 %4382  ;;  %v4402_v34 = vmul.f32 %v8085_v51, %v10676_v1 }
0x10a7   : > { %8086 = vrcp.f32 %v4383_v4 }
0x10ad   : > { %v8087_v27 = vpop.eup %8086 }
0x10ae   : > { %v4403_v13 = vmul.f32 %v8087_v27, %v10680_v18  ;;  %v4386_v59 = vpop.xlane.xlu2 %4385 }
0x10af   : > { %8088 = vrcp.f32 %v4386_v59 }
0x10b0   : > { %v4408_v58 = vpack.c.bf16 %v4403_v13, %v4402_v34 }
0x10b2   : > { %7320 = vmatmul.msk.bf16.gmra.mxu0 %vm1545_vm11, %v4408_v58 }
0x10b5   : > { %v8089_v37 = vpop.eup %8088 }
0x10b6   : > { %v4389_v2 = vpop.xlane.xlu1 %4388  ;;  %v4404_v26 = vmul.f32 %v8089_v37, %v10684_v25  ;;  %v4492_v3 = vpop.permute.xlu2 %4491 }
0x10b7   : > { %8090 = vrcp.f32 %v4389_v2  ;;  %v4514_v19 = vsel %vm1491_vm10, %v4492_v3, 0 }
0x10b9   : > { %v4494_v45 = vpop.permute.xlu0 %4493 }
0x10ba   : > { %v4517_v6 = vsel %vm1491_vm10, %v4494_v45, 0 }
0x10bb   : > { %4523 = vmatpush.bf16.xpose.msra.mxu1 %v4517_v6 }
0x10bd   : > { %v8091_v47 = vpop.eup %8090 }
0x10be   : > { %v4405_v43 = vmul.f32 %v8091_v47, %v10688_v62  ;;  %v4480_v40 = vpop.permute.xlu2 %4479 }
0x10c0   : > { %v4409_v35 = vpack.c.bf16 %v4405_v43, %v4404_v26 }
0x10c1   : > { %v4488_v32 = vpop.permute.xlu0 %4487 }
0x10c2   : > { %7321 = vmatmul.msk.bf16.gmra.mxu0 %vm1545_vm11, %v4409_v35  ;;  %v4508_v18 = vsel %vm1491_vm10, %v4488_v32, 0 }
0x10c3   : > { %4524 = vmatpush.bf16.xpose.msra.mxu1 %v4514_v19 }
0x10c6   : > { %v4818_v41 = vpop.permute.xlu2 %4817 }
0x10c7   : > { %v4841_v17 = vsel %vm1491_vm10, %v4818_v41, 0 }
0x10c9   : > { %v4482_v1 = vpop.permute.xlu0 %4481 }
0x10ce   : > { %v4490_v48 = vpop.permute.xlu1 %4489  ;;  %v4486_v25 = vpop.permute.xlu2 %4485 }
0x10cf   : > { %v4511_v16 = vsel %vm1491_vm10, %v4490_v48, 0 }
0x10d0   : > { %4525 = vmatpush.bf16.xpose.msra.mxu1 %v4511_v16 }
0x10d1   : > { %v4816_v21 = vpop.permute.xlu0 %4815 }
0x10d2   : > { %v4838_v49 = vsel %vm1491_vm10, %v4816_v21, 0 }
0x10d6   : > { %v4484_v31 = vpop.permute.xlu1 %4483  ;;  %v4812_v38 = vpop.permute.xlu2 %4811 }
0x10d7   : > { %v4832_v39 = vsel %vm1491_vm10, %v4812_v38, 0 }
0x10d8   : > { %4526 = vmatpush.bf16.xpose.msra.mxu1 %v4508_v18 }
0x10d9   : > { %v4814_v14 = vpop.permute.xlu0 %4813 }
0x10da   : > { %v4835_v63 = vsel %vm1491_vm10, %v4814_v14, 0 }
0x10de   : > { %v5097_v29 = vpop.permute.xlu1 %5096  ;;  %v5091_v50 = vpop.permute.xlu2 %5090 }
0x10df   : > { %v5120_v15 = vsel %vm1491_vm10, %v5097_v29, 0  ;;  %7322 = vmatmul.msk.bf16.vlgmr.msra.gmra.mxu1 %vm1491_vm10, %v4480_v40  ;;  %v5111_v55 = vsel %vm1491_vm10, %v5091_v50, 0 }
0x10e0   : > { %4847 = vmatpush.bf16.xpose.msrb.mxu1 %v4841_v17  ;;  %5126 = vmatpush.bf16.xpose.msrb.mxu0 %v5120_v15 }
0x10e1   : > { %v5093_v61 = vpop.permute.xlu0 %5092 }
0x10e2   : > { %v5114_v28 = vsel %vm1491_vm10, %v5093_v61, 0 }
0x10e6   : > { %v5095_v62 = vpop.permute.xlu1 %5094  ;;  %v5085_v59 = vpop.permute.xlu2 %5084 }
0x10e7   : > { %v5117_v22 = vsel %vm1491_vm10, %v5095_v62, 0 }
0x10e8   : > { %4848 = vmatpush.bf16.xpose.msrb.mxu1 %v4838_v49  ;;  %5127 = vmatpush.bf16.xpose.msrb.mxu0 %v5117_v22 }
0x10e9   : > { %v5083_v51 = vpop.permute.xlu0 %5082 }
0x10ee   : > { %v4804_v54 = vpop.permute.xlu1 %4803  ;;  %v4810_v6 = vpop.permute.xlu2 %4809 }
0x10ef   : > { %7323 = vmatmul.msk.bf16.gmra.mxu1 %vm1491_vm10, %v4482_v1 }
0x10f0   : > { %4849 = vmatpush.bf16.xpose.msrb.mxu1 %v4835_v63  ;;  %5128 = vmatpush.bf16.xpose.msrb.mxu0 %v5114_v28 }
0x10f1   : > { %v4808_v13 = vpop.permute.xlu0 %4807 }
0x10f6   : > { %v4806_v10 = vpop.permute.xlu1 %4805 }
0x10f8   : > { %4850 = vmatpush.bf16.xpose.msrb.mxu1 %v4832_v39  ;;  %5129 = vmatpush.bf16.xpose.msrb.mxu0 %v5111_v55 }
0x10f9   : > { %v5089_v16 = vpop.permute.xlu0 %5088 }
0x10fe   : > { %v5087_v19 = vpop.permute.xlu1 %5086 }
0x10ff   : > { %7324 = vmatmul.msk.bf16.gmra.mxu1 %vm1491_vm10, %v4484_v31 }
0x110f   : > { %v4455_v33 = vpop.f32.mrf.mxu0  ;;  %7325 = vmatmul.msk.bf16.gmra.mxu1 %vm1491_vm10, %v4486_v25 }
0x1117   : > { %v4457_v30 = vpop.f32.mrf.mxu0 }
0x1118   : > { %v4475_v60 = vpack.c.bf16 %v4457_v30, %v4455_v33 }
0x111a   : > { %7350 = vmatmul.msk.bf16.vlgmr.msra.gmra.mxu0 %vm1491_vm10, %v4475_v60 }
0x111f   : > { %v4460_v24 = vpop.f32.mrf.mxu0  ;;  %7354 = vmatmul.msk.bf16.vlgmr.msrb.gmra.mxu1 %vm1491_vm10, %v4804_v54 }
0x1127   : > { %v4462_v46 = vpop.f32.mrf.mxu0 }
0x1128   : > { %v4476_v12 = vpack.c.bf16 %v4462_v46, %v4460_v24 }
0x112a   : > { %7351 = vmatmul.msk.bf16.gmra.mxu0 %vm1491_vm10, %v4476_v12 }
0x112f   : > { %v4465_v4 = vpop.f32.mrf.mxu0  ;;  %7355 = vmatmul.msk.bf16.gmra.mxu1 %vm1491_vm10, %v4806_v10 }
0x1137   : > { %v4467_v27 = vpop.f32.mrf.mxu0 }
0x1138   : > { %v4477_v34 = vpack.c.bf16 %v4467_v27, %v4465_v4 }
0x113a   : > { %7352 = vmatmul.msk.bf16.gmra.mxu0 %vm1491_vm10, %v4477_v34 }
0x113f   : > { %v4470_v58 = vpop.f32.mrf.mxu0  ;;  %7356 = vmatmul.msk.bf16.gmra.mxu1 %vm1491_vm10, %v4808_v13 }
0x1147   : > { %v4472_v2 = vpop.f32.mrf.mxu0 }
0x1148   : > { %v4478_v45 = vpack.c.bf16 %v4472_v2, %v4470_v58 }
0x114a   : > { %7353 = vmatmul.msk.bf16.gmra.mxu0 %vm1491_vm10, %v4478_v45 }
0x114f   : > { %7357 = vmatmul.msk.bf16.gmra.mxu1 %vm1491_vm10, %v4810_v6 }
0x115a   : > { %7374 = vmatmul.msk.bf16.vlgmr.msrb.gmra.mxu0 %vm1491_vm10, %v5083_v51 }
0x115c   : > { %v4528_v5 = vpop.f32.mrf.mxu1 }
0x115d   : > { %v4548_v37 = vsel %vm1545_vm11, %v4528_v5, -inf }
0x115e   : > { %4549 = vmax.xlane.f32.xlu1 %v4548_v37 }
0x1164   : > { %v10784_v47 = vpop.f32.mrf.mxu1 }
0x1165   : > { %v4551_v26 = vsel %vm1545_vm11, %v10784_v47, -inf }
0x1166   : > { %4552 = vmax.xlane.f32.xlu2 %v4551_v26 }
0x116a   : > { %7375 = vmatmul.msk.bf16.gmra.mxu0 %vm1491_vm10, %v5085_v59 }
0x116c   : > { %v4533_v43 = vpop.f32.mrf.mxu1 }
0x116d   : > { %v4554_v3 = vsel %vm1545_vm11, %v4533_v43, -inf }
0x116e   : > { %4555 = vmax.xlane.f32.xlu0 %v4554_v3 }
0x1174   : > { %v10790_v11 = vpop.f32.mrf.mxu1 }
0x1175   : > { %v4557_v35 = vsel %vm1545_vm11, %v10790_v11, -inf }
0x1176   : > { %4558 = vmax.xlane.f32.xlu1 %v4557_v35 }
0x117a   : > { %7376 = vmatmul.msk.bf16.gmra.mxu0 %vm1491_vm10, %v5087_v19 }
0x117c   : > { %v10795_v32 = vpop.f32.mrf.mxu1 }
0x117d   : > { %v4560_v40 = vsel %vm1545_vm11, %v10795_v32, -inf }
0x117e   : > { %4561 = vmax.xlane.f32.xlu2 %v4560_v40 }
0x1184   : > { %v4540_v1 = vpop.f32.mrf.mxu1 }
0x1185   : > { %v4563_v48 = vsel %vm1545_vm11, %v4540_v1, -inf }
0x1186   : > { %4564 = vmax.xlane.f32.xlu0 %v4563_v48 }
0x118a   : > { %7377 = vmatmul.msk.bf16.gmra.mxu0 %vm1491_vm10, %v5089_v16 }
0x118c   : > { %v10801_v41 = vpop.f32.mrf.mxu1 }
0x118d   : > { %v4566_v31 = vsel %vm1545_vm11, %v10801_v41, -inf }
0x118e   : > { %4567 = vmax.xlane.f32.xlu1 %v4566_v31 }
0x1194   : > { %v10805_v18 = vpop.f32.mrf.mxu1 }
0x1195   : > { %v4569_v17 = vsel %vm1545_vm11, %v10805_v18, -inf }
0x1196   : > { %4570 = vmax.xlane.f32.xlu2 %v4569_v17 }
0x1197   : > { %v10815_v21 = vpop.f32.mrf.mxu0 }
0x119a   : > { %4646 = vrot.lane.b32.xlu0 %v10607_v23, %s11998_s2 }
0x119c   : > { %v10821_v29 = vpop.f32.mrf.mxu1 }
0x119d   : > { %v4872_v22 = vsel %vm1545_vm11, %v10821_v29, -inf }
0x119f   : > { %v10823_v15 = vpop.f32.mrf.mxu0 }
0x11a2   : > { %4640 = vrot.lane.b32.xlu0 %v10627_v9, %s11998_s2 }
0x11a4   : > { %v10827_v25 = vpop.f32.mrf.mxu1 }
0x11a5   : > { %v4875_v61 = vsel %vm1545_vm11, %v10827_v25, -inf }
0x11a7   : > { %4644 = vrot.lane.b32.xlu1 %v10617_v42, %s11998_s2  ;;  %v10829_v49 = vpop.f32.mrf.mxu0 }
0x11ac   : > { %v10831_v14 = vpop.f32.mrf.mxu1 }
0x11ad   : > { %v4878_v50 = vsel %vm1545_vm11, %v10831_v14, -inf }
0x11ae   : > { %4642 = vrot.lane.b32.xlu2 %v10622_v20, %s11998_s2  ;;  %s512_s2 = sand.u32 1, %s8338_s22  }
0x11af   : > { %4968 = vrot.lane.b32.xlu1 %v10617_v42, %s11999_s3  ;;  %v10833_v62 = vpop.f32.mrf.mxu0  ;;  %s6830_s20 = sshll.u32 %s512_s2, 6  ;;  %s6749_s25 = scalar_lea.sflag [#allocation3], %s512_s2 }
0x11b0   : > { %s11885_s23 = scalar_lea.vmem [#allocation2], %s6830_s20 }
0x11b4   : > { %v10837_v63 = vpop.f32.mrf.mxu1 }
0x11b7   : > { %5249 = vrot.lane.b32.xlu1 %v10607_v23, %s12000_s28  ;;  %v10839_v38 = vpop.f32.mrf.mxu0 }
0x11bc   : > { %v10843_v28 = vpop.f32.mrf.mxu1 }
0x11bd   : > { %v4884_v54 = vsel %vm1545_vm11, %v10843_v28, -inf }
0x11bf   : > { %v10845_v39 = vpop.f32.mrf.mxu0 }
0x11c4   : > { %v10851_v55 = vpop.f32.mrf.mxu1 }
0x11c7   : > { %v10853_v33 = vpop.f32.mrf.mxu0 }
0x11cc   : > { %4873 = vmax.xlane.f32.xlu0 %v4872_v22 }
0x11cf   : > { %v10861_v12 = vpop.f32.mrf.mxu0 }
0x11d1   : > { %v4550_v30 = vpop.xlane.xlu1 %4549 }
0x11d2   : > { %v4572_v60 = vsub.f32 %v4528_v5, %v4550_v30 }
0x11d4   : > { %v4580_v24 = vmul.f32 1.442695, %v4572_v60 }
0x11d6   : > { %8092 = vpow2.f32 %v4580_v24 }
0x11d7   : > { %4876 = vmax.xlane.f32.xlu2 %v4875_v61  ;;  %v10869_v34 = vpop.f32.mrf.mxu0 }
0x11d9   : > { %v4553_v58 = vpop.xlane.xlu2 %4552 }
0x11dc   : > { %v10867_v27 = vpop.eup %8092 }
0x11dd   : > { %v4596_v13 = vsel %vm1545_vm11, %v10867_v27, 0.0 }
0x11df   : > { %v10878_v3 = vpop.f32.mrf.mxu0 }
0x11e0   : > { %4970 = vrot.lane.b32.xlu0 %v10607_v23, %s11999_s3  ;;  %v10859_v23 = vpop.f32.mrf.mxu1 }
0x11e1   : > { %4879 = vmax.xlane.f32.xlu1 %v4878_v50  ;;  %v4556_v46 = vpop.xlane.xlu0 %4555  ;;  %v4890_v4 = vsel %vm1545_vm11, %v10859_v23, -inf }
0x11e2   : > { %v4574_v10 = vsub.f32 %v4533_v43, %v4556_v46 }
0x11e4   : > { %v4584_v51 = vmul.f32 1.442695, %v4574_v10  ;;  %v4881_v10 = vsel %vm1545_vm11, %v10837_v63, -inf }
0x11e6   : > { %8094 = vpow2.f32 %v4584_v51 }
0x11e7   : > { %v10886_v16 = vpop.f32.mrf.mxu0 }
0x11e8   : > { %4964 = vrot.lane.b32.xlu0 %v10627_v9, %s11999_s3 }
0x11e9   : > { %4885 = vmax.xlane.f32.xlu1 %v4884_v54  ;;  %v4559_v5 = vpop.xlane.xlu1 %4558 }
0x11ea   : > { %v4575_v37 = vsub.f32 %v10790_v11, %v4559_v5 }
0x11ec   : > { %v10873_v6 = vpop.eup %8094  ;;  %v4586_v35 = vmul.f32 1.442695, %v4575_v37 }
0x11ed   : > { %v4602_v26 = vsel %vm1545_vm11, %v10873_v6, 0.0 }
0x11ef   : > { %4966 = vrot.lane.b32.xlu2 %v10622_v20, %s11999_s3  ;;  %v10899_v46 = vpop.f32.mrf.mxu0  ;;  %s6761_s3 = sshll.u32 %s11885_s23, 4  ;;  %s6762_s3 = int_to_ptr.vmem [resolvable:$true] %s6761_s3 }
0x11f1   : > { %4891 = vmax.xlane.f32.xlu1 %v4890_v4  ;;  %v4562_v43 = vpop.xlane.xlu2 %4561 }
0x11f2   : > { %v4576_v40 = vsub.f32 %v10795_v32, %v4562_v43 }
0x11f4   : > { %v4588_v31 = vmul.f32 1.442695, %v4576_v40  ;;  %v5154_v40 = vsel %vm1545_vm11, %v10878_v3, -inf }
0x11f9   : > { %4597 = vadd.xlane.f32.xlu1 %v4596_v13  ;;  %v4565_v59 = vpop.xlane.xlu0 %4564 }
0x11fa   : > { %v4577_v2 = vsub.f32 %v4540_v1, %v4565_v59  ;;  %v4573_v59 = vsub.f32 %v10784_v47, %v4553_v58 }
0x11fc   : > { %v4590_v45 = vmul.f32 1.442695, %v4577_v2  ;;  %v4887_v2 = vsel %vm1545_vm11, %v10851_v55, -inf  ;;  %v4582_v43 = vmul.f32 1.442695, %v4573_v59 }
0x11fe   : > { %8096 = vpow2.f32 %v4590_v45  ;;  %v10910_v45 = vpop.f32.mrf.mxu0 }
0x11ff   : > { %8098 = vpow2.f32 %v4586_v35  ;;  %v10914_v35 = vpop.f32.mrf.mxu1 }
0x1200   : > { %v4893_v47 = vsel %vm1545_vm11, %v10914_v35, -inf }
0x1201   : > { %4603 = vadd.xlane.f32.xlu1 %v4602_v26  ;;  %v4568_v61 = vpop.xlane.xlu1 %4567 }
0x1202   : > { %v4578_v32 = vsub.f32 %v10801_v41, %v4568_v61 }
0x1204   : > { %v10880_v19 = vpop.eup %8096 }
0x1205   : > { %v4611_v1 = vsel %vm1545_vm11, %v10880_v19, 0.0  ;;  %v10888_v50 = vpop.eup %8098 }
0x1206   : > { %v4605_v30 = vsel %vm1545_vm11, %v10888_v50, 0.0 }
0x1209   : > { %v4571_v48 = vpop.xlane.xlu2 %4570  ;;  %4612 = vadd.xlane.f32.xlu1 %v4611_v1  ;;  %v10920_v1 = vpop.f32.mrf.mxu0 }
0x120a   : > { %v4579_v11 = vsub.f32 %v10805_v18, %v4571_v48  ;;  %v4592_v18 = vmul.f32 1.442695, %v4578_v32 }
0x120c   : > { %v4594_v17 = vmul.f32 1.442695, %v4579_v11  ;;  %v4647_v22 = vpop.permute.xlu0 %4646 }
0x120d   : > { %4668 = vmatpush.bf16.msra.mxu2 %v4647_v22  ;;  %v5166_v22 = vsel %vm1545_vm11, %v10920_v1, -inf }
0x120e   : > { %8100 = vpow2.f32 %v4594_v17 }
0x120f   : > { %8102 = vpow2.f32 %v4588_v31  ;;  %v5160_v31 = vsel %vm1545_vm11, %v10899_v46, -inf }
0x1210   : > { %8104 = vpow2.f32 %v4592_v18 }
0x1211   : > { %v4643_v51 = vpop.permute.xlu2 %4642  ;;  %8106 = vpow2.f32 %v4582_v43  ;;  %v10928_v17 = vpop.f32.mrf.mxu0  ;;  %v5151_v43 = vsel %vm1545_vm11, %v10869_v34, -inf }
0x1212   : > { %4606 = vadd.xlane.f32.xlu0 %v4605_v30 }
0x1214   : > { %v10893_v60 = vpop.eup %8100  ;;  %v4641_v5 = vpop.permute.xlu0 %4640 }
0x1215   : > { %v4617_v54 = vsel %vm1545_vm11, %v10893_v60, 0.0  ;;  %v10897_v24 = vpop.eup %8102 }
0x1216   : > { %4618 = vadd.xlane.f32.xlu1 %v4617_v54  ;;  %v4608_v4 = vsel %vm1545_vm11, %v10897_v24, 0.0  ;;  %v10905_v13 = vpop.eup %8104 }
0x1217   : > { %v4614_v26 = vsel %vm1545_vm11, %v10905_v13, 0.0  ;;  %v10922_v48 = vpop.eup %8106 }
0x1218   : > { %4882 = vmax.xlane.f32.xlu2 %v4881_v10  ;;  %v4599_v11 = vsel %vm1545_vm11, %v10922_v48, 0.0 }
0x1219   : > { %v4645_v41 = vpop.permute.xlu1 %4644  ;;  %v10932_v61 = vpop.f32.mrf.mxu0 }
0x121a   : > { %4609 = vadd.xlane.f32.xlu0 %v4608_v4  ;;  %4669 = vmatpush.bf16.msra.mxu2 %v4645_v41  ;;  %v5172_v18 = vsel %vm1545_vm11, %v10932_v61, -inf }
0x121e   : > { %4670 = vmatpush.bf16.msra.mxu2 %v4643_v51 }
0x1220   : > { %4888 = vmax.xlane.f32.xlu2 %v4887_v2 }
0x1221   : > { %v4969_v37 = vpop.permute.xlu1 %4968 }
0x1222   : > { %4615 = vadd.xlane.f32.xlu0 %v4614_v26  ;;  %4671 = vmatpush.bf16.msra.mxu2 %v4641_v5 }
0x1228   : > { %4894 = vmax.xlane.f32.xlu2 %v4893_v47  ;;  %v5157_v47 = vsel %vm1545_vm11, %v10886_v16, -inf }
0x1229   : > { %v5250_v58 = vpop.permute.xlu1 %5249 }
0x122a   : > { %5271 = vmatpush.bf16.msra.mxu1 %v5250_v58  ;;  %5155 = vmax.xlane.f32.xlu0 %v5154_v40  ;;  %v5163_v40 = vsel %vm1545_vm11, %v10910_v45, -inf }
0x1230   : > { %4600 = vadd.xlane.f32.xlu2 %v4599_v11  ;;  %v5169_v11 = vsel %vm1545_vm11, %v10928_v17, -inf }
0x1232   : > { %5161 = vmax.xlane.f32.xlu0 %v5160_v31 }
0x123a   : > { %5167 = vmax.xlane.f32.xlu0 %v5166_v22 }
0x123f   : > { %v4874_v32 = vpop.xlane.xlu0 %4873 }
0x1240   : > { %v4896_v30 = vsub.f32 %v10821_v29, %v4874_v32 }
0x1242   : > { %v4904_v54 = vmul.f32 1.442695, %v4896_v30  ;;  %5173 = vmax.xlane.f32.xlu0 %v5172_v18 }
0x1244   : > { %8108 = vpow2.f32 %v4904_v54 }
0x124a   : > { %v10937_v10 = vpop.eup %8108  ;;  %v4877_v41 = vpop.xlane.xlu2 %4876 }
0x124b   : > { %v4897_v4 = vsub.f32 %v10827_v25, %v4877_v41  ;;  %v4920_v51 = vsel %vm1545_vm11, %v10937_v10, 0.0 }
0x124c   : > { %4921 = vadd.xlane.f32.xlu1 %v4920_v51 }
0x124d   : > { %v4906_v59 = vmul.f32 1.442695, %v4897_v4 }
0x124f   : > { %8110 = vpow2.f32 %v4906_v59 }
0x1252   : > { %v4971_v2 = vpop.permute.xlu0 %4970  ;;  %v4967_v26 = vpop.permute.xlu2 %4966 }
0x1253   : > { %4992 = vmatpush.bf16.msrb.mxu2 %v4971_v2 }
0x1254   : > { %v4880_v58 = vpop.xlane.xlu1 %4879 }
0x1255   : > { %v10942_v29 = vpop.eup %8110 }
0x1256   : > { %5247 = vrot.lane.b32.xlu0 %v10617_v42, %s12000_s28  ;;  %v4923_v5 = vsel %vm1545_vm11, %v10942_v29, 0.0  ;;  %v4898_v42 = vsub.f32 %v10831_v14, %v4880_v58 }
0x1257   : > { %4924 = vadd.xlane.f32.xlu2 %v4923_v5  ;;  %4993 = vmatpush.bf16.msrb.mxu2 %v4969_v37 }
0x1258   : > { %v4908_v37 = vmul.f32 1.442695, %v4898_v42 }
0x125a   : > { %v4965_v25 = vpop.permute.xlu0 %4964  ;;  %8112 = vpow2.f32 %v4908_v37 }
0x125b   : > { %4994 = vmatpush.bf16.msrb.mxu2 %v4967_v26 }
0x125c   : > { %v4886_v30 = vpop.xlane.xlu1 %4885 }
0x125d   : > { %v4900_v41 = vsub.f32 %v10843_v28, %v4886_v30 }
0x125f   : > { %5152 = vmax.xlane.f32.xlu2 %v5151_v43  ;;  %4995 = vmatpush.bf16.msrb.mxu2 %v4965_v25  ;;  %v4912_v51 = vmul.f32 1.442695, %v4900_v41 }
0x1260   : > { %v10957_v31 = vpop.eup %8112 }
0x1261   : > { %v4926_v22 = vsel %vm1545_vm11, %v10957_v31, 0.0 }
0x1264   : > { %v10963_v2 = vpop.xlane.xlu1 %4891 }
0x1267   : > { %5158 = vmax.xlane.f32.xlu2 %v5157_v47 }
0x126c   : > { %v4598_v42 = vpop.xlane.xlu1 %4597 }
0x126f   : > { %5164 = vmax.xlane.f32.xlu2 %v5163_v40 }
0x1277   : > { %5170 = vmax.xlane.f32.xlu2 %v5169_v11 }
0x127f   : > { %4927 = vadd.xlane.f32.xlu2 %v4926_v22 }
0x1285   : > { %v4607_v32 = vpop.xlane.xlu0 %4606 }
0x128b   : > { %v4883_v18 = vpop.xlane.xlu2 %4882 }
0x128c   : > { %v4899_v14 = vsub.f32 %v10837_v63, %v4883_v18 }
0x128d   : > { %v4610_v54 = vpop.xlane.xlu0 %4609 }
0x128e   : > { %v4910_v4 = vmul.f32 1.442695, %v4899_v14 }
0x1290   : > { %8114 = vpow2.f32 %v4910_v4 }
0x1291   : > { %8116 = vpow2.f32 %v4912_v51 }
0x1293   : > { %v4889_v59 = vpop.xlane.xlu2 %4888 }
0x1294   : > { %v4901_v25 = vsub.f32 %v10851_v55, %v4889_v59 }
0x1295   : > { %v4616_v5 = vpop.xlane.xlu0 %4615 }
0x1296   : > { %v10965_v26 = vpop.eup %8114  ;;  %v4914_v63 = vmul.f32 1.442695, %v4901_v25 }
0x1297   : > { %v4929_v43 = vsel %vm1545_vm11, %v10965_v26, 0.0  ;;  %v10972_v28 = vpop.eup %8116 }
0x1298   : > { %4930 = vadd.xlane.f32.xlu0 %v4929_v43  ;;  %8118 = vpow2.f32 %v4914_v63  ;;  %v4932_v37 = vsel %vm1545_vm11, %v10972_v28, 0.0  ;;  %v4604_v43 = vpop.xlane.xlu1 %4603 }
0x1299   : > { %8120 = vrcp.f32 %v4598_v42 }
0x129b   : > { %v10970_v47 = vpop.xlane.xlu2 %4894 }
0x129d   : > { %v5156_v58 = vpop.xlane.xlu0 %5155 }
0x129e   : > { %v5176_v40 = vsub.f32 %v10878_v3, %v5156_v58  ;;  %v10977_v22 = vpop.eup %8118 }
0x129f   : > { %v8121_v30 = vpop.eup %8120  ;;  %v4935_v18 = vsel %vm1545_vm11, %v10977_v22, 0.0 }
0x12a0   : > { %v5185_v11 = vmul.f32 1.442695, %v5176_v40  ;;  %4933 = vadd.xlane.f32.xlu0 %v4932_v37  ;;  %v4628_v4 = vmul.f32 %v8121_v30, %v10867_v27 }
0x12a2   : > { %8122 = vpow2.f32 %v5185_v11 }
0x12a3   : > { %v4601_v55 = vpop.xlane.xlu2 %4600 }
0x12a4   : > { %8124 = vrcp.f32 %v4601_v55  ;;  %v4613_v55 = vpop.xlane.xlu1 %4612 }
0x12a5   : > { %v5162_v59 = vpop.xlane.xlu0 %5161  ;;  %8126 = vrcp.f32 %v4607_v32 }
0x12a6   : > { %8128 = vrcp.f32 %v4604_v43 }
0x12a7   : > { %8130 = vrcp.f32 %v4610_v54 }
0x12a8   : > { %v10981_v14 = vpop.eup %8122  ;;  %4936 = vadd.xlane.f32.xlu0 %v4935_v18  ;;  %8132 = vrcp.f32 %v4613_v55 }
0x12a9   : > { %v5202_v3 = vsel %vm1545_vm11, %v10981_v14, 0.0  ;;  %8134 = vrcp.f32 %v4616_v5 }
0x12aa   : > { %v8125_v41 = vpop.eup %8124  ;;  %5203 = vadd.xlane.f32.xlu2 %v5202_v3 }
0x12ab   : > { %v4629_v51 = vmul.f32 %v8125_v41, %v10922_v48  ;;  %v8127_v63 = vpop.eup %8126 }
0x12ac   : > { %v8129_v42 = vpop.eup %8128  ;;  %v4631_v40 = vmul.f32 %v8127_v63, %v10888_v50  ;;  %v4619_v41 = vpop.xlane.xlu1 %4618 }
0x12ad   : > { %v4636_v25 = vpack.c.bf16 %v4629_v51, %v4628_v4  ;;  %v10988_v58 = vpop.xlane.xlu0 %5167  ;;  %v4630_v37 = vmul.f32 %v8129_v42, %v10873_v6  ;;  %v8131_v48 = vpop.eup %8130  ;;  %8136 = vrcp.f32 %v4619_v41 }
0x12ae   : > { %v8133_v32 = vpop.eup %8132  ;;  %v4632_v18 = vmul.f32 %v8131_v48, %v10897_v24  ;;  %v5178_v24 = vsub.f32 %v10899_v46, %v5162_v59 }
0x12af   : > { %7326 = vmatmul.msk.bf16.vlgmr.msra.gmra.mxu2 %vm1545_vm11, %v4636_v25  ;;  %v4637_v11 = vpack.c.bf16 %v4631_v40, %v4630_v37  ;;  %v4633_v50 = vmul.f32 %v8133_v32, %v10880_v19 }
0x12b0   : > { %v5189_v40 = vmul.f32 1.442695, %v5178_v24 }
0x12b1   : > { %v4638_v6 = vpack.c.bf16 %v4633_v50, %v4632_v18 }
0x12b5   : > { %v5174_v27 = vpop.xlane.xlu0 %5173 }
0x12bf   : > { %7327 = vmatmul.msk.bf16.gmra.mxu2 %vm1545_vm11, %v4637_v11  ;;  %v4922_v11 = vpop.xlane.xlu1 %4921 }
0x12c2   : > { %5243 = vrot.lane.b32.xlu2 %v10627_v9, %s12000_s28  ;;  %v8135_v9 = vpop.eup %8134 }
0x12c3   : > { %v8137_v25 = vpop.eup %8136  ;;  %v4634_v43 = vmul.f32 %v8135_v9, %v10905_v13 }
0x12c4   : > { %v4635_v19 = vmul.f32 %v8137_v25, %v10893_v60  ;;  %v4902_v60 = vsub.f32 %v10859_v23, %v10963_v2  ;;  %v5182_v23 = vsub.f32 %v10932_v61, %v5174_v27 }
0x12c6   : > { %v4639_v37 = vpack.c.bf16 %v4635_v19, %v4634_v43  ;;  %v4916_v32 = vmul.f32 1.442695, %v4902_v60 }
0x12c8   : > { %v5248_v30 = vpop.permute.xlu0 %5247 }
0x12c9   : > { %5272 = vmatpush.bf16.msra.mxu1 %v5248_v30 }
0x12ca   : > { %v4925_v3 = vpop.xlane.xlu2 %4924 }
0x12cf   : > { %7328 = vmatmul.msk.bf16.gmra.mxu2 %vm1545_vm11, %v4638_v6 }
0x12d2   : > { %v5153_v54 = vpop.xlane.xlu2 %5152 }
0x12d3   : > { %v5175_v4 = vsub.f32 %v10869_v34, %v5153_v54 }
0x12d5   : > { %v5183_v51 = vmul.f32 1.442695, %v5175_v4 }
0x12d7   : > { %8138 = vpow2.f32 %v5183_v51 }
0x12d8   : > { %8140 = vrcp.f32 %v4925_v3 }
0x12d9   : > { %8142 = vpow2.f32 %v5189_v40  ;;  %v7678_v40 = vld [vmem:[%s11964_s8 + $0x58] sm:$0xff] }
0x12da   : > { %v5159_v63 = vpop.xlane.xlu2 %5158  ;;  %8144 = vrcp.f32 %v4922_v11  ;;  %4727 = vmatpush.bf16.msra.mxu3 %v7678_v40 }
0x12db   : > { %v5177_v24 = vsub.f32 %v10886_v16, %v5159_v63  ;;  %v7677_v16 = vld [vmem:[%s11964_s8 + $0x50] sm:$0xff] }
0x12dd   : > { %v11002_v42 = vpop.eup %8138  ;;  %v5187_v11 = vmul.f32 1.442695, %v5177_v24 }
0x12de   : > { %v5199_v5 = vsel %vm1545_vm11, %v11002_v42, 0.0  ;;  %v8141_v59 = vpop.eup %8140  ;;  %4728 = vmatpush.bf16.msra.mxu3 %v7677_v16 }
0x12df   : > { %5200 = vadd.xlane.f32.xlu1 %v5199_v5  ;;  %7329 = vmatmul.msk.bf16.gmra.mxu2 %vm1545_vm11, %v4639_v37  ;;  %v11010_v55 = vpop.eup %8142  ;;  %v4953_v30 = vmul.f32 %v8141_v59, %v10942_v29  ;;  %v5197_v29 = vmul.f32 1.442695, %v5182_v23 }
0x12e0   : > { %v8145_v48 = vpop.eup %8144  ;;  %v5208_v3 = vsel %vm1545_vm11, %v11010_v55, 0.0 }
0x12e1   : > { %v4952_v50 = vmul.f32 %v8145_v48, %v10937_v10 }
0x12e2   : > { %v5165_v34 = vpop.xlane.xlu2 %5164 }
0x12e3   : > { %v5179_v46 = vsub.f32 %v10910_v45, %v5165_v34  ;;  %v4960_v2 = vpack.c.bf16 %v4953_v30, %v4952_v50 }
0x12e5   : > { %v5191_v13 = vmul.f32 1.442695, %v5179_v46  ;;  %v5180_v46 = vsub.f32 %v10920_v1, %v10988_v58 }
0x12e7   : > { %8146 = vpow2.f32 %v5191_v13  ;;  %v5193_v60 = vmul.f32 1.442695, %v5180_v46  ;;  %v4903_v13 = vsub.f32 %v10914_v35, %v10970_v47 }
0x12e8   : > { %8148 = vpow2.f32 %v4916_v32 }
0x12e9   : > { %v4918_v32 = vmul.f32 1.442695, %v4903_v13 }
0x12ea   : > { %v5171_v18 = vpop.xlane.xlu2 %5170 }
0x12eb   : > { %v5181_v45 = vsub.f32 %v10928_v17, %v5171_v18  ;;  %5209 = vadd.xlane.f32.xlu2 %v5208_v3 }
0x12ed   : > { %v11017_v6 = vpop.eup %8146  ;;  %v5195_v41 = vmul.f32 1.442695, %v5181_v45 }
0x12ee   : > { %v5211_v54 = vsel %vm1545_vm11, %v11017_v6, 0.0  ;;  %v11023_v4 = vpop.eup %8148 }
0x12ef   : > { %8150 = vpow2.f32 %v5195_v41  ;;  %5212 = vadd.xlane.f32.xlu0 %v5211_v54  ;;  %7358 = vmatmul.msk.bf16.vlgmr.msrb.gmra.mxu2 %vm1545_vm11, %v4960_v2  ;;  %v4938_v17 = vsel %vm1545_vm11, %v11023_v4, 0.0  ;;  %v7680_v54 = vld [vmem:[%s11964_s8 + $0x68] sm:$0xff] }
0x12f0   : > { %8152 = vpow2.f32 %v5197_v29  ;;  %5051 = vmatpush.bf16.msrb.mxu3 %v7680_v54 }
0x12f2   : > { %v4928_v9 = vpop.xlane.xlu2 %4927 }
0x12f3   : > { %8154 = vrcp.f32 %v4928_v9 }
0x12f5   : > { %v11025_v10 = vpop.eup %8150 }
0x12f6   : > { %v5217_v61 = vsel %vm1545_vm11, %v11025_v10, 0.0  ;;  %v11033_v27 = vpop.eup %8152 }
0x12f7   : > { %4939 = vadd.xlane.f32.xlu0 %v4938_v17  ;;  %5218 = vadd.xlane.f32.xlu2 %v5217_v61  ;;  %v5220_v51 = vsel %vm1545_vm11, %v11033_v27, 0.0  ;;  %v7679_v17 = vld [vmem:[%s11964_s8 + $0x60] sm:$0xff] }
0x12f8   : > { %5245 = vrot.lane.b32.xlu1 %v10622_v20, %s12000_s28  ;;  %5052 = vmatpush.bf16.msrb.mxu3 %v7679_v17  ;;  %s6763_s28 = sshll.u32 %s6760_s1, 4  ;;  %s6764_s28 = int_to_ptr.hbm [resolvable:$true] %s6763_s28 }
0x12f9   : > { %v8155_v43 = vpop.eup %8154  ;;  %s8298_s18 = sshra.s32 %s6764_s28, 4  ;;  %s8299_s18 = int_to_ptr.hbm [resolvable:$true] %s8298_s18 }
0x12fa   : > { %v4954_v20 = vmul.f32 %v8155_v43, %v10957_v31  ;;  %s8300_s19 = scalar_lea.hbm %s8299_s18, 64  ;;  %p8305_p0 = scmp.lt.s32.totalorder %s8299_s18, %s11972_s16 }
0x12fb   : > { %p8301_p11 = scmp.ne.s32.totalorder %s8299_s18, %s8300_s19  ;;  %p8306_p1 = scmp.lt.s32.totalorder %s8304_s30, %s8300_s19 }
0x12fd   : > { %p8302_p12 = pnand %p8301_p11, %p8477_p5  ;;  %p8307_p2 = por %p8306_p1, %p8305_p0 }
0x12ff   : > { %5221 = vadd.xlane.f32.xlu0 %v5220_v51  ;;  %p8303_p13 = pneg %p8302_p12 }
0x1301   : > { %p8308_p3 = pnand %p8307_p2, %p8303_p13 }
0x130b   : > { %v4931_v25 = vpop.xlane.xlu0 %4930 }
0x130c   : > { %8156 = vrcp.f32 %v4931_v25 }
0x130d   : > { %8158 = vpow2.f32 %v5187_v11 }
0x1312   : > { %v8157_v19 = vpop.eup %8156 }
0x1313   : > { %v4955_v37 = vmul.f32 %v8157_v19, %v10965_v26  ;;  %v4934_v5 = vpop.xlane.xlu0 %4933  ;;  %v11049_v31 = vpop.eup %8158 }
0x1314   : > { %8160 = vrcp.f32 %v4934_v5  ;;  %v5205_v1 = vsel %vm1545_vm11, %v11049_v31, 0.0 }
0x1315   : > { %v4961_v34 = vpack.c.bf16 %v4955_v37, %v4954_v20 }
0x1317   : > { %7359 = vmatmul.msk.bf16.gmra.mxu2 %vm1545_vm11, %v4961_v34 }
0x131a   : > { %v8161_v26 = vpop.eup %8160 }
0x131b   : > { %v4937_v63 = vpop.xlane.xlu0 %4936  ;;  %v4956_v59 = vmul.f32 %v8161_v26, %v10972_v28 }
0x131c   : > { %8162 = vrcp.f32 %v4937_v63 }
0x131d   : > { %8164 = vpow2.f32 %v5193_v60  ;;  %v5204_v9 = vpop.xlane.xlu2 %5203 }
0x131e   : > { %8166 = vpow2.f32 %v4918_v32 }
0x1322   : > { %v8163_v58 = vpop.eup %8162  ;;  %5206 = vadd.xlane.f32.xlu1 %v5205_v1 }
0x1323   : > { %v4957_v48 = vmul.f32 %v8163_v58, %v10977_v22  ;;  %v11057_v18 = vpop.eup %8164 }
0x1324   : > { %v5214_v35 = vsel %vm1545_vm11, %v11057_v18, 0.0  ;;  %v11062_v47 = vpop.eup %8166 }
0x1325   : > { %v4962_v30 = vpack.c.bf16 %v4957_v48, %v4956_v59  ;;  %v4941_v3 = vsel %vm1545_vm11, %v11062_v47, 0.0  ;;  %v5244_v11 = vpop.permute.xlu2 %5243 }
0x1327   : > { %7360 = vmatmul.msk.bf16.gmra.mxu2 %vm1545_vm11, %v4962_v30 }
0x132a   : > { %5215 = vadd.xlane.f32.xlu1 %v5214_v35 }
0x1332   : > { %v4673_v50 = vpop.f32.mrf.mxu2  ;;  %4942 = vadd.xlane.f32.xlu1 %v4941_v3 }
0x133a   : > { %v4675_v28 = vpop.f32.mrf.mxu2 }
0x133b   : > { %v4693_v22 = vpack.c.bf16 %v4675_v28, %v4673_v50 }
0x133d   : > { %7338 = vmatmul.msk.bf16.vlgmr.msra.gmra.mxu3 %vm1491_vm10, %v4693_v22 }
0x1342   : > { %v4678_v45 = vpop.f32.mrf.mxu2 }
0x134a   : > { %v4680_v23 = vpop.f32.mrf.mxu2 }
0x134b   : > { %v4694_v2 = vpack.c.bf16 %v4680_v23, %v4678_v45 }
0x134d   : > { %7339 = vmatmul.msk.bf16.gmra.mxu3 %vm1491_vm10, %v4694_v2 }
0x1352   : > { %v4683_v41 = vpop.f32.mrf.mxu2  ;;  %v5201_v51 = vpop.xlane.xlu1 %5200 }
0x1353   : > { %8168 = vrcp.f32 %v5201_v51 }
0x1354   : > { %8170 = vrcp.f32 %v5204_v9 }
0x1359   : > { %v8169_v43 = vpop.eup %8168 }
0x135a   : > { %v4685_v29 = vpop.f32.mrf.mxu2  ;;  %v8171_v40 = vpop.eup %8170  ;;  %v5231_v37 = vmul.f32 %v8169_v43, %v11002_v42 }
0x135b   : > { %v4695_v61 = vpack.c.bf16 %v4685_v29, %v4683_v41  ;;  %v5232_v5 = vmul.f32 %v8171_v40, %v10981_v14 }
0x135d   : > { %7340 = vmatmul.msk.bf16.gmra.mxu3 %vm1491_vm10, %v4695_v61  ;;  %v5239_v34 = vpack.c.bf16 %v5232_v5, %v5231_v37 }
0x135e   : > { %v5210_v60 = vpop.xlane.xlu2 %5209 }
0x135f   : > { %8172 = vrcp.f32 %v5210_v60 }
0x1362   : > { %v4688_v25 = vpop.f32.mrf.mxu2  ;;  %v5213_v13 = vpop.xlane.xlu0 %5212 }
0x1365   : > { %v8173_v42 = vpop.eup %8172 }
0x1366   : > { %v5234_v14 = vmul.f32 %v8173_v42, %v11010_v55 }
0x136a   : > { %v5246_v24 = vpop.permute.xlu1 %5245  ;;  %v4690_v19 = vpop.f32.mrf.mxu2 }
0x136b   : > { %v4696_v20 = vpack.c.bf16 %v4690_v19, %v4688_v25  ;;  %5273 = vmatpush.bf16.msra.mxu1 %v5246_v24  ;;  %v4940_v30 = vpop.xlane.xlu0 %4939  ;;  %v5219_v51 = vpop.xlane.xlu2 %5218  ;;  %v7681_v19 = vld [vmem:[%s11964_s8 + $0x70] sm:$0xff] }
0x136d   : > { %7341 = vmatmul.msk.bf16.gmra.mxu3 %vm1491_vm10, %v4696_v20 }
0x136f   : > { %5274 = vmatpush.bf16.msra.mxu1 %v5244_v11 }
0x1372   : > { %v4997_v46 = vpop.f32.mrf.mxu2  ;;  %7378 = vmatmul.msk.bf16.vlgmr.msra.gmra.mxu1 %vm1545_vm11, %v5239_v34 }
0x1373   : > { %v5222_v29 = vpop.xlane.xlu0 %5221 }
0x137a   : > { %v4999_v16 = vpop.f32.mrf.mxu2 }
0x137b   : > { %v5017_v63 = vpack.c.bf16 %v4999_v16, %v4997_v46 }
0x137d   : > { %7370 = vmatmul.msk.bf16.vlgmr.msrb.gmra.mxu3 %vm1491_vm10, %v5017_v63 }
0x1395   : > { %v5207_v26 = vpop.xlane.xlu1 %5206 }
0x1396   : > { %8174 = vrcp.f32 %v5207_v26 }
0x139a   : > { %v5002_v1 = vpop.f32.mrf.mxu2 }
0x139c   : > { %v8175_v58 = vpop.eup %8174 }
0x139d   : > { %v5233_v59 = vmul.f32 %v8175_v58, %v11049_v31  ;;  %v5216_v48 = vpop.xlane.xlu1 %5215 }
0x139e   : > { %8176 = vrcp.f32 %v5216_v48 }
0x139f   : > { %v5240_v32 = vpack.c.bf16 %v5234_v14, %v5233_v59  ;;  %8178 = vrcp.f32 %v5213_v13 }
0x13a0   : > { %8180 = vrcp.f32 %v4940_v30 }
0x13a1   : > { %7379 = vmatmul.msk.bf16.gmra.mxu1 %vm1545_vm11, %v5240_v32 }
0x13a2   : > { %v5004_v35 = vpop.f32.mrf.mxu2 }
0x13a3   : > { %v5018_v3 = vpack.c.bf16 %v5004_v35, %v5002_v1 }
0x13a4   : > { %v8177_v28 = vpop.eup %8176 }
0x13a5   : > { %v4943_v50 = vpop.xlane.xlu1 %4942  ;;  %7371 = vmatmul.msk.bf16.gmra.mxu3 %vm1491_vm10, %v5018_v3  ;;  %v8179_v22 = vpop.eup %8178  ;;  %v5236_v31 = vmul.f32 %v8177_v28, %v11057_v18 }
0x13a6   : > { %8182 = vrcp.f32 %v4943_v50  ;;  %v8181_v45 = vpop.eup %8180  ;;  %v5235_v2 = vmul.f32 %v8179_v22, %v11017_v6  ;;  %v7682_v6 = vld [vmem:[%s11964_s8 + $0x78] sm:$0xff]  ;;  %v11109_v22 = vld [vmem:[%s11965_s9 + $0x1] ss:$0 sm:$0xff] }
0x13a7   : > { %v4958_v41 = vmul.f32 %v8181_v45, %v11023_v4  ;;  %8184 = vrcp.f32 %v5222_v29  ;;  %5330 = vmatpush.bf16.msra.mxu2 %v7682_v6 }
0x13a8   : > { %v5241_v61 = vpack.c.bf16 %v5236_v31, %v5235_v2  ;;  %8186 = vrcp.f32 %v5219_v51 }
0x13aa   : > { %v5007_v55 = vpop.f32.mrf.mxu2 }
0x13ab   : > { %5331 = vmatpush.bf16.msra.mxu2 %v7681_v19 }
0x13ac   : > { %v8183_v23 = vpop.eup %8182 }
0x13ad   : > { %v4959_v54 = vmul.f32 %v8183_v23, %v11062_v47  ;;  %v8185_v18 = vpop.eup %8184 }
0x13ae   : > { %v8187_v4 = vpop.eup %8186  ;;  %v5238_v47 = vmul.f32 %v8185_v18, %v11033_v27 }
0x13af   : > { %v4963_v17 = vpack.c.bf16 %v4959_v54, %v4958_v41  ;;  %v5237_v43 = vmul.f32 %v8187_v4, %v11025_v10 }
0x13b1   : > { %7361 = vmatmul.msk.bf16.gmra.mxu2 %vm1545_vm11, %v4963_v17  ;;  %7380 = vmatmul.msk.bf16.gmra.mxu1 %vm1545_vm11, %v5241_v61  ;;  %v5242_v24 = vpack.c.bf16 %v5238_v47, %v5237_v43 }
0x13b2   : > { %v5009_v9 = vpop.f32.mrf.mxu2 }
0x13b3   : > { %v5019_v25 = vpack.c.bf16 %v5009_v9, %v5007_v55 }
0x13b5   : > { %7372 = vmatmul.msk.bf16.gmra.mxu3 %vm1491_vm10, %v5019_v25 }
0x13c0   : > { %v4730_v34 = vpop.f32.mrf.mxu3 }
0x13c1   : > { %7381 = vmatmul.msk.bf16.gmra.mxu1 %vm1545_vm11, %v5242_v24  ;;  %v4784_v50 = vadd.f32 %v10815_v21, %v4730_v34 }
0x13c8   : > { %v4732_v46 = vpop.f32.mrf.mxu3 }
0x13c9   : > { %v4786_v2 = vadd.f32 %v10823_v15, %v4732_v46 }
0x13d0   : > { %v4735_v26 = vpop.f32.mrf.mxu3 }
0x13d1   : > { %v4789_v9 = vadd.f32 %v10829_v49, %v4735_v26 }
0x13d8   : > { %v4737_v58 = vpop.f32.mrf.mxu3 }
0x13d9   : > { %v4791_v4 = vadd.f32 %v10833_v62, %v4737_v58 }
0x13e0   : > { %v4740_v48 = vpop.f32.mrf.mxu3 }
0x13e1   : > { %v4794_v49 = vadd.f32 %v10839_v38, %v4740_v48 }
0x13e8   : > { %v4742_v32 = vpop.f32.mrf.mxu3 }
0x13e9   : > { %v4796_v34 = vadd.f32 %v10845_v39, %v4742_v32 }
0x13ef   : > { %v5276_v40 = vpop.f32.mrf.mxu1 }
0x13f0   : > { %v4745_v30 = vpop.f32.mrf.mxu3 }
0x13f7   : > { %v5278_v20 = vpop.f32.mrf.mxu1 }
0x13f8   : > { %v5296_v37 = vpack.c.bf16 %v5278_v20, %v5276_v40  ;;  %v4747_v35 = vpop.f32.mrf.mxu3 }
0x13fa   : > { %7390 = vmatmul.msk.bf16.vlgmr.msra.gmra.mxu2 %vm1491_vm10, %v5296_v37 }
0x1400   : > { %v5054_v3 = vpop.f32.mrf.mxu3 }
0x1401   : > { %v5074_v28 = vadd.f32 %v5054_v3, %v4784_v50 }
0x1408   : > { %v5056_v23 = vpop.f32.mrf.mxu3 }
0x1409   : > { %v5075_v54 = vadd.f32 %v5056_v23, %v4786_v2 }
0x141e   : > { %v5281_v5 = vpop.f32.mrf.mxu1 }
0x1426   : > { %v5283_v11 = vpop.f32.mrf.mxu1 }
0x1427   : > { %v5297_v27 = vpack.c.bf16 %v5283_v11, %v5281_v5 }
0x1428   : > { %v5059_v51 = vpop.f32.mrf.mxu3 }
0x1429   : > { %7391 = vmatmul.msk.bf16.gmra.mxu2 %vm1491_vm10, %v5297_v27  ;;  %v5076_v25 = vadd.f32 %v5059_v51, %v4789_v9 }
0x142e   : > { %v5286_v10 = vpop.f32.mrf.mxu1 }
0x1430   : > { %v5061_v15 = vpop.f32.mrf.mxu3 }
0x1431   : > { %v5077_v43 = vadd.f32 %v5061_v15, %v4791_v4 }
0x1434   : > { %v5012_v16 = vpop.f32.mrf.mxu2 }
0x1436   : > { %v5288_v63 = vpop.f32.mrf.mxu1 }
0x1437   : > { %v5298_v60 = vpack.c.bf16 %v5288_v63, %v5286_v10  ;;  %v4799_v63 = vadd.f32 %v10853_v33, %v4745_v30 }
0x1438   : > { %v5064_v19 = vpop.f32.mrf.mxu3 }
0x1439   : > { %7392 = vmatmul.msk.bf16.gmra.mxu2 %vm1491_vm10, %v5298_v60  ;;  %v5078_v37 = vadd.f32 %v5064_v19, %v4794_v49  ;;  %v7697_v19 = vld [vmem:[%s11966_s10 + $0xf4] sm:$0xf]  ;;  %v7472_v49 = vld [vmem:[%s11966_s10 + $0xf8] sm:$0xf0] }
0x143c   : > { %v5014_v13 = vpop.f32.mrf.mxu2 }
0x143d   : > { %v5020_v42 = vpack.c.bf16 %v5014_v13, %v5012_v16 }
0x143e   : > { %v5291_v1 = vpop.f32.mrf.mxu1 }
0x143f   : > { %7373 = vmatmul.msk.bf16.gmra.mxu3 %vm1491_vm10, %v5020_v42 }
0x1440   : > { %v5066_v11 = vpop.f32.mrf.mxu3 }
0x1441   : > { %v5079_v10 = vadd.f32 %v5066_v11, %v4796_v34  ;;  %v7464_v34 = vld [vmem:[%s11966_s10 + $0xe8] sm:$0xf0] }
0x1446   : > { %v5293_v14 = vpop.f32.mrf.mxu1 }
0x1447   : > { %v5299_v59 = vpack.c.bf16 %v5293_v14, %v5291_v1  ;;  %v4801_v14 = vadd.f32 %v10861_v12, %v4747_v35 }
0x1449   : > { %7393 = vmatmul.msk.bf16.gmra.mxu2 %vm1491_vm10, %v5299_v59 }
0x147d   : > { %v5333_v45 = vpop.f32.mrf.mxu2 }
0x147e   : > { %v5353_v55 = vadd.f32 %v5333_v45, %v5074_v28 }
0x1480   : > { %v5366_v31 = vadd.f32 %v11109_v22, %v5353_v55 }
0x1482   : > { %v11114_v41 = vadd.f32 %v5366_v31, %v10286_v8 }
0x1484   : > { %5382 = vadd.xlane.f32.xlu1 %v11114_v41 }
0x1485   : > { %v5335_v21 = vpop.f32.mrf.mxu2 }
0x1486   : > { %v5354_v29 = vadd.f32 %v5335_v21, %v5075_v54 }
0x1488   : > { %v5367_v17 = vadd.f32 %v11109_v22, %v5354_v29 }
0x148a   : > { %v11119_v61 = vadd.f32 %v5367_v17, %v10293_v36 }
0x148c   : > { %5384 = vadd.xlane.f32.xlu2 %v11119_v61 }
0x14ac   : > { %v5338_v18 = vpop.f32.mrf.mxu2 }
0x14ad   : > { %v5355_v8 = vadd.f32 %v5338_v18, %v5076_v25 }
0x14af   : > { %v5368_v6 = vadd.f32 %v11109_v22, %v5355_v8 }
0x14b1   : > { %v11126_v47 = vadd.f32 %v5368_v6, %v10304_v44 }
0x14b3   : > { %5386 = vadd.xlane.f32.xlu0 %v11126_v47 }
0x14b4   : > { %v5340_v36 = vpop.f32.mrf.mxu2 }
0x14b5   : > { %v5356_v24 = vadd.f32 %v5340_v36, %v5077_v43  ;;  %v7470_v36 = vld [vmem:[%s11966_s10 + $0xf0] sm:$0xf] }
0x14b7   : > { %v5369_v40 = vadd.f32 %v11109_v22, %v5356_v24  ;;  %v7698_v24 = vld [vmem:[%s11966_s10 + $0xf4] sm:$0xf0] }
0x14b9   : > { %v11132_v20 = vadd.f32 %v5369_v40, %v10309_v7  ;;  %v7471_v40 = vor.u32 %v7698_v24, %v7470_v36 }
0x14bb   : > { %5388 = vadd.xlane.f32.xlu1 %v11132_v20  ;;  %5650 = vmatpush.bf16.msra.mxu3 %v7471_v40 }
0x14bc   : > { %v5343_v62 = vpop.f32.mrf.mxu2 }
0x14bd   : > { %v5357_v5 = vadd.f32 %v5343_v62, %v5078_v37  ;;  %v7475_v37 = vor.u32 %v7697_v19, %v7472_v49  ;;  %v7462_v62 = vld [vmem:[%s11966_s10 + $0xe0] sm:$0xf] }
0x14bf   : > { %v5370_v44 = vadd.f32 %v11109_v22, %v5357_v5  ;;  %5679 = vmatpush.bf16.msra.mxu0 %v7475_v37  ;;  %v7696_v5 = vld [vmem:[%s11966_s10 + $0xe4] sm:$0xf0] }
0x14c0   : > { %v7463_v11 = vor.u32 %v7696_v5, %v7462_v62 }
0x14c1   : > { %v11138_v27 = vadd.f32 %v5370_v44, %v10318_v57  ;;  %v7695_v44 = vld [vmem:[%s11966_s10 + $0xe4] sm:$0xf] }
0x14c2   : > { %v5069_v16 = vpop.f32.mrf.mxu3  ;;  %5651 = vmatpush.bf16.msra.mxu3 %v7463_v11 }
0x14c3   : > { %5390 = vadd.xlane.f32.xlu2 %v11138_v27  ;;  %v5080_v26 = vadd.f32 %v5069_v16, %v4799_v63  ;;  %v7456_v63 = vld [vmem:[%s11966_s10 + $0xd8] sm:$0xf0] }
0x14c4   : > { %v5345_v38 = vpop.f32.mrf.mxu2 }
0x14c5   : > { %v5358_v46 = vadd.f32 %v5345_v38, %v5079_v10  ;;  %v7467_v10 = vor.u32 %v7695_v44, %v7464_v34  ;;  %v7454_v38 = vld [vmem:[%s11966_s10 + $0xd0] sm:$0xf] }
0x14c7   : > { %v5371_v7 = vadd.f32 %v11109_v22, %v5358_v46  ;;  %5680 = vmatpush.bf16.msra.mxu0 %v7467_v10  ;;  %v7694_v46 = vld [vmem:[%s11966_s10 + $0xd4] sm:$0xf0] }
0x14c8   : > { %v7455_v16 = vor.u32 %v7694_v46, %v7454_v38 }
0x14c9   : > { %v11144_v60 = vadd.f32 %v5371_v7, %v10329_v52  ;;  %v7693_v7 = vld [vmem:[%s11966_s10 + $0xd4] sm:$0xf] }
0x14ca   : > { %v5071_v1 = vpop.f32.mrf.mxu3  ;;  %5652 = vmatpush.bf16.msra.mxu3 %v7455_v16 }
0x14cb   : > { %5392 = vadd.xlane.f32.xlu0 %v11144_v60  ;;  %v5081_v59 = vadd.f32 %v5071_v1, %v4801_v14 }
0x14cc   : > { %v5348_v39 = vpop.f32.mrf.mxu2 }
0x14cd   : > { %v5359_v13 = vadd.f32 %v5348_v39, %v5080_v26  ;;  %v7459_v26 = vor.u32 %v7693_v7, %v7456_v63  ;;  %v7446_v39 = vld [vmem:[%s11966_s10 + $0xc0] sm:$0xf] }
0x14cf   : > { %v5372_v57 = vadd.f32 %v11109_v22, %v5359_v13  ;;  %5681 = vmatpush.bf16.msra.mxu0 %v7459_v26  ;;  %v7692_v13 = vld [vmem:[%s11966_s10 + $0xc4] sm:$0xf0] }
0x14d0   : > { %v7447_v1 = vor.u32 %v7692_v13, %v7446_v39 }
0x14d1   : > { %v11149_v42 = vadd.f32 %v5372_v57, %v10336_v0  ;;  %v7691_v57 = vld [vmem:[%s11966_s10 + $0xc4] sm:$0xf] }
0x14d2   : > { %5653 = vmatpush.bf16.msra.mxu3 %v7447_v1 }
0x14d3   : > { %5394 = vadd.xlane.f32.xlu0 %v11149_v42 }
0x14d4   : > { %v5350_v52 = vpop.f32.mrf.mxu2 }
0x14d5   : > { %v5360_v32 = vadd.f32 %v5350_v52, %v5081_v59  ;;  %v7690_v52 = vld [vmem:[%s11966_s10 + $0xb4] sm:$0xf0]  ;;  %v7689_v59 = vld [vmem:[%s11966_s10 + $0xb4] sm:$0xf] }
0x14d7   : > { %v5373_v3 = vadd.f32 %v11109_v22, %v5360_v32 }
0x14d9   : > { %v11167_v35 = vadd.f32 %v5373_v3, %v10341_v56  ;;  %v7430_v3 = vld [vmem:[%s11966_s10 + $0xa0] sm:$0xf] }
0x14f7   : > { %v5383_v58 = vpop.xlane.xlu1 %5382 }
0x14f8   : > { %v5398_v33 = vmul.f32 %v5383_v58, %v8637_v53  ;;  %v7448_v58 = vld [vmem:[%s11966_s10 + $0xc8] sm:$0xf0] }
0x14f9   : > { %v7451_v14 = vor.u32 %v7691_v57, %v7448_v58 }
0x14fa   : > { %v11155_v48 = vsub.f32 %v11114_v41, %v5398_v33  ;;  %v7438_v33 = vld [vmem:[%s11966_s10 + $0xb0] sm:$0xf] }
0x14fb   : > { %5682 = vmatpush.bf16.msra.mxu0 %v7451_v14  ;;  %v7439_v32 = vor.u32 %v7690_v52, %v7438_v33 }
0x14fc   : > { %v5414_v30 = vmul.f32 %v11155_v48, %v11155_v48 }
0x14fd   : > { %5654 = vmatpush.bf16.msra.mxu3 %v7439_v32 }
0x14fe   : > { %5422 = vadd.xlane.f32.xlu1 %v5414_v30  ;;  %v7440_v30 = vld [vmem:[%s11966_s10 + $0xb8] sm:$0xf0] }
0x14ff   : > { %v5385_v0 = vpop.xlane.xlu2 %5384 }
0x1500   : > { %v5399_v50 = vmul.f32 %v5385_v0, %v8637_v53  ;;  %v7443_v0 = vor.u32 %v7689_v59, %v7440_v30 }
0x1502   : > { %v11162_v28 = vsub.f32 %v11119_v61, %v5399_v50  ;;  %5683 = vmatpush.bf16.msra.mxu0 %v7443_v0  ;;  %v7688_v50 = vld [vmem:[%s11966_s10 + $0xa4] sm:$0xf0] }
0x1504   : > { %v5415_v12 = vmul.f32 %v11162_v28, %v11162_v28 }
0x1506   : > { %5424 = vadd.xlane.f32.xlu2 %v5415_v12  ;;  %5396 = vadd.xlane.f32.xlu1 %v11167_v35  ;;  %v7687_v12 = vld [vmem:[%s11966_s10 + $0xa4] sm:$0xf] }
0x1526   : > { %v5387_v45 = vpop.xlane.xlu0 %5386 }
0x1527   : > { %v5400_v55 = vmul.f32 %v5387_v45, %v8637_v53  ;;  %v7431_v45 = vor.u32 %v7688_v50, %v7430_v3 }
0x1529   : > { %v11172_v31 = vsub.f32 %v11126_v47, %v5400_v55  ;;  %v7432_v55 = vld [vmem:[%s11966_s10 + $0xa8] sm:$0xf0]  ;;  %5655 = vmatpush.bf16.msra.mxu3 %v7431_v45 }
0x152b   : > { %v5416_v22 = vmul.f32 %v11172_v31, %v11172_v31 }
0x152d   : > { %5426 = vadd.xlane.f32.xlu2 %v5416_v22  ;;  %v7435_v22 = vor.u32 %v7687_v12, %v7432_v55 }
0x152e   : > { %v5389_v23 = vpop.xlane.xlu1 %5388 }
0x152f   : > { %v5401_v2 = vmul.f32 %v5389_v23, %v8637_v53  ;;  %5684 = vmatpush.bf16.msra.mxu0 %v7435_v22  ;;  %v7422_v23 = vld [vmem:[%s11966_s10 + $0x90] sm:$0xf] }
0x1531   : > { %v11178_v54 = vsub.f32 %v11132_v20, %v5401_v2  ;;  %v7686_v2 = vld [vmem:[%s11966_s10 + $0x94] sm:$0xf0] }
0x1533   : > { %v5417_v56 = vmul.f32 %v11178_v54, %v11178_v54 }
0x1535   : > { %5428 = vadd.xlane.f32.xlu0 %v5417_v56  ;;  %v7685_v56 = vld [vmem:[%s11966_s10 + $0x94] sm:$0xf] }
0x1536   : > { %v5391_v21 = vpop.xlane.xlu2 %5390 }
0x1537   : > { %v5402_v29 = vmul.f32 %v5391_v21, %v8637_v53  ;;  %v7423_v21 = vor.u32 %v7686_v2, %v7422_v23 }
0x1539   : > { %v11184_v17 = vsub.f32 %v11138_v27, %v5402_v29  ;;  %v7424_v29 = vld [vmem:[%s11966_s10 + $0x98] sm:$0xf0]  ;;  %5656 = vmatpush.bf16.msra.mxu3 %v7423_v21 }
0x153b   : > { %v5418_v51 = vmul.f32 %v11184_v17, %v11184_v17 }
0x153d   : > { %5430 = vadd.xlane.f32.xlu1 %v5418_v51  ;;  %v7427_v51 = vor.u32 %v7685_v56, %v7424_v29 }
0x153e   : > { %v5393_v9 = vpop.xlane.xlu0 %5392 }
0x153f   : > { %v5403_v25 = vmul.f32 %v5393_v9, %v8637_v53  ;;  %5685 = vmatpush.bf16.msra.mxu0 %v7427_v51  ;;  %v7414_v9 = vld [vmem:[%s11966_s10 + $0x80] sm:$0xf] }
0x1541   : > { %v11190_v15 = vsub.f32 %v11144_v60, %v5403_v25  ;;  %v7684_v25 = vld [vmem:[%s11966_s10 + $0x84] sm:$0xf0] }
0x1543   : > { %v5419_v18 = vmul.f32 %v11190_v15, %v11190_v15 }
0x1545   : > { %5432 = vadd.xlane.f32.xlu2 %v5419_v18  ;;  %v7683_v18 = vld [vmem:[%s11966_s10 + $0x84] sm:$0xf] }
0x1546   : > { %v5395_v8 = vpop.xlane.xlu0 %5394 }
0x1547   : > { %v5404_v6 = vmul.f32 %v5395_v8, %v8637_v53 }
0x1549   : > { %v11196_v4 = vsub.f32 %v11149_v42, %v5404_v6  ;;  %v7415_v6 = vor.u32 %v7684_v25, %v7414_v9 }
0x154b   : > { %v5420_v43 = vmul.f32 %v11196_v4, %v11196_v4  ;;  %5657 = vmatpush.bf16.msra.mxu3 %v7415_v6 }
0x154d   : > { %5434 = vadd.xlane.f32.xlu0 %v5420_v43  ;;  %v7416_v43 = vld [vmem:[%s11966_s10 + $0x88] sm:$0xf0] }
0x154e   : > { %v7419_v24 = vor.u32 %v7683_v18, %v7416_v43 }
0x1550   : > { %5686 = vmatpush.bf16.msra.mxu0 %v7419_v24 }
0x1571   : > { %v5423_v8 = vpop.xlane.xlu1 %5422 }
0x1572   : > { %v5438_v36 = vmul.f32 %v5423_v8, %v8637_v53 }
0x1574   : > { %v5446_v19 = vadd.f32 1e-05, %v5438_v36 }
0x1576   : > { %8188 = vrsqrt.f32 %v5446_v19  ;;  %vm5460_vm11 = vweird.f32 %v5446_v19 }
0x1579   : > { %v5425_v40 = vpop.xlane.xlu2 %5424  ;;  %v5397_v49 = vpop.xlane.xlu1 %5396 }
0x157a   : > { %v5439_v37 = vmul.f32 %v5425_v40, %v8637_v53  ;;  %v5405_v62 = vmul.f32 %v5397_v49, %v8637_v53 }
0x157c   : > { %v8189_v5 = vpop.eup %8188  ;;  %v5447_v44 = vadd.f32 1e-05, %v5439_v37  ;;  %v11300_v11 = vsub.f32 %v11167_v35, %v5405_v62 }
0x157d   : > { %v5455_v34 = vmul.f32 %v8189_v5, %v5446_v19  ;;  %vm5461_vm10 = vweird.f32 %v8189_v5 }
0x157e   : > { %8190 = vrsqrt.f32 %v5447_v44  ;;  %v5421_v10 = vmul.f32 %v11300_v11, %v11300_v11  ;;  %vm5462_vm15 = vmor %vm5460_vm11, %vm5461_vm10  ;;  %vm5470_vm0 = vweird.f32 %v5447_v44 }
0x157f   : > { %v5456_v38 = vmul.f32 %v8189_v5, %v5455_v34 }
0x1580   : > { %5436 = vadd.xlane.f32.xlu1 %v5421_v10 }
0x1581   : > { %v5457_v46 = vmul.f32 0.5, %v5456_v38 }
0x1583   : > { %v5458_v16 = vsub.f32 1.5, %v5457_v46 }
0x1584   : > { %v8191_v7 = vpop.eup %8190 }
0x1585   : > { %v5465_v63 = vmul.f32 %v8191_v7, %v5447_v44  ;;  %v5459_v39 = vmul.f32 %v8189_v5, %v5458_v16  ;;  %vm5471_vm14 = vweird.f32 %v8191_v7 }
0x1586   : > { %vm5472_vm1 = vmor %vm5470_vm0, %vm5471_vm14 }
0x1587   : > { %v5466_v26 = vmul.f32 %v8191_v7, %v5465_v63  ;;  %v5463_v1 = vsel %vm5462_vm15, %v8189_v5, %v5459_v39 }
0x1588   : > { %v5534_v33 = vmul.f32 %v5463_v1, %v11155_v48 }
0x1589   : > { %v5467_v13 = vmul.f32 0.5, %v5466_v26 }
0x158b   : > { %v5468_v57 = vsub.f32 1.5, %v5467_v13 }
0x158d   : > { %v5469_v58 = vmul.f32 %v8191_v7, %v5468_v57 }
0x158f   : > { %v5473_v14 = vsel %vm5472_vm1, %v8191_v7, %v5469_v58 }
0x1590   : > { %v5535_v52 = vmul.f32 %v5473_v14, %v11162_v28 }
0x1592   : > { %v5559_v59 = vpack.c.bf16 %v5535_v52, %v5534_v33 }
0x1594   : > { %5658 = vmatmul.bf16.vlgmr.msra.gmra.mxu3 %v5559_v59  ;;  %5687 = vmatmul.bf16.vlgmr.msra.gmra.mxu0 %v5559_v59 }
0x15a0   : > { %v5427_v32 = vpop.xlane.xlu2 %5426 }
0x15a1   : > { %v5440_v30 = vmul.f32 %v5427_v32, %v8637_v53 }
0x15a3   : > { %v5448_v0 = vadd.f32 1e-05, %v5440_v30 }
0x15a5   : > { %8192 = vrsqrt.f32 %v5448_v0  ;;  %vm5480_vm3 = vweird.f32 %v5448_v0 }
0x15a8   : > { %v5429_v3 = vpop.xlane.xlu0 %5428 }
0x15a9   : > { %v5441_v50 = vmul.f32 %v5429_v3, %v8637_v53 }
0x15ab   : > { %v8193_v12 = vpop.eup %8192  ;;  %v5449_v45 = vadd.f32 1e-05, %v5441_v50 }
0x15ac   : > { %v5475_v55 = vmul.f32 %v8193_v12, %v5448_v0  ;;  %vm5481_vm2 = vweird.f32 %v8193_v12 }
0x15ad   : > { %8194 = vrsqrt.f32 %v5449_v45  ;;  %vm5482_vm5 = vmor %vm5480_vm3, %vm5481_vm2  ;;  %vm5490_vm6 = vweird.f32 %v5449_v45 }
0x15ae   : > { %v5476_v22 = vmul.f32 %v8193_v12, %v5475_v55 }
0x15b0   : > { %v5477_v23 = vmul.f32 0.5, %v5476_v22  ;;  %v5431_v48 = vpop.xlane.xlu1 %5430 }
0x15b1   : > { %v5442_v28 = vmul.f32 %v5431_v48, %v8637_v53 }
0x15b2   : > { %v5478_v21 = vsub.f32 1.5, %v5477_v23 }
0x15b3   : > { %v8195_v2 = vpop.eup %8194  ;;  %v5450_v56 = vadd.f32 1e-05, %v5442_v28 }
0x15b4   : > { %v5485_v29 = vmul.f32 %v8195_v2, %v5449_v45  ;;  %v5479_v9 = vmul.f32 %v8193_v12, %v5478_v21  ;;  %vm5491_vm4 = vweird.f32 %v8195_v2 }
0x15b5   : > { %8196 = vrsqrt.f32 %v5450_v56  ;;  %vm5492_vm7 = vmor %vm5490_vm6, %vm5491_vm4  ;;  %vm5500_vm9 = vweird.f32 %v5450_v56 }
0x15b6   : > { %v5486_v51 = vmul.f32 %v8195_v2, %v5485_v29  ;;  %v5483_v40 = vsel %vm5482_vm5, %v8193_v12, %v5479_v9  ;;  %v7411_v29 = vld [vmem:[%s11967_s11 + $0x2] sm:$0x3] }
0x15b7   : > { %v5536_v62 = vmul.f32 %v5483_v40, %v11172_v31  ;;  %v11321_v9 = vperm.slane %v7411_v29, 1 }
0x15b8   : > { %v5487_v25 = vmul.f32 0.5, %v5486_v51  ;;  %v5433_v18 = vpop.xlane.xlu2 %5432 }
0x15b9   : > { %v5443_v8 = vmul.f32 %v5433_v18, %v8637_v53 }
0x15ba   : > { %v5488_v6 = vsub.f32 1.5, %v5487_v25 }
0x15bb   : > { %v8197_v43 = vpop.eup %8196  ;;  %v5451_v36 = vadd.f32 1e-05, %v5443_v8 }
0x15bc   : > { %v5489_v24 = vmul.f32 %v8195_v2, %v5488_v6  ;;  %v5495_v19 = vmul.f32 %v8197_v43, %v5450_v56  ;;  %vm5501_vm8 = vweird.f32 %v8197_v43  ;;  %v11329_v6 = vperm.slane %v7411_v29, 0 }
0x15bd   : > { %8198 = vrsqrt.f32 %v5451_v36  ;;  %vm5502_vm13 = vmor %vm5500_vm9, %vm5501_vm8  ;;  %vm5510_vm10 = vweird.f32 %v5451_v36 }
0x15be   : > { %v5496_v49 = vmul.f32 %v8197_v43, %v5495_v19  ;;  %v5493_v37 = vsel %vm5492_vm7, %v8195_v2, %v5489_v24 }
0x15bf   : > { %v5537_v5 = vmul.f32 %v5493_v37, %v11178_v54 }
0x15c0   : > { %v5497_v44 = vmul.f32 0.5, %v5496_v49  ;;  %v5435_v58 = vpop.xlane.xlu0 %5434 }
0x15c1   : > { %v5560_v34 = vpack.c.bf16 %v5537_v5, %v5536_v62  ;;  %v5444_v14 = vmul.f32 %v5435_v58, %v8637_v53  ;;  %v7713_v62 = vld [vmem:[%s11968_s12 + $0xf0] sm:$0xff] }
0x15c2   : > { %v5498_v38 = vsub.f32 1.5, %v5497_v44 }
0x15c3   : > { %v8199_v10 = vpop.eup %8198  ;;  %5663 = vmatmul.bf16.gmra.mxu3 %v5560_v34  ;;  %5692 = vmatmul.bf16.gmra.mxu0 %v5560_v34  ;;  %v5452_v33 = vadd.f32 1e-05, %v5444_v14  ;;  %v7706_v34 = vld [vmem:[%s11968_s12 + $0xb8] sm:$0xff] }
0x15c4   : > { %v5505_v46 = vmul.f32 %v8199_v10, %v5451_v36  ;;  %v5499_v16 = vmul.f32 %v8197_v43, %v5498_v38  ;;  %vm5511_vm12 = vweird.f32 %v8199_v10  ;;  %6490 = vmatpush.bf16.msrb.mxu1 %v7706_v34 }
0x15c5   : > { %vm5512_vm11 = vmor %vm5510_vm10, %vm5511_vm12  ;;  %8200 = vrsqrt.f32 %v5452_v33  ;;  %vm5520_vm15 = vweird.f32 %v5452_v33 }
0x15c6   : > { %v5506_v7 = vmul.f32 %v8199_v10, %v5505_v46  ;;  %v5503_v31 = vsel %vm5502_vm13, %v8197_v43, %v5499_v16  ;;  %v7714_v43 = vld [vmem:[%s11968_s12 + $0xf8] sm:$0xff]  ;;  %v7712_v46 = vld [vmem:[%s11968_s12 + $0xe8] sm:$0xff] }
0x15c7   : > { %v5538_v13 = vmul.f32 %v5503_v31, %v11184_v17  ;;  %6519 = vmatpush.bf16.msrb.mxu2 %v7714_v43 }
0x15c8   : > { %v5507_v63 = vmul.f32 0.5, %v5506_v7 }
0x15ca   : > { %v5508_v26 = vsub.f32 1.5, %v5507_v63 }
0x15cb   : > { %v8201_v52 = vpop.eup %8200  ;;  %6520 = vmatpush.bf16.msrb.mxu2 %v7713_v62 }
0x15cc   : > { %v5509_v39 = vmul.f32 %v8199_v10, %v5508_v26  ;;  %v5515_v59 = vmul.f32 %v8201_v52, %v5452_v33  ;;  %vm5521_vm14 = vweird.f32 %v8201_v52  ;;  %v7705_v26 = vld [vmem:[%s11968_s12 + $0xb0] sm:$0xff]  ;;  %v7704_v33 = vld [vmem:[%s11968_s12 + $0xa8] sm:$0xff] }
0x15cd   : > { %vm5522_vm1 = vmor %vm5520_vm15, %vm5521_vm14  ;;  %6491 = vmatpush.bf16.msrb.mxu1 %v7705_v26 }
0x15ce   : > { %v5513_v54 = vsel %vm5512_vm11, %v8199_v10, %v5509_v39  ;;  %v5516_v3 = vmul.f32 %v8201_v52, %v5515_v59 }
0x15cf   : > { %v5539_v57 = vmul.f32 %v5513_v54, %v11190_v15  ;;  %6521 = vmatpush.bf16.msrb.mxu2 %v7712_v46  ;;  %v7702_v46 = vld [vmem:[%s11968_s12 + $0x98] sm:$0xff] }
0x15d0   : > { %v5517_v50 = vmul.f32 0.5, %v5516_v3 }
0x15d1   : > { %v5561_v1 = vpack.c.bf16 %v5539_v57, %v5538_v13  ;;  %v7711_v57 = vld [vmem:[%s11968_s12 + $0xe0] sm:$0xff]  ;;  %6492 = vmatpush.bf16.msrb.mxu1 %v7704_v33  ;;  %v7708_v33 = vld [vmem:[%s11968_s12 + $0xc8] sm:$0xff] }
0x15d2   : > { %v5518_v12 = vsub.f32 1.5, %v5517_v50 }
0x15d3   : > { %5668 = vmatmul.bf16.gmra.mxu3 %v5561_v1  ;;  %5697 = vmatmul.bf16.gmra.mxu0 %v5561_v1 }
0x15d4   : > { %v5519_v55 = vmul.f32 %v8201_v52, %v5518_v12  ;;  %6522 = vmatpush.bf16.msrb.mxu2 %v7711_v57  ;;  %v7703_v12 = vld [vmem:[%s11968_s12 + $0xa0] sm:$0xff] }
0x15d5   : > { %6493 = vmatpush.bf16.msrb.mxu1 %v7703_v12 }
0x15d6   : > { %v5523_v28 = vsel %vm5522_vm1, %v8201_v52, %v5519_v55 }
0x15d7   : > { %v5540_v56 = vmul.f32 %v5523_v28, %v11196_v4 }
0x15d9   : > { %6494 = vmatpush.bf16.msrb.mxu1 %v7702_v46 }
0x15f3   : > { %v5437_v32 = vpop.xlane.xlu1 %5436 }
0x15f4   : > { %v5445_v30 = vmul.f32 %v5437_v32, %v8637_v53 }
0x15f6   : > { %v5453_v0 = vadd.f32 1e-05, %v5445_v30  ;;  %v7710_v30 = vld [vmem:[%s11968_s12 + $0xd8] sm:$0xff] }
0x15f7   : > { %6523 = vmatpush.bf16.msrb.mxu2 %v7710_v30 }
0x15f8   : > { %8202 = vrsqrt.f32 %v5453_v0  ;;  %vm5530_vm2 = vweird.f32 %v5453_v0 }
0x15fe   : > { %v8203_v17 = vpop.eup %8202 }
0x15ff   : > { %v5525_v15 = vmul.f32 %v8203_v17, %v5453_v0  ;;  %vm5531_vm0 = vweird.f32 %v8203_v17 }
0x1600   : > { %vm5532_vm3 = vmor %vm5530_vm2, %vm5531_vm0 }
0x1601   : > { %v5526_v45 = vmul.f32 %v8203_v17, %v5525_v15 }
0x1603   : > { %v5527_v22 = vmul.f32 0.5, %v5526_v45 }
0x1605   : > { %v5528_v23 = vsub.f32 1.5, %v5527_v22 }
0x1607   : > { %v5529_v48 = vmul.f32 %v8203_v17, %v5528_v23 }
0x1609   : > { %v5533_v2 = vsel %vm5532_vm3, %v8203_v17, %v5529_v48 }
0x160a   : > { %v5541_v21 = vmul.f32 %v5533_v2, %v11300_v11 }
0x160c   : > { %v5562_v51 = vpack.c.bf16 %v5541_v21, %v5540_v56 }
0x160e   : > { %5673 = vmatmul.bf16.gmra.mxu3 %v5562_v51  ;;  %5702 = vmatmul.bf16.gmra.mxu0 %v5562_v51 }
0x1611   : > { %v5688_v25 = vpop.f32.mrf.mxu0 }
0x1612   : > { %v11324_v18 = vadd.f32 %v5688_v25, %v11321_v9 }
0x1614   : > { %v11327_v8 = vmul.f32 0.70710677, %v11324_v18 }
0x1616   : > { %v5741_v4 = vand.u32 2147483647, %v11327_v8 }
0x1617   : > { %v5659_v11 = vpop.f32.mrf.mxu3 }
0x1618   : > { %v5757_v36 = vmul.f32 0.3275911, %v5741_v4  ;;  %v11336_v24 = vadd.f32 %v5659_v11, %v11329_v6  ;;  %v6173_v0 = vsub.f32 0.0, %v5741_v4 }
0x1619   : > { %v5690_v19 = vpop.f32.mrf.mxu0 }
0x161a   : > { %v5773_v40 = vadd.f32 1.0, %v5757_v36  ;;  %v11339_v49 = vmul.f32 0.70710677, %v11336_v24  ;;  %v11342_v37 = vadd.f32 %v5690_v19, %v11321_v9  ;;  %v6189_v48 = vmul.f32 %v6173_v0, %v5741_v4  ;;  %v7709_v4 = vld [vmem:[%s11968_s12 + $0xd0] sm:$0xff] }
0x161b   : > { %6524 = vmatpush.bf16.msrb.mxu2 %v7709_v4 }
0x161c   : > { %8204 = vrcp.f32 %v5773_v40  ;;  %v11348_v5 = vand.u32 2147483647, %v11339_v49  ;;  %v11351_v44 = vmul.f32 0.70710677, %v11342_v37  ;;  %v5814_v52 = vand.u32 2147483648, %v5773_v40 }
0x161d   : > { %v5812_v32 = vand.u32 2147483647, %v5773_v40  ;;  %vm5808_vm5 = vweird.f32 %v5773_v40  ;;  %v6206_v36 = vmul.f32 1.442695, %v6189_v48 }
0x161e   : > { %v5756_v10 = vmul.f32 0.3275911, %v11348_v5  ;;  %v11361_v7 = vand.u32 2147483647, %v11351_v44  ;;  %v5815_v15 = vor.u32 1.1754944e-38, %v5814_v52  ;;  %v6172_v43 = vsub.f32 0.0, %v11348_v5 }
0x161f   : > { %v5661_v38 = vpop.f32.mrf.mxu3  ;;  %vm5813_vm7 = vcmp.eq.f32.partialorder %v5812_v32, 8.507059e+37  ;;  %6525 = vmatpush.bf16.msrb.mxu2 %v7708_v33 }
0x1620   : > { %v11364_v16 = vadd.f32 %v5661_v38, %v11329_v6  ;;  %v11366_v63 = vadd.f32 1.0, %v5756_v10  ;;  %v5759_v31 = vmul.f32 0.3275911, %v11361_v7  ;;  %v6188_v57 = vmul.f32 %v6172_v43, %v11348_v5 }
0x1621   : > { %v6175_v32 = vsub.f32 0.0, %v11361_v7 }
0x1622   : > { %v8205_v39 = vpop.eup %8204  ;;  %v11373_v54 = vmul.f32 0.70710677, %v11364_v16  ;;  %8206 = vrcp.f32 %v11366_v63  ;;  %v11379_v1 = vadd.f32 1.0, %v5759_v31  ;;  %v5799_v21 = vand.u32 2147483648, %v11366_v63 }
0x1623   : > { %v5804_v13 = vmul.f32 %v8205_v39, %v5773_v40  ;;  %vm5809_vm4 = vweird.f32 %v8205_v39  ;;  %v5797_v51 = vand.u32 2147483647, %v11366_v63  ;;  %vm5793_vm9 = vweird.f32 %v11366_v63 }
0x1624   : > { %v11382_v14 = vand.u32 2147483647, %v11373_v54  ;;  %8208 = vrcp.f32 %v11379_v1  ;;  %vm5810_vm6 = vmor %vm5808_vm5, %vm5809_vm4  ;;  %v5800_v34 = vor.u32 1.1754944e-38, %v5799_v21  ;;  %v5842_v10 = vand.u32 2147483647, %v11379_v1 }
0x1625   : > { %v5805_v58 = vsub.f32 1.0, %v5804_v13  ;;  %v5844_v38 = vand.u32 2147483648, %v11379_v1  ;;  %vm5798_vm13 = vcmp.eq.f32.partialorder %v5797_v51, 8.507059e+37  ;;  %vm5838_vm11 = vweird.f32 %v11379_v1 }
0x1626   : > { %v5758_v3 = vmul.f32 0.3275911, %v11382_v14  ;;  %vm5843_vm15 = vcmp.eq.f32.partialorder %v5842_v10, 8.507059e+37  ;;  %v6191_v43 = vmul.f32 %v6175_v32, %v11361_v7  ;;  %v7707_v10 = vld [vmem:[%s11968_s12 + $0xc0] sm:$0xff]  ;;  %vm6269_vm4 = vcmp.ge.f32.partialorder %v11327_v8, 0.0 }
0x1627   : > { %v5806_v59 = vmul.f32 %v8205_v39, %v5805_v58  ;;  %v5845_v0 = vor.u32 1.1754944e-38, %v5844_v38  ;;  %6526 = vmatpush.bf16.msrb.mxu2 %v7707_v10  ;;  %vm6271_vm5 = vcmp.ge.f32.partialorder %v11351_v44, 0.0  ;;  %v5708_v44 = vmul.f32 0.5, %v11336_v24 }
0x1628   : > { %v8207_v50 = vpop.eup %8206  ;;  %v11396_v55 = vadd.f32 1.0, %v5758_v3 }
0x1629   : > { %v5807_v17 = vadd.f32 %v8205_v39, %v5806_v59  ;;  %v5789_v45 = vmul.f32 %v8207_v50, %v11366_v63  ;;  %vm5794_vm8 = vweird.f32 %v8207_v50 }
0x162a   : > { %8210 = vrcp.f32 %v11396_v55  ;;  %v8209_v2 = vpop.eup %8208  ;;  %vm5795_vm12 = vmor %vm5793_vm9, %vm5794_vm8  ;;  %v5829_v12 = vand.u32 2147483648, %v11396_v55  ;;  %vm5823_vm1 = vweird.f32 %v11396_v55 }
0x162b   : > { %v5811_v22 = vsel %vm5810_vm6, %v8205_v39, %v5807_v17  ;;  %v5790_v28 = vsub.f32 1.0, %v5789_v45  ;;  %v5834_v25 = vmul.f32 %v8209_v2, %v11379_v1  ;;  %vm5839_vm10 = vweird.f32 %v8209_v2 }
0x162c   : > { %v11398_v23 = vsel %vm5813_vm7, %v5815_v15, %v5811_v22  ;;  %vm5840_vm14 = vmor %vm5838_vm11, %vm5839_vm10  ;;  %v5827_v17 = vand.u32 2147483647, %v11396_v55  ;;  %8212 = vpow2.f32 %v6206_v36  ;;  %vm6268_vm6 = vcmp.ge.f32.partialorder %v11339_v49, 0.0 }
0x162d   : > { %v6029_v56 = vmul.f32 1.0614054, %v11398_v23  ;;  %v5791_v29 = vmul.f32 %v8207_v50, %v5790_v28  ;;  %v5835_v40 = vsub.f32 1.0, %v5834_v25  ;;  %v5830_v25 = vor.u32 1.1754944e-38, %v5829_v12 }
0x162e   : > { %vm5828_vm3 = vcmp.eq.f32.partialorder %v5827_v17, 8.507059e+37  ;;  %vm6270_vm7 = vcmp.ge.f32.partialorder %v11373_v54, 0.0 }
0x162f   : > { %v6045_v11 = vadd.f32 -1.4531521, %v6029_v56  ;;  %v5792_v19 = vadd.f32 %v8207_v50, %v5791_v29  ;;  %v5836_v31 = vmul.f32 %v8209_v2, %v5835_v40  ;;  %v6204_v56 = vmul.f32 1.442695, %v6188_v57 }
0x1630   : > { %v8211_v26 = vpop.eup %8210 }
0x1631   : > { %v6061_v62 = vmul.f32 %v6045_v11, %v11398_v23  ;;  %v5796_v39 = vsel %vm5795_vm12, %v8207_v50, %v5792_v19  ;;  %v5819_v58 = vmul.f32 %v8211_v26, %v11396_v55  ;;  %v5837_v59 = vadd.f32 %v8209_v2, %v5836_v31  ;;  %v7700_v31 = vld [vmem:[%s11968_s12 + $0x88] sm:$0xff] }
0x1632   : > { %v11416_v13 = vsel %vm5798_vm13, %v5800_v34, %v5796_v39  ;;  %vm5824_vm0 = vweird.f32 %v8211_v26  ;;  %v6174_v55 = vsub.f32 0.0, %v11382_v14  ;;  %v8213_v38 = vpop.eup %8212  ;;  %8214 = vpow2.f32 %v6204_v56 }
0x1633   : > { %v6077_v63 = vadd.f32 1.4214138, %v6061_v62  ;;  %v6028_v52 = vmul.f32 1.0614054, %v11416_v13  ;;  %v5820_v5 = vsub.f32 1.0, %v5819_v58  ;;  %v5841_v50 = vsel %vm5840_vm14, %v8209_v2, %v5837_v59  ;;  %v7701_v2 = vld [vmem:[%s11968_s12 + $0x90] sm:$0xff]  ;;  %vm5825_vm2 = vmor %vm5823_vm1, %vm5824_vm0 }
0x1634   : > { %v11429_v45 = vsel %vm5843_vm15, %v5845_v0, %v5841_v50  ;;  %6495 = vmatpush.bf16.msrb.mxu1 %v7701_v2  ;;  %v6190_v58 = vmul.f32 %v6174_v55, %v11382_v14 }
0x1635   : > { %v6093_v30 = vmul.f32 %v6077_v63, %v11398_v23  ;;  %v6044_v3 = vadd.f32 -1.4531521, %v6028_v52  ;;  %v5821_v22 = vmul.f32 %v8211_v26, %v5820_v5  ;;  %v6031_v48 = vmul.f32 1.0614054, %v11429_v45 }
0x1636   : > { %v6208_v12 = vmul.f32 1.442695, %v6190_v58 }
0x1637   : > { %v6109_v15 = vadd.f32 -0.28449672, %v6093_v30  ;;  %v6060_v1 = vmul.f32 %v6044_v3, %v11416_v13  ;;  %v5822_v21 = vadd.f32 %v8211_v26, %v5821_v22  ;;  %v6047_v51 = vadd.f32 -1.4531521, %v6031_v48 }
0x1638   : > { %6496 = vmatpush.bf16.msrb.mxu1 %v7700_v31  ;;  %v8215_v14 = vpop.eup %8214 }
0x1639   : > { %v6125_v28 = vmul.f32 %v6109_v15, %v11398_v23  ;;  %v6076_v29 = vadd.f32 1.4214138, %v6060_v1  ;;  %v5826_v4 = vsel %vm5825_vm2, %v8211_v26, %v5822_v21  ;;  %v6063_v19 = vmul.f32 %v6047_v51, %v11429_v45 }
0x163a   : > { %v5831_v40 = vsel %vm5828_vm3, %v5830_v25, %v5826_v4  ;;  %v6210_v26 = vmul.f32 1.442695, %v6191_v43 }
0x163b   : > { %v6141_v11 = vadd.f32 0.2548296, %v6125_v28  ;;  %v6092_v36 = vmul.f32 %v6076_v29, %v11416_v13  ;;  %v6030_v34 = vmul.f32 1.0614054, %v5831_v40  ;;  %v6079_v7 = vadd.f32 1.4214138, %v6063_v19 }
0x163c   : > { %8216 = vpow2.f32 %v6210_v26 }
0x163d   : > { %v6157_v62 = vmul.f32 %v6141_v11, %v11398_v23  ;;  %v6108_v46 = vadd.f32 -0.28449672, %v6092_v36  ;;  %v6046_v39 = vadd.f32 -1.4531521, %v6030_v34  ;;  %v6095_v23 = vmul.f32 %v6079_v7, %v11429_v45 }
0x163e   : > { %8218 = vpow2.f32 %v6208_v12 }
0x163f   : > { %v6237_v63 = vmul.f32 %v8213_v38, %v6157_v62  ;;  %v6124_v57 = vmul.f32 %v6108_v46, %v11416_v13  ;;  %v6062_v52 = vmul.f32 %v6046_v39, %v5831_v40  ;;  %v6111_v30 = vadd.f32 -0.28449672, %v6095_v23 }
0x1640   : > { %v5693_v33 = vpop.f32.mrf.mxu0  ;;  %v5709_v39 = vmul.f32 0.5, %v11324_v18  ;;  %v5711_v23 = vmul.f32 0.5, %v11342_v37 }
0x1641   : > { %v11453_v59 = vadd.f32 %v5693_v33, %v11321_v9  ;;  %v6140_v32 = vadd.f32 0.2548296, %v6124_v57  ;;  %v6078_v0 = vadd.f32 1.4214138, %v6062_v52  ;;  %v6253_v3 = vsub.f32 1.0, %v6237_v63 }
0x1642   : > { %v6127_v17 = vmul.f32 %v6111_v30, %v11429_v45  ;;  %v8217_v25 = vpop.eup %8216 }
0x1643   : > { %v11456_v5 = vmul.f32 0.70710677, %v11453_v59  ;;  %v6156_v50 = vmul.f32 %v6140_v32, %v11416_v13  ;;  %v6094_v15 = vmul.f32 %v6078_v0, %v5831_v40  ;;  %v7699_v13 = vld [vmem:[%s11968_s12 + $0x80] sm:$0xff]  ;;  %v6285_v29 = vsub.f32 0.0, %v6253_v3 }
0x1644   : > { %v6143_v48 = vadd.f32 0.2548296, %v6127_v17  ;;  %6497 = vmatpush.bf16.msrb.mxu1 %v7699_v13  ;;  %v8219_v26 = vpop.eup %8218 }
0x1645   : > { %v11461_v22 = vand.u32 2147483647, %v11456_v5  ;;  %v6236_v1 = vmul.f32 %v8215_v14, %v6156_v50  ;;  %v6110_v56 = vadd.f32 -0.28449672, %v6094_v15  ;;  %v6301_v34 = vsel %vm6269_vm4, %v6253_v3, %v6285_v29 }
0x1646   : > { %v5664_v28 = vpop.f32.mrf.mxu3  ;;  %v6159_v51 = vmul.f32 %v6143_v48, %v11429_v45  ;;  %v6317_v63 = vadd.f32 1.0, %v6301_v34  ;;  %v5710_v3 = vmul.f32 0.5, %v11364_v16 }
0x1647   : > { %v5761_v21 = vmul.f32 0.3275911, %v11461_v22  ;;  %v11465_v2 = vadd.f32 %v5664_v28, %v11329_v6  ;;  %v6252_v11 = vsub.f32 1.0, %v6236_v1  ;;  %v6126_v43 = vmul.f32 %v6110_v56, %v5831_v40 }
0x1648   : > { %v5695_v36 = vpop.f32.mrf.mxu0  ;;  %v6239_v19 = vmul.f32 %v8217_v25, %v6159_v51  ;;  %v6333_v37 = vmul.f32 %v6317_v63, %v5709_v39 }
0x1649   : > { %v11471_v4 = vadd.f32 1.0, %v5761_v21  ;;  %v11474_v55 = vmul.f32 0.70710677, %v11465_v2  ;;  %v6142_v62 = vadd.f32 0.2548296, %v6126_v43  ;;  %v11479_v45 = vadd.f32 %v5695_v36, %v11321_v9 }
0x164a   : > { %v6255_v10 = vsub.f32 1.0, %v6239_v19  ;;  %v6284_v38 = vsub.f32 0.0, %v6252_v11 }
0x164b   : > { %8220 = vrcp.f32 %v11471_v4  ;;  %v6158_v46 = vmul.f32 %v6142_v62, %v5831_v40  ;;  %v11482_v7 = vand.u32 2147483647, %v11474_v55  ;;  %v11490_v40 = vmul.f32 0.70710677, %v11479_v45 }
0x164c   : > { %v6287_v31 = vsub.f32 0.0, %v6255_v10  ;;  %v6300_v52 = vsel %vm6268_vm6, %v6252_v11, %v6284_v38  ;;  %v5874_v16 = vand.u32 2147483648, %v11471_v4  ;;  %v5872_v13 = vand.u32 2147483647, %v11471_v4 }
0x164d   : > { %v6238_v8 = vmul.f32 %v8219_v26, %v6158_v46  ;;  %v5760_v57 = vmul.f32 0.3275911, %v11482_v7  ;;  %v11498_v49 = vand.u32 2147483647, %v11490_v40  ;;  %v6316_v14 = vadd.f32 1.0, %v6300_v52 }
0x164e   : > { %v6303_v58 = vsel %vm6271_vm5, %v6255_v10, %v6287_v31  ;;  %v5666_v0 = vpop.f32.mrf.mxu3  ;;  %vm5868_vm9 = vweird.f32 %v11471_v4  ;;  %v5875_v19 = vor.u32 1.1754944e-38, %v5874_v16  ;;  %vm5873_vm13 = vcmp.eq.f32.partialorder %v5872_v13, 8.507059e+37 }
0x164f   : > { %v6319_v32 = vadd.f32 1.0, %v6303_v58  ;;  %v6254_v30 = vsub.f32 1.0, %v6238_v8  ;;  %v11492_v18 = vadd.f32 1.0, %v5760_v57  ;;  %v11503_v1 = vadd.f32 %v5666_v0, %v11329_v6 }
0x1650   : > { %v5763_v28 = vmul.f32 0.3275911, %v11498_v49  ;;  %v5698_v29 = vpop.f32.mrf.mxu0  ;;  %v6332_v54 = vmul.f32 %v6316_v14, %v5708_v44  ;;  %v6177_v46 = vsub.f32 0.0, %v11461_v22  ;;  %v6176_v26 = vsub.f32 0.0, %v11482_v7 }
0x1651   : > { %v8221_v33 = vpop.eup %8220  ;;  %v6335_v17 = vmul.f32 %v6319_v32, %v5711_v23  ;;  %v6286_v12 = vsub.f32 0.0, %v6254_v30  ;;  %8222 = vrcp.f32 %v11492_v18  ;;  %v11512_v43 = vmul.f32 0.70710677, %v11503_v1 }
0x1652   : > { %v5864_v50 = vmul.f32 %v8221_v33, %v11471_v4  ;;  %vm5869_vm8 = vweird.f32 %v8221_v33  ;;  %v11509_v51 = vadd.f32 1.0, %v5763_v28  ;;  %v11516_v62 = vadd.f32 %v5698_v29, %v11321_v9 }
0x1653   : > { %v6382_v24 = vpack.c.bf16 %v6335_v17, %v6333_v37  ;;  %v6302_v48 = vsel %vm6270_vm7, %v6254_v30, %v6286_v12  ;;  %vm5870_vm12 = vmor %vm5868_vm9, %vm5869_vm8  ;;  %v11525_v63 = vand.u32 2147483647, %v11512_v43  ;;  %v5857_v57 = vand.u32 2147483647, %v11492_v18 }
0x1654   : > { %v5865_v15 = vsub.f32 1.0, %v5864_v50  ;;  %v6318_v56 = vadd.f32 1.0, %v6302_v48  ;;  %8224 = vrcp.f32 %v11509_v51  ;;  %v5859_v23 = vand.u32 2147483648, %v11492_v18 }
0x1655   : > { %6527 = vmatmul.bf16.vlgmr.msrb.gmra.mxu2 %v6382_v24  ;;  %v11530_v58 = vmul.f32 0.70710677, %v11516_v62  ;;  %v5762_v32 = vmul.f32 0.3275911, %v11525_v63  ;;  %v6193_v0 = vmul.f32 %v6177_v46, %v11461_v22  ;;  %v6192_v44 = vmul.f32 %v6176_v26, %v11482_v7 }
0x1656   : > { %v5866_v21 = vmul.f32 %v8221_v33, %v5865_v15  ;;  %v6334_v25 = vmul.f32 %v6318_v56, %v5710_v3  ;;  %v5669_v8 = vpop.f32.mrf.mxu3  ;;  %vm5853_vm11 = vweird.f32 %v11492_v18  ;;  %vm5858_vm15 = vcmp.eq.f32.partialorder %v5857_v57, 8.507059e+37 }
0x1657   : > { %v8223_v36 = vpop.eup %8222  ;;  %v11536_v3 = vand.u32 2147483647, %v11530_v58  ;;  %v11539_v50 = vadd.f32 %v5669_v8, %v11329_v6  ;;  %v5860_v14 = vor.u32 1.1754944e-38, %v5859_v23  ;;  %v11544_v15 = vadd.f32 1.0, %v5762_v32 }
0x1658   : > { %v5867_v11 = vadd.f32 %v8221_v33, %v5866_v21  ;;  %v6381_v34 = vpack.c.bf16 %v6334_v25, %v6332_v54  ;;  %v5849_v4 = vmul.f32 %v8223_v36, %v11492_v18  ;;  %vm5854_vm10 = vweird.f32 %v8223_v36 }
0x1659   : > { %vm5855_vm14 = vmor %vm5853_vm11, %vm5854_vm10  ;;  %v5765_v22 = vmul.f32 0.3275911, %v11536_v3  ;;  %v5902_v16 = vand.u32 2147483647, %v11509_v51  ;;  %v5904_v56 = vand.u32 2147483648, %v11509_v51  ;;  %8226 = vrcp.f32 %v11544_v15 }
0x165a   : > { %v5871_v10 = vsel %vm5870_vm12, %v8221_v33, %v5867_v11  ;;  %v5850_v31 = vsub.f32 1.0, %v5849_v4  ;;  %6498 = vmatmul.bf16.vlgmr.msrb.gmra.mxu1 %v6381_v34  ;;  %v8225_v30 = vpop.eup %8224  ;;  %v11553_v18 = vmul.f32 0.70710677, %v11539_v50  ;;  %v6214_v54 = vmul.f32 1.442695, %v6193_v0 }
0x165b   : > { %v11519_v38 = vsel %vm5873_vm13, %v5875_v19, %v5871_v10  ;;  %v5894_v12 = vmul.f32 %v8225_v30, %v11509_v51  ;;  %vm5899_vm0 = vweird.f32 %v8225_v30  ;;  %v6212_v25 = vmul.f32 1.442695, %v6192_v44 }
0x165c   : > { %v6033_v39 = vmul.f32 1.0614054, %v11519_v38  ;;  %v5851_v52 = vmul.f32 %v8223_v36, %v5850_v31  ;;  %v6179_v11 = vsub.f32 0.0, %v11498_v49  ;;  %vm5898_vm1 = vweird.f32 %v11509_v51 }
0x165d   : > { %v5895_v48 = vsub.f32 1.0, %v5894_v12  ;;  %vm5900_vm2 = vmor %vm5898_vm1, %vm5899_vm0  ;;  %vm5903_vm3 = vcmp.eq.f32.partialorder %v5902_v16, 8.507059e+37  ;;  %v5905_v4 = vor.u32 1.1754944e-38, %v5904_v56  ;;  %v6178_v46 = vsub.f32 0.0, %v11525_v63 }
0x165e   : > { %v6049_v33 = vadd.f32 -1.4531521, %v6033_v39  ;;  %v5852_v17 = vadd.f32 %v8223_v36, %v5851_v52  ;;  %v11563_v26 = vand.u32 2147483647, %v11553_v18  ;;  %v6195_v51 = vmul.f32 %v6179_v11, %v11498_v49 }
0x165f   : > { %v5896_v29 = vmul.f32 %v8225_v30, %v5895_v48  ;;  %v8227_v57 = vpop.eup %8226  ;;  %v5887_v44 = vand.u32 2147483647, %v11544_v15  ;;  %vm5883_vm4 = vweird.f32 %v11544_v15  ;;  %v5889_v49 = vand.u32 2147483648, %v11544_v15 }
0x1660   : > { %v6065_v37 = vmul.f32 %v6049_v33, %v11519_v38  ;;  %v5856_v24 = vsel %vm5855_vm14, %v8223_v36, %v5852_v17  ;;  %v11558_v36 = vadd.f32 1.0, %v5765_v22  ;;  %v5879_v32 = vmul.f32 %v8227_v57, %v11544_v15 }
0x1661   : > { %v11548_v28 = vsel %vm5858_vm15, %v5860_v14, %v5856_v24  ;;  %v5897_v10 = vadd.f32 %v8225_v30, %v5896_v29  ;;  %v6194_v14 = vmul.f32 %v6178_v46, %v11525_v63  ;;  %v6218_v22 = vmul.f32 1.442695, %v6195_v51  ;;  %v5700_v29 = vpop.f32.mrf.mxu0 }
0x1662   : > { %v6081_v7 = vadd.f32 1.4214138, %v6065_v37  ;;  %v6032_v13 = vmul.f32 1.0614054, %v11548_v28  ;;  %8228 = vrcp.f32 %v11558_v36  ;;  %v5764_v37 = vmul.f32 0.3275911, %v11563_v26 }
0x1663   : > { %v5901_v8 = vsel %vm5900_vm2, %v8225_v30, %v5897_v10  ;;  %8230 = vpow2.f32 %v6214_v54  ;;  %v5880_v12 = vsub.f32 1.0, %v5879_v32  ;;  %vm5884_vm5 = vweird.f32 %v8227_v57 }
0x1664   : > { %v6097_v21 = vmul.f32 %v6081_v7, %v11519_v38  ;;  %v6048_v34 = vadd.f32 -1.4531521, %v6032_v13  ;;  %v11568_v23 = vsel %vm5903_vm3, %v5905_v4, %v5901_v8  ;;  %8232 = vpow2.f32 %v6212_v25  ;;  %vm5885_vm7 = vmor %vm5883_vm4, %vm5884_vm5 }
0x1665   : > { %v6035_v52 = vmul.f32 1.0614054, %v11568_v23  ;;  %v11579_v7 = vadd.f32 1.0, %v5764_v37  ;;  %v5881_v56 = vmul.f32 %v8227_v57, %v5880_v12  ;;  %vm11583_vm6 = vcmp.eq.f32.partialorder %v5887_v44, 8.507059e+37 }
0x1666   : > { %v6113_v19 = vadd.f32 -0.28449672, %v6097_v21  ;;  %v6064_v31 = vmul.f32 %v6048_v34, %v11548_v28  ;;  %v6216_v34 = vmul.f32 1.442695, %v6194_v14  ;;  %v5932_v46 = vand.u32 2147483647, %v11558_v36 }
0x1667   : > { %v6051_v17 = vadd.f32 -1.4531521, %v6035_v52  ;;  %8234 = vrcp.f32 %v11579_v7  ;;  %vm5928_vm9 = vweird.f32 %v11558_v36  ;;  %vm5913_vm11 = vweird.f32 %v11579_v7 }
0x1668   : > { %v6129_v39 = vmul.f32 %v6113_v19, %v11519_v38  ;;  %v6080_v33 = vadd.f32 1.4214138, %v6064_v31  ;;  %v8229_v24 = vpop.eup %8228  ;;  %v5882_v19 = vadd.f32 %v8227_v57, %v5881_v56  ;;  %8236 = vpow2.f32 %v6218_v22  ;;  %v5671_v56 = vpop.f32.mrf.mxu3 }
0x1669   : > { %v6067_v16 = vmul.f32 %v6051_v17, %v11568_v23  ;;  %v5924_v63 = vmul.f32 %v8229_v24, %v11558_v36  ;;  %v8231_v54 = vpop.eup %8230  ;;  %vm5929_vm8 = vweird.f32 %v8229_v24  ;;  %8238 = vpow2.f32 %v6216_v34 }
0x166a   : > { %v6145_v0 = vadd.f32 0.2548296, %v6129_v39  ;;  %v6096_v30 = vmul.f32 %v6080_v33, %v11548_v28  ;;  %v8233_v10 = vpop.eup %8232  ;;  %v5934_v39 = vand.u32 2147483648, %v11558_v36  ;;  %v5886_v51 = vsel %vm5885_vm7, %v8227_v57, %v5882_v19  ;;  %vm5930_vm12 = vmor %vm5928_vm9, %vm5929_vm8 }
0x166b   : > { %v6083_v11 = vadd.f32 1.4214138, %v6067_v16  ;;  %v5925_v4 = vsub.f32 1.0, %v5924_v63  ;;  %v11596_v33 = vadd.f32 %v5700_v29, %v11321_v9  ;;  %vm5933_vm13 = vcmp.eq.f32.partialorder %v5932_v46, 8.507059e+37 }
0x166c   : > { %v6112_v48 = vadd.f32 -0.28449672, %v6096_v30  ;;  %v6161_v21 = vmul.f32 %v6145_v0, %v11519_v38  ;;  %v5890_v38 = vor.u32 1.1754944e-38, %v5889_v49  ;;  %v5935_v14 = vor.u32 1.1754944e-38, %v5934_v39 }
0x166d   : > { %v6099_v8 = vmul.f32 %v6083_v11, %v11568_v23  ;;  %v5926_v15 = vmul.f32 %v8229_v24, %v5925_v4  ;;  %v8235_v37 = vpop.eup %8234  ;;  %v11611_v22 = vmul.f32 0.70710677, %v11596_v33  ;;  %v5917_v36 = vand.u32 2147483647, %v11579_v7 }
0x166e   : > { %v6128_v25 = vmul.f32 %v6112_v48, %v11548_v28  ;;  %v11598_v52 = vmul.f32 %v8231_v54, %v6161_v21  ;;  %v11602_v32 = vsel %vm11583_vm6, %v5890_v38, %v5886_v51  ;;  %v5909_v49 = vmul.f32 %v8235_v37, %v11579_v7 }
0x166f   : > { %v6115_v0 = vadd.f32 -0.28449672, %v6099_v8  ;;  %v6034_v44 = vmul.f32 1.0614054, %v11602_v32  ;;  %v5927_v57 = vadd.f32 %v8229_v24, %v5926_v15  ;;  %v5919_v34 = vand.u32 2147483648, %v11579_v7 }
0x1670   : > { %v6144_v31 = vadd.f32 0.2548296, %v6128_v25  ;;  %v6257_v48 = vsub.f32 1.0, %v11598_v52  ;;  %v5910_v54 = vsub.f32 1.0, %v5909_v49  ;;  %v11619_v25 = vand.u32 2147483647, %v11611_v22 }
0x1671   : > { %v6131_v17 = vmul.f32 %v6115_v0, %v11568_v23  ;;  %v6050_v12 = vadd.f32 -1.4531521, %v6034_v44  ;;  %v5931_v16 = vsel %vm5930_vm12, %v8229_v24, %v5927_v57  ;;  %v8237_v24 = vpop.eup %8236  ;;  %v11624_v38 = vadd.f32 %v5671_v56, %v11329_v6 }
0x1672   : > { %v6160_v30 = vmul.f32 %v6144_v31, %v11548_v28  ;;  %v11614_v13 = vsel %vm5933_vm13, %v5935_v14, %v5931_v16  ;;  %v8239_v4 = vpop.eup %8238  ;;  %v5911_v39 = vmul.f32 %v8235_v37, %v5910_v54  ;;  %vm5914_vm10 = vweird.f32 %v8235_v37 }
0x1673   : > { %v6147_v28 = vadd.f32 0.2548296, %v6131_v17  ;;  %v6066_v21 = vmul.f32 %v6050_v12, %v11602_v32  ;;  %v6037_v29 = vmul.f32 1.0614054, %v11614_v13  ;;  %v6289_v31 = vsub.f32 0.0, %v6257_v48  ;;  %vm5915_vm14 = vmor %vm5913_vm11, %vm5914_vm10 }
0x1674   : > { %v6240_v63 = vmul.f32 %v8233_v10, %v6160_v30  ;;  %v5767_v10 = vmul.f32 0.3275911, %v11619_v25  ;;  %v5912_v15 = vadd.f32 %v8235_v37, %v5911_v39  ;;  %v5920_v57 = vor.u32 1.1754944e-38, %v5919_v34 }
0x1675   : > { %v6163_v11 = vmul.f32 %v6147_v28, %v11568_v23  ;;  %v6082_v19 = vadd.f32 1.4214138, %v6066_v21  ;;  %v6053_v46 = vadd.f32 -1.4531521, %v6037_v29  ;;  %v11633_v17 = vmul.f32 0.70710677, %v11624_v38 }
0x1676   : > { %v6256_v52 = vsub.f32 1.0, %v6240_v63  ;;  %v11630_v0 = vadd.f32 1.0, %v5767_v10  ;;  %v5916_v14 = vsel %vm5915_vm14, %v8235_v37, %v5912_v15  ;;  %vm5918_vm15 = vcmp.eq.f32.partialorder %v5917_v36, 8.507059e+37 }
0x1677   : > { %v6243_v8 = vmul.f32 %v8237_v24, %v6163_v11  ;;  %v6098_v51 = vmul.f32 %v6082_v19, %v11602_v32  ;;  %v6069_v23 = vmul.f32 %v6053_v46, %v11614_v13  ;;  %vm6273_vm0 = vcmp.ge.f32.partialorder %v11456_v5, 0.0 }
0x1678   : > { %8240 = vrcp.f32 %v11630_v0  ;;  %v11638_v16 = vsel %vm5918_vm15, %v5920_v57, %v5916_v14  ;;  %v6305_v56 = vsel %vm6273_vm0, %v6257_v48, %v6289_v31  ;;  %v6288_v28 = vsub.f32 0.0, %v6256_v52 }
0x1679   : > { %v6259_v44 = vsub.f32 1.0, %v6243_v8  ;;  %v6114_v30 = vadd.f32 -0.28449672, %v6098_v51  ;;  %v6085_v12 = vadd.f32 1.4214138, %v6069_v23  ;;  %vm6275_vm1 = vcmp.ge.f32.partialorder %v11490_v40, 0.0 }
0x167a   : > { %v6036_v21 = vmul.f32 1.0614054, %v11638_v16  ;;  %vm6272_vm2 = vcmp.ge.f32.partialorder %v11474_v55, 0.0  ;;  %v11644_v36 = vand.u32 2147483647, %v11633_v17  ;;  %v6181_v54 = vsub.f32 0.0, %v11536_v3 }
0x167b   : > { %v6291_v7 = vsub.f32 0.0, %v6259_v44  ;;  %v6130_v49 = vmul.f32 %v6114_v30, %v11602_v32  ;;  %v6101_v5 = vmul.f32 %v6085_v12, %v11614_v13  ;;  %v6321_v11 = vadd.f32 1.0, %v6305_v56 }
0x167c   : > { %v6052_v24 = vadd.f32 -1.4531521, %v6036_v21  ;;  %v5715_v48 = vmul.f32 0.5, %v11479_v45  ;;  %v5766_v19 = vmul.f32 0.3275911, %v11644_v36  ;;  %v5713_v55 = vmul.f32 0.5, %v11453_v59 }
0x167d   : > { %v6307_v63 = vsel %vm6275_vm1, %v6259_v44, %v6291_v7  ;;  %v6146_v37 = vadd.f32 0.2548296, %v6130_v49  ;;  %v6304_v46 = vsel %vm6272_vm2, %v6256_v52, %v6288_v28  ;;  %v6117_v23 = vadd.f32 -0.28449672, %v6101_v5 }
0x167e   : > { %v6323_v29 = vadd.f32 1.0, %v6307_v63  ;;  %v8241_v34 = vpop.eup %8240  ;;  %v6068_v39 = vmul.f32 %v6052_v24, %v11638_v16  ;;  %v11654_v51 = vadd.f32 1.0, %v5766_v19  ;;  %v6197_v15 = vmul.f32 %v6181_v54, %v11536_v3 }
0x167f   : > { %v6162_v40 = vmul.f32 %v6146_v37, %v11602_v32  ;;  %v5954_v8 = vmul.f32 %v8241_v34, %v11630_v0  ;;  %v6337_v44 = vmul.f32 %v6321_v11, %v5713_v55  ;;  %v6320_v57 = vadd.f32 1.0, %v6304_v46 }
0x1680   : > { %v6339_v10 = vmul.f32 %v6323_v29, %v5715_v48  ;;  %v6084_v45 = vadd.f32 1.4214138, %v6068_v39  ;;  %8242 = vrcp.f32 %v11654_v51  ;;  %v6180_v59 = vsub.f32 0.0, %v11563_v26 }
0x1681   : > { %v6242_v31 = vmul.f32 %v8239_v4, %v6162_v40  ;;  %v5955_v30 = vsub.f32 1.0, %v5954_v8  ;;  %v5962_v52 = vand.u32 2147483647, %v11630_v0  ;;  %v5964_v4 = vand.u32 2147483648, %v11630_v0 }
0x1682   : > { %vm5959_vm3 = vweird.f32 %v8241_v34  ;;  %v6384_v7 = vpack.c.bf16 %v6339_v10, %v6337_v44  ;;  %v5712_v49 = vmul.f32 0.5, %v11465_v2  ;;  %vm6274_vm4 = vcmp.ge.f32.partialorder %v11512_v43, 0.0 }
0x1683   : > { %v6258_v32 = vsub.f32 1.0, %v6242_v31  ;;  %v5956_v14 = vmul.f32 %v8241_v34, %v5955_v30  ;;  %v6133_v3 = vmul.f32 %v6117_v23, %v11614_v13  ;;  %v6100_v56 = vmul.f32 %v6084_v45, %v11638_v16 }
0x1684   : > { %v6222_v21 = vmul.f32 1.442695, %v6197_v15  ;;  %vm5958_vm5 = vweird.f32 %v11630_v0  ;;  %6532 = vmatmul.bf16.gmra.mxu2 %v6384_v7  ;;  %v5714_v37 = vmul.f32 0.5, %v11503_v1  ;;  %v5965_v5 = vor.u32 1.1754944e-38, %v5964_v4 }
0x1685   : > { %v6290_v12 = vsub.f32 0.0, %v6258_v32  ;;  %v5957_v63 = vadd.f32 %v8241_v34, %v5956_v14  ;;  %vm5960_vm6 = vmor %vm5958_vm5, %vm5959_vm3  ;;  %v6183_v54 = vsub.f32 0.0, %v11619_v25  ;;  %v6336_v24 = vmul.f32 %v6320_v57, %v5712_v49 }
0x1686   : > { %v8243_v2 = vpop.eup %8242  ;;  %v6196_v43 = vmul.f32 %v6180_v59, %v11563_v26  ;;  %vm5963_vm7 = vcmp.eq.f32.partialorder %v5962_v52, 8.507059e+37  ;;  %v6149_v40 = vadd.f32 0.2548296, %v6133_v3  ;;  %v6116_v19 = vadd.f32 -0.28449672, %v6100_v56 }
0x1687   : > { %v6306_v28 = vsel %vm6274_vm4, %v6258_v32, %v6290_v12  ;;  %v5961_v11 = vsel %vm5960_vm6, %v8241_v34, %v5957_v63  ;;  %8244 = vpow2.f32 %v6222_v21  ;;  %v5939_v46 = vmul.f32 %v8243_v2, %v11654_v51 }
0x1688   : > { %v6322_v29 = vadd.f32 1.0, %v6306_v28  ;;  %v11669_v55 = vsel %vm5963_vm7, %v5965_v5, %v5961_v11  ;;  %v6199_v10 = vmul.f32 %v6183_v54, %v11619_v25  ;;  %v6220_v26 = vmul.f32 1.442695, %v6196_v43 }
0x1689   : > { %v6039_v1 = vmul.f32 1.0614054, %v11669_v55  ;;  %v5940_v8 = vsub.f32 1.0, %v5939_v46  ;;  %v6165_v23 = vmul.f32 %v6149_v40, %v11614_v13  ;;  %v6132_v15 = vmul.f32 %v6116_v19, %v11638_v16 }
0x168a   : > { %v6338_v48 = vmul.f32 %v6322_v29, %v5714_v37  ;;  %v5949_v45 = vand.u32 2147483648, %v11654_v51  ;;  %vm5944_vm8 = vweird.f32 %v8243_v2  ;;  %v5947_v25 = vand.u32 2147483647, %v11654_v51 }
0x168b   : > { %v5703_v0 = vpop.f32.mrf.mxu0  ;;  %v6055_v34 = vadd.f32 -1.4531521, %v6039_v1  ;;  %v5941_v30 = vmul.f32 %v8243_v2, %v5940_v8  ;;  %v6226_v57 = vmul.f32 1.442695, %v6199_v10  ;;  %vm5943_vm9 = vweird.f32 %v11654_v51 }
0x168c   : > { %v11674_v39 = vadd.f32 %v5703_v0, %v11321_v9  ;;  %v6383_v31 = vpack.c.bf16 %v6338_v48, %v6336_v24  ;;  %v6148_v49 = vadd.f32 0.2548296, %v6132_v15  ;;  %vm5945_vm12 = vmor %vm5943_vm9, %vm5944_vm8  ;;  %v5950_v3 = vor.u32 1.1754944e-38, %v5949_v45 }
0x168d   : > { %v6071_v32 = vmul.f32 %v6055_v34, %v11669_v55  ;;  %v8245_v13 = vpop.eup %8244  ;;  %v5942_v12 = vadd.f32 %v8243_v2, %v5941_v30  ;;  %8246 = vpow2.f32 %v6220_v26  ;;  %vm5948_vm13 = vcmp.eq.f32.partialorder %v5947_v25, 8.507059e+37 }
0x168e   : > { %6503 = vmatmul.bf16.gmra.mxu1 %v6383_v31  ;;  %v11681_v44 = vmul.f32 0.70710677, %v11674_v39  ;;  %v6245_v7 = vmul.f32 %v8245_v13, %v6165_v23  ;;  %v6182_v37 = vsub.f32 0.0, %v11644_v36  ;;  %8248 = vpow2.f32 %v6226_v57 }
0x168f   : > { %v6087_v4 = vadd.f32 1.4214138, %v6071_v32  ;;  %v5946_v21 = vsel %vm5945_vm12, %v8243_v2, %v5942_v12  ;;  %v6164_v11 = vmul.f32 %v6148_v49, %v11638_v16  ;;  %v5717_v46 = vmul.f32 0.5, %v11516_v62 }
0x1690   : > { %v11686_v59 = vand.u32 2147483647, %v11681_v44  ;;  %v11694_v63 = vsel %vm5948_vm13, %v5950_v3, %v5946_v21  ;;  %v6261_v43 = vsub.f32 1.0, %v6245_v7  ;;  %v6198_v40 = vmul.f32 %v6182_v37, %v11644_v36 }
0x1691   : > { %v5674_v52 = vpop.f32.mrf.mxu3  ;;  %v6103_v28 = vmul.f32 %v6087_v4, %v11669_v55  ;;  %v6038_v54 = vmul.f32 1.0614054, %v11694_v63  ;;  %vm6277_vm10 = vcmp.ge.f32.partialorder %v11530_v58, 0.0  ;;  %vm6276_vm11 = vcmp.ge.f32.partialorder %v11553_v18, 0.0 }
0x1692   : > { %v11690_v14 = vadd.f32 %v5674_v52, %v11329_v6  ;;  %v5769_v56 = vmul.f32 0.3275911, %v11686_v59  ;;  %v6293_v26 = vsub.f32 0.0, %v6261_v43  ;;  %v6224_v32 = vmul.f32 1.442695, %v6198_v40 }
0x1693   : > { %v6119_v5 = vadd.f32 -0.28449672, %v6103_v28  ;;  %v5705_v24 = vpop.f32.mrf.mxu0  ;;  %v6054_v48 = vadd.f32 -1.4531521, %v6038_v54  ;;  %v8247_v1 = vpop.eup %8246  ;;  %v5719_v52 = vmul.f32 0.5, %v11596_v33  ;;  %vm6279_vm14 = vcmp.ge.f32.partialorder %v11611_v22, 0.0 }
0x1694   : > { %v11697_v29 = vadd.f32 1.0, %v5769_v56  ;;  %v11700_v51 = vmul.f32 0.70710677, %v11690_v14  ;;  %v11711_v0 = vadd.f32 %v5705_v24, %v11321_v9  ;;  %v6244_v34 = vmul.f32 %v8247_v1, %v6164_v11  ;;  %v8249_v36 = vpop.eup %8248 }
0x1695   : > { %v6135_v2 = vmul.f32 %v6119_v5, %v11669_v55  ;;  %v6070_v31 = vmul.f32 %v6054_v48, %v11694_v63  ;;  %v11721_v9 = vmul.f32 0.5, %v11539_v50  ;;  %v6309_v4 = vsel %vm6277_vm10, %v6261_v43, %v6293_v26 }
0x1696   : > { %8250 = vrcp.f32 %v11697_v29  ;;  %v11708_v19 = vand.u32 2147483647, %v11700_v51  ;;  %v11717_v23 = vmul.f32 0.70710677, %v11711_v0  ;;  %v5994_v33 = vand.u32 2147483648, %v11697_v29 }
0x1697   : > { %v6151_v10 = vadd.f32 0.2548296, %v6135_v2  ;;  %v6086_v62 = vadd.f32 1.4214138, %v6070_v31  ;;  %v6325_v5 = vadd.f32 1.0, %v6309_v4  ;;  %v5718_v24 = vmul.f32 0.5, %v11624_v38 }
0x1698   : > { %v5768_v8 = vmul.f32 0.3275911, %v11708_v19  ;;  %v11727_v25 = vand.u32 2147483647, %v11717_v23  ;;  %vm5988_vm0 = vweird.f32 %v11697_v29  ;;  %vm6278_vm4 = vcmp.ge.f32.partialorder %v11633_v17, 0.0 }
0x1699   : > { %v5676_v16 = vpop.f32.mrf.mxu3  ;;  %v6167_v15 = vmul.f32 %v6151_v10, %v11669_v55  ;;  %v6102_v58 = vmul.f32 %v6086_v62, %v11694_v63  ;;  %v6260_v55 = vsub.f32 1.0, %v6244_v34  ;;  %v5995_v10 = vor.u32 1.1754944e-38, %v5994_v33 }
0x169a   : > { %v11724_v30 = vadd.f32 1.0, %v5768_v8  ;;  %v11730_v57 = vadd.f32 %v5676_v16, %v11329_v6  ;;  %v5992_v6 = vand.u32 2147483647, %v11697_v29  ;;  %v5771_v3 = vmul.f32 0.3275911, %v11727_v25 }
0x169b   : > { %v6247_v13 = vmul.f32 %v8249_v36, %v6167_v15  ;;  %v6118_v7 = vadd.f32 -0.28449672, %v6102_v58  ;;  %v6292_v54 = vsub.f32 0.0, %v6260_v55  ;;  %v6341_v34 = vmul.f32 %v6325_v5, %v5717_v46 }
0x169c   : > { %v8251_v45 = vpop.eup %8250  ;;  %8252 = vrcp.f32 %v11724_v30  ;;  %v11742_v56 = vmul.f32 0.70710677, %v11730_v57  ;;  %v11746_v43 = vadd.f32 1.0, %v5771_v3  ;;  %vm5993_vm2 = vcmp.eq.f32.partialorder %v5992_v6, 8.507059e+37 }
0x169d   : > { %v5984_v50 = vmul.f32 %v8251_v45, %v11697_v29  ;;  %v6263_v12 = vsub.f32 1.0, %v6247_v13  ;;  %8254 = vpow2.f32 %v6224_v32  ;;  %v6134_v21 = vmul.f32 %v6118_v7, %v11694_v63 }
0x169e   : > { %vm5989_vm15 = vweird.f32 %v8251_v45  ;;  %8256 = vrcp.f32 %v11746_v43  ;;  %v11753_v31 = vand.u32 2147483647, %v11742_v56  ;;  %v6185_v29 = vsub.f32 0.0, %v11686_v59 }
0x169f   : > { %v5985_v49 = vsub.f32 1.0, %v5984_v50  ;;  %v6295_v28 = vsub.f32 0.0, %v6263_v12  ;;  %v6150_v2 = vadd.f32 0.2548296, %v6134_v21  ;;  %vm5990_vm1 = vmor %vm5988_vm0, %vm5989_vm15  ;;  %v6308_v15 = vsel %vm6276_vm11, %v6260_v55, %v6292_v54 }
0x16a0   : > { %v5770_v50 = vmul.f32 0.3275911, %v11753_v31  ;;  %v6201_v18 = vmul.f32 %v6185_v29, %v11686_v59  ;;  %vm5973_vm5 = vweird.f32 %v11724_v30  ;;  %v6324_v3 = vadd.f32 1.0, %v6308_v15 }
0x16a1   : > { %v5986_v37 = vmul.f32 %v8251_v45, %v5985_v49  ;;  %v6311_v11 = vsel %vm6279_vm14, %v6263_v12, %v6295_v28  ;;  %v6166_v38 = vmul.f32 %v6150_v2, %v11694_v63  ;;  %v5977_v63 = vand.u32 2147483647, %v11724_v30 }
0x16a2   : > { %v8253_v40 = vpop.eup %8252  ;;  %v6327_v1 = vadd.f32 1.0, %v6311_v11  ;;  %v11769_v55 = vadd.f32 1.0, %v5770_v50  ;;  %v6022_v54 = vand.u32 2147483647, %v11746_v43  ;;  %v6024_v11 = vand.u32 2147483648, %v11746_v43 }
0x16a3   : > { %v5987_v48 = vadd.f32 %v8251_v45, %v5986_v37  ;;  %v5969_v22 = vmul.f32 %v8253_v40, %v11724_v30  ;;  %v8255_v26 = vpop.eup %8254  ;;  %vm5974_vm3 = vweird.f32 %v8253_v40  ;;  %vm5978_vm7 = vcmp.eq.f32.partialorder %v5977_v63, 8.507059e+37 }
0x16a4   : > { %v6343_v8 = vmul.f32 %v6327_v1, %v5719_v52  ;;  %v6246_v62 = vmul.f32 %v8255_v26, %v6166_v38  ;;  %v8257_v12 = vpop.eup %8256  ;;  %vm5975_vm6 = vmor %vm5973_vm5, %vm5974_vm3  ;;  %8258 = vrcp.f32 %v11769_v55  ;;  %vm6018_vm9 = vweird.f32 %v11746_v43 }
0x16a5   : > { %v5991_v16 = vsel %vm5990_vm1, %v8251_v45, %v5987_v48  ;;  %v5970_v13 = vsub.f32 1.0, %v5969_v22  ;;  %v5979_v45 = vand.u32 2147483648, %v11724_v30  ;;  %v6014_v33 = vmul.f32 %v8257_v12, %v11746_v43 }
0x16a6   : > { %v11757_v36 = vsel %vm5993_vm2, %v5995_v10, %v5991_v16  ;;  %v6386_v58 = vpack.c.bf16 %v6343_v8, %v6341_v34  ;;  %v6262_v46 = vsub.f32 1.0, %v6246_v62  ;;  %vm6019_vm8 = vweird.f32 %v8257_v12 }
0x16a7   : > { %v6041_v32 = vmul.f32 1.0614054, %v11757_v36  ;;  %v5971_v4 = vmul.f32 %v8253_v40, %v5970_v13  ;;  %v5980_v28 = vor.u32 1.1754944e-38, %v5979_v45  ;;  %v6015_v37 = vsub.f32 1.0, %v6014_v33  ;;  %vm6020_vm12 = vmor %vm6018_vm9, %vm6019_vm8 }
0x16a8   : > { %6537 = vmatmul.bf16.gmra.mxu2 %v6386_v58  ;;  %v6294_v7 = vsub.f32 0.0, %v6262_v46  ;;  %v6340_v10 = vmul.f32 %v6324_v3, %v11721_v9  ;;  %v6230_v16 = vmul.f32 1.442695, %v6201_v18  ;;  %v6184_v8 = vsub.f32 0.0, %v11708_v19 }
0x16a9   : > { %v6057_v52 = vadd.f32 -1.4531521, %v6041_v32  ;;  %v5972_v6 = vadd.f32 %v8253_v40, %v5971_v4  ;;  %v6016_v1 = vmul.f32 %v8257_v12, %v6015_v37  ;;  %vm6023_vm13 = vcmp.eq.f32.partialorder %v6022_v54, 8.507059e+37 }
0x16aa   : > { %v6310_v17 = vsel %vm6278_vm4, %v6262_v46, %v6294_v7  ;;  %v8259_v34 = vpop.eup %8258  ;;  %v6025_v29 = vor.u32 1.1754944e-38, %v6024_v11  ;;  %v6187_v63 = vsub.f32 0.0, %v11727_v25  ;;  %8260 = vpow2.f32 %v6230_v16 }
0x16ab   : > { %v6073_v49 = vmul.f32 %v6057_v52, %v11757_v36  ;;  %v5976_v59 = vsel %vm5975_vm6, %v8253_v40, %v5972_v6  ;;  %v6326_v30 = vadd.f32 1.0, %v6310_v17  ;;  %v6017_v26 = vadd.f32 %v8257_v12, %v6016_v1 }
0x16ac   : > { %v11774_v5 = vsel %vm5978_vm7, %v5980_v28, %v5976_v59  ;;  %v5999_v9 = vmul.f32 %v8259_v34, %v11769_v55  ;;  %v6200_v52 = vmul.f32 %v6184_v8, %v11708_v19  ;;  %v6009_v18 = vand.u32 2147483648, %v11769_v55 }
0x16ad   : > { %v6089_v21 = vadd.f32 1.4214138, %v6073_v49  ;;  %v6040_v48 = vmul.f32 1.0614054, %v11774_v5  ;;  %v6342_v38 = vmul.f32 %v6326_v30, %v5718_v24  ;;  %v6021_v13 = vsel %vm6020_vm12, %v8257_v12, %v6017_v26 }
0x16ae   : > { %v6026_v24 = vsel %vm6023_vm13, %v6025_v29, %v6021_v13  ;;  %v6000_v50 = vsub.f32 1.0, %v5999_v9  ;;  %v6203_v12 = vmul.f32 %v6187_v63, %v11727_v25  ;;  %vm6004_vm10 = vweird.f32 %v8259_v34 }
0x16af   : > { %v6105_v2 = vmul.f32 %v6089_v21, %v11757_v36  ;;  %v6056_v40 = vadd.f32 -1.4531521, %v6040_v48  ;;  %v6385_v15 = vpack.c.bf16 %v6342_v38, %v6340_v10  ;;  %v6043_v58 = vmul.f32 1.0614054, %v6026_v24 }
0x16b0   : > { %v6001_v7 = vmul.f32 %v8259_v34, %v6000_v50  ;;  %v6007_v49 = vand.u32 2147483647, %v11769_v55  ;;  %vm6003_vm11 = vweird.f32 %v11769_v55  ;;  %v6228_v21 = vmul.f32 1.442695, %v6200_v52  ;;  %v8261_v37 = vpop.eup %8260 }
0x16b1   : > { %v6121_v22 = vadd.f32 -0.28449672, %v6105_v2  ;;  %v6072_v32 = vmul.f32 %v6056_v40, %v11774_v5  ;;  %6508 = vmatmul.bf16.gmra.mxu1 %v6385_v15  ;;  %v6059_v4 = vadd.f32 -1.4531521, %v6043_v58  ;;  %vm6005_vm14 = vmor %vm6003_vm11, %vm6004_vm10  ;;  %v6010_v59 = vor.u32 1.1754944e-38, %v6009_v18 }
0x16b2   : > { %v6002_v28 = vadd.f32 %v8259_v34, %v6001_v7  ;;  %v6234_v30 = vmul.f32 1.442695, %v6203_v12  ;;  %vm6008_vm15 = vcmp.eq.f32.partialorder %v6007_v49, 8.507059e+37  ;;  %8262 = vpow2.f32 %v6228_v21 }
0x16b3   : > { %v6137_v62 = vmul.f32 %v6121_v22, %v11757_v36  ;;  %v6088_v43 = vadd.f32 1.4214138, %v6072_v32  ;;  %v6075_v3 = vmul.f32 %v6059_v4, %v6026_v24  ;;  %vm6281_vm0 = vcmp.ge.f32.partialorder %v11681_v44, 0.0 }
0x16b4   : > { %v6006_v25 = vsel %vm6005_vm14, %v8259_v34, %v6002_v28  ;;  %8264 = vpow2.f32 %v6234_v30  ;;  %vm6283_vm1 = vcmp.ge.f32.partialorder %v11717_v23, 0.0  ;;  %v5723_v7 = vmul.f32 0.5, %v11711_v0 }
0x16b5   : > { %v6153_v45 = vadd.f32 0.2548296, %v6137_v62  ;;  %v6104_v46 = vmul.f32 %v6088_v43, %v11774_v5  ;;  %v6091_v19 = vadd.f32 1.4214138, %v6075_v3  ;;  %v6011_v2 = vsel %vm6008_vm15, %v6010_v59, %v6006_v25 }
0x16b6   : > { %v6042_v1 = vmul.f32 1.0614054, %v6011_v2  ;;  %vm6280_vm2 = vcmp.ge.f32.partialorder %v11700_v51, 0.0  ;;  %vm6282_vm3 = vcmp.ge.f32.partialorder %v11742_v56, 0.0  ;;  %v5720_v51 = vmul.f32 0.5, %v11690_v14 }
0x16b7   : > { %v6169_v6 = vmul.f32 %v6153_v45, %v11757_v36  ;;  %v6120_v33 = vadd.f32 -0.28449672, %v6104_v46  ;;  %v6107_v11 = vmul.f32 %v6091_v19, %v6026_v24  ;;  %v6186_v36 = vsub.f32 0.0, %v11753_v31 }
0x16b8   : > { %v6058_v55 = vadd.f32 -1.4531521, %v6042_v1  ;;  %v8263_v29 = vpop.eup %8262 }
0x16b9   : > { %v6136_v17 = vmul.f32 %v6120_v33, %v11774_v5  ;;  %v6249_v54 = vmul.f32 %v8261_v37, %v6169_v6  ;;  %v6123_v10 = vadd.f32 -0.28449672, %v6107_v11  ;;  %v6202_v22 = vmul.f32 %v6186_v36, %v11753_v31 }
0x16ba   : > { %v6074_v26 = vmul.f32 %v6058_v55, %v6011_v2  ;;  %v8265_v13 = vpop.eup %8264 }
0x16bb   : > { %v6152_v48 = vadd.f32 0.2548296, %v6136_v17  ;;  %v6265_v38 = vsub.f32 1.0, %v6249_v54  ;;  %v6139_v16 = vmul.f32 %v6123_v10, %v6026_v24  ;;  %v6232_v32 = vmul.f32 1.442695, %v6202_v22 }
0x16bc   : > { %v6090_v8 = vadd.f32 1.4214138, %v6074_v26  ;;  %v11806_v17 = vld [vmem:[%s11969_s13 + $0x1] ss:$0 sm:$0xff]  ;;  %v5722_v54 = vmul.f32 0.5, %v11730_v57 }
0x16bd   : > { %v6168_v40 = vmul.f32 %v6152_v48, %v11774_v5  ;;  %v6155_v34 = vadd.f32 0.2548296, %v6139_v16  ;;  %v6297_v15 = vsub.f32 0.0, %v6265_v38  ;;  %8266 = vpow2.f32 %v6232_v32 }
0x16be   : > { %v6106_v63 = vmul.f32 %v6090_v8, %v6011_v2 }
0x16bf   : > { %v6171_v62 = vmul.f32 %v6155_v34, %v6026_v24  ;;  %v6248_v9 = vmul.f32 %v8263_v29, %v6168_v40  ;;  %v6313_v58 = vsel %vm6281_vm0, %v6265_v38, %v6297_v15  ;;  %v5721_v24 = vmul.f32 0.5, %v11674_v39 }
0x16c0   : > { %v6122_v43 = vadd.f32 -0.28449672, %v6106_v63  ;;  %v6329_v52 = vadd.f32 1.0, %v6313_v58 }
0x16c1   : > { %v6251_v45 = vmul.f32 %v8265_v13, %v6171_v62  ;;  %v6264_v31 = vsub.f32 1.0, %v6248_v9 }
0x16c2   : > { %v6138_v46 = vmul.f32 %v6122_v43, %v6011_v2  ;;  %v6345_v33 = vmul.f32 %v6329_v52, %v5721_v24 }
0x16c3   : > { %v6267_v50 = vsub.f32 1.0, %v6251_v45  ;;  %v6296_v12 = vsub.f32 0.0, %v6264_v31  ;;  %v8267_v44 = vpop.eup %8266 }
0x16c4   : > { %v6154_v4 = vadd.f32 0.2548296, %v6138_v46 }
0x16c5   : > { %v6299_v5 = vsub.f32 0.0, %v6267_v50  ;;  %v6312_v23 = vsel %vm6280_vm2, %v6264_v31, %v6296_v12 }
0x16c6   : > { %v6170_v6 = vmul.f32 %v6154_v4, %v6011_v2  ;;  %v6328_v0 = vadd.f32 1.0, %v6312_v23 }
0x16c7   : > { %v6315_v18 = vsel %vm6283_vm1, %v6267_v50, %v6299_v5 }
0x16c8   : > { %v6331_v49 = vadd.f32 1.0, %v6315_v18  ;;  %v6250_v28 = vmul.f32 %v8267_v44, %v6170_v6  ;;  %v6344_v36 = vmul.f32 %v6328_v0, %v5720_v51 }
0x16ca   : > { %v6347_v3 = vmul.f32 %v6331_v49, %v5723_v7  ;;  %v6266_v21 = vsub.f32 1.0, %v6250_v28 }
0x16cc   : > { %v6388_v39 = vpack.c.bf16 %v6347_v3, %v6345_v33  ;;  %v6298_v19 = vsub.f32 0.0, %v6266_v21 }
0x16ce   : > { %6542 = vmatmul.bf16.gmra.mxu2 %v6388_v39  ;;  %v6314_v25 = vsel %vm6282_vm3, %v6266_v21, %v6298_v19 }
0x16cf   : > { %v6330_v11 = vadd.f32 1.0, %v6314_v25 }
0x16d1   : > { %v6346_v48 = vmul.f32 %v6330_v11, %v5722_v54 }
0x16d3   : > { %v6387_v10 = vpack.c.bf16 %v6346_v48, %v6344_v36 }
0x16d5   : > { %6513 = vmatmul.bf16.gmra.mxu1 %v6387_v10 }
0x16d7   : > { %v6499_v59 = vpop.f32.mrf.mxu1 }
0x16d8   : > { %v6500_v37 = vadd.f32 %v11806_v17, %v6499_v59  ;;  %v6528_v30 = vpop.f32.mrf.mxu2 }
0x16da   : > { %v6529_v2 = vadd.f32 %v6528_v30, %v6500_v37 }
0x16dc   : > { %v6548_v1 = vadd.f32 %v6529_v2, %v11114_v41 }
0x16de   : > { %6558 = vadd.xlane.f32.xlu2 %v6548_v1 }
0x16df   : > { %v6501_v55 = vpop.f32.mrf.mxu1 }
0x16e0   : > { %v6502_v56 = vadd.f32 %v11806_v17, %v6501_v55  ;;  %v6530_v38 = vpop.f32.mrf.mxu2 }
0x16e2   : > { %v6531_v16 = vadd.f32 %v6530_v38, %v6502_v56 }
0x16e4   : > { %v6549_v22 = vadd.f32 %v6531_v16, %v11119_v61 }
0x16e6   : > { %6560 = vadd.xlane.f32.xlu0 %v6549_v22 }
0x1707   : > { %v6533_v40 = vpop.f32.mrf.mxu2 }
0x170b   : > { %v6504_v14 = vpop.f32.mrf.mxu1 }
0x170c   : > { %v6505_v57 = vadd.f32 %v11806_v17, %v6504_v14 }
0x170e   : > { %v6534_v26 = vadd.f32 %v6533_v40, %v6505_v57 }
0x170f   : > { %v6535_v29 = vpop.f32.mrf.mxu2 }
0x1710   : > { %v6550_v34 = vadd.f32 %v6534_v26, %v11126_v47 }
0x1712   : > { %6562 = vadd.xlane.f32.xlu1 %v6550_v34 }
0x1713   : > { %v6506_v41 = vpop.f32.mrf.mxu1 }
0x1714   : > { %v6507_v8 = vadd.f32 %v11806_v17, %v6506_v41 }
0x1716   : > { %v6536_v15 = vadd.f32 %v6535_v29, %v6507_v8  ;;  %v11867_v8 = vld [vmem:[%s11970_s14] ss:$0 sm:$0xff] }
0x1718   : > { %v6551_v62 = vadd.f32 %v6536_v15, %v11132_v20 }
0x171a   : > { %6564 = vadd.xlane.f32.xlu2 %v6551_v62 }
0x172b   : > { %v6538_v13 = vpop.f32.mrf.mxu2 }
0x172e   : > { %v6509_v32 = vpop.f32.mrf.mxu1 }
0x172f   : > { %v6510_v61 = vadd.f32 %v11806_v17, %v6509_v32  ;;  %v11874_v32 = vld [vmem:[%s11971_s15] ss:$0 sm:$0xff] }
0x1731   : > { %v6539_v9 = vadd.f32 %v6538_v13, %v6510_v61 }
0x1733   : > { %v6552_v63 = vadd.f32 %v6539_v9, %v11138_v27  ;;  %v6540_v43 = vpop.f32.mrf.mxu2 }
0x1735   : > { %6566 = vadd.xlane.f32.xlu0 %v6552_v63 }
0x1736   : > { %v6511_v45 = vpop.f32.mrf.mxu1 }
0x1737   : > { %v6512_v47 = vadd.f32 %v11806_v17, %v6511_v45 }
0x1739   : > { %v6541_v58 = vadd.f32 %v6540_v43, %v6512_v47 }
0x173b   : > { %v6553_v50 = vadd.f32 %v6541_v58, %v11144_v60 }
0x173d   : > { %6568 = vadd.xlane.f32.xlu1 %v6553_v50 }
0x1751   : > { %v6559_v31 = vpop.xlane.xlu2 %6558  ;;  %v6543_v4 = vpop.f32.mrf.mxu2 }
0x1752   : > { %v6574_v20 = vmul.f32 %v6559_v31, %v8637_v53  ;;  %v6514_v27 = vpop.f32.mrf.mxu1 }
0x1753   : > { %v6515_v24 = vadd.f32 %v11806_v17, %v6514_v27 }
0x1754   : > { %v11824_v46 = vsub.f32 %v6548_v1, %v6574_v20 }
0x1755   : > { %v6544_v18 = vadd.f32 %v6543_v4, %v6515_v24 }
0x1756   : > { %v6590_v5 = vmul.f32 %v11824_v46, %v11824_v46 }
0x1757   : > { %v6554_v60 = vadd.f32 %v6544_v18, %v11149_v42 }
0x1758   : > { %6598 = vadd.xlane.f32.xlu1 %v6590_v5 }
0x1759   : > { %v6561_v52 = vpop.xlane.xlu0 %6560  ;;  %6570 = vadd.xlane.f32.xlu2 %v6554_v60  ;;  %v6545_v44 = vpop.f32.mrf.mxu2 }
0x175a   : > { %v6575_v12 = vmul.f32 %v6561_v52, %v8637_v53  ;;  %v6516_v49 = vpop.f32.mrf.mxu1 }
0x175b   : > { %v6517_v6 = vadd.f32 %v11806_v17, %v6516_v49 }
0x175c   : > { %v11831_v7 = vsub.f32 %v6549_v22, %v6575_v12 }
0x175d   : > { %v6546_v33 = vadd.f32 %v6545_v44, %v6517_v6 }
0x175e   : > { %v6591_v3 = vmul.f32 %v11831_v7, %v11831_v7 }
0x175f   : > { %v6555_v28 = vadd.f32 %v6546_v33, %v11167_v35 }
0x1761   : > { %6572 = vadd.xlane.f32.xlu0 %v6555_v28  ;;  %6600 = vadd.xlane.f32.xlu2 %v6591_v3 }
0x1785   : > { %v6563_v23 = vpop.xlane.xlu1 %6562 }
0x1786   : > { %v6576_v21 = vmul.f32 %v6563_v23, %v8637_v53 }
0x1788   : > { %v11838_v39 = vsub.f32 %v6550_v34, %v6576_v21 }
0x178a   : > { %v6592_v42 = vmul.f32 %v11838_v39, %v11838_v39 }
0x178c   : > { %6602 = vadd.xlane.f32.xlu0 %v6592_v42 }
0x178d   : > { %v6565_v19 = vpop.xlane.xlu2 %6564 }
0x178e   : > { %v6577_v17 = vmul.f32 %v6565_v19, %v8637_v53 }
0x1790   : > { %v11843_v59 = vsub.f32 %v6551_v62, %v6577_v17 }
0x1792   : > { %v6593_v0 = vmul.f32 %v11843_v59, %v11843_v59 }
0x1794   : > { %6604 = vadd.xlane.f32.xlu1 %v6593_v0 }
0x17a8   : > { %v6567_v35 = vpop.xlane.xlu0 %6566 }
0x17a9   : > { %v6578_v37 = vmul.f32 %v6567_v35, %v8637_v53 }
0x17ab   : > { %v11848_v30 = vsub.f32 %v6552_v63, %v6578_v37 }
0x17ad   : > { %v6594_v25 = vmul.f32 %v11848_v30, %v11848_v30 }
0x17af   : > { %6606 = vadd.xlane.f32.xlu2 %v6594_v25 }
0x17b0   : > { %v6569_v51 = vpop.xlane.xlu1 %6568 }
0x17b1   : > { %v6579_v54 = vmul.f32 %v6569_v51, %v8637_v53 }
0x17b3   : > { %v11853_v11 = vsub.f32 %v6553_v50, %v6579_v54 }
0x17b5   : > { %v6595_v2 = vmul.f32 %v11853_v11, %v11853_v11 }
0x17b7   : > { %6608 = vadd.xlane.f32.xlu0 %v6595_v2 }
0x17cb   : > { %v6599_v36 = vpop.xlane.xlu1 %6598 }
0x17cc   : > { %v6614_v48 = vmul.f32 %v6599_v36, %v8637_v53  ;;  %v6571_v56 = vpop.xlane.xlu2 %6570 }
0x17cd   : > { %v6580_v38 = vmul.f32 %v6571_v56, %v8637_v53 }
0x17ce   : > { %v6622_v1 = vadd.f32 1e-05, %v6614_v48 }
0x17cf   : > { %v11859_v22 = vsub.f32 %v6554_v60, %v6580_v38 }
0x17d0   : > { %8268 = vrsqrt.f32 %v6622_v1  ;;  %vm6636_vm5 = vweird.f32 %v6622_v1 }
0x17d1   : > { %v6596_v40 = vmul.f32 %v11859_v22, %v11859_v22 }
0x17d3   : > { %6610 = vadd.xlane.f32.xlu1 %v6596_v40 }
0x17d4   : > { %v6601_v34 = vpop.xlane.xlu2 %6600  ;;  %v6573_v41 = vpop.xlane.xlu0 %6572 }
0x17d5   : > { %v6615_v29 = vmul.f32 %v6601_v34, %v8637_v53  ;;  %v6581_v15 = vmul.f32 %v6573_v41, %v8637_v53 }
0x17d6   : > { %v8269_v10 = vpop.eup %8268 }
0x17d7   : > { %v6631_v55 = vmul.f32 %v8269_v10, %v6622_v1  ;;  %vm6637_vm4 = vweird.f32 %v8269_v10  ;;  %v6623_v61 = vadd.f32 1e-05, %v6615_v29  ;;  %v11879_v9 = vsub.f32 %v6555_v28, %v6581_v15 }
0x17d8   : > { %vm6638_vm6 = vmor %vm6636_vm5, %vm6637_vm4 }
0x17d9   : > { %v6632_v16 = vmul.f32 %v8269_v10, %v6631_v55  ;;  %8270 = vrsqrt.f32 %v6623_v61  ;;  %v6597_v45 = vmul.f32 %v11879_v9, %v11879_v9  ;;  %vm6646_vm8 = vweird.f32 %v6623_v61 }
0x17db   : > { %v6633_v14 = vmul.f32 0.5, %v6632_v16  ;;  %6612 = vadd.xlane.f32.xlu2 %v6597_v45 }
0x17dd   : > { %v6634_v57 = vsub.f32 1.5, %v6633_v14 }
0x17df   : > { %v6635_v26 = vmul.f32 %v8269_v10, %v6634_v57  ;;  %v8271_v43 = vpop.eup %8270 }
0x17e0   : > { %v6641_v58 = vmul.f32 %v8271_v43, %v6623_v61  ;;  %vm6647_vm7 = vweird.f32 %v8271_v43 }
0x17e1   : > { %v6639_v62 = vsel %vm6638_vm6, %v8269_v10, %v6635_v26  ;;  %vm6648_vm9 = vmor %vm6646_vm8, %vm6647_vm7 }
0x17e2   : > { %v6710_v13 = vmul.f32 %v6639_v62, %v11824_v46  ;;  %v6642_v50 = vmul.f32 %v8271_v43, %v6641_v58 }
0x17e4   : > { %v6721_v63 = vmul.f32 %v11867_v8, %v6710_v13  ;;  %v6643_v31 = vmul.f32 0.5, %v6642_v50 }
0x17e6   : > { %v6732_v47 = vadd.f32 %v11874_v32, %v6721_v63  ;;  %v6644_v20 = vsub.f32 1.5, %v6643_v31 }
0x17e8   : > { %6740 = vst [vmem:[%s11885_s23] sm:$0xff] %v6732_v47  ;;  %v6645_v46 = vmul.f32 %v8271_v43, %v6644_v20 }
0x17ea   : > { %v6649_v5 = vsel %vm6648_vm9, %v8271_v43, %v6645_v46 }
0x17eb   : > { %v6711_v52 = vmul.f32 %v6649_v5, %v11831_v7 }
0x17ed   : > { %v6722_v27 = vmul.f32 %v11867_v8, %v6711_v52 }
0x17ef   : > { %v6733_v4 = vadd.f32 %v11874_v32, %v6722_v27 }
0x17f1   : > { %6741 = vst [vmem:[%s11885_s23 + $0x8] sm:$0xff] %v6733_v4 }
0x17ff   : > { %v6603_v24 = vpop.xlane.xlu0 %6602 }
0x1800   : > { %v6616_v18 = vmul.f32 %v6603_v24, %v8637_v53 }
0x1802   : > { %v6624_v12 = vadd.f32 1e-05, %v6616_v18 }
0x1804   : > { %8272 = vrsqrt.f32 %v6624_v12  ;;  %vm6656_vm13 = vweird.f32 %v6624_v12 }
0x1807   : > { %v6605_v60 = vpop.xlane.xlu1 %6604 }
0x1808   : > { %v6617_v49 = vmul.f32 %v6605_v60, %v8637_v53 }
0x180a   : > { %v8273_v6 = vpop.eup %8272  ;;  %v6625_v44 = vadd.f32 1e-05, %v6617_v49 }
0x180b   : > { %v6651_v33 = vmul.f32 %v8273_v6, %v6624_v12  ;;  %vm6657_vm12 = vweird.f32 %v8273_v6 }
0x180c   : > { %8274 = vrsqrt.f32 %v6625_v44  ;;  %vm6658_vm10 = vmor %vm6656_vm13, %vm6657_vm12  ;;  %vm6666_vm14 = vweird.f32 %v6625_v44 }
0x180d   : > { %v6652_v3 = vmul.f32 %v8273_v6, %v6651_v33 }
0x180f   : > { %v6653_v28 = vmul.f32 0.5, %v6652_v3 }
0x1811   : > { %v6654_v7 = vsub.f32 1.5, %v6653_v28 }
0x1812   : > { %v8275_v23 = vpop.eup %8274 }
0x1813   : > { %v6655_v21 = vmul.f32 %v8273_v6, %v6654_v7  ;;  %v6661_v42 = vmul.f32 %v8275_v23, %v6625_v44  ;;  %vm6667_vm11 = vweird.f32 %v8275_v23 }
0x1814   : > { %vm6668_vm15 = vmor %vm6666_vm14, %vm6667_vm11 }
0x1815   : > { %v6659_v19 = vsel %vm6658_vm10, %v8273_v6, %v6655_v21  ;;  %v6662_v17 = vmul.f32 %v8275_v23, %v6661_v42 }
0x1816   : > { %v6712_v0 = vmul.f32 %v6659_v19, %v11838_v39 }
0x1817   : > { %v6663_v35 = vmul.f32 0.5, %v6662_v17 }
0x1818   : > { %v6723_v37 = vmul.f32 %v11867_v8, %v6712_v0 }
0x1819   : > { %v6664_v25 = vsub.f32 1.5, %v6663_v35 }
0x181a   : > { %v6734_v51 = vadd.f32 %v11874_v32, %v6723_v37 }
0x181b   : > { %v6665_v54 = vmul.f32 %v8275_v23, %v6664_v25 }
0x181c   : > { %6742 = vst [vmem:[%s11885_s23 + $0x10] sm:$0xff] %v6734_v51 }
0x181d   : > { %v6669_v2 = vsel %vm6668_vm15, %v8275_v23, %v6665_v54 }
0x181e   : > { %v6713_v36 = vmul.f32 %v6669_v2, %v11843_v59 }
0x1820   : > { %v6724_v48 = vmul.f32 %v11867_v8, %v6713_v36 }
0x1822   : > { %v6735_v1 = vadd.f32 %v11874_v32, %v6724_v48  ;;  %v6607_v39 = vpop.xlane.xlu2 %6606 }
0x1823   : > { %v6618_v10 = vmul.f32 %v6607_v39, %v8637_v53 }
0x1824   : > { %6743 = vst [vmem:[%s11885_s23 + $0x18] sm:$0xff] %v6735_v1 }
0x1825   : > { %v6626_v55 = vadd.f32 1e-05, %v6618_v10 }
0x1827   : > { %8276 = vrsqrt.f32 %v6626_v55  ;;  %vm6676_vm1 = vweird.f32 %v6626_v55 }
0x182a   : > { %v6609_v56 = vpop.xlane.xlu0 %6608 }
0x182b   : > { %v6619_v38 = vmul.f32 %v6609_v56, %v8637_v53 }
0x182d   : > { %v8277_v16 = vpop.eup %8276  ;;  %v6627_v14 = vadd.f32 1e-05, %v6619_v38 }
0x182e   : > { %v6671_v40 = vmul.f32 %v8277_v16, %v6626_v55  ;;  %vm6677_vm0 = vweird.f32 %v8277_v16 }
0x182f   : > { %8278 = vrsqrt.f32 %v6627_v14  ;;  %vm6678_vm2 = vmor %vm6676_vm1, %vm6677_vm0  ;;  %vm6686_vm4 = vweird.f32 %v6627_v14 }
0x1830   : > { %v6672_v57 = vmul.f32 %v8277_v16, %v6671_v40 }
0x1832   : > { %v6673_v26 = vmul.f32 0.5, %v6672_v57 }
0x1834   : > { %v6674_v59 = vsub.f32 1.5, %v6673_v26 }
0x1835   : > { %v8279_v34 = vpop.eup %8278 }
0x1836   : > { %v6675_v41 = vmul.f32 %v8277_v16, %v6674_v59  ;;  %v6681_v29 = vmul.f32 %v8279_v34, %v6627_v14  ;;  %vm6687_vm3 = vweird.f32 %v8279_v34 }
0x1837   : > { %vm6688_vm5 = vmor %vm6686_vm4, %vm6687_vm3 }
0x1838   : > { %v6679_v15 = vsel %vm6678_vm2, %v8277_v16, %v6675_v41  ;;  %v6682_v62 = vmul.f32 %v8279_v34, %v6681_v29 }
0x1839   : > { %v6714_v13 = vmul.f32 %v6679_v15, %v11848_v30 }
0x183a   : > { %v6683_v61 = vmul.f32 0.5, %v6682_v62 }
0x183b   : > { %v6725_v63 = vmul.f32 %v11867_v8, %v6714_v13 }
0x183c   : > { %v6684_v45 = vsub.f32 1.5, %v6683_v61 }
0x183d   : > { %v6736_v47 = vadd.f32 %v11874_v32, %v6725_v63 }
0x183e   : > { %v6685_v43 = vmul.f32 %v8279_v34, %v6684_v45 }
0x183f   : > { %6744 = vst [vmem:[%s11885_s23 + $0x20] sm:$0xff] %v6736_v47 }
0x1840   : > { %v6689_v58 = vsel %vm6688_vm5, %v8279_v34, %v6685_v43 }
0x1841   : > { %v6715_v50 = vmul.f32 %v6689_v58, %v11853_v11 }
0x1843   : > { %v6726_v31 = vmul.f32 %v11867_v8, %v6715_v50 }
0x1845   : > { %v6737_v20 = vadd.f32 %v11874_v32, %v6726_v31 }
0x1846   : > { %v6611_v30 = vpop.xlane.xlu1 %6610 }
0x1847   : > { %6745 = vst [vmem:[%s11885_s23 + $0x28] sm:$0xff] %v6737_v20  ;;  %v6620_v46 = vmul.f32 %v6611_v30, %v8637_v53 }
0x1849   : > { %v6628_v5 = vadd.f32 1e-05, %v6620_v46 }
0x184b   : > { %8280 = vrsqrt.f32 %v6628_v5  ;;  %vm6696_vm7 = vweird.f32 %v6628_v5 }
0x184e   : > { %v6613_v52 = vpop.xlane.xlu2 %6612 }
0x184f   : > { %v6621_v27 = vmul.f32 %v6613_v52, %v8637_v53 }
0x1851   : > { %v8281_v4 = vpop.eup %8280  ;;  %v6629_v24 = vadd.f32 1e-05, %v6621_v27 }
0x1852   : > { %v6691_v18 = vmul.f32 %v8281_v4, %v6628_v5  ;;  %vm6697_vm6 = vweird.f32 %v8281_v4 }
0x1853   : > { %8282 = vrsqrt.f32 %v6629_v24  ;;  %vm6698_vm8 = vmor %vm6696_vm7, %vm6697_vm6  ;;  %vm6706_vm12 = vweird.f32 %v6629_v24 }
0x1854   : > { %v6692_v12 = vmul.f32 %v8281_v4, %v6691_v18 }
0x1856   : > { %v6693_v11 = vmul.f32 0.5, %v6692_v12 }
0x1858   : > { %v6694_v60 = vsub.f32 1.5, %v6693_v11 }
0x1859   : > { %v8283_v49 = vpop.eup %8282 }
0x185a   : > { %v6695_v6 = vmul.f32 %v8281_v4, %v6694_v60  ;;  %v6701_v44 = vmul.f32 %v8283_v49, %v6629_v24  ;;  %vm6707_vm9 = vweird.f32 %v8283_v49 }
0x185b   : > { %vm6708_vm13 = vmor %vm6706_vm12, %vm6707_vm9 }
0x185c   : > { %v6699_v33 = vsel %vm6698_vm8, %v8281_v4, %v6695_v6  ;;  %v6702_v3 = vmul.f32 %v8283_v49, %v6701_v44 }
0x185d   : > { %v6716_v53 = vmul.f32 %v6699_v33, %v11859_v22 }
0x185e   : > { %v6703_v28 = vmul.f32 0.5, %v6702_v3 }
0x185f   : > { %v6727_v7 = vmul.f32 %v11867_v8, %v6716_v53 }
0x1860   : > { %v6704_v23 = vsub.f32 1.5, %v6703_v28 }
0x1861   : > { %v6738_v21 = vadd.f32 %v11874_v32, %v6727_v7 }
0x1862   : > { %v6705_v42 = vmul.f32 %v8283_v49, %v6704_v23 }
0x1863   : > { %6746 = vst [vmem:[%s11885_s23 + $0x30] sm:$0xff] %v6738_v21 }
0x1864   : > { %v6709_v22 = vsel %vm6708_vm13, %v8283_v49, %v6705_v42 }
0x1865   : > { %v6717_v19 = vmul.f32 %v6709_v22, %v11879_v9 }
0x1867   : > { %v6728_v17 = vmul.f32 %v11867_v8, %v6717_v19 }
0x1869   : > { %v6739_v0 = vadd.f32 %v11874_v32, %v6728_v17 }
0x186b   : > { %6747 = vst [vmem:[%s11885_s23 + $0x38] sm:$0xff] %v6739_v0 }
0x186c   : > { %8311 = shalt.err (!%p8308_p3)
}
0x186d   : > { %s8352_s2 = smov 128   ;;  %s8353_s23 = smov 8  }
0x186e   : > { %7732 = dma.vmem_to_hbm [thread:$0]  (%p8477_p5), %s6762_s3, 1024, %s6764_s28, %s6749_s25, %s8352_s2, %s8352_s2, %s8353_s23  }
0x186f PF: > { %p7738_p4 = scmp.ge.s32.totalorder %s8346_s24, 2  ;;  %s6778_s20 = sand.u32 1, %s8334_s21  }
0x1870   : > { %s6779_s29 = scalar_lea.sflag [#allocation3], %s6778_s20 }
0x1871   : > { %p7735_p7 = pnand %p7738_p4, %p8481_p6 }
0x1873   : > { %p7736_p8 = pneg %p7735_p7 }
0x1875   : > { %8329 = dma.done.wait (%p7736_p8), %s6779_s29, 1024  }
0x1876   : > { %8331 = vsyncadd (%p7736_p8), %s6779_s29, 4294966272  ;;  %s12003_s18 = sld [smem:[#allocation5_spill]]  ;;  %p26_p9 = scmp.ge.s32.totalorder %s8464_s27, 4  }
0x1877   : > { %s12004_s23 = sld [smem:[#allocation6_spill]]  ;;  %s12005_s21 = smov %s8338_s22 }
0x1878   : > { %s12007_s24 = smov %s8464_s27  ;;  %28 = sbr.rel (!%p26_p9) target bundleno = 8 (0x8), region = 127 }
0x187c   : > { %s12006_s22 = smov %s12003_s18 }
0x187d   :  { %6785 = vsyncpa [#allocation3], 1 }
0x187e   :  { %6787 = vsyncpa [#allocation3 + $0x1], 1 }

</bundles_post_ra>
